<compile_context>
chip_gen: v7x
topology: tpu7x:2x2x1
jax: 0.10.0
libtpu: 0.0.40
codegen_flags: <defaults>
</compile_context>

<pallas_src>
import math
from functools import partial

import numpy as np
import jax
import jax.numpy as jnp
from jax import lax
from jax.experimental import pallas as pl
from jax.experimental.pallas import tpu as pltpu


_EPS = 1e-5
_BN_SCALE = 1.0 / math.sqrt(1.0 + _EPS)   # gamma=1, running_var=1 (fresh init)


def _round_up(x, m):
    return (x + m - 1) // m * m


def _out_size(h, k, s, p):
    return (h + 2 * p - k) // s + 1


# ---------------------------------------------------------------------------
# Per-image flat-layout constants (specialized to the 3x32x32 default input).
# A feature map is stored as (rows, 128) with row index h*pitch + w.
# ---------------------------------------------------------------------------
_G0, _R0 = 18, 324                 # space-to-depth grid (36/2 = 18)
_L1 = _R0 - (1 * _G0 + 1)          # 305: conv1 dense out rows (2x2 taps)
_P1LEN = _L1 - (2 * _G0 + 2)       # 267: pool1 dense rows    (3x3 taps)
_G1, _R1 = 12, 144                 # conv2 input grid: 8x8 valid + pad 2
_L2 = _R1 - (4 * _G1 + 4)          # 92:  conv2 dense out rows (5x5 taps)
_P2LEN = _L2 - (2 * _G1 + 2)       # 66:  pool2 dense rows
_G2, _R2 = 5, 25                   # conv3/4/5 input grid: 3x3 valid + pad 1
_L3 = _R2 - (2 * _G2 + 2)          # 13:  conv3/4/5 dense out rows
_P3LEN = _L3 - (2 * _G2 + 2)       # 1:   pool3 output rows


# ---------------------------------------------------------------------------
# The fused kernel (one grid step == one image, everything stays in VMEM)
# ---------------------------------------------------------------------------
def alexnet_kernel(x_ref, w1_ref, b1_ref, w2_ref, b2_ref, w3_ref, b3_ref,
                   w4_ref, b4_ref, w5_ref, b5_ref, s1_ref, s2_ref, s3_ref,
                   wf1_ref, bf1_ref, wf2_ref, bf2_ref, wf3_ref, bf3_ref,
                   o_ref):

    def conv(x, w_ref, b_ref, pitch, k, out_rows):
        # Stride-1 conv over a flat (rows, C) map with row pitch `pitch`:
        #   y[p] = sum_t x[p + dy*pitch + dx] @ w[t]   (contiguous slices only;
        # rows where the window wraps around a row/image edge are garbage and
        # are never read downstream).  bf16 operands, f32 accumulation.
        acc = jnp.dot(x[:out_rows], w_ref[0],
                      preferred_element_type=jnp.float32)
        for t in range(1, k * k):
            off = (t // k) * pitch + (t % k)
            acc += jnp.dot(x[off:off + out_rows], w_ref[t],
                           preferred_element_type=jnp.float32)
        # folded BatchNorm shift + ReLU, then back to bf16 for the next matmul
        return jnp.maximum(acc + b_ref[...], 0.0).astype(jnp.bfloat16)

    def pool3x3(x, pitch, out_rows):
        # Dense 3x3 max on the same flat layout (the stride-2 subsampling is
        # performed by the selection matmul that follows).
        m = x[:out_rows]
        for t in range(1, 9):
            off = (t // 3) * pitch + (t % 3)
            m = jnp.maximum(m, x[off:off + out_rows])
        return m

    def select(s_ref, x):
        # Exact 0/1 row gather + zero-pad re-layout as a single MXU matmul.
        return jnp.dot(s_ref[...], x,
                       preferred_element_type=jnp.float32).astype(jnp.bfloat16)

    def dense(x, w_ref, b_ref, relu):
        y = jnp.dot(x, w_ref[...], preferred_element_type=jnp.float32)
        y = y + b_ref[...]
        return jnp.maximum(y, 0.0).astype(jnp.bfloat16) if relu else y

    x0 = x_ref[0]                                    # (324, 128) bf16 s2d input
    a1 = conv(x0, w1_ref, b1_ref, _G0, 2, _L1)       # conv1 (4x4 s2 via s2d 2x2)
    p1 = select(s1_ref, pool3x3(a1, _G0, _P1LEN))    # maxpool -> padded 12x12
    a2 = conv(p1, w2_ref, b2_ref, _G1, 5, _L2)       # conv2 5x5 pad 2
    p2 = select(s2_ref, pool3x3(a2, _G1, _P2LEN))    # maxpool -> padded 5x5
    a3 = conv(p2, w3_ref, b3_ref, _G2, 3, _L3)       # conv3 3x3 pad 1
    a4 = conv(select(s3_ref, a3), w4_ref, b4_ref, _G2, 3, _L3)   # conv4
    a5 = conv(select(s3_ref, a4), w5_ref, b5_ref, _G2, 3, _L3)   # conv5
    feat = pool3x3(a5, _G2, _P3LEN)                  # (1, 128) pooled features

    # classifier (Dropout = identity in eval mode); flatten is trivial because
    # the spatial size is 1x1 here, so NCHW/NHWC ordering coincide.
    h = dense(feat, wf1_ref, bf1_ref, relu=True)
    h = dense(h, wf2_ref, bf2_ref, relu=True)
    o_ref[0] = dense(h, wf3_ref, bf3_ref, relu=False)


# ---------------------------------------------------------------------------
# Raw parameters (PyTorch-default-style init), kept for the f32 reference.
# ---------------------------------------------------------------------------
def init_raw_params(key, ch, size, width, num_classes):
    keys = iter(jax.random.split(key, 16))

    def uniform(k, shape, fan_in):
        bound = 1.0 / math.sqrt(fan_in)
        return jax.random.uniform(k, shape, jnp.float32, -bound, bound)

    R = {}
    R["w1"] = uniform(next(keys), (4, 4, 3, ch), 4 * 4 * 3)      # HWIO
    R["b1"] = uniform(next(keys), (ch,), 4 * 4 * 3)
    for name, k in (("2", 5), ("3", 3), ("4", 3), ("5", 3)):
        R["w" + name] = uniform(next(keys), (k, k, ch, ch), k * k * ch)
        R["b" + name] = uniform(next(keys), (ch,), k * k * ch)
    R["wf1"] = uniform(next(keys), (size, width), size)
    R["bf1"] = uniform(next(keys), (width,), size)
    R["wf2"] = uniform(next(keys), (width, width), width)
    R["bf2"] = uniform(next(keys), (width,), width)
    R["wf3"] = uniform(next(keys), (width, num_classes), width)
    R["bf3"] = uniform(next(keys), (num_classes,), width)
    return R


# ---------------------------------------------------------------------------
# Parameter packing: fold BN, pad to 128 lanes, reorder per tap, cast to bf16.
# ---------------------------------------------------------------------------
def _selection_matrices():
    """0/1 matrices gathering stride-2 pooled / valid conv rows out of the
    dense flat buffers into the next stage's zero-padded grid."""
    s1 = np.zeros((_R1, _P1LEN), np.float32)     # pool1 (8x8) -> 12x12 (pad 2)
    for ph in range(8):
        for pw in range(8):
            s1[(ph + 2) * _G1 + (pw + 2), (2 * ph) * _G0 + 2 * pw] = 1.0
    s2 = np.zeros((_R2, _P2LEN), np.float32)     # pool2 (3x3) -> 5x5 (pad 1)
    for ph in range(3):
        for pw in range(3):
            s2[(ph + 1) * _G2 + (pw + 1), (2 * ph) * _G1 + 2 * pw] = 1.0
    s3 = np.zeros((_R2, _L3), np.float32)        # conv3/4 out (3x3) -> 5x5
    for oh in range(3):
        for ow in range(3):
            s3[(oh + 1) * _G2 + (ow + 1), oh * _G2 + ow] = 1.0
    return (jnp.asarray(s1, jnp.bfloat16), jnp.asarray(s2, jnp.bfloat16),
            jnp.asarray(s3, jnp.bfloat16))


def pack_params(raw, ch, width, num_classes):
    CP = 128                          # padded conv channel lanes
    WP = _round_up(width, 128)        # 512
    OP = _round_up(num_classes, 128)  # 1024
    P = {}

    # conv1: 4x4 stride-2 conv re-expressed as a 2x2 stride-1 conv over the
    # space-to-depth input (s2d channel index = ry*6 + rx*3 + c).
    w = raw["w1"] * _BN_SCALE
    b = raw["b1"] * _BN_SCALE
    w = w.reshape(2, 2, 2, 2, 3, ch).transpose(0, 2, 1, 3, 4, 5).reshape(4, 12, ch)
    P["w1"] = jnp.pad(w, ((0, 0), (0, CP - 12), (0, CP - ch))).astype(jnp.bfloat16)
    P["b1"] = jnp.pad(b, (0, CP - ch)).reshape(1, CP)

    for name, k in (("2", 5), ("3", 3), ("4", 3), ("5", 3)):
        w = raw["w" + name] * _BN_SCALE
        b = raw["b" + name] * _BN_SCALE
        w = jnp.pad(w, ((0, 0), (0, 0), (0, CP - ch), (0, CP - ch)))
        P["w" + name] = w.reshape(k * k, CP, CP).astype(jnp.bfloat16)
        P["b" + name] = jnp.pad(b, (0, CP - ch)).reshape(1, CP)

    def fc(name, cin_p, cout_p, bn):
        s = _BN_SCALE if bn else 1.0
        w = raw["w" + name] * s
        b = raw["b" + name] * s
        cin, cout = w.shape
        P["w" + name] = jnp.pad(w, ((0, cin_p - cin),
                                    (0, cout_p - cout))).astype(jnp.bfloat16)
        P["b" + name] = jnp.pad(b, (0, cout_p - cout)).reshape(1, cout_p)

    fc("f1", CP, WP, True)
    fc("f2", WP, WP, True)
    fc("f3", WP, OP, False)

    P["s1"], P["s2"], P["s3"] = _selection_matrices()
    return P


# ---------------------------------------------------------------------------
# Forward wrapper: one pallas_call for the whole network.
# ---------------------------------------------------------------------------
_PARAM_ORDER = ("w1", "b1", "w2", "b2", "w3", "b3", "w4", "b4", "w5", "b5",
                "s1", "s2", "s3", "wf1", "bf1", "wf2", "bf2", "wf3", "bf3")


def _const_map(ndim):
    return lambda n: (0,) * ndim


def alexnet_forward(x_nchw, params, *, num_classes):
    N, C, H, W = x_nchw.shape
    assert (C, H, W) == (3, 32, 32), "kernel layout specialized to 3x32x32"

    # Tiny host-side glue on the 24 KB network input (once per forward):
    # NCHW -> NHWC, pad=2, space-to-depth(2), pad channels 12 -> 128, bf16.
    x = jnp.transpose(x_nchw, (0, 2, 3, 1)).astype(jnp.float32)
    x = jnp.pad(x, ((0, 0), (2, 2), (2, 2), (0, 0)))               # (N,36,36,3)
    x = x.reshape(N, 18, 2, 18, 2, 3).transpose(0, 1, 3, 2, 4, 5)  # s2d
    x = x.reshape(N, _R0, 12)
    x = jnp.pad(x, ((0, 0), (0, 0), (0, 128 - 12))).astype(jnp.bfloat16)

    args = [x] + [params[k] for k in _PARAM_ORDER]
    in_specs = [pl.BlockSpec((1, _R0, 128), lambda n: (n, 0, 0))]
    in_specs += [pl.BlockSpec(a.shape, _const_map(a.ndim)) for a in args[1:]]

    ncp = params["wf3"].shape[1]      # padded class count (1024)
    out = pl.pallas_call(
        alexnet_kernel,
        out_shape=jax.ShapeDtypeStruct((N, 1, ncp), jnp.float32),
        grid=(N,),
        in_specs=in_specs,
        out_specs=pl.BlockSpec((1, 1, ncp), lambda n: (n, 0, 0)),
        compiler_params=pltpu.CompilerParams(
            dimension_semantics=("parallel",)),   # batch across TCs on v7x
    )(*args)
    return out.reshape(N, ncp)[:, :num_classes]


# ---------------------------------------------------------------------------
# Pure-JAX f32 reference (same raw weights), for validation only.
# ---------------------------------------------------------------------------
def reference_forward(x_nchw, raw):
    x = jnp.transpose(x_nchw, (0, 2, 3, 1)).astype(jnp.float32)   # NHWC

    def conv_bn_relu(x, w, b, stride, pad):
        y = lax.conv_general_dilated(
            x, w, window_strides=(stride, stride),
            padding=((pad, pad), (pad, pad)),
            dimension_numbers=("NHWC", "HWIO", "NHWC"))
        return jnp.maximum((y + b) * _BN_SCALE, 0.0)

    def maxpool(x):
        return lax.reduce_window(x, -jnp.inf, lax.max,
                                 (1, 3, 3, 1), (1, 2, 2, 1), "VALID")

    x = conv_bn_relu(x, raw["w1"], raw["b1"], 2, 2)
    x = maxpool(x)
    x = conv_bn_relu(x, raw["w2"], raw["b2"], 1, 2)
    x = maxpool(x)
    x = conv_bn_relu(x, raw["w3"], raw["b3"], 1, 1)
    x = conv_bn_relu(x, raw["w4"], raw["b4"], 1, 1)
    x = conv_bn_relu(x, raw["w5"], raw["b5"], 1, 1)
    x = maxpool(x)
    x = x.reshape(x.shape[0], -1)          # 1x1 spatial -> NCHW flatten == NHWC
    x = jnp.maximum((x @ raw["wf1"] + raw["bf1"]) * _BN_SCALE, 0.0)
    x = jnp.maximum((x @ raw["wf2"] + raw["bf2"]) * _BN_SCALE, 0.0)
    return x @ raw["wf3"] + raw["bf3"]


if __name__ == "__main__":
    input_h = input_w = 32
    input_c = 3
    ch = 64
    num_classes = 1000
    batch = 2

    # Replicate get_size()/width computation of the PyTorch module.
    h = _out_size(input_h, 4, 2, 2)   # conv1   -> 17
    h = _out_size(h, 3, 2, 0)         # maxpool -> 8
    h = _out_size(h, 5, 1, 2)         # conv2   -> 8
    h = _out_size(h, 3, 2, 0)         # maxpool -> 3
    h = _out_size(h, 3, 1, 1)         # conv3   -> 3
    h = _out_size(h, 3, 1, 1)         # conv4   -> 3
    h = _out_size(h, 3, 1, 1)         # conv5   -> 3
    h = _out_size(h, 3, 2, 0)         # maxpool -> 1
    size = ch * h * h                 # 64
    width = size * int(1 + math.log2(size))   # 448

    key = jax.random.PRNGKey(0)
    pkey, xkey = jax.random.split(key)
    raw = init_raw_params(pkey, ch, size, width, num_classes)
    params = pack_params(raw, ch, width, num_classes)
    x = jax.random.normal(xkey, (batch, input_c, input_h, input_w), jnp.float32)

    fwd = jax.jit(partial(alexnet_forward, num_classes=num_classes))
    out = jax.block_until_ready(fwd(x, params))
    assert out.shape == (batch, num_classes), out.shape
    assert bool(jnp.all(jnp.isfinite(out)))

    # Validate against the pure-JAX f32 reference (kernel runs bf16 on MXU).
    ref = jax.block_until_ready(jax.jit(reference_forward)(x, raw))
    scale = float(jnp.max(jnp.abs(ref)))
    err = float(jnp.max(jnp.abs(out - ref)))
    assert err <= 0.1 * scale + 1e-4, (err, scale)

    print("KERNEL_OK")
</pallas_src>

<mosaic_0001>
module attributes {stable_mosaic.version = 11 : i64} {
  func.func @alexnet_kernel(%arg0: i32, %arg1: memref<1x324x128xbf16, #tpu.memory_space<vmem>>, %arg2: memref<4x128x128xbf16, #tpu.memory_space<vmem>>, %arg3: memref<1x128xf32, #tpu.memory_space<vmem>>, %arg4: memref<25x128x128xbf16, #tpu.memory_space<vmem>>, %arg5: memref<1x128xf32, #tpu.memory_space<vmem>>, %arg6: memref<9x128x128xbf16, #tpu.memory_space<vmem>>, %arg7: memref<1x128xf32, #tpu.memory_space<vmem>>, %arg8: memref<9x128x128xbf16, #tpu.memory_space<vmem>>, %arg9: memref<1x128xf32, #tpu.memory_space<vmem>>, %arg10: memref<9x128x128xbf16, #tpu.memory_space<vmem>>, %arg11: memref<1x128xf32, #tpu.memory_space<vmem>>, %arg12: memref<144x267xbf16, #tpu.memory_space<vmem>>, %arg13: memref<25x66xbf16, #tpu.memory_space<vmem>>, %arg14: memref<25x13xbf16, #tpu.memory_space<vmem>>, %arg15: memref<128x512xbf16, #tpu.memory_space<vmem>>, %arg16: memref<1x512xf32, #tpu.memory_space<vmem>>, %arg17: memref<512x512xbf16, #tpu.memory_space<vmem>>, %arg18: memref<1x512xf32, #tpu.memory_space<vmem>>, %arg19: memref<512x1024xbf16, #tpu.memory_space<vmem>>, %arg20: memref<1x1024xf32, #tpu.memory_space<vmem>>, %arg21: memref<1x1x1024xf32, #tpu.memory_space<vmem>>) attributes {dimension_semantics = [#tpu.dimension_semantics<parallel>], iteration_bounds = array<i64: 2>, scalar_prefetch = 0 : i64, scratch_operands = 0 : i64, tpu.core_type = #tpu.core_type<tc>, window_params = [{transform_indices = @transform_0, window_bounds = array<i64: 1, 324, 128>}, {pipeline_mode = #tpu.pipeline_mode<synchronous>, transform_indices = @transform_1, window_bounds = array<i64: 4, 128, 128>}, {pipeline_mode = #tpu.pipeline_mode<synchronous>, transform_indices = @transform_2, window_bounds = array<i64: 1, 128>}, {pipeline_mode = #tpu.pipeline_mode<synchronous>, transform_indices = @transform_3, window_bounds = array<i64: 25, 128, 128>}, {pipeline_mode = #tpu.pipeline_mode<synchronous>, transform_indices = @transform_4, window_bounds = array<i64: 1, 128>}, {pipeline_mode = #tpu.pipeline_mode<synchronous>, transform_indices = @transform_5, window_bounds = array<i64: 9, 128, 128>}, {pipeline_mode = #tpu.pipeline_mode<synchronous>, transform_indices = @transform_6, window_bounds = array<i64: 1, 128>}, {pipeline_mode = #tpu.pipeline_mode<synchronous>, transform_indices = @transform_7, window_bounds = array<i64: 9, 128, 128>}, {pipeline_mode = #tpu.pipeline_mode<synchronous>, transform_indices = @transform_8, window_bounds = array<i64: 1, 128>}, {pipeline_mode = #tpu.pipeline_mode<synchronous>, transform_indices = @transform_9, window_bounds = array<i64: 9, 128, 128>}, {pipeline_mode = #tpu.pipeline_mode<synchronous>, transform_indices = @transform_10, window_bounds = array<i64: 1, 128>}, {pipeline_mode = #tpu.pipeline_mode<synchronous>, transform_indices = @transform_11, window_bounds = array<i64: 144, 267>}, {pipeline_mode = #tpu.pipeline_mode<synchronous>, transform_indices = @transform_12, window_bounds = array<i64: 25, 66>}, {pipeline_mode = #tpu.pipeline_mode<synchronous>, transform_indices = @transform_13, window_bounds = array<i64: 25, 13>}, {pipeline_mode = #tpu.pipeline_mode<synchronous>, transform_indices = @transform_14, window_bounds = array<i64: 128, 512>}, {pipeline_mode = #tpu.pipeline_mode<synchronous>, transform_indices = @transform_15, window_bounds = array<i64: 1, 512>}, {pipeline_mode = #tpu.pipeline_mode<synchronous>, transform_indices = @transform_16, window_bounds = array<i64: 512, 512>}, {pipeline_mode = #tpu.pipeline_mode<synchronous>, transform_indices = @transform_17, window_bounds = array<i64: 1, 512>}, {pipeline_mode = #tpu.pipeline_mode<synchronous>, transform_indices = @transform_18, window_bounds = array<i64: 512, 1024>}, {pipeline_mode = #tpu.pipeline_mode<synchronous>, transform_indices = @transform_19, window_bounds = array<i64: 1, 1024>}, {transform_indices = @transform_20, window_bounds = array<i64: 1, 1, 1024>}]} {
    %c0 = arith.constant 0 : index
    %c0_0 = arith.constant 0 : index
    %c0_1 = arith.constant 0 : index
    %0 = vector.load %arg1[%c0, %c0_0, %c0_1] : memref<1x324x128xbf16, #tpu.memory_space<vmem>>, vector<1x324x128xbf16>
    %1 = vector.shape_cast %0 : vector<1x324x128xbf16> to vector<324x128xbf16>
    %2 = vector.extract_strided_slice %1 {offsets = [0, 0], sizes = [305, 128], strides = [1, 1]} : vector<324x128xbf16> to vector<305x128xbf16>
    %c0_2 = arith.constant 0 : index
    %c0_3 = arith.constant 0 : index
    %c0_4 = arith.constant 0 : index
    %3 = vector.load %arg2[%c0_2, %c0_3, %c0_4] : memref<4x128x128xbf16, #tpu.memory_space<vmem>>, vector<1x128x128xbf16>
    %4 = vector.shape_cast %3 : vector<1x128x128xbf16> to vector<128x128xbf16>
    %cst = arith.constant dense<0.000000e+00> : vector<305x128xf32>
    %5 = tpu.matmul %2, %4, %cst {dimension_numbers = #tpu.dot_dimension_numbers<[1], [0], [0], [1], [0, 0, 1, 1], [], []>} : vector<305x128xbf16>, vector<128x128xbf16>, vector<305x128xf32> -> vector<305x128xf32>
    %6 = vector.extract_strided_slice %1 {offsets = [1, 0], sizes = [305, 128], strides = [1, 1]} : vector<324x128xbf16> to vector<305x128xbf16>
    %c1 = arith.constant 1 : index
    %c0_5 = arith.constant 0 : index
    %c0_6 = arith.constant 0 : index
    %7 = vector.load %arg2[%c1, %c0_5, %c0_6] : memref<4x128x128xbf16, #tpu.memory_space<vmem>>, vector<1x128x128xbf16>
    %8 = vector.shape_cast %7 : vector<1x128x128xbf16> to vector<128x128xbf16>
    %cst_7 = arith.constant dense<0.000000e+00> : vector<305x128xf32>
    %9 = tpu.matmul %6, %8, %cst_7 {dimension_numbers = #tpu.dot_dimension_numbers<[1], [0], [0], [1], [0, 0, 1, 1], [], []>} : vector<305x128xbf16>, vector<128x128xbf16>, vector<305x128xf32> -> vector<305x128xf32>
    %10 = arith.addf %5, %9 : vector<305x128xf32>
    %11 = vector.extract_strided_slice %1 {offsets = [18, 0], sizes = [305, 128], strides = [1, 1]} : vector<324x128xbf16> to vector<305x128xbf16>
    %c2 = arith.constant 2 : index
    %c0_8 = arith.constant 0 : index
    %c0_9 = arith.constant 0 : index
    %12 = vector.load %arg2[%c2, %c0_8, %c0_9] : memref<4x128x128xbf16, #tpu.memory_space<vmem>>, vector<1x128x128xbf16>
    %13 = vector.shape_cast %12 : vector<1x128x128xbf16> to vector<128x128xbf16>
    %cst_10 = arith.constant dense<0.000000e+00> : vector<305x128xf32>
    %14 = tpu.matmul %11, %13, %cst_10 {dimension_numbers = #tpu.dot_dimension_numbers<[1], [0], [0], [1], [0, 0, 1, 1], [], []>} : vector<305x128xbf16>, vector<128x128xbf16>, vector<305x128xf32> -> vector<305x128xf32>
    %15 = arith.addf %10, %14 : vector<305x128xf32>
    %16 = vector.extract_strided_slice %1 {offsets = [19, 0], sizes = [305, 128], strides = [1, 1]} : vector<324x128xbf16> to vector<305x128xbf16>
    %c3 = arith.constant 3 : index
    %c0_11 = arith.constant 0 : index
    %c0_12 = arith.constant 0 : index
    %17 = vector.load %arg2[%c3, %c0_11, %c0_12] : memref<4x128x128xbf16, #tpu.memory_space<vmem>>, vector<1x128x128xbf16>
    %18 = vector.shape_cast %17 : vector<1x128x128xbf16> to vector<128x128xbf16>
    %cst_13 = arith.constant dense<0.000000e+00> : vector<305x128xf32>
    %19 = tpu.matmul %16, %18, %cst_13 {dimension_numbers = #tpu.dot_dimension_numbers<[1], [0], [0], [1], [0, 0, 1, 1], [], []>} : vector<305x128xbf16>, vector<128x128xbf16>, vector<305x128xf32> -> vector<305x128xf32>
    %20 = arith.addf %15, %19 : vector<305x128xf32>
    %c0_14 = arith.constant 0 : index
    %c0_15 = arith.constant 0 : index
    %21 = vector.load %arg3[%c0_14, %c0_15] : memref<1x128xf32, #tpu.memory_space<vmem>>, vector<1x128xf32>
    %22 = vector.broadcast %21 : vector<1x128xf32> to vector<305x128xf32>
    %23 = arith.addf %20, %22 : vector<305x128xf32>
    %cst_16 = arith.constant 0.000000e+00 : f32
    %24 = vector.broadcast %cst_16 : f32 to vector<305x128xf32>
    %25 = arith.maximumf %23, %24 : vector<305x128xf32>
    %26 = arith.truncf %25 : vector<305x128xf32> to vector<305x128xbf16>
    %27 = vector.extract_strided_slice %26 {offsets = [0, 0], sizes = [267, 128], strides = [1, 1]} : vector<305x128xbf16> to vector<267x128xbf16>
    %28 = vector.extract_strided_slice %26 {offsets = [1, 0], sizes = [267, 128], strides = [1, 1]} : vector<305x128xbf16> to vector<267x128xbf16>
    %29 = arith.maximumf %27, %28 : vector<267x128xbf16>
    %30 = vector.extract_strided_slice %26 {offsets = [2, 0], sizes = [267, 128], strides = [1, 1]} : vector<305x128xbf16> to vector<267x128xbf16>
    %31 = arith.maximumf %29, %30 : vector<267x128xbf16>
    %32 = vector.extract_strided_slice %26 {offsets = [18, 0], sizes = [267, 128], strides = [1, 1]} : vector<305x128xbf16> to vector<267x128xbf16>
    %33 = arith.maximumf %31, %32 : vector<267x128xbf16>
    %34 = vector.extract_strided_slice %26 {offsets = [19, 0], sizes = [267, 128], strides = [1, 1]} : vector<305x128xbf16> to vector<267x128xbf16>
    %35 = arith.maximumf %33, %34 : vector<267x128xbf16>
    %36 = vector.extract_strided_slice %26 {offsets = [20, 0], sizes = [267, 128], strides = [1, 1]} : vector<305x128xbf16> to vector<267x128xbf16>
    %37 = arith.maximumf %35, %36 : vector<267x128xbf16>
    %38 = vector.extract_strided_slice %26 {offsets = [36, 0], sizes = [267, 128], strides = [1, 1]} : vector<305x128xbf16> to vector<267x128xbf16>
    %39 = arith.maximumf %37, %38 : vector<267x128xbf16>
    %40 = vector.extract_strided_slice %26 {offsets = [37, 0], sizes = [267, 128], strides = [1, 1]} : vector<305x128xbf16> to vector<267x128xbf16>
    %41 = arith.maximumf %39, %40 : vector<267x128xbf16>
    %42 = vector.extract_strided_slice %26 {offsets = [38, 0], sizes = [267, 128], strides = [1, 1]} : vector<305x128xbf16> to vector<267x128xbf16>
    %43 = arith.maximumf %41, %42 : vector<267x128xbf16>
    %c0_17 = arith.constant 0 : index
    %c0_18 = arith.constant 0 : index
    %44 = vector.load %arg12[%c0_17, %c0_18] : memref<144x267xbf16, #tpu.memory_space<vmem>>, vector<144x267xbf16>
    %cst_19 = arith.constant dense<0.000000e+00> : vector<144x128xf32>
    %45 = tpu.matmul %44, %43, %cst_19 {dimension_numbers = #tpu.dot_dimension_numbers<[1], [0], [0], [1], [0, 0, 1, 1], [], []>} : vector<144x267xbf16>, vector<267x128xbf16>, vector<144x128xf32> -> vector<144x128xf32>
    %46 = arith.truncf %45 : vector<144x128xf32> to vector<144x128xbf16>
    %47 = vector.extract_strided_slice %46 {offsets = [0, 0], sizes = [92, 128], strides = [1, 1]} : vector<144x128xbf16> to vector<92x128xbf16>
    %c0_20 = arith.constant 0 : index
    %c0_21 = arith.constant 0 : index
    %c0_22 = arith.constant 0 : index
    %48 = vector.load %arg4[%c0_20, %c0_21, %c0_22] : memref<25x128x128xbf16, #tpu.memory_space<vmem>>, vector<1x128x128xbf16>
    %49 = vector.shape_cast %48 : vector<1x128x128xbf16> to vector<128x128xbf16>
    %cst_23 = arith.constant dense<0.000000e+00> : vector<92x128xf32>
    %50 = tpu.matmul %47, %49, %cst_23 {dimension_numbers = #tpu.dot_dimension_numbers<[1], [0], [0], [1], [0, 0, 1, 1], [], []>} : vector<92x128xbf16>, vector<128x128xbf16>, vector<92x128xf32> -> vector<92x128xf32>
    %51 = vector.extract_strided_slice %46 {offsets = [1, 0], sizes = [92, 128], strides = [1, 1]} : vector<144x128xbf16> to vector<92x128xbf16>
    %c1_24 = arith.constant 1 : index
    %c0_25 = arith.constant 0 : index
    %c0_26 = arith.constant 0 : index
    %52 = vector.load %arg4[%c1_24, %c0_25, %c0_26] : memref<25x128x128xbf16, #tpu.memory_space<vmem>>, vector<1x128x128xbf16>
    %53 = vector.shape_cast %52 : vector<1x128x128xbf16> to vector<128x128xbf16>
    %cst_27 = arith.constant dense<0.000000e+00> : vector<92x128xf32>
    %54 = tpu.matmul %51, %53, %cst_27 {dimension_numbers = #tpu.dot_dimension_numbers<[1], [0], [0], [1], [0, 0, 1, 1], [], []>} : vector<92x128xbf16>, vector<128x128xbf16>, vector<92x128xf32> -> vector<92x128xf32>
    %55 = arith.addf %50, %54 : vector<92x128xf32>
    %56 = vector.extract_strided_slice %46 {offsets = [2, 0], sizes = [92, 128], strides = [1, 1]} : vector<144x128xbf16> to vector<92x128xbf16>
    %c2_28 = arith.constant 2 : index
    %c0_29 = arith.constant 0 : index
    %c0_30 = arith.constant 0 : index
    %57 = vector.load %arg4[%c2_28, %c0_29, %c0_30] : memref<25x128x128xbf16, #tpu.memory_space<vmem>>, vector<1x128x128xbf16>
    %58 = vector.shape_cast %57 : vector<1x128x128xbf16> to vector<128x128xbf16>
    %cst_31 = arith.constant dense<0.000000e+00> : vector<92x128xf32>
    %59 = tpu.matmul %56, %58, %cst_31 {dimension_numbers = #tpu.dot_dimension_numbers<[1], [0], [0], [1], [0, 0, 1, 1], [], []>} : vector<92x128xbf16>, vector<128x128xbf16>, vector<92x128xf32> -> vector<92x128xf32>
    %60 = arith.addf %55, %59 : vector<92x128xf32>
    %61 = vector.extract_strided_slice %46 {offsets = [3, 0], sizes = [92, 128], strides = [1, 1]} : vector<144x128xbf16> to vector<92x128xbf16>
    %c3_32 = arith.constant 3 : index
    %c0_33 = arith.constant 0 : index
    %c0_34 = arith.constant 0 : index
    %62 = vector.load %arg4[%c3_32, %c0_33, %c0_34] : memref<25x128x128xbf16, #tpu.memory_space<vmem>>, vector<1x128x128xbf16>
    %63 = vector.shape_cast %62 : vector<1x128x128xbf16> to vector<128x128xbf16>
    %cst_35 = arith.constant dense<0.000000e+00> : vector<92x128xf32>
    %64 = tpu.matmul %61, %63, %cst_35 {dimension_numbers = #tpu.dot_dimension_numbers<[1], [0], [0], [1], [0, 0, 1, 1], [], []>} : vector<92x128xbf16>, vector<128x128xbf16>, vector<92x128xf32> -> vector<92x128xf32>
    %65 = arith.addf %60, %64 : vector<92x128xf32>
    %66 = vector.extract_strided_slice %46 {offsets = [4, 0], sizes = [92, 128], strides = [1, 1]} : vector<144x128xbf16> to vector<92x128xbf16>
    %c4 = arith.constant 4 : index
    %c0_36 = arith.constant 0 : index
    %c0_37 = arith.constant 0 : index
    %67 = vector.load %arg4[%c4, %c0_36, %c0_37] : memref<25x128x128xbf16, #tpu.memory_space<vmem>>, vector<1x128x128xbf16>
    %68 = vector.shape_cast %67 : vector<1x128x128xbf16> to vector<128x128xbf16>
    %cst_38 = arith.constant dense<0.000000e+00> : vector<92x128xf32>
    %69 = tpu.matmul %66, %68, %cst_38 {dimension_numbers = #tpu.dot_dimension_numbers<[1], [0], [0], [1], [0, 0, 1, 1], [], []>} : vector<92x128xbf16>, vector<128x128xbf16>, vector<92x128xf32> -> vector<92x128xf32>
    %70 = arith.addf %65, %69 : vector<92x128xf32>
    %71 = vector.extract_strided_slice %46 {offsets = [12, 0], sizes = [92, 128], strides = [1, 1]} : vector<144x128xbf16> to vector<92x128xbf16>
    %c5 = arith.constant 5 : index
    %c0_39 = arith.constant 0 : index
    %c0_40 = arith.constant 0 : index
    %72 = vector.load %arg4[%c5, %c0_39, %c0_40] : memref<25x128x128xbf16, #tpu.memory_space<vmem>>, vector<1x128x128xbf16>
    %73 = vector.shape_cast %72 : vector<1x128x128xbf16> to vector<128x128xbf16>
    %cst_41 = arith.constant dense<0.000000e+00> : vector<92x128xf32>
    %74 = tpu.matmul %71, %73, %cst_41 {dimension_numbers = #tpu.dot_dimension_numbers<[1], [0], [0], [1], [0, 0, 1, 1], [], []>} : vector<92x128xbf16>, vector<128x128xbf16>, vector<92x128xf32> -> vector<92x128xf32>
    %75 = arith.addf %70, %74 : vector<92x128xf32>
    %76 = vector.extract_strided_slice %46 {offsets = [13, 0], sizes = [92, 128], strides = [1, 1]} : vector<144x128xbf16> to vector<92x128xbf16>
    %c6 = arith.constant 6 : index
    %c0_42 = arith.constant 0 : index
    %c0_43 = arith.constant 0 : index
    %77 = vector.load %arg4[%c6, %c0_42, %c0_43] : memref<25x128x128xbf16, #tpu.memory_space<vmem>>, vector<1x128x128xbf16>
    %78 = vector.shape_cast %77 : vector<1x128x128xbf16> to vector<128x128xbf16>
    %cst_44 = arith.constant dense<0.000000e+00> : vector<92x128xf32>
    %79 = tpu.matmul %76, %78, %cst_44 {dimension_numbers = #tpu.dot_dimension_numbers<[1], [0], [0], [1], [0, 0, 1, 1], [], []>} : vector<92x128xbf16>, vector<128x128xbf16>, vector<92x128xf32> -> vector<92x128xf32>
    %80 = arith.addf %75, %79 : vector<92x128xf32>
    %81 = vector.extract_strided_slice %46 {offsets = [14, 0], sizes = [92, 128], strides = [1, 1]} : vector<144x128xbf16> to vector<92x128xbf16>
    %c7 = arith.constant 7 : index
    %c0_45 = arith.constant 0 : index
    %c0_46 = arith.constant 0 : index
    %82 = vector.load %arg4[%c7, %c0_45, %c0_46] : memref<25x128x128xbf16, #tpu.memory_space<vmem>>, vector<1x128x128xbf16>
    %83 = vector.shape_cast %82 : vector<1x128x128xbf16> to vector<128x128xbf16>
    %cst_47 = arith.constant dense<0.000000e+00> : vector<92x128xf32>
    %84 = tpu.matmul %81, %83, %cst_47 {dimension_numbers = #tpu.dot_dimension_numbers<[1], [0], [0], [1], [0, 0, 1, 1], [], []>} : vector<92x128xbf16>, vector<128x128xbf16>, vector<92x128xf32> -> vector<92x128xf32>
    %85 = arith.addf %80, %84 : vector<92x128xf32>
    %86 = vector.extract_strided_slice %46 {offsets = [15, 0], sizes = [92, 128], strides = [1, 1]} : vector<144x128xbf16> to vector<92x128xbf16>
    %c8 = arith.constant 8 : index
    %c0_48 = arith.constant 0 : index
    %c0_49 = arith.constant 0 : index
    %87 = vector.load %arg4[%c8, %c0_48, %c0_49] : memref<25x128x128xbf16, #tpu.memory_space<vmem>>, vector<1x128x128xbf16>
    %88 = vector.shape_cast %87 : vector<1x128x128xbf16> to vector<128x128xbf16>
    %cst_50 = arith.constant dense<0.000000e+00> : vector<92x128xf32>
    %89 = tpu.matmul %86, %88, %cst_50 {dimension_numbers = #tpu.dot_dimension_numbers<[1], [0], [0], [1], [0, 0, 1, 1], [], []>} : vector<92x128xbf16>, vector<128x128xbf16>, vector<92x128xf32> -> vector<92x128xf32>
    %90 = arith.addf %85, %89 : vector<92x128xf32>
    %91 = vector.extract_strided_slice %46 {offsets = [16, 0], sizes = [92, 128], strides = [1, 1]} : vector<144x128xbf16> to vector<92x128xbf16>
    %c9 = arith.constant 9 : index
    %c0_51 = arith.constant 0 : index
    %c0_52 = arith.constant 0 : index
    %92 = vector.load %arg4[%c9, %c0_51, %c0_52] : memref<25x128x128xbf16, #tpu.memory_space<vmem>>, vector<1x128x128xbf16>
    %93 = vector.shape_cast %92 : vector<1x128x128xbf16> to vector<128x128xbf16>
    %cst_53 = arith.constant dense<0.000000e+00> : vector<92x128xf32>
    %94 = tpu.matmul %91, %93, %cst_53 {dimension_numbers = #tpu.dot_dimension_numbers<[1], [0], [0], [1], [0, 0, 1, 1], [], []>} : vector<92x128xbf16>, vector<128x128xbf16>, vector<92x128xf32> -> vector<92x128xf32>
    %95 = arith.addf %90, %94 : vector<92x128xf32>
    %96 = vector.extract_strided_slice %46 {offsets = [24, 0], sizes = [92, 128], strides = [1, 1]} : vector<144x128xbf16> to vector<92x128xbf16>
    %c10 = arith.constant 10 : index
    %c0_54 = arith.constant 0 : index
    %c0_55 = arith.constant 0 : index
    %97 = vector.load %arg4[%c10, %c0_54, %c0_55] : memref<25x128x128xbf16, #tpu.memory_space<vmem>>, vector<1x128x128xbf16>
    %98 = vector.shape_cast %97 : vector<1x128x128xbf16> to vector<128x128xbf16>
    %cst_56 = arith.constant dense<0.000000e+00> : vector<92x128xf32>
    %99 = tpu.matmul %96, %98, %cst_56 {dimension_numbers = #tpu.dot_dimension_numbers<[1], [0], [0], [1], [0, 0, 1, 1], [], []>} : vector<92x128xbf16>, vector<128x128xbf16>, vector<92x128xf32> -> vector<92x128xf32>
    %100 = arith.addf %95, %99 : vector<92x128xf32>
    %101 = vector.extract_strided_slice %46 {offsets = [25, 0], sizes = [92, 128], strides = [1, 1]} : vector<144x128xbf16> to vector<92x128xbf16>
    %c11 = arith.constant 11 : index
    %c0_57 = arith.constant 0 : index
    %c0_58 = arith.constant 0 : index
    %102 = vector.load %arg4[%c11, %c0_57, %c0_58] : memref<25x128x128xbf16, #tpu.memory_space<vmem>>, vector<1x128x128xbf16>
    %103 = vector.shape_cast %102 : vector<1x128x128xbf16> to vector<128x128xbf16>
    %cst_59 = arith.constant dense<0.000000e+00> : vector<92x128xf32>
    %104 = tpu.matmul %101, %103, %cst_59 {dimension_numbers = #tpu.dot_dimension_numbers<[1], [0], [0], [1], [0, 0, 1, 1], [], []>} : vector<92x128xbf16>, vector<128x128xbf16>, vector<92x128xf32> -> vector<92x128xf32>
    %105 = arith.addf %100, %104 : vector<92x128xf32>
    %106 = vector.extract_strided_slice %46 {offsets = [26, 0], sizes = [92, 128], strides = [1, 1]} : vector<144x128xbf16> to vector<92x128xbf16>
    %c12 = arith.constant 12 : index
    %c0_60 = arith.constant 0 : index
    %c0_61 = arith.constant 0 : index
    %107 = vector.load %arg4[%c12, %c0_60, %c0_61] : memref<25x128x128xbf16, #tpu.memory_space<vmem>>, vector<1x128x128xbf16>
    %108 = vector.shape_cast %107 : vector<1x128x128xbf16> to vector<128x128xbf16>
    %cst_62 = arith.constant dense<0.000000e+00> : vector<92x128xf32>
    %109 = tpu.matmul %106, %108, %cst_62 {dimension_numbers = #tpu.dot_dimension_numbers<[1], [0], [0], [1], [0, 0, 1, 1], [], []>} : vector<92x128xbf16>, vector<128x128xbf16>, vector<92x128xf32> -> vector<92x128xf32>
    %110 = arith.addf %105, %109 : vector<92x128xf32>
    %111 = vector.extract_strided_slice %46 {offsets = [27, 0], sizes = [92, 128], strides = [1, 1]} : vector<144x128xbf16> to vector<92x128xbf16>
    %c13 = arith.constant 13 : index
    %c0_63 = arith.constant 0 : index
    %c0_64 = arith.constant 0 : index
    %112 = vector.load %arg4[%c13, %c0_63, %c0_64] : memref<25x128x128xbf16, #tpu.memory_space<vmem>>, vector<1x128x128xbf16>
    %113 = vector.shape_cast %112 : vector<1x128x128xbf16> to vector<128x128xbf16>
    %cst_65 = arith.constant dense<0.000000e+00> : vector<92x128xf32>
    %114 = tpu.matmul %111, %113, %cst_65 {dimension_numbers = #tpu.dot_dimension_numbers<[1], [0], [0], [1], [0, 0, 1, 1], [], []>} : vector<92x128xbf16>, vector<128x128xbf16>, vector<92x128xf32> -> vector<92x128xf32>
    %115 = arith.addf %110, %114 : vector<92x128xf32>
    %116 = vector.extract_strided_slice %46 {offsets = [28, 0], sizes = [92, 128], strides = [1, 1]} : vector<144x128xbf16> to vector<92x128xbf16>
    %c14 = arith.constant 14 : index
    %c0_66 = arith.constant 0 : index
    %c0_67 = arith.constant 0 : index
    %117 = vector.load %arg4[%c14, %c0_66, %c0_67] : memref<25x128x128xbf16, #tpu.memory_space<vmem>>, vector<1x128x128xbf16>
    %118 = vector.shape_cast %117 : vector<1x128x128xbf16> to vector<128x128xbf16>
    %cst_68 = arith.constant dense<0.000000e+00> : vector<92x128xf32>
    %119 = tpu.matmul %116, %118, %cst_68 {dimension_numbers = #tpu.dot_dimension_numbers<[1], [0], [0], [1], [0, 0, 1, 1], [], []>} : vector<92x128xbf16>, vector<128x128xbf16>, vector<92x128xf32> -> vector<92x128xf32>
    %120 = arith.addf %115, %119 : vector<92x128xf32>
    %121 = vector.extract_strided_slice %46 {offsets = [36, 0], sizes = [92, 128], strides = [1, 1]} : vector<144x128xbf16> to vector<92x128xbf16>
    %c15 = arith.constant 15 : index
    %c0_69 = arith.constant 0 : index
    %c0_70 = arith.constant 0 : index
    %122 = vector.load %arg4[%c15, %c0_69, %c0_70] : memref<25x128x128xbf16, #tpu.memory_space<vmem>>, vector<1x128x128xbf16>
    %123 = vector.shape_cast %122 : vector<1x128x128xbf16> to vector<128x128xbf16>
    %cst_71 = arith.constant dense<0.000000e+00> : vector<92x128xf32>
    %124 = tpu.matmul %121, %123, %cst_71 {dimension_numbers = #tpu.dot_dimension_numbers<[1], [0], [0], [1], [0, 0, 1, 1], [], []>} : vector<92x128xbf16>, vector<128x128xbf16>, vector<92x128xf32> -> vector<92x128xf32>
    %125 = arith.addf %120, %124 : vector<92x128xf32>
    %126 = vector.extract_strided_slice %46 {offsets = [37, 0], sizes = [92, 128], strides = [1, 1]} : vector<144x128xbf16> to vector<92x128xbf16>
    %c16 = arith.constant 16 : index
    %c0_72 = arith.constant 0 : index
    %c0_73 = arith.constant 0 : index
    %127 = vector.load %arg4[%c16, %c0_72, %c0_73] : memref<25x128x128xbf16, #tpu.memory_space<vmem>>, vector<1x128x128xbf16>
    %128 = vector.shape_cast %127 : vector<1x128x128xbf16> to vector<128x128xbf16>
    %cst_74 = arith.constant dense<0.000000e+00> : vector<92x128xf32>
    %129 = tpu.matmul %126, %128, %cst_74 {dimension_numbers = #tpu.dot_dimension_numbers<[1], [0], [0], [1], [0, 0, 1, 1], [], []>} : vector<92x128xbf16>, vector<128x128xbf16>, vector<92x128xf32> -> vector<92x128xf32>
    %130 = arith.addf %125, %129 : vector<92x128xf32>
    %131 = vector.extract_strided_slice %46 {offsets = [38, 0], sizes = [92, 128], strides = [1, 1]} : vector<144x128xbf16> to vector<92x128xbf16>
    %c17 = arith.constant 17 : index
    %c0_75 = arith.constant 0 : index
    %c0_76 = arith.constant 0 : index
    %132 = vector.load %arg4[%c17, %c0_75, %c0_76] : memref<25x128x128xbf16, #tpu.memory_space<vmem>>, vector<1x128x128xbf16>
    %133 = vector.shape_cast %132 : vector<1x128x128xbf16> to vector<128x128xbf16>
    %cst_77 = arith.constant dense<0.000000e+00> : vector<92x128xf32>
    %134 = tpu.matmul %131, %133, %cst_77 {dimension_numbers = #tpu.dot_dimension_numbers<[1], [0], [0], [1], [0, 0, 1, 1], [], []>} : vector<92x128xbf16>, vector<128x128xbf16>, vector<92x128xf32> -> vector<92x128xf32>
    %135 = arith.addf %130, %134 : vector<92x128xf32>
    %136 = vector.extract_strided_slice %46 {offsets = [39, 0], sizes = [92, 128], strides = [1, 1]} : vector<144x128xbf16> to vector<92x128xbf16>
    %c18 = arith.constant 18 : index
    %c0_78 = arith.constant 0 : index
    %c0_79 = arith.constant 0 : index
    %137 = vector.load %arg4[%c18, %c0_78, %c0_79] : memref<25x128x128xbf16, #tpu.memory_space<vmem>>, vector<1x128x128xbf16>
    %138 = vector.shape_cast %137 : vector<1x128x128xbf16> to vector<128x128xbf16>
    %cst_80 = arith.constant dense<0.000000e+00> : vector<92x128xf32>
    %139 = tpu.matmul %136, %138, %cst_80 {dimension_numbers = #tpu.dot_dimension_numbers<[1], [0], [0], [1], [0, 0, 1, 1], [], []>} : vector<92x128xbf16>, vector<128x128xbf16>, vector<92x128xf32> -> vector<92x128xf32>
    %140 = arith.addf %135, %139 : vector<92x128xf32>
    %141 = vector.extract_strided_slice %46 {offsets = [40, 0], sizes = [92, 128], strides = [1, 1]} : vector<144x128xbf16> to vector<92x128xbf16>
    %c19 = arith.constant 19 : index
    %c0_81 = arith.constant 0 : index
    %c0_82 = arith.constant 0 : index
    %142 = vector.load %arg4[%c19, %c0_81, %c0_82] : memref<25x128x128xbf16, #tpu.memory_space<vmem>>, vector<1x128x128xbf16>
    %143 = vector.shape_cast %142 : vector<1x128x128xbf16> to vector<128x128xbf16>
    %cst_83 = arith.constant dense<0.000000e+00> : vector<92x128xf32>
    %144 = tpu.matmul %141, %143, %cst_83 {dimension_numbers = #tpu.dot_dimension_numbers<[1], [0], [0], [1], [0, 0, 1, 1], [], []>} : vector<92x128xbf16>, vector<128x128xbf16>, vector<92x128xf32> -> vector<92x128xf32>
    %145 = arith.addf %140, %144 : vector<92x128xf32>
    %146 = vector.extract_strided_slice %46 {offsets = [48, 0], sizes = [92, 128], strides = [1, 1]} : vector<144x128xbf16> to vector<92x128xbf16>
    %c20 = arith.constant 20 : index
    %c0_84 = arith.constant 0 : index
    %c0_85 = arith.constant 0 : index
    %147 = vector.load %arg4[%c20, %c0_84, %c0_85] : memref<25x128x128xbf16, #tpu.memory_space<vmem>>, vector<1x128x128xbf16>
    %148 = vector.shape_cast %147 : vector<1x128x128xbf16> to vector<128x128xbf16>
    %cst_86 = arith.constant dense<0.000000e+00> : vector<92x128xf32>
    %149 = tpu.matmul %146, %148, %cst_86 {dimension_numbers = #tpu.dot_dimension_numbers<[1], [0], [0], [1], [0, 0, 1, 1], [], []>} : vector<92x128xbf16>, vector<128x128xbf16>, vector<92x128xf32> -> vector<92x128xf32>
    %150 = arith.addf %145, %149 : vector<92x128xf32>
    %151 = vector.extract_strided_slice %46 {offsets = [49, 0], sizes = [92, 128], strides = [1, 1]} : vector<144x128xbf16> to vector<92x128xbf16>
    %c21 = arith.constant 21 : index
    %c0_87 = arith.constant 0 : index
    %c0_88 = arith.constant 0 : index
    %152 = vector.load %arg4[%c21, %c0_87, %c0_88] : memref<25x128x128xbf16, #tpu.memory_space<vmem>>, vector<1x128x128xbf16>
    %153 = vector.shape_cast %152 : vector<1x128x128xbf16> to vector<128x128xbf16>
    %cst_89 = arith.constant dense<0.000000e+00> : vector<92x128xf32>
    %154 = tpu.matmul %151, %153, %cst_89 {dimension_numbers = #tpu.dot_dimension_numbers<[1], [0], [0], [1], [0, 0, 1, 1], [], []>} : vector<92x128xbf16>, vector<128x128xbf16>, vector<92x128xf32> -> vector<92x128xf32>
    %155 = arith.addf %150, %154 : vector<92x128xf32>
    %156 = vector.extract_strided_slice %46 {offsets = [50, 0], sizes = [92, 128], strides = [1, 1]} : vector<144x128xbf16> to vector<92x128xbf16>
    %c22 = arith.constant 22 : index
    %c0_90 = arith.constant 0 : index
    %c0_91 = arith.constant 0 : index
    %157 = vector.load %arg4[%c22, %c0_90, %c0_91] : memref<25x128x128xbf16, #tpu.memory_space<vmem>>, vector<1x128x128xbf16>
    %158 = vector.shape_cast %157 : vector<1x128x128xbf16> to vector<128x128xbf16>
    %cst_92 = arith.constant dense<0.000000e+00> : vector<92x128xf32>
    %159 = tpu.matmul %156, %158, %cst_92 {dimension_numbers = #tpu.dot_dimension_numbers<[1], [0], [0], [1], [0, 0, 1, 1], [], []>} : vector<92x128xbf16>, vector<128x128xbf16>, vector<92x128xf32> -> vector<92x128xf32>
    %160 = arith.addf %155, %159 : vector<92x128xf32>
    %161 = vector.extract_strided_slice %46 {offsets = [51, 0], sizes = [92, 128], strides = [1, 1]} : vector<144x128xbf16> to vector<92x128xbf16>
    %c23 = arith.constant 23 : index
    %c0_93 = arith.constant 0 : index
    %c0_94 = arith.constant 0 : index
    %162 = vector.load %arg4[%c23, %c0_93, %c0_94] : memref<25x128x128xbf16, #tpu.memory_space<vmem>>, vector<1x128x128xbf16>
    %163 = vector.shape_cast %162 : vector<1x128x128xbf16> to vector<128x128xbf16>
    %cst_95 = arith.constant dense<0.000000e+00> : vector<92x128xf32>
    %164 = tpu.matmul %161, %163, %cst_95 {dimension_numbers = #tpu.dot_dimension_numbers<[1], [0], [0], [1], [0, 0, 1, 1], [], []>} : vector<92x128xbf16>, vector<128x128xbf16>, vector<92x128xf32> -> vector<92x128xf32>
    %165 = arith.addf %160, %164 : vector<92x128xf32>
    %166 = vector.extract_strided_slice %46 {offsets = [52, 0], sizes = [92, 128], strides = [1, 1]} : vector<144x128xbf16> to vector<92x128xbf16>
    %c24 = arith.constant 24 : index
    %c0_96 = arith.constant 0 : index
    %c0_97 = arith.constant 0 : index
    %167 = vector.load %arg4[%c24, %c0_96, %c0_97] : memref<25x128x128xbf16, #tpu.memory_space<vmem>>, vector<1x128x128xbf16>
    %168 = vector.shape_cast %167 : vector<1x128x128xbf16> to vector<128x128xbf16>
    %cst_98 = arith.constant dense<0.000000e+00> : vector<92x128xf32>
    %169 = tpu.matmul %166, %168, %cst_98 {dimension_numbers = #tpu.dot_dimension_numbers<[1], [0], [0], [1], [0, 0, 1, 1], [], []>} : vector<92x128xbf16>, vector<128x128xbf16>, vector<92x128xf32> -> vector<92x128xf32>
    %170 = arith.addf %165, %169 : vector<92x128xf32>
    %c0_99 = arith.constant 0 : index
    %c0_100 = arith.constant 0 : index
    %171 = vector.load %arg5[%c0_99, %c0_100] : memref<1x128xf32, #tpu.memory_space<vmem>>, vector<1x128xf32>
    %172 = vector.broadcast %171 : vector<1x128xf32> to vector<92x128xf32>
    %173 = arith.addf %170, %172 : vector<92x128xf32>
    %cst_101 = arith.constant 0.000000e+00 : f32
    %174 = vector.broadcast %cst_101 : f32 to vector<92x128xf32>
    %175 = arith.maximumf %173, %174 : vector<92x128xf32>
    %176 = arith.truncf %175 : vector<92x128xf32> to vector<92x128xbf16>
    %177 = vector.extract_strided_slice %176 {offsets = [0, 0], sizes = [66, 128], strides = [1, 1]} : vector<92x128xbf16> to vector<66x128xbf16>
    %178 = vector.extract_strided_slice %176 {offsets = [1, 0], sizes = [66, 128], strides = [1, 1]} : vector<92x128xbf16> to vector<66x128xbf16>
    %179 = arith.maximumf %177, %178 : vector<66x128xbf16>
    %180 = vector.extract_strided_slice %176 {offsets = [2, 0], sizes = [66, 128], strides = [1, 1]} : vector<92x128xbf16> to vector<66x128xbf16>
    %181 = arith.maximumf %179, %180 : vector<66x128xbf16>
    %182 = vector.extract_strided_slice %176 {offsets = [12, 0], sizes = [66, 128], strides = [1, 1]} : vector<92x128xbf16> to vector<66x128xbf16>
    %183 = arith.maximumf %181, %182 : vector<66x128xbf16>
    %184 = vector.extract_strided_slice %176 {offsets = [13, 0], sizes = [66, 128], strides = [1, 1]} : vector<92x128xbf16> to vector<66x128xbf16>
    %185 = arith.maximumf %183, %184 : vector<66x128xbf16>
    %186 = vector.extract_strided_slice %176 {offsets = [14, 0], sizes = [66, 128], strides = [1, 1]} : vector<92x128xbf16> to vector<66x128xbf16>
    %187 = arith.maximumf %185, %186 : vector<66x128xbf16>
    %188 = vector.extract_strided_slice %176 {offsets = [24, 0], sizes = [66, 128], strides = [1, 1]} : vector<92x128xbf16> to vector<66x128xbf16>
    %189 = arith.maximumf %187, %188 : vector<66x128xbf16>
    %190 = vector.extract_strided_slice %176 {offsets = [25, 0], sizes = [66, 128], strides = [1, 1]} : vector<92x128xbf16> to vector<66x128xbf16>
    %191 = arith.maximumf %189, %190 : vector<66x128xbf16>
    %192 = vector.extract_strided_slice %176 {offsets = [26, 0], sizes = [66, 128], strides = [1, 1]} : vector<92x128xbf16> to vector<66x128xbf16>
    %193 = arith.maximumf %191, %192 : vector<66x128xbf16>
    %c0_102 = arith.constant 0 : index
    %c0_103 = arith.constant 0 : index
    %194 = vector.load %arg13[%c0_102, %c0_103] : memref<25x66xbf16, #tpu.memory_space<vmem>>, vector<25x66xbf16>
    %cst_104 = arith.constant dense<0.000000e+00> : vector<25x128xf32>
    %195 = tpu.matmul %194, %193, %cst_104 {dimension_numbers = #tpu.dot_dimension_numbers<[1], [0], [0], [1], [0, 0, 1, 1], [], []>} : vector<25x66xbf16>, vector<66x128xbf16>, vector<25x128xf32> -> vector<25x128xf32>
    %196 = arith.truncf %195 : vector<25x128xf32> to vector<25x128xbf16>
    %197 = vector.extract_strided_slice %196 {offsets = [0, 0], sizes = [13, 128], strides = [1, 1]} : vector<25x128xbf16> to vector<13x128xbf16>
    %c0_105 = arith.constant 0 : index
    %c0_106 = arith.constant 0 : index
    %c0_107 = arith.constant 0 : index
    %198 = vector.load %arg6[%c0_105, %c0_106, %c0_107] : memref<9x128x128xbf16, #tpu.memory_space<vmem>>, vector<1x128x128xbf16>
    %199 = vector.shape_cast %198 : vector<1x128x128xbf16> to vector<128x128xbf16>
    %cst_108 = arith.constant dense<0.000000e+00> : vector<13x128xf32>
    %200 = tpu.matmul %197, %199, %cst_108 {dimension_numbers = #tpu.dot_dimension_numbers<[1], [0], [0], [1], [0, 0, 1, 1], [], []>} : vector<13x128xbf16>, vector<128x128xbf16>, vector<13x128xf32> -> vector<13x128xf32>
    %201 = vector.extract_strided_slice %196 {offsets = [1, 0], sizes = [13, 128], strides = [1, 1]} : vector<25x128xbf16> to vector<13x128xbf16>
    %c1_109 = arith.constant 1 : index
    %c0_110 = arith.constant 0 : index
    %c0_111 = arith.constant 0 : index
    %202 = vector.load %arg6[%c1_109, %c0_110, %c0_111] : memref<9x128x128xbf16, #tpu.memory_space<vmem>>, vector<1x128x128xbf16>
    %203 = vector.shape_cast %202 : vector<1x128x128xbf16> to vector<128x128xbf16>
    %cst_112 = arith.constant dense<0.000000e+00> : vector<13x128xf32>
    %204 = tpu.matmul %201, %203, %cst_112 {dimension_numbers = #tpu.dot_dimension_numbers<[1], [0], [0], [1], [0, 0, 1, 1], [], []>} : vector<13x128xbf16>, vector<128x128xbf16>, vector<13x128xf32> -> vector<13x128xf32>
    %205 = arith.addf %200, %204 : vector<13x128xf32>
    %206 = vector.extract_strided_slice %196 {offsets = [2, 0], sizes = [13, 128], strides = [1, 1]} : vector<25x128xbf16> to vector<13x128xbf16>
    %c2_113 = arith.constant 2 : index
    %c0_114 = arith.constant 0 : index
    %c0_115 = arith.constant 0 : index
    %207 = vector.load %arg6[%c2_113, %c0_114, %c0_115] : memref<9x128x128xbf16, #tpu.memory_space<vmem>>, vector<1x128x128xbf16>
    %208 = vector.shape_cast %207 : vector<1x128x128xbf16> to vector<128x128xbf16>
    %cst_116 = arith.constant dense<0.000000e+00> : vector<13x128xf32>
    %209 = tpu.matmul %206, %208, %cst_116 {dimension_numbers = #tpu.dot_dimension_numbers<[1], [0], [0], [1], [0, 0, 1, 1], [], []>} : vector<13x128xbf16>, vector<128x128xbf16>, vector<13x128xf32> -> vector<13x128xf32>
    %210 = arith.addf %205, %209 : vector<13x128xf32>
    %211 = vector.extract_strided_slice %196 {offsets = [5, 0], sizes = [13, 128], strides = [1, 1]} : vector<25x128xbf16> to vector<13x128xbf16>
    %c3_117 = arith.constant 3 : index
    %c0_118 = arith.constant 0 : index
    %c0_119 = arith.constant 0 : index
    %212 = vector.load %arg6[%c3_117, %c0_118, %c0_119] : memref<9x128x128xbf16, #tpu.memory_space<vmem>>, vector<1x128x128xbf16>
    %213 = vector.shape_cast %212 : vector<1x128x128xbf16> to vector<128x128xbf16>
    %cst_120 = arith.constant dense<0.000000e+00> : vector<13x128xf32>
    %214 = tpu.matmul %211, %213, %cst_120 {dimension_numbers = #tpu.dot_dimension_numbers<[1], [0], [0], [1], [0, 0, 1, 1], [], []>} : vector<13x128xbf16>, vector<128x128xbf16>, vector<13x128xf32> -> vector<13x128xf32>
    %215 = arith.addf %210, %214 : vector<13x128xf32>
    %216 = vector.extract_strided_slice %196 {offsets = [6, 0], sizes = [13, 128], strides = [1, 1]} : vector<25x128xbf16> to vector<13x128xbf16>
    %c4_121 = arith.constant 4 : index
    %c0_122 = arith.constant 0 : index
    %c0_123 = arith.constant 0 : index
    %217 = vector.load %arg6[%c4_121, %c0_122, %c0_123] : memref<9x128x128xbf16, #tpu.memory_space<vmem>>, vector<1x128x128xbf16>
    %218 = vector.shape_cast %217 : vector<1x128x128xbf16> to vector<128x128xbf16>
    %cst_124 = arith.constant dense<0.000000e+00> : vector<13x128xf32>
    %219 = tpu.matmul %216, %218, %cst_124 {dimension_numbers = #tpu.dot_dimension_numbers<[1], [0], [0], [1], [0, 0, 1, 1], [], []>} : vector<13x128xbf16>, vector<128x128xbf16>, vector<13x128xf32> -> vector<13x128xf32>
    %220 = arith.addf %215, %219 : vector<13x128xf32>
    %221 = vector.extract_strided_slice %196 {offsets = [7, 0], sizes = [13, 128], strides = [1, 1]} : vector<25x128xbf16> to vector<13x128xbf16>
    %c5_125 = arith.constant 5 : index
    %c0_126 = arith.constant 0 : index
    %c0_127 = arith.constant 0 : index
    %222 = vector.load %arg6[%c5_125, %c0_126, %c0_127] : memref<9x128x128xbf16, #tpu.memory_space<vmem>>, vector<1x128x128xbf16>
    %223 = vector.shape_cast %222 : vector<1x128x128xbf16> to vector<128x128xbf16>
    %cst_128 = arith.constant dense<0.000000e+00> : vector<13x128xf32>
    %224 = tpu.matmul %221, %223, %cst_128 {dimension_numbers = #tpu.dot_dimension_numbers<[1], [0], [0], [1], [0, 0, 1, 1], [], []>} : vector<13x128xbf16>, vector<128x128xbf16>, vector<13x128xf32> -> vector<13x128xf32>
    %225 = arith.addf %220, %224 : vector<13x128xf32>
    %226 = vector.extract_strided_slice %196 {offsets = [10, 0], sizes = [13, 128], strides = [1, 1]} : vector<25x128xbf16> to vector<13x128xbf16>
    %c6_129 = arith.constant 6 : index
    %c0_130 = arith.constant 0 : index
    %c0_131 = arith.constant 0 : index
    %227 = vector.load %arg6[%c6_129, %c0_130, %c0_131] : memref<9x128x128xbf16, #tpu.memory_space<vmem>>, vector<1x128x128xbf16>
    %228 = vector.shape_cast %227 : vector<1x128x128xbf16> to vector<128x128xbf16>
    %cst_132 = arith.constant dense<0.000000e+00> : vector<13x128xf32>
    %229 = tpu.matmul %226, %228, %cst_132 {dimension_numbers = #tpu.dot_dimension_numbers<[1], [0], [0], [1], [0, 0, 1, 1], [], []>} : vector<13x128xbf16>, vector<128x128xbf16>, vector<13x128xf32> -> vector<13x128xf32>
    %230 = arith.addf %225, %229 : vector<13x128xf32>
    %231 = vector.extract_strided_slice %196 {offsets = [11, 0], sizes = [13, 128], strides = [1, 1]} : vector<25x128xbf16> to vector<13x128xbf16>
    %c7_133 = arith.constant 7 : index
    %c0_134 = arith.constant 0 : index
    %c0_135 = arith.constant 0 : index
    %232 = vector.load %arg6[%c7_133, %c0_134, %c0_135] : memref<9x128x128xbf16, #tpu.memory_space<vmem>>, vector<1x128x128xbf16>
    %233 = vector.shape_cast %232 : vector<1x128x128xbf16> to vector<128x128xbf16>
    %cst_136 = arith.constant dense<0.000000e+00> : vector<13x128xf32>
    %234 = tpu.matmul %231, %233, %cst_136 {dimension_numbers = #tpu.dot_dimension_numbers<[1], [0], [0], [1], [0, 0, 1, 1], [], []>} : vector<13x128xbf16>, vector<128x128xbf16>, vector<13x128xf32> -> vector<13x128xf32>
    %235 = arith.addf %230, %234 : vector<13x128xf32>
    %236 = vector.extract_strided_slice %196 {offsets = [12, 0], sizes = [13, 128], strides = [1, 1]} : vector<25x128xbf16> to vector<13x128xbf16>
    %c8_137 = arith.constant 8 : index
    %c0_138 = arith.constant 0 : index
    %c0_139 = arith.constant 0 : index
    %237 = vector.load %arg6[%c8_137, %c0_138, %c0_139] : memref<9x128x128xbf16, #tpu.memory_space<vmem>>, vector<1x128x128xbf16>
    %238 = vector.shape_cast %237 : vector<1x128x128xbf16> to vector<128x128xbf16>
    %cst_140 = arith.constant dense<0.000000e+00> : vector<13x128xf32>
    %239 = tpu.matmul %236, %238, %cst_140 {dimension_numbers = #tpu.dot_dimension_numbers<[1], [0], [0], [1], [0, 0, 1, 1], [], []>} : vector<13x128xbf16>, vector<128x128xbf16>, vector<13x128xf32> -> vector<13x128xf32>
    %240 = arith.addf %235, %239 : vector<13x128xf32>
    %c0_141 = arith.constant 0 : index
    %c0_142 = arith.constant 0 : index
    %241 = vector.load %arg7[%c0_141, %c0_142] : memref<1x128xf32, #tpu.memory_space<vmem>>, vector<1x128xf32>
    %242 = vector.broadcast %241 : vector<1x128xf32> to vector<13x128xf32>
    %243 = arith.addf %240, %242 : vector<13x128xf32>
    %cst_143 = arith.constant 0.000000e+00 : f32
    %244 = vector.broadcast %cst_143 : f32 to vector<13x128xf32>
    %245 = arith.maximumf %243, %244 : vector<13x128xf32>
    %246 = arith.truncf %245 : vector<13x128xf32> to vector<13x128xbf16>
    %c0_144 = arith.constant 0 : index
    %c0_145 = arith.constant 0 : index
    %247 = vector.load %arg14[%c0_144, %c0_145] : memref<25x13xbf16, #tpu.memory_space<vmem>>, vector<25x13xbf16>
    %cst_146 = arith.constant dense<0.000000e+00> : vector<25x128xf32>
    %248 = tpu.matmul %247, %246, %cst_146 {dimension_numbers = #tpu.dot_dimension_numbers<[1], [0], [0], [1], [0, 0, 1, 1], [], []>} : vector<25x13xbf16>, vector<13x128xbf16>, vector<25x128xf32> -> vector<25x128xf32>
    %249 = arith.truncf %248 : vector<25x128xf32> to vector<25x128xbf16>
    %250 = vector.extract_strided_slice %249 {offsets = [0, 0], sizes = [13, 128], strides = [1, 1]} : vector<25x128xbf16> to vector<13x128xbf16>
    %c0_147 = arith.constant 0 : index
    %c0_148 = arith.constant 0 : index
    %c0_149 = arith.constant 0 : index
    %251 = vector.load %arg8[%c0_147, %c0_148, %c0_149] : memref<9x128x128xbf16, #tpu.memory_space<vmem>>, vector<1x128x128xbf16>
    %252 = vector.shape_cast %251 : vector<1x128x128xbf16> to vector<128x128xbf16>
    %cst_150 = arith.constant dense<0.000000e+00> : vector<13x128xf32>
    %253 = tpu.matmul %250, %252, %cst_150 {dimension_numbers = #tpu.dot_dimension_numbers<[1], [0], [0], [1], [0, 0, 1, 1], [], []>} : vector<13x128xbf16>, vector<128x128xbf16>, vector<13x128xf32> -> vector<13x128xf32>
    %254 = vector.extract_strided_slice %249 {offsets = [1, 0], sizes = [13, 128], strides = [1, 1]} : vector<25x128xbf16> to vector<13x128xbf16>
    %c1_151 = arith.constant 1 : index
    %c0_152 = arith.constant 0 : index
    %c0_153 = arith.constant 0 : index
    %255 = vector.load %arg8[%c1_151, %c0_152, %c0_153] : memref<9x128x128xbf16, #tpu.memory_space<vmem>>, vector<1x128x128xbf16>
    %256 = vector.shape_cast %255 : vector<1x128x128xbf16> to vector<128x128xbf16>
    %cst_154 = arith.constant dense<0.000000e+00> : vector<13x128xf32>
    %257 = tpu.matmul %254, %256, %cst_154 {dimension_numbers = #tpu.dot_dimension_numbers<[1], [0], [0], [1], [0, 0, 1, 1], [], []>} : vector<13x128xbf16>, vector<128x128xbf16>, vector<13x128xf32> -> vector<13x128xf32>
    %258 = arith.addf %253, %257 : vector<13x128xf32>
    %259 = vector.extract_strided_slice %249 {offsets = [2, 0], sizes = [13, 128], strides = [1, 1]} : vector<25x128xbf16> to vector<13x128xbf16>
    %c2_155 = arith.constant 2 : index
    %c0_156 = arith.constant 0 : index
    %c0_157 = arith.constant 0 : index
    %260 = vector.load %arg8[%c2_155, %c0_156, %c0_157] : memref<9x128x128xbf16, #tpu.memory_space<vmem>>, vector<1x128x128xbf16>
    %261 = vector.shape_cast %260 : vector<1x128x128xbf16> to vector<128x128xbf16>
    %cst_158 = arith.constant dense<0.000000e+00> : vector<13x128xf32>
    %262 = tpu.matmul %259, %261, %cst_158 {dimension_numbers = #tpu.dot_dimension_numbers<[1], [0], [0], [1], [0, 0, 1, 1], [], []>} : vector<13x128xbf16>, vector<128x128xbf16>, vector<13x128xf32> -> vector<13x128xf32>
    %263 = arith.addf %258, %262 : vector<13x128xf32>
    %264 = vector.extract_strided_slice %249 {offsets = [5, 0], sizes = [13, 128], strides = [1, 1]} : vector<25x128xbf16> to vector<13x128xbf16>
    %c3_159 = arith.constant 3 : index
    %c0_160 = arith.constant 0 : index
    %c0_161 = arith.constant 0 : index
    %265 = vector.load %arg8[%c3_159, %c0_160, %c0_161] : memref<9x128x128xbf16, #tpu.memory_space<vmem>>, vector<1x128x128xbf16>
    %266 = vector.shape_cast %265 : vector<1x128x128xbf16> to vector<128x128xbf16>
    %cst_162 = arith.constant dense<0.000000e+00> : vector<13x128xf32>
    %267 = tpu.matmul %264, %266, %cst_162 {dimension_numbers = #tpu.dot_dimension_numbers<[1], [0], [0], [1], [0, 0, 1, 1], [], []>} : vector<13x128xbf16>, vector<128x128xbf16>, vector<13x128xf32> -> vector<13x128xf32>
    %268 = arith.addf %263, %267 : vector<13x128xf32>
    %269 = vector.extract_strided_slice %249 {offsets = [6, 0], sizes = [13, 128], strides = [1, 1]} : vector<25x128xbf16> to vector<13x128xbf16>
    %c4_163 = arith.constant 4 : index
    %c0_164 = arith.constant 0 : index
    %c0_165 = arith.constant 0 : index
    %270 = vector.load %arg8[%c4_163, %c0_164, %c0_165] : memref<9x128x128xbf16, #tpu.memory_space<vmem>>, vector<1x128x128xbf16>
    %271 = vector.shape_cast %270 : vector<1x128x128xbf16> to vector<128x128xbf16>
    %cst_166 = arith.constant dense<0.000000e+00> : vector<13x128xf32>
    %272 = tpu.matmul %269, %271, %cst_166 {dimension_numbers = #tpu.dot_dimension_numbers<[1], [0], [0], [1], [0, 0, 1, 1], [], []>} : vector<13x128xbf16>, vector<128x128xbf16>, vector<13x128xf32> -> vector<13x128xf32>
    %273 = arith.addf %268, %272 : vector<13x128xf32>
    %274 = vector.extract_strided_slice %249 {offsets = [7, 0], sizes = [13, 128], strides = [1, 1]} : vector<25x128xbf16> to vector<13x128xbf16>
    %c5_167 = arith.constant 5 : index
    %c0_168 = arith.constant 0 : index
    %c0_169 = arith.constant 0 : index
    %275 = vector.load %arg8[%c5_167, %c0_168, %c0_169] : memref<9x128x128xbf16, #tpu.memory_space<vmem>>, vector<1x128x128xbf16>
    %276 = vector.shape_cast %275 : vector<1x128x128xbf16> to vector<128x128xbf16>
    %cst_170 = arith.constant dense<0.000000e+00> : vector<13x128xf32>
    %277 = tpu.matmul %274, %276, %cst_170 {dimension_numbers = #tpu.dot_dimension_numbers<[1], [0], [0], [1], [0, 0, 1, 1], [], []>} : vector<13x128xbf16>, vector<128x128xbf16>, vector<13x128xf32> -> vector<13x128xf32>
    %278 = arith.addf %273, %277 : vector<13x128xf32>
    %279 = vector.extract_strided_slice %249 {offsets = [10, 0], sizes = [13, 128], strides = [1, 1]} : vector<25x128xbf16> to vector<13x128xbf16>
    %c6_171 = arith.constant 6 : index
    %c0_172 = arith.constant 0 : index
    %c0_173 = arith.constant 0 : index
    %280 = vector.load %arg8[%c6_171, %c0_172, %c0_173] : memref<9x128x128xbf16, #tpu.memory_space<vmem>>, vector<1x128x128xbf16>
    %281 = vector.shape_cast %280 : vector<1x128x128xbf16> to vector<128x128xbf16>
    %cst_174 = arith.constant dense<0.000000e+00> : vector<13x128xf32>
    %282 = tpu.matmul %279, %281, %cst_174 {dimension_numbers = #tpu.dot_dimension_numbers<[1], [0], [0], [1], [0, 0, 1, 1], [], []>} : vector<13x128xbf16>, vector<128x128xbf16>, vector<13x128xf32> -> vector<13x128xf32>
    %283 = arith.addf %278, %282 : vector<13x128xf32>
    %284 = vector.extract_strided_slice %249 {offsets = [11, 0], sizes = [13, 128], strides = [1, 1]} : vector<25x128xbf16> to vector<13x128xbf16>
    %c7_175 = arith.constant 7 : index
    %c0_176 = arith.constant 0 : index
    %c0_177 = arith.constant 0 : index
    %285 = vector.load %arg8[%c7_175, %c0_176, %c0_177] : memref<9x128x128xbf16, #tpu.memory_space<vmem>>, vector<1x128x128xbf16>
    %286 = vector.shape_cast %285 : vector<1x128x128xbf16> to vector<128x128xbf16>
    %cst_178 = arith.constant dense<0.000000e+00> : vector<13x128xf32>
    %287 = tpu.matmul %284, %286, %cst_178 {dimension_numbers = #tpu.dot_dimension_numbers<[1], [0], [0], [1], [0, 0, 1, 1], [], []>} : vector<13x128xbf16>, vector<128x128xbf16>, vector<13x128xf32> -> vector<13x128xf32>
    %288 = arith.addf %283, %287 : vector<13x128xf32>
    %289 = vector.extract_strided_slice %249 {offsets = [12, 0], sizes = [13, 128], strides = [1, 1]} : vector<25x128xbf16> to vector<13x128xbf16>
    %c8_179 = arith.constant 8 : index
    %c0_180 = arith.constant 0 : index
    %c0_181 = arith.constant 0 : index
    %290 = vector.load %arg8[%c8_179, %c0_180, %c0_181] : memref<9x128x128xbf16, #tpu.memory_space<vmem>>, vector<1x128x128xbf16>
    %291 = vector.shape_cast %290 : vector<1x128x128xbf16> to vector<128x128xbf16>
    %cst_182 = arith.constant dense<0.000000e+00> : vector<13x128xf32>
    %292 = tpu.matmul %289, %291, %cst_182 {dimension_numbers = #tpu.dot_dimension_numbers<[1], [0], [0], [1], [0, 0, 1, 1], [], []>} : vector<13x128xbf16>, vector<128x128xbf16>, vector<13x128xf32> -> vector<13x128xf32>
    %293 = arith.addf %288, %292 : vector<13x128xf32>
    %c0_183 = arith.constant 0 : index
    %c0_184 = arith.constant 0 : index
    %294 = vector.load %arg9[%c0_183, %c0_184] : memref<1x128xf32, #tpu.memory_space<vmem>>, vector<1x128xf32>
    %295 = vector.broadcast %294 : vector<1x128xf32> to vector<13x128xf32>
    %296 = arith.addf %293, %295 : vector<13x128xf32>
    %cst_185 = arith.constant 0.000000e+00 : f32
    %297 = vector.broadcast %cst_185 : f32 to vector<13x128xf32>
    %298 = arith.maximumf %296, %297 : vector<13x128xf32>
    %299 = arith.truncf %298 : vector<13x128xf32> to vector<13x128xbf16>
    %c0_186 = arith.constant 0 : index
    %c0_187 = arith.constant 0 : index
    %300 = vector.load %arg14[%c0_186, %c0_187] : memref<25x13xbf16, #tpu.memory_space<vmem>>, vector<25x13xbf16>
    %cst_188 = arith.constant dense<0.000000e+00> : vector<25x128xf32>
    %301 = tpu.matmul %300, %299, %cst_188 {dimension_numbers = #tpu.dot_dimension_numbers<[1], [0], [0], [1], [0, 0, 1, 1], [], []>} : vector<25x13xbf16>, vector<13x128xbf16>, vector<25x128xf32> -> vector<25x128xf32>
    %302 = arith.truncf %301 : vector<25x128xf32> to vector<25x128xbf16>
    %303 = vector.extract_strided_slice %302 {offsets = [0, 0], sizes = [13, 128], strides = [1, 1]} : vector<25x128xbf16> to vector<13x128xbf16>
    %c0_189 = arith.constant 0 : index
    %c0_190 = arith.constant 0 : index
    %c0_191 = arith.constant 0 : index
    %304 = vector.load %arg10[%c0_189, %c0_190, %c0_191] : memref<9x128x128xbf16, #tpu.memory_space<vmem>>, vector<1x128x128xbf16>
    %305 = vector.shape_cast %304 : vector<1x128x128xbf16> to vector<128x128xbf16>
    %cst_192 = arith.constant dense<0.000000e+00> : vector<13x128xf32>
    %306 = tpu.matmul %303, %305, %cst_192 {dimension_numbers = #tpu.dot_dimension_numbers<[1], [0], [0], [1], [0, 0, 1, 1], [], []>} : vector<13x128xbf16>, vector<128x128xbf16>, vector<13x128xf32> -> vector<13x128xf32>
    %307 = vector.extract_strided_slice %302 {offsets = [1, 0], sizes = [13, 128], strides = [1, 1]} : vector<25x128xbf16> to vector<13x128xbf16>
    %c1_193 = arith.constant 1 : index
    %c0_194 = arith.constant 0 : index
    %c0_195 = arith.constant 0 : index
    %308 = vector.load %arg10[%c1_193, %c0_194, %c0_195] : memref<9x128x128xbf16, #tpu.memory_space<vmem>>, vector<1x128x128xbf16>
    %309 = vector.shape_cast %308 : vector<1x128x128xbf16> to vector<128x128xbf16>
    %cst_196 = arith.constant dense<0.000000e+00> : vector<13x128xf32>
    %310 = tpu.matmul %307, %309, %cst_196 {dimension_numbers = #tpu.dot_dimension_numbers<[1], [0], [0], [1], [0, 0, 1, 1], [], []>} : vector<13x128xbf16>, vector<128x128xbf16>, vector<13x128xf32> -> vector<13x128xf32>
    %311 = arith.addf %306, %310 : vector<13x128xf32>
    %312 = vector.extract_strided_slice %302 {offsets = [2, 0], sizes = [13, 128], strides = [1, 1]} : vector<25x128xbf16> to vector<13x128xbf16>
    %c2_197 = arith.constant 2 : index
    %c0_198 = arith.constant 0 : index
    %c0_199 = arith.constant 0 : index
    %313 = vector.load %arg10[%c2_197, %c0_198, %c0_199] : memref<9x128x128xbf16, #tpu.memory_space<vmem>>, vector<1x128x128xbf16>
    %314 = vector.shape_cast %313 : vector<1x128x128xbf16> to vector<128x128xbf16>
    %cst_200 = arith.constant dense<0.000000e+00> : vector<13x128xf32>
    %315 = tpu.matmul %312, %314, %cst_200 {dimension_numbers = #tpu.dot_dimension_numbers<[1], [0], [0], [1], [0, 0, 1, 1], [], []>} : vector<13x128xbf16>, vector<128x128xbf16>, vector<13x128xf32> -> vector<13x128xf32>
    %316 = arith.addf %311, %315 : vector<13x128xf32>
    %317 = vector.extract_strided_slice %302 {offsets = [5, 0], sizes = [13, 128], strides = [1, 1]} : vector<25x128xbf16> to vector<13x128xbf16>
    %c3_201 = arith.constant 3 : index
    %c0_202 = arith.constant 0 : index
    %c0_203 = arith.constant 0 : index
    %318 = vector.load %arg10[%c3_201, %c0_202, %c0_203] : memref<9x128x128xbf16, #tpu.memory_space<vmem>>, vector<1x128x128xbf16>
    %319 = vector.shape_cast %318 : vector<1x128x128xbf16> to vector<128x128xbf16>
    %cst_204 = arith.constant dense<0.000000e+00> : vector<13x128xf32>
    %320 = tpu.matmul %317, %319, %cst_204 {dimension_numbers = #tpu.dot_dimension_numbers<[1], [0], [0], [1], [0, 0, 1, 1], [], []>} : vector<13x128xbf16>, vector<128x128xbf16>, vector<13x128xf32> -> vector<13x128xf32>
    %321 = arith.addf %316, %320 : vector<13x128xf32>
    %322 = vector.extract_strided_slice %302 {offsets = [6, 0], sizes = [13, 128], strides = [1, 1]} : vector<25x128xbf16> to vector<13x128xbf16>
    %c4_205 = arith.constant 4 : index
    %c0_206 = arith.constant 0 : index
    %c0_207 = arith.constant 0 : index
    %323 = vector.load %arg10[%c4_205, %c0_206, %c0_207] : memref<9x128x128xbf16, #tpu.memory_space<vmem>>, vector<1x128x128xbf16>
    %324 = vector.shape_cast %323 : vector<1x128x128xbf16> to vector<128x128xbf16>
    %cst_208 = arith.constant dense<0.000000e+00> : vector<13x128xf32>
    %325 = tpu.matmul %322, %324, %cst_208 {dimension_numbers = #tpu.dot_dimension_numbers<[1], [0], [0], [1], [0, 0, 1, 1], [], []>} : vector<13x128xbf16>, vector<128x128xbf16>, vector<13x128xf32> -> vector<13x128xf32>
    %326 = arith.addf %321, %325 : vector<13x128xf32>
    %327 = vector.extract_strided_slice %302 {offsets = [7, 0], sizes = [13, 128], strides = [1, 1]} : vector<25x128xbf16> to vector<13x128xbf16>
    %c5_209 = arith.constant 5 : index
    %c0_210 = arith.constant 0 : index
    %c0_211 = arith.constant 0 : index
    %328 = vector.load %arg10[%c5_209, %c0_210, %c0_211] : memref<9x128x128xbf16, #tpu.memory_space<vmem>>, vector<1x128x128xbf16>
    %329 = vector.shape_cast %328 : vector<1x128x128xbf16> to vector<128x128xbf16>
    %cst_212 = arith.constant dense<0.000000e+00> : vector<13x128xf32>
    %330 = tpu.matmul %327, %329, %cst_212 {dimension_numbers = #tpu.dot_dimension_numbers<[1], [0], [0], [1], [0, 0, 1, 1], [], []>} : vector<13x128xbf16>, vector<128x128xbf16>, vector<13x128xf32> -> vector<13x128xf32>
    %331 = arith.addf %326, %330 : vector<13x128xf32>
    %332 = vector.extract_strided_slice %302 {offsets = [10, 0], sizes = [13, 128], strides = [1, 1]} : vector<25x128xbf16> to vector<13x128xbf16>
    %c6_213 = arith.constant 6 : index
    %c0_214 = arith.constant 0 : index
    %c0_215 = arith.constant 0 : index
    %333 = vector.load %arg10[%c6_213, %c0_214, %c0_215] : memref<9x128x128xbf16, #tpu.memory_space<vmem>>, vector<1x128x128xbf16>
    %334 = vector.shape_cast %333 : vector<1x128x128xbf16> to vector<128x128xbf16>
    %cst_216 = arith.constant dense<0.000000e+00> : vector<13x128xf32>
    %335 = tpu.matmul %332, %334, %cst_216 {dimension_numbers = #tpu.dot_dimension_numbers<[1], [0], [0], [1], [0, 0, 1, 1], [], []>} : vector<13x128xbf16>, vector<128x128xbf16>, vector<13x128xf32> -> vector<13x128xf32>
    %336 = arith.addf %331, %335 : vector<13x128xf32>
    %337 = vector.extract_strided_slice %302 {offsets = [11, 0], sizes = [13, 128], strides = [1, 1]} : vector<25x128xbf16> to vector<13x128xbf16>
    %c7_217 = arith.constant 7 : index
    %c0_218 = arith.constant 0 : index
    %c0_219 = arith.constant 0 : index
    %338 = vector.load %arg10[%c7_217, %c0_218, %c0_219] : memref<9x128x128xbf16, #tpu.memory_space<vmem>>, vector<1x128x128xbf16>
    %339 = vector.shape_cast %338 : vector<1x128x128xbf16> to vector<128x128xbf16>
    %cst_220 = arith.constant dense<0.000000e+00> : vector<13x128xf32>
    %340 = tpu.matmul %337, %339, %cst_220 {dimension_numbers = #tpu.dot_dimension_numbers<[1], [0], [0], [1], [0, 0, 1, 1], [], []>} : vector<13x128xbf16>, vector<128x128xbf16>, vector<13x128xf32> -> vector<13x128xf32>
    %341 = arith.addf %336, %340 : vector<13x128xf32>
    %342 = vector.extract_strided_slice %302 {offsets = [12, 0], sizes = [13, 128], strides = [1, 1]} : vector<25x128xbf16> to vector<13x128xbf16>
    %c8_221 = arith.constant 8 : index
    %c0_222 = arith.constant 0 : index
    %c0_223 = arith.constant 0 : index
    %343 = vector.load %arg10[%c8_221, %c0_222, %c0_223] : memref<9x128x128xbf16, #tpu.memory_space<vmem>>, vector<1x128x128xbf16>
    %344 = vector.shape_cast %343 : vector<1x128x128xbf16> to vector<128x128xbf16>
    %cst_224 = arith.constant dense<0.000000e+00> : vector<13x128xf32>
    %345 = tpu.matmul %342, %344, %cst_224 {dimension_numbers = #tpu.dot_dimension_numbers<[1], [0], [0], [1], [0, 0, 1, 1], [], []>} : vector<13x128xbf16>, vector<128x128xbf16>, vector<13x128xf32> -> vector<13x128xf32>
    %346 = arith.addf %341, %345 : vector<13x128xf32>
    %c0_225 = arith.constant 0 : index
    %c0_226 = arith.constant 0 : index
    %347 = vector.load %arg11[%c0_225, %c0_226] : memref<1x128xf32, #tpu.memory_space<vmem>>, vector<1x128xf32>
    %348 = vector.broadcast %347 : vector<1x128xf32> to vector<13x128xf32>
    %349 = arith.addf %346, %348 : vector<13x128xf32>
    %cst_227 = arith.constant 0.000000e+00 : f32
    %350 = vector.broadcast %cst_227 : f32 to vector<13x128xf32>
    %351 = arith.maximumf %349, %350 : vector<13x128xf32>
    %352 = arith.truncf %351 : vector<13x128xf32> to vector<13x128xbf16>
    %353 = vector.extract_strided_slice %352 {offsets = [0, 0], sizes = [1, 128], strides = [1, 1]} : vector<13x128xbf16> to vector<1x128xbf16>
    %354 = vector.extract_strided_slice %352 {offsets = [1, 0], sizes = [1, 128], strides = [1, 1]} : vector<13x128xbf16> to vector<1x128xbf16>
    %355 = arith.maximumf %353, %354 : vector<1x128xbf16>
    %356 = vector.extract_strided_slice %352 {offsets = [2, 0], sizes = [1, 128], strides = [1, 1]} : vector<13x128xbf16> to vector<1x128xbf16>
    %357 = arith.maximumf %355, %356 : vector<1x128xbf16>
    %358 = vector.extract_strided_slice %352 {offsets = [5, 0], sizes = [1, 128], strides = [1, 1]} : vector<13x128xbf16> to vector<1x128xbf16>
    %359 = arith.maximumf %357, %358 : vector<1x128xbf16>
    %360 = vector.extract_strided_slice %352 {offsets = [6, 0], sizes = [1, 128], strides = [1, 1]} : vector<13x128xbf16> to vector<1x128xbf16>
    %361 = arith.maximumf %359, %360 : vector<1x128xbf16>
    %362 = vector.extract_strided_slice %352 {offsets = [7, 0], sizes = [1, 128], strides = [1, 1]} : vector<13x128xbf16> to vector<1x128xbf16>
    %363 = arith.maximumf %361, %362 : vector<1x128xbf16>
    %364 = vector.extract_strided_slice %352 {offsets = [10, 0], sizes = [1, 128], strides = [1, 1]} : vector<13x128xbf16> to vector<1x128xbf16>
    %365 = arith.maximumf %363, %364 : vector<1x128xbf16>
    %366 = vector.extract_strided_slice %352 {offsets = [11, 0], sizes = [1, 128], strides = [1, 1]} : vector<13x128xbf16> to vector<1x128xbf16>
    %367 = arith.maximumf %365, %366 : vector<1x128xbf16>
    %368 = vector.extract_strided_slice %352 {offsets = [12, 0], sizes = [1, 128], strides = [1, 1]} : vector<13x128xbf16> to vector<1x128xbf16>
    %369 = arith.maximumf %367, %368 : vector<1x128xbf16>
    %c0_228 = arith.constant 0 : index
    %c0_229 = arith.constant 0 : index
    %370 = vector.load %arg15[%c0_228, %c0_229] : memref<128x512xbf16, #tpu.memory_space<vmem>>, vector<128x512xbf16>
    %cst_230 = arith.constant dense<0.000000e+00> : vector<1x512xf32>
    %371 = tpu.matmul %369, %370, %cst_230 {dimension_numbers = #tpu.dot_dimension_numbers<[1], [0], [0], [1], [0, 0, 1, 1], [], []>} : vector<1x128xbf16>, vector<128x512xbf16>, vector<1x512xf32> -> vector<1x512xf32>
    %c0_231 = arith.constant 0 : index
    %c0_232 = arith.constant 0 : index
    %372 = vector.load %arg16[%c0_231, %c0_232] : memref<1x512xf32, #tpu.memory_space<vmem>>, vector<1x512xf32>
    %373 = arith.addf %371, %372 : vector<1x512xf32>
    %cst_233 = arith.constant 0.000000e+00 : f32
    %374 = vector.broadcast %cst_233 : f32 to vector<1x512xf32>
    %375 = arith.maximumf %373, %374 : vector<1x512xf32>
    %376 = arith.truncf %375 : vector<1x512xf32> to vector<1x512xbf16>
    %c0_234 = arith.constant 0 : index
    %c0_235 = arith.constant 0 : index
    %377 = vector.load %arg17[%c0_234, %c0_235] : memref<512x512xbf16, #tpu.memory_space<vmem>>, vector<512x512xbf16>
    %cst_236 = arith.constant dense<0.000000e+00> : vector<1x512xf32>
    %378 = tpu.matmul %376, %377, %cst_236 {dimension_numbers = #tpu.dot_dimension_numbers<[1], [0], [0], [1], [0, 0, 1, 1], [], []>} : vector<1x512xbf16>, vector<512x512xbf16>, vector<1x512xf32> -> vector<1x512xf32>
    %c0_237 = arith.constant 0 : index
    %c0_238 = arith.constant 0 : index
    %379 = vector.load %arg18[%c0_237, %c0_238] : memref<1x512xf32, #tpu.memory_space<vmem>>, vector<1x512xf32>
    %380 = arith.addf %378, %379 : vector<1x512xf32>
    %cst_239 = arith.constant 0.000000e+00 : f32
    %381 = vector.broadcast %cst_239 : f32 to vector<1x512xf32>
    %382 = arith.maximumf %380, %381 : vector<1x512xf32>
    %383 = arith.truncf %382 : vector<1x512xf32> to vector<1x512xbf16>
    %c0_240 = arith.constant 0 : index
    %c0_241 = arith.constant 0 : index
    %384 = vector.load %arg19[%c0_240, %c0_241] : memref<512x1024xbf16, #tpu.memory_space<vmem>>, vector<512x1024xbf16>
    %cst_242 = arith.constant dense<0.000000e+00> : vector<1x1024xf32>
    %385 = tpu.matmul %383, %384, %cst_242 {dimension_numbers = #tpu.dot_dimension_numbers<[1], [0], [0], [1], [0, 0, 1, 1], [], []>} : vector<1x512xbf16>, vector<512x1024xbf16>, vector<1x1024xf32> -> vector<1x1024xf32>
    %c0_243 = arith.constant 0 : index
    %c0_244 = arith.constant 0 : index
    %386 = vector.load %arg20[%c0_243, %c0_244] : memref<1x1024xf32, #tpu.memory_space<vmem>>, vector<1x1024xf32>
    %387 = arith.addf %385, %386 : vector<1x1024xf32>
    %c0_245 = arith.constant 0 : index
    %c0_246 = arith.constant 0 : index
    %c0_247 = arith.constant 0 : index
    %388 = vector.load %arg21[%c0_245, %c0_246, %c0_247] : memref<1x1x1024xf32, #tpu.memory_space<vmem>>, vector<1x1x1024xf32>
    %389 = vector.shape_cast %388 : vector<1x1x1024xf32> to vector<1x1024xf32>
    %390 = vector.shape_cast %387 : vector<1x1024xf32> to vector<1x1x1024xf32>
    tpu.vector_store %arg21[%c0_245, %c0_246, %c0_247], %390 {strides = array<i32>} : memref<1x1x1024xf32, #tpu.memory_space<vmem>>, vector<1x1x1024xf32>,
    return
  }
  func.func @transform_0(%arg0: i32) -> (i32, i32, i32) {
    %c0_i32 = arith.constant 0 : i32
    %c0_i32_0 = arith.constant 0 : i32
    %c0_i32_1 = arith.constant 0 : i32
    return %arg0, %c0_i32, %c0_i32_0 : i32, i32, i32
  }
  func.func @transform_1(%arg0: i32) -> (i32, i32, i32) {
    %c0_i32 = arith.constant 0 : i32
    %c0_i32_0 = arith.constant 0 : i32
    %c0_i32_1 = arith.constant 0 : i32
    %c0_i32_2 = arith.constant 0 : i32
    return %c0_i32, %c0_i32_0, %c0_i32_1 : i32, i32, i32
  }
  func.func @transform_2(%arg0: i32) -> (i32, i32) {
    %c0_i32 = arith.constant 0 : i32
    %c0_i32_0 = arith.constant 0 : i32
    %c0_i32_1 = arith.constant 0 : i32
    return %c0_i32, %c0_i32_0 : i32, i32
  }
  func.func @transform_3(%arg0: i32) -> (i32, i32, i32) {
    %c0_i32 = arith.constant 0 : i32
    %c0_i32_0 = arith.constant 0 : i32
    %c0_i32_1 = arith.constant 0 : i32
    %c0_i32_2 = arith.constant 0 : i32
    return %c0_i32, %c0_i32_0, %c0_i32_1 : i32, i32, i32
  }
  func.func @transform_4(%arg0: i32) -> (i32, i32) {
    %c0_i32 = arith.constant 0 : i32
    %c0_i32_0 = arith.constant 0 : i32
    %c0_i32_1 = arith.constant 0 : i32
    return %c0_i32, %c0_i32_0 : i32, i32
  }
  func.func @transform_5(%arg0: i32) -> (i32, i32, i32) {
    %c0_i32 = arith.constant 0 : i32
    %c0_i32_0 = arith.constant 0 : i32
    %c0_i32_1 = arith.constant 0 : i32
    %c0_i32_2 = arith.constant 0 : i32
    return %c0_i32, %c0_i32_0, %c0_i32_1 : i32, i32, i32
  }
  func.func @transform_6(%arg0: i32) -> (i32, i32) {
    %c0_i32 = arith.constant 0 : i32
    %c0_i32_0 = arith.constant 0 : i32
    %c0_i32_1 = arith.constant 0 : i32
    return %c0_i32, %c0_i32_0 : i32, i32
  }
  func.func @transform_7(%arg0: i32) -> (i32, i32, i32) {
    %c0_i32 = arith.constant 0 : i32
    %c0_i32_0 = arith.constant 0 : i32
    %c0_i32_1 = arith.constant 0 : i32
    %c0_i32_2 = arith.constant 0 : i32
    return %c0_i32, %c0_i32_0, %c0_i32_1 : i32, i32, i32
  }
  func.func @transform_8(%arg0: i32) -> (i32, i32) {
    %c0_i32 = arith.constant 0 : i32
    %c0_i32_0 = arith.constant 0 : i32
    %c0_i32_1 = arith.constant 0 : i32
    return %c0_i32, %c0_i32_0 : i32, i32
  }
  func.func @transform_9(%arg0: i32) -> (i32, i32, i32) {
    %c0_i32 = arith.constant 0 : i32
    %c0_i32_0 = arith.constant 0 : i32
    %c0_i32_1 = arith.constant 0 : i32
    %c0_i32_2 = arith.constant 0 : i32
    return %c0_i32, %c0_i32_0, %c0_i32_1 : i32, i32, i32
  }
  func.func @transform_10(%arg0: i32) -> (i32, i32) {
    %c0_i32 = arith.constant 0 : i32
    %c0_i32_0 = arith.constant 0 : i32
    %c0_i32_1 = arith.constant 0 : i32
    return %c0_i32, %c0_i32_0 : i32, i32
  }
  func.func @transform_11(%arg0: i32) -> (i32, i32) {
    %c0_i32 = arith.constant 0 : i32
    %c0_i32_0 = arith.constant 0 : i32
    %c0_i32_1 = arith.constant 0 : i32
    return %c0_i32, %c0_i32_0 : i32, i32
  }
  func.func @transform_12(%arg0: i32) -> (i32, i32) {
    %c0_i32 = arith.constant 0 : i32
    %c0_i32_0 = arith.constant 0 : i32
    %c0_i32_1 = arith.constant 0 : i32
    return %c0_i32, %c0_i32_0 : i32, i32
  }
  func.func @transform_13(%arg0: i32) -> (i32, i32) {
    %c0_i32 = arith.constant 0 : i32
    %c0_i32_0 = arith.constant 0 : i32
    %c0_i32_1 = arith.constant 0 : i32
    return %c0_i32, %c0_i32_0 : i32, i32
  }
  func.func @transform_14(%arg0: i32) -> (i32, i32) {
    %c0_i32 = arith.constant 0 : i32
    %c0_i32_0 = arith.constant 0 : i32
    %c0_i32_1 = arith.constant 0 : i32
    return %c0_i32, %c0_i32_0 : i32, i32
  }
  func.func @transform_15(%arg0: i32) -> (i32, i32) {
    %c0_i32 = arith.constant 0 : i32
    %c0_i32_0 = arith.constant 0 : i32
    %c0_i32_1 = arith.constant 0 : i32
    return %c0_i32, %c0_i32_0 : i32, i32
  }
  func.func @transform_16(%arg0: i32) -> (i32, i32) {
    %c0_i32 = arith.constant 0 : i32
    %c0_i32_0 = arith.constant 0 : i32
    %c0_i32_1 = arith.constant 0 : i32
    return %c0_i32, %c0_i32_0 : i32, i32
  }
  func.func @transform_17(%arg0: i32) -> (i32, i32) {
    %c0_i32 = arith.constant 0 : i32
    %c0_i32_0 = arith.constant 0 : i32
    %c0_i32_1 = arith.constant 0 : i32
    return %c0_i32, %c0_i32_0 : i32, i32
  }
  func.func @transform_18(%arg0: i32) -> (i32, i32) {
    %c0_i32 = arith.constant 0 : i32
    %c0_i32_0 = arith.constant 0 : i32
    %c0_i32_1 = arith.constant 0 : i32
    return %c0_i32, %c0_i32_0 : i32, i32
  }
  func.func @transform_19(%arg0: i32) -> (i32, i32) {
    %c0_i32 = arith.constant 0 : i32
    %c0_i32_0 = arith.constant 0 : i32
    %c0_i32_1 = arith.constant 0 : i32
    return %c0_i32, %c0_i32_0 : i32, i32
  }
  func.func @transform_20(%arg0: i32) -> (i32, i32, i32) {
    %c0_i32 = arith.constant 0 : i32
    %c0_i32_0 = arith.constant 0 : i32
    %c0_i32_1 = arith.constant 0 : i32
    return %arg0, %c0_i32, %c0_i32_0 : i32, i32, i32
  }
}

</mosaic_0001>

<bundles_post_ra>
// kernel: alexnet_forward.1
= control target key start
LH: loop header
LB: loop body
LE: loop exit
PB: predicated region body
PF: predicated region fallthrough
CT: control target
= control target key end

     0   :  { %s25935_s0 = inlined_call_operand.vmem [shape: bf16[2,324,128], index: 0, kind: input, shape index: {}]   ;;  %s25936_s1 = inlined_call_operand.vmem [shape: bf16[4,128,128], index: 1, kind: input, shape index: {}]   ;;  %s25937_s2 = inlined_call_operand.vmem [shape: f32[1,128], index: 2, kind: input, shape index: {}]   ;;  %s25938_s3 = inlined_call_operand.vmem [shape: bf16[25,128,128], index: 3, kind: input, shape index: {}]   ;;  %s25939_s4 = inlined_call_operand.hbm [shape: f32[1,128], index: 4, kind: input, shape index: {}]   ;;  %s25940_s5 = inlined_call_operand.vmem [shape: bf16[9,128,128], index: 5, kind: input, shape index: {}]   ;;  %s25941_s6 = inlined_call_operand.hbm [shape: f32[1,128], index: 6, kind: input, shape index: {}]   ;;  %s25942_s7 = inlined_call_operand.vmem [shape: bf16[9,128,128], index: 7, kind: input, shape index: {}]   ;;  %s25943_s8 = inlined_call_operand.hbm [shape: f32[1,128], index: 8, kind: input, shape index: {}]   ;;  %s25944_s9 = inlined_call_operand.vmem [shape: bf16[9,128,128], index: 9, kind: input, shape index: {}]   ;;  %s25945_s10 = inlined_call_operand.hbm [shape: f32[1,128], index: 10, kind: input, shape index: {}]   ;;  %s25946_s11 = inlined_call_operand.hbm [shape: bf16[144,267], index: 11, kind: input, shape index: {}]   ;;  %s25947_s12 = inlined_call_operand.vmem [shape: bf16[25,66], index: 12, kind: input, shape index: {}]   ;;  %s25948_s13 = inlined_call_operand.vmem [shape: bf16[25,13], index: 13, kind: input, shape index: {}]   ;;  %s25949_s14 = inlined_call_operand.hbm [shape: bf16[128,512], index: 14, kind: input, shape index: {}]   ;;  %s25950_s15 = inlined_call_operand.vmem [shape: f32[1,512], index: 15, kind: input, shape index: {}]   ;;  %s25951_s16 = inlined_call_operand.vmem [shape: bf16[512,512], index: 16, kind: input, shape index: {}]   ;;  %s25952_s17 = inlined_call_operand.hbm [shape: f32[1,512], index: 17, kind: input, shape index: {}]   ;;  %s25953_s18 = inlined_call_operand.vmem [shape: bf16[512,1024], index: 18, kind: input, shape index: {}]   ;;  %s25954_s19 = inlined_call_operand.vmem [shape: f32[1,1024], index: 19, kind: input, shape index: {}]   ;;  %s25955_s20 = inlined_call_operand.vmem [shape: f32[2,1,1024], index: 20, kind: output, shape index: {}]  }
   0x1   :  { %25995 = sst [smem:[#allocation36_spill]] %s25935_s0 }
   0x2   :  { %25996 = sst [smem:[#allocation37_spill]] %s25936_s1 }
   0x3   :  { %25997 = sst [smem:[#allocation38_spill]] %s25937_s2 }
   0x4   :  { %25998 = sst [smem:[#allocation39_spill]] %s25938_s3 }
   0x5   :  { %25999 = sst [smem:[#allocation40_spill]] %s25939_s4 }
   0x6   :  { %26000 = sst [smem:[#allocation41_spill]] %s25941_s6 }
   0x7   :  { %26001 = sst [smem:[#allocation42_spill]] %s25954_s19 }
   0x8   :  { %26002 = sst [smem:[#allocation43_spill]] %s25955_s20 }
   0x9   :  { %25 = vsyncpa [#allocation3], 0 }
   0xa   :  { %26 = vsyncpa [#allocation5], 0 }
   0xb   :  { %27 = vsyncpa [#allocation8], 0 }
   0xc   :  { %28 = vsyncpa [#allocation11], 0  ;;  %s20581_s1 = smov 0  }
   0xd LB: > { %26003 = sst [smem:[#allocation17_spill]] %s20458_s1  ;;  %s20460_s22 = smov [#allocation4]   ;;  %s20458_s1 = sphi %s20581_s1, %s34_s1  }
   0xe   : > { %s526_s23 = sshll.u32 %s20460_s22, 4  ;;  %s20587_s24 = sadd.s32 4294967295, %s20458_s1   ;;  %s20592_s23 = int_to_ptr.vmem [resolvable:$true] %s526_s23 }
   0xf   : > { %p14868_p0 = scmp.ge.s32.totalorder %s20458_s1, 1  ;;  %p490_p1 = scmp.lt.s32.totalorder %s20458_s1, 3 }
  0x10   : > { %p25960_p2 = scmp.eq.s32.totalorder %s20587_s24, 0  ;;  %s20461_s25 = smov [#allocation7]  }
  0x11   : > { %p20594_p3 = pnand %p14868_p0, %p490_p1  ;;  %s554_s3 = sshll.u32 %s20461_s25, 4  ;;  %s20600_s3 = int_to_ptr.vmem [resolvable:$true] %s554_s3 }
  0x12   : > { %s20462_s26 = smov [#allocation10]   ;;  %s20463_s4 = smov [#allocation2]  }
  0x13   : > { %s26004_s2 = scalar_select %p20594_p3, 1, 0 }
  0x14   : > { %p19430_p4 = pneg %p20594_p3  ;;  %s583_s27 = sshll.u32 %s20462_s26, 4  ;;  %s20608_s27 = int_to_ptr.vmem [resolvable:$true] %s583_s27 }
  0x15   : > { %s20610_s29 = sshll.u32 %s20463_s4, 4  ;;  %s26006_s6 = sld [smem:[#allocation41_spill]]  ;;  %s513_s29 = int_to_ptr.vmem [resolvable:$true] %s20610_s29 }
  0x16   : > { %p20604_p5 = pnand %p25960_p2, %p19430_p4 }
  0x18   : > { %p20620_p7 = pneg %p20604_p5 }
  0x1b   : > { %s20240_s21 = scalar_lea.hbm %s26006_s6, 16 }
  0x1c   : > { %p20241_p6 = scmp.ne.s32.totalorder %s26006_s6, %s20240_s21  ;;  %p20247_p10 = scmp.lt.u32.totalorder %s20240_s21, %s26006_s6 }
  0x1e   : > { %p20243_p8 = pnand %p20620_p7, %p20241_p6 }
  0x20   : > { %p20244_p9 = pneg %p20243_p8 }
  0x22   : > { %p20249_p11 = pnand %p20247_p10, %p20244_p9 }
  0x24   : > { %20252 = shalt.err (!%p20249_p11)
}
  0x25   : > { %s20253_s30 = scalar_lea.vmem %s20592_s23, 16  ;;  %s20260_s0 = scalar_lea.vmem %s20592_s23, 32 }
  0x26   : > { %p20254_p12 = scmp.ne.s32.totalorder %s20592_s23, %s20253_s30  ;;  %p20261_p1 = scmp.lt.s32.totalorder %s20592_s23, %s20592_s23 }
  0x27   : > { %p20262_p4 = scmp.lt.s32.totalorder %s20260_s0, %s20253_s30 }
  0x28   : > { %p20256_p13 = pnand %p20254_p12, %p20620_p7 }
  0x29   : > { %p20263_p6 = por %p20262_p4, %p20261_p1 }
  0x2a   : > { %p20257_p0 = pneg %p20256_p13 }
  0x2c   : > { %p20264_p8 = pnand %p20263_p6, %p20257_p0 }
  0x2e   : > { %20267 = shalt.err (!%p20264_p8)
}
  0x2f   : > { %19436 = dma.hbm_to_vmem [thread:$0]  (!%p20604_p5), %s26006_s6, 16, %s20592_s23, [#allocation5]  }
  0x30   : > { %s20268_s4 = scalar_lea.hbm %s25945_s10, 16 }
  0x31   : > { %p20269_p9 = scmp.ne.s32.totalorder %s25945_s10, %s20268_s4  ;;  %p20275_p12 = scmp.lt.u32.totalorder %s20268_s4, %s25945_s10 }
  0x33   : > { %p20271_p10 = pnand %p20269_p9, %p20620_p7 }
  0x35   : > { %p20272_p11 = pneg %p20271_p10 }
  0x37   : > { %p20277_p13 = pnand %p20275_p12, %p20272_p11 }
  0x39   : > { %20280 = shalt.err (!%p20277_p13)
}
  0x3a   : > { %s20281_s23 = scalar_lea.vmem %s20600_s3, 16  ;;  %s20288_s19 = scalar_lea.vmem %s20600_s3, 32 }
  0x3b   : > { %p20282_p0 = scmp.ne.s32.totalorder %s20600_s3, %s20281_s23  ;;  %p20289_p6 = scmp.lt.s32.totalorder %s20600_s3, %s20600_s3 }
  0x3c   : > { %p20290_p8 = scmp.lt.s32.totalorder %s20288_s19, %s20281_s23 }
  0x3d   : > { %p20284_p1 = pnand %p20282_p0, %p20620_p7 }
  0x3e   : > { %p20291_p9 = por %p20290_p8, %p20289_p6 }
  0x3f   : > { %p20285_p4 = pneg %p20284_p1 }
  0x41   : > { %p20292_p10 = pnand %p20291_p9, %p20285_p4 }
  0x43   : > { %20295 = shalt.err (!%p20292_p10)
}
  0x44   : > { %19442 = dma.hbm_to_vmem [thread:$0]  (!%p20604_p5), %s25945_s10, 16, %s20600_s3, [#allocation8]  }
  0x45   : > { %s20296_s25 = scalar_lea.hbm %s25949_s14, 4096 }
  0x46   : > { %p20297_p11 = scmp.ne.s32.totalorder %s25949_s14, %s20296_s25  ;;  %p20303_p0 = scmp.lt.u32.totalorder %s20296_s25, %s25949_s14 }
  0x48   : > { %p20299_p12 = pnand %p20297_p11, %p20620_p7 }
  0x4a   : > { %p20300_p13 = pneg %p20299_p12 }
  0x4c   : > { %p20305_p1 = pnand %p20303_p0, %p20300_p13 }
  0x4e   : > { %20308 = shalt.err (!%p20305_p1)
}
  0x4f   : > { %s20309_s3 = scalar_lea.vmem %s20608_s27, 4096  ;;  %p20317_p9 = scmp.lt.s32.totalorder %s20608_s27, %s20608_s27 }
  0x50   : > { %p20310_p4 = scmp.ne.s32.totalorder %s20608_s27, %s20309_s3  ;;  %p20318_p10 = scmp.lt.s32.totalorder %s20309_s3, %s20309_s3 }
  0x52   : > { %p20312_p6 = pnand %p20310_p4, %p20620_p7  ;;  %p20319_p11 = por %p20318_p10, %p20317_p9 }
  0x54   : > { %p20313_p8 = pneg %p20312_p6 }
  0x56   : > { %p20320_p12 = pnand %p20319_p11, %p20313_p8 }
  0x58   : > { %20323 = shalt.err (!%p20320_p12)
}
  0x59   : > { %s20464_s19 = smov 256   ;;  %s20465_s20 = smov 16  }
  0x5a   : > { %19448 = dma.hbm_to_vmem [thread:$0]  (!%p20604_p5), %s25949_s14, 4096, %s20608_s27, [#allocation11], %s20464_s19, %s20464_s19, %s20465_s20  }
  0x5b   : > { %s26008_s4 = sld [smem:[#allocation40_spill]] }
  0x61   : > { %s20324_s30 = scalar_lea.hbm %s26008_s4, 16 }
  0x62   : > { %p20325_p13 = scmp.ne.s32.totalorder %s26008_s4, %s20324_s30  ;;  %p20331_p4 = scmp.lt.u32.totalorder %s20324_s30, %s26008_s4 }
  0x64   : > { %p20327_p0 = pnand %p20325_p13, %p20620_p7 }
  0x66   : > { %p20328_p1 = pneg %p20327_p0 }
  0x68   : > { %p20333_p6 = pnand %p20331_p4, %p20328_p1 }
  0x6a   : > { %20336 = shalt.err (!%p20333_p6)
}
  0x6b   : > { %s20337_s1 = scalar_lea.vmem %s513_s29, 16  ;;  %s20344_s27 = scalar_lea.vmem %s513_s29, 32 }
  0x6c   : > { %p20338_p8 = scmp.ne.s32.totalorder %s513_s29, %s20337_s1  ;;  %p20345_p11 = scmp.lt.s32.totalorder %s513_s29, %s513_s29 }
  0x6d   : > { %p20346_p12 = scmp.lt.s32.totalorder %s20344_s27, %s20337_s1 }
  0x6e   : > { %p20340_p9 = pnand %p20338_p8, %p20620_p7 }
  0x6f   : > { %p20347_p2 = por %p20346_p12, %p20345_p11 }
  0x70   : > { %p20341_p10 = pneg %p20340_p9 }
  0x72   : > { %p20348_p3 = pnand %p20347_p2, %p20341_p10 }
  0x74   : > { %20351 = shalt.err (!%p20348_p3)
}
  0x75   : > { %19433 = dma.hbm_to_vmem [thread:$0]  (!%p20604_p5), %s26008_s4, 16, %s513_s29, [#allocation3]  }
  0x76   : > { %s20466_s6 = smov [#allocation6]   ;;  %s20467_s22 = smov [#allocation9]  }
  0x77   : > { %s540_s21 = sshll.u32 %s20466_s6, 4  ;;  %s564_s25 = sshll.u32 %s20467_s22, 4  ;;  %s541_s21 = int_to_ptr.vmem [resolvable:$true] %s540_s21  ;;  %s565_s25 = int_to_ptr.vmem [resolvable:$true] %s564_s25 }
  0x78   : > { %s20352_s23 = scalar_lea.hbm %s25943_s8, 16 }
  0x79   : > { %p20353_p2 = scmp.ne.s32.totalorder %s25943_s8, %s20352_s23  ;;  %p20359_p0 = scmp.lt.u32.totalorder %s20352_s23, %s25943_s8 }
  0x7b   : > { %p20355_p3 = pnand %p20353_p2, %p20620_p7 }
  0x7d   : > { %p20356_p13 = pneg %p20355_p3 }
  0x7f   : > { %p20361_p1 = pnand %p20359_p0, %p20356_p13 }
  0x81   : > { %20364 = shalt.err (!%p20361_p1)
}
  0x82   : > { %s20365_s29 = scalar_lea.vmem %s541_s21, 16  ;;  %s20372_s20 = scalar_lea.vmem %s541_s21, 32 }
  0x83   : > { %p20366_p4 = scmp.ne.s32.totalorder %s541_s21, %s20365_s29  ;;  %p20373_p9 = scmp.lt.s32.totalorder %s541_s21, %s541_s21 }
  0x84   : > { %p20374_p10 = scmp.lt.s32.totalorder %s20372_s20, %s20365_s29 }
  0x85   : > { %p20368_p6 = pnand %p20366_p4, %p20620_p7 }
  0x86   : > { %p20375_p11 = por %p20374_p10, %p20373_p9 }
  0x87   : > { %p20369_p8 = pneg %p20368_p6 }
  0x89   : > { %p20376_p12 = pnand %p20375_p11, %p20369_p8 }
  0x8b   : > { %20379 = shalt.err (!%p20376_p12)
}
  0x8c   : > { %19439 = dma.hbm_to_vmem [thread:$0]  (!%p20604_p5), %s25943_s8, 16, %s541_s21, [#allocation5]  }
  0x8d   : > { %s20380_s23 = scalar_lea.hbm %s25946_s11, 3456 }
  0x8e   : > { %p20381_p2 = scmp.ne.s32.totalorder %s25946_s11, %s20380_s23  ;;  %p20387_p0 = scmp.lt.u32.totalorder %s20380_s23, %s25946_s11 }
  0x90   : > { %p20383_p3 = pnand %p20381_p2, %p20620_p7 }
  0x92   : > { %p20384_p13 = pneg %p20383_p3 }
  0x94   : > { %p20389_p1 = pnand %p20387_p0, %p20384_p13 }
  0x96   : > { %20392 = shalt.err (!%p20389_p1)
}
  0x97   : > { %s20393_s29 = scalar_lea.vmem %s565_s25, 3456  ;;  %p20401_p9 = scmp.lt.s32.totalorder %s565_s25, %s565_s25 }
  0x98   : > { %p20394_p4 = scmp.ne.s32.totalorder %s565_s25, %s20393_s29  ;;  %p20402_p10 = scmp.lt.s32.totalorder %s20393_s29, %s20393_s29 }
  0x9a   : > { %p20396_p6 = pnand %p20394_p4, %p20620_p7  ;;  %p20403_p11 = por %p20402_p10, %p20401_p9 }
  0x9c   : > { %p20397_p8 = pneg %p20396_p6 }
  0x9e   : > { %p20404_p12 = pnand %p20403_p11, %p20397_p8 }
  0xa0   : > { %20407 = shalt.err (!%p20404_p12)
}
  0xa1   : > { %s20468_s21 = smov 192   ;;  %s20469_s20 = smov 12  }
  0xa2   : > { %19445 = dma.hbm_to_vmem [thread:$0]  (!%p20604_p5), %s25946_s11, 3456, %s565_s25, [#allocation8], %s20468_s21, %s20468_s21, %s20469_s20  }
  0xa3   : > { %s20470_s30 = smov [#allocation12]   ;;  %s20408_s1 = scalar_lea.hbm %s25952_s17, 64 }
  0xa4   : > { %s603_s0 = sshll.u32 %s20470_s30, 4  ;;  %p20409_p2 = scmp.ne.s32.totalorder %s25952_s17, %s20408_s1  ;;  %s604_s0 = int_to_ptr.vmem [resolvable:$true] %s603_s0 }
  0xa5   : > { %p20415_p0 = scmp.lt.u32.totalorder %s20408_s1, %s25952_s17 }
  0xa6   : > { %p20411_p3 = pnand %p20409_p2, %p20620_p7 }
  0xa8   : > { %p20412_p13 = pneg %p20411_p3 }
  0xaa   : > { %p20417_p1 = pnand %p20415_p0, %p20412_p13 }
  0xac   : > { %20420 = shalt.err (!%p20417_p1)
}
  0xad   : > { %s20421_s25 = scalar_lea.vmem %s604_s0, 64  ;;  %p20429_p9 = scmp.lt.s32.totalorder %s604_s0, %s604_s0 }
  0xae   : > { %p20422_p4 = scmp.ne.s32.totalorder %s604_s0, %s20421_s25  ;;  %p20430_p10 = scmp.lt.s32.totalorder %s20421_s25, %s20421_s25 }
  0xb0   : > { %p20424_p6 = pnand %p20422_p4, %p20620_p7  ;;  %p20431_p11 = por %p20430_p10, %p20429_p9 }
  0xb2   : > { %p20425_p8 = pneg %p20424_p6 }
  0xb4   : > { %p20432_p12 = pnand %p20431_p11, %p20425_p8 }
  0xb6   : > { %20435 = shalt.err (!%p20432_p12)
}
  0xb7   : > { %19451 = dma.hbm_to_vmem [thread:$0]  (!%p20604_p5), %s25952_s17, 64, %s604_s0, [#allocation11]  }
  0xb8   : > { %p26009_p2 = scmp.ne.s32.totalorder %s26004_s2, 0 }
  0xba   : > { %630 = sbr.rel (%p26009_p2) target bundleno = 5147 (0x141b), region = 100 }
  0xc1   : > { %p26010_p3 = scmp.eq.s32.totalorder %s20587_s24, 0 }
  0xc3   : > { %20441 = dma.done.wait (%p26010_p3), [#allocation3], 16   ;;  %p26011_p7 = pmov %p26010_p3 }
  0xc4   : > { %p26012_p13 = pmov %p26010_p3 }
  0xc5   : > { %20443 = vsyncadd (%p26011_p7), [#allocation3], 4294967280 }
  0xc6   : > { %20445 = dma.done.wait (%p26012_p13), [#allocation5], 32   ;;  %p26013_p0 = pmov %p26010_p3 }
  0xc8   : > { %20447 = vsyncadd (%p26013_p0), [#allocation5], 4294967264  ;;  %p26014_p1 = pmov %p26013_p0 }
  0xc9   : > { %p26015_p5 = pmov %p26013_p0 }
  0xca   : > { %20449 = dma.done.wait (%p26014_p1), [#allocation8], 3472  }
  0xcb   : > { %20451 = vsyncadd (%p26015_p5), [#allocation8], 4294963824  ;;  %p26016_p4 = pmov %p26013_p0 }
  0xcc   : > { %p26017_p6 = pmov %p26013_p0 }
  0xcd   : > { %20453 = dma.done.wait (%p26016_p4), [#allocation11], 4160  }
  0xce   : > { %20455 = vsyncadd (%p26017_p6), [#allocation11], 4294963136  ;;  %p711_p8 = scmp.lt.s32.totalorder %s20587_s24, 1  ;;  %s26018_s26 = sld [smem:[#allocation37_spill]]  ;;  %vm893_vm0 = vsmask.f32 7424 }
  0xcf   : > { %s26019_s1 = sld [smem:[#allocation36_spill]]  ;;  %vm1595_vm1 = vcmask 1046528   ;;  %vm1951_vm2 = vsmask.f32 6400  ;;  %vm2826_vm3 = vcmask 1045504   ;;  %vm3024_vm4 = vcmask 1044480  }
  0xd0   : > { %s26129_s24 = smov (!%p711_p8, %s20587_s24), 1  ;;  %vm2916_vm5 = vsmask.f32 5376  ;;  %vm20472_vm6 = vmmov 0   ;;  %vm3265_vm7 = vcmask 89088   ;;  %s26084_s29 = sld [smem:[#allocation39_spill]] }
  0xd1   : > { %s19401_s22 = smul.u32 164, %s26129_s24  ;;  %vm4602_vm8 = vsmask.f32 1280  ;;  %vm4977_vm9 = vsmask.f32 256  ;;  %vm4424_vm13 = vcmask 1041408  }
  0xd2   : > { %vm5498_vm10 = vsmask.f32 3328  ;;  %vm5873_vm11 = vsmask.f32 2304  ;;  %vm6761_vm12 = vsmask.f32 4352 }
  0xd3   : > { %vm4799_vm14 = vcmask 1040384   ;;  %vm5320_vm15 = vcmask 1043456   ;;  %s26125_s4 = sld [smem:[#allocation42_spill]]  ;;  %s14886_s6 = sshll.u32 %s26129_s24, 3 }
  0xd4   : > { %v19490_v0 = vld [vmem:[%s26018_s26 + $0x40] sm:$0xff]   ;;  %v19491_v1 = vld [vmem:[%s26018_s26 + $0x48] sm:$0xff]   ;;  %v19492_v2 = vld [vmem:[%s26018_s26 + $0x50] sm:$0xff]   ;;  %s26126_s0 = sld [smem:[#allocation43_spill]] }
  0xd5   : > { %17440 = vmatprep.subr.bf16.mxu0 %v19490_v0  ;;  %s20797_s27 = scalar_lea.vmem %s26019_s1, %s19401_s22  ;;  %v19493_v3 = vld [vmem:[%s26018_s26 + $0x58] sm:$0xff]   ;;  %v19494_v9 = vld [vmem:[%s26018_s26 + $0x60] sm:$0xff]   ;;  %v19495_v13 = vld [vmem:[%s26018_s26 + $0x68] sm:$0xff]  }
  0xd6   : > { %17441 = vmatpush3.bf16.msra.mxu0 %v19490_v0  ;;  %v20803_v4 = vld [vmem:[%s20797_s27] sm:$0xff]   ;;  %v20806_v5 = vld [vmem:[%s20797_s27 + $0x8] sm:$0xff]   ;;  %v20821_v15 = vld [vmem:[%s20797_s27 + $0x10] sm:$0xff]  }
  0xd7   : > { %17442 = vmatprep.subr.bf16.mxu0 %v19491_v1  ;;  %v895_v6 = vshrl.u32 %v20803_v4, 16  ;;  %v897_v7 = vshll.u32 %v20803_v4, 16  ;;  %v902_v8 = vshll.u32 %v20806_v5, 16  ;;  %v19496_v16 = vld [vmem:[%s26018_s26 + $0x70] sm:$0xff]   ;;  %v20827_v17 = vld [vmem:[%s20797_s27 + $0x18] sm:$0xff]   ;;  %v910_v18 = vshll.u32 %v20821_v15, 16 }
  0xd8   : > { %v19497_v19 = vld [vmem:[%s26018_s26 + $0x78] sm:$0xff]   ;;  %v906_v20 = vshrl.u32 %v20806_v5, 16  ;;  %v914_v21 = vshrl.u32 %v20821_v15, 16  ;;  %v918_v22 = vshll.u32 %v20827_v17, 16  ;;  %v20839_v24 = vld [vmem:[%s20797_s27 + $0x20] sm:$0xff]   ;;  %v20849_v29 = vld [vmem:[%s20797_s27 + $0x28] sm:$0xff]  }
  0xd9   : > { %v899_v10 = vrot.slane %v897_v7, 1  ;;  %v904_v11 = vrot.slane %v902_v8, 1  ;;  %v912_v23 = vrot.slane %v910_v18, 1  ;;  %v19501_v26 = vld [vmem:[%s26018_s26] sm:$0xff]   ;;  %v926_v30 = vshll.u32 %v20839_v24, 16  ;;  %v20853_v31 = vld [vmem:[%s20797_s27 + $0x30] sm:$0xff]  }
  0xda   : > { %17443 = vmatpush3.bf16.msra.mxu0 %v19491_v1  ;;  %v920_v28 = vrot.slane %v918_v22, 1  ;;  %v922_v33 = vshrl.u32 %v20827_v17, 16  ;;  %v20858_v34 = vld [vmem:[%s20797_s27 + $0x38] sm:$0xff]   ;;  %v19504_v36 = vld [vmem:[%s26018_s26 + $0x8] sm:$0xff]   ;;  %v930_v37 = vshrl.u32 %v20839_v24, 16  ;;  %v934_v38 = vshll.u32 %v20849_v29, 16  ;;  %s719_s23 = scalar_lea.vmem %s26126_s0, %s14886_s6 }
  0xdb   : > { %17444 = vmatprep.subr.bf16.mxu0 %v19492_v2  ;;  %v900_v12 = vor.u32 %v899_v10, %v895_v6  ;;  %v908_v25 = vor.u32 %v906_v20, %v904_v11  ;;  %v916_v27 = vor.u32 %v914_v21, %v912_v23  ;;  %v928_v39 = vrot.slane %v926_v30, 1  ;;  %v20869_v40 = vld [vmem:[%s20797_s27 + $0x40] sm:$0xff]   ;;  %v19509_v46 = vld [vmem:[%s26018_s26 + $0x10] sm:$0xff]   ;;  %v20881_v47 = vld [vmem:[%s20797_s27 + $0x48] sm:$0xff]  }
  0xdc   : > { %v924_v41 = vor.u32 %v922_v33, %v920_v28  ;;  %v942_v42 = vshll.u32 %v20853_v31, 16  ;;  %v950_v43 = vshll.u32 %v20858_v34, 16  ;;  %v936_v45 = vrot.slane %v934_v38, 1  ;;  %v19512_v58 = vld [vmem:[%s26018_s26 + $0x18] sm:$0xff]   ;;  %v20902_v60 = vld [vmem:[%s20797_s27 + $0x50] sm:$0xff]   ;;  %v20911_v0 = vld [vmem:[%s20797_s27 + $0x60] sm:$0xff]  }
  0xdd   : > { %v905_v14 = vsel %vm893_vm0, %v900_v12, %v904_v11  ;;  %v913_v32 = vsel %vm893_vm0, %v908_v25, %v912_v23  ;;  %v921_v35 = vsel %vm893_vm0, %v916_v27, %v920_v28  ;;  %v932_v44 = vor.u32 %v930_v37, %v928_v39  ;;  %v20908_v63 = vld [vmem:[%s20797_s27 + $0x58] sm:$0xff]   ;;  %v19515_v6 = vld [vmem:[%s26018_s26 + $0x20] sm:$0xff]   ;;  %v20926_v11 = vld [vmem:[%s20797_s27 + $0x68] sm:$0xff]  }
  0xde   : > { %17445 = vmatpush3.bf16.msra.mxu0 %v19492_v2  ;;  %17456 = vmatprep.mubr.bf16.mxu0 %v905_v14  ;;  %v20883_v48 = vrot.slane %v918_v22, 2  ;;  %v20885_v49 = vrot.slane %v922_v33, 1  ;;  %v938_v50 = vshrl.u32 %v20849_v29, 16  ;;  %v958_v51 = vshll.u32 %v20869_v40, 16  ;;  %v19518_v14 = vld [vmem:[%s26018_s26 + $0x28] sm:$0xff]   ;;  %v20938_v22 = vld [vmem:[%s20797_s27 + $0x78] sm:$0xff]  }
  0xdf   : > { %17446 = vmatprep.subr.bf16.mxu0 %v19493_v3  ;;  %v929_v52 = vsel %vm893_vm0, %v924_v41, %v928_v39  ;;  %v944_v53 = vrot.slane %v942_v42, 1  ;;  %v946_v54 = vshrl.u32 %v20853_v31, 16  ;;  %v954_v55 = vshrl.u32 %v20858_v34, 16  ;;  %v20942_v25 = vld [vmem:[%s20797_s27 + $0x80] sm:$0xff]   ;;  %v20953_v33 = vld [vmem:[%s20797_s27 + $0x88] sm:$0xff]  }
  0xe0   : > { %v937_v56 = vsel %vm893_vm0, %v932_v44, %v936_v45  ;;  %v952_v57 = vrot.slane %v950_v43, 1  ;;  %v966_v59 = vshll.u32 %v20881_v47, 16  ;;  %v960_v61 = vrot.slane %v958_v51, 1 }
  0xe1   : > { %v962_v62 = vshrl.u32 %v20869_v40, 16  ;;  %v940_v1 = vor.u32 %v938_v50, %v936_v45  ;;  %v948_v2 = vor.u32 %v946_v54, %v944_v53  ;;  %v25968_v10 = vshll.u32 %v20908_v63, 16 }
  0xe2   : > { %17447 = vmatpush3.bf16.msra.mxu0 %v19493_v3  ;;  %v970_v3 = vshrl.u32 %v20881_v47, 16  ;;  %v968_v7 = vrot.slane %v966_v59, 1  ;;  %v25965_v23 = vshll.u32 %v20926_v11, 16  ;;  %v956_v27 = vor.u32 %v954_v55, %v952_v57 }
  0xe3   : > { %17448 = vmatprep.subr.bf16.mxu0 %v19494_v9  ;;  %v945_v12 = vsel %vm893_vm0, %v940_v1, %v944_v53  ;;  %v964_v28 = vor.u32 %v962_v62, %v960_v61  ;;  %v978_v41 = vshrl.u32 %v20902_v60, 16  ;;  %v25964_v44 = vshll.u32 %v20938_v22, 16 }
  0xe4   : > { %v25966_v53 = vshll.u32 %v20942_v25, 16 }
  0xe5   : > { %v969_v45 = vsel %vm893_vm0, %v964_v28, %v968_v7 }
  0xe6   : > { %17449 = vmatpush3.bf16.msra.mxu0 %v19494_v9  ;;  %v974_v9 = vshll.u32 %v20902_v60, 16 }
  0xe7   : > { %17450 = vmatprep.subr.bf16.mxu0 %v19495_v13 }
  0xe8   : > { %v976_v39 = vrot.slane %v974_v9, 1 }
  0xea   : > { %17451 = vmatpush3.bf16.msra.mxu0 %v19495_v13  ;;  %v25967_v13 = vshll.u32 %v20911_v0, 16  ;;  %v980_v28 = vor.u32 %v978_v41, %v976_v39 }
  0xeb   : > { %17452 = vmatprep.subr.bf16.mxu0 %v19496_v16 }
  0xee   : > { %17453 = vmatpush3.bf16.msra.mxu0 %v19496_v16  ;;  %v953_v16 = vsel %vm893_vm0, %v948_v2, %v952_v57  ;;  %v992_v57 = vrot.slane %v25967_v13, 1 }
  0xef   : > { %17454 = vmatprep.subr.bf16.mxu0 %v19497_v19 }
  0xf2   : > { %17455 = vmatpush3.bf16.msra.mxu0 %v19497_v19  ;;  %v20935_v19 = vld [vmem:[%s20797_s27 + $0x70] sm:$0xff]  }
  0xf3   : > { %17496 = vmatprep.subr.bf16.mxu0 %v19501_v26  ;;  %v1010_v2 = vshrl.u32 %v20935_v19, 16 }
  0xf5   : > { %17457 = vmatmul.mubr.bf16.vlgmr.msra.gmra.mrb[0].mxu0 %v913_v32  ;;  %v25963_v32 = vshll.u32 %v20935_v19, 16 }
  0xf6   : > { %17497 = vmatpush3.bf16.msra.mxu0 %v19501_v26  ;;  %17460 = vmatprep.mubr.bf16.mxu0 %v921_v35  ;;  %v19523_v26 = vld [vmem:[%s26018_s26 + $0x30] sm:$0xff]   ;;  %v19525_v35 = vld [vmem:[%s26018_s26 + $0x38] sm:$0xff]  }
  0xf7   : > { %17498 = vmatprep.subr.bf16.mxu0 %v19504_v36  ;;  %v1008_v1 = vrot.slane %v25963_v32, 1  ;;  %v1034_v32 = vshrl.u32 %v20953_v33, 16 }
  0xfa   : > { %17499 = vmatpush3.bf16.msra.mxu0 %v19504_v36  ;;  %v961_v36 = vsel %vm893_vm0, %v956_v27, %v960_v61  ;;  %v1000_v61 = vrot.slane %v25965_v23, 1  ;;  %v1026_v27 = vshrl.u32 %v20942_v25, 16 }
  0xfb   : > { %17500 = vmatprep.subr.bf16.mxu0 %v19509_v46 }
  0xfd   : > { %17461 = vmatmul.mubr.bf16.gmra.mrb[4].mxu0 %v929_v52  ;;  %v25970_v52 = vshrl.u32 %v20911_v0, 16 }
  0xfe   : > { %17464 = vmatprep.mubr.bf16.mxu0 %v937_v56  ;;  %17501 = vmatpush3.bf16.msra.mxu0 %v19509_v46  ;;  %v986_v46 = vshrl.u32 %v20908_v63, 16  ;;  %v984_v56 = vrot.slane %v25968_v10, 1 }
  0xff   : > { %17502 = vmatprep.subr.bf16.mxu0 %v19512_v58 }
 0x100   : > { %v985_v23 = vsel %vm893_vm0, %v980_v28, %v984_v56 }
 0x102   : > { %17503 = vmatpush3.bf16.msra.mxu0 %v19512_v58  ;;  %v25972_v58 = vshrl.u32 %v20926_v11, 16 }
 0x103   : > { %17504 = vmatprep.subr.bf16.mxu0 %v19515_v6 }
 0x104   : > { %v1004_v28 = vor.u32 %v25972_v58, %v1000_v61 }
 0x105   : > { %17465 = vmatmul.mubr.bf16.gmra.mrb[8].mxu0 %v945_v12  ;;  %v972_v12 = vor.u32 %v970_v3, %v968_v7  ;;  %v20995_v7 = vld [vmem:[%s20797_s27 + $0x90] sm:$0xff]  }
 0x106   : > { %17468 = vmatprep.mubr.bf16.mxu0 %v953_v16  ;;  %17505 = vmatpush3.bf16.msra.mxu0 %v19515_v6  ;;  %v20980_v6 = vld [vmem:[%s26018_s26 + $0x80] sm:$0xff]   ;;  %v1018_v16 = vshrl.u32 %v20938_v22, 16  ;;  %v25971_v10 = vshll.u32 %v20995_v7, 16 }
 0x107   : > { %17506 = vmatprep.subr.bf16.mxu0 %v19518_v14 }
 0x10a   : > { %17507 = vmatpush3.bf16.msra.mxu0 %v19518_v14  ;;  %v1016_v14 = vrot.slane %v25964_v44, 1  ;;  %v977_v44 = vsel %vm893_vm0, %v972_v12, %v976_v39  ;;  %v996_v39 = vor.u32 %v25970_v52, %v992_v57 }
 0x10b   : > { %17508 = vmatprep.subr.bf16.mxu0 %v19523_v26 }
 0x10d   : > { %17469 = vmatmul.mubr.bf16.gmra.mrb[12].mxu0 %v961_v36  ;;  %v1024_v36 = vrot.slane %v25966_v53, 1  ;;  %v988_v53 = vor.u32 %v986_v46, %v984_v56  ;;  %v1042_v56 = vshrl.u32 %v20995_v7, 16 }
 0x10e   : > { %17472 = vmatprep.mubr.bf16.mxu0 %v969_v45  ;;  %17509 = vmatpush3.bf16.msra.mxu0 %v19523_v26  ;;  %v25969_v45 = vshll.u32 %v20953_v33, 16  ;;  %v21001_v26 = vld [vmem:[%s20797_s27 + $0x98] sm:$0xf] }
 0x10f   : > { %17510 = vmatprep.subr.bf16.mxu0 %v19525_v35  ;;  %v21013_v12 = vcombine.low %v21001_v26, %v21001_v26 }
 0x110   : > { %v1032_v13 = vrot.slane %v25969_v45, 1 }
 0x111   : > { %v1046_v45 = vshll.u32 %v21013_v12, 16 }
 0x112   : > { %17511 = vmatpush3.bf16.msra.mxu0 %v19525_v35  ;;  %v993_v35 = vsel %vm893_vm0, %v988_v53, %v992_v57  ;;  %v1012_v53 = vor.u32 %v1010_v2, %v1008_v1  ;;  %v1009_v57 = vsel %vm893_vm0, %v1004_v28, %v1008_v1  ;;  %v1596_v1 = vrot.slane %v20806_v5, 1 }
 0x113   : > { %17552 = vmatprep.subr.bf16.mxu0 %v20980_v6  ;;  %v1597_v28 = vrot.slane %v20821_v15, 1 }
 0x114   : > { %v1017_v52 = vsel %vm893_vm0, %v1012_v53, %v1016_v14  ;;  %v1599_v53 = vrot.slane %v20827_v17, 1 }
 0x115   : > { %17473 = vmatmul.mubr.bf16.gmra.mrb[16].mxu0 %v977_v44  ;;  %v1001_v44 = vsel %vm893_vm0, %v996_v39, %v1000_v61  ;;  %v1050_v39 = vshrl.u32 %v21013_v12, 16  ;;  %v1028_v61 = vor.u32 %v1026_v27, %v1024_v36 }
 0x116   : > { %17476 = vmatprep.mubr.bf16.mxu0 %v985_v23  ;;  %v1040_v23 = vrot.slane %v25971_v10, 1 }
 0x117   : > { %v1033_v58 = vsel %vm893_vm0, %v1028_v61, %v1032_v13  ;;  %v21118_v61 = vor.u32 %v20883_v48, %v20885_v49  ;;  %v21150_v48 = vrot.slane %v954_v55, 1  ;;  %v21159_v49 = vrot.slane %v962_v62, 1 }
 0x118   : > { %v21186_v55 = vrot.slane %v986_v46, 1  ;;  %v26020_v62 = vshll.u32 %v20908_v63, 16  ;;  %v26023_v46 = vshrl.u32 %v20926_v11, 16 }
 0x11d   : > { %17477 = vmatmul.mubr.bf16.gmra.mrb[20].mxu0 %v993_v35  ;;  %v1020_v35 = vor.u32 %v1018_v16, %v1016_v14  ;;  %v1044_v14 = vor.u32 %v1042_v56, %v1040_v23 }
 0x11e   : > { %17480 = vmatprep.mubr.bf16.mxu0 %v1001_v44  ;;  %v1048_v44 = vrot.slane %v1046_v45, 1 }
 0x11f   : > { %v1025_v10 = vsel %vm893_vm0, %v1020_v35, %v1024_v36  ;;  %v19534_v35 = vld [vmem:[%s26018_s26 + $0xc0] sm:$0xff]  }
 0x120   : > { %v1049_v36 = vsel %vm893_vm0, %v1044_v14, %v1048_v44  ;;  %v19528_v44 = vld [vmem:[%s26018_s26 + $0x90] sm:$0xff]   ;;  %v19529_v14 = vld [vmem:[%s26018_s26 + $0x98] sm:$0xff]  }
 0x125   : > { %17481 = vmatmul.mubr.bf16.gmra.mrb[24].mxu0 %v1009_v57  ;;  %v1603_v57 = vrot.slane %v20849_v29, 1 }
 0x126   : > { %17484 = vmatprep.mubr.bf16.mxu0 %v1017_v52  ;;  %v1036_v52 = vor.u32 %v1034_v32, %v1032_v13  ;;  %v26026_v13 = vshll.u32 %v20938_v22, 16 }
 0x128   : > { %v1041_v45 = vsel %vm893_vm0, %v1036_v52, %v1040_v23  ;;  %v19527_v23 = vld [vmem:[%s26018_s26 + $0x88] sm:$0xff]  }
 0x12d   : > { %17485 = vmatmul.mubr.bf16.gmra.mrb[28].mxu0 %v1025_v10  ;;  %v1601_v10 = vrot.slane %v20839_v24, 1 }
 0x12e   : > { %17488 = vmatprep.mubr.bf16.mxu0 %v1033_v58  ;;  %v1605_v58 = vrot.slane %v20853_v31, 1 }
 0x135   : > { %17489 = vmatmul.mubr.bf16.gmra.mrb[32].mxu0 %v1041_v45  ;;  %v19530_v45 = vld [vmem:[%s26018_s26 + $0xa0] sm:$0xff]  }
 0x136   : > { %17492 = vmatprep.mubr.bf16.mxu0 %v1049_v36 }
 0x13d   : > { %17493 = vmatmul.mubr.bf16.gmra.mrb[36].mxu0 %v1050_v39  ;;  %v21114_v39 = vrot.slane %v910_v18, 2  ;;  %v21132_v18 = vrot.slane %v938_v50, 1  ;;  %v21168_v50 = vrot.slane %v970_v3, 1  ;;  %v26021_v3 = vshrl.u32 %v20911_v0, 16 }
 0x13e   : > { %17512 = vmatprep.mubr.bf16.mxu0 %v20803_v4  ;;  %v19531_v4 = vld [vmem:[%s26018_s26 + $0xa8] sm:$0xff]  }
 0x145   : > { %17513 = vmatmul.mubr.bf16.vlgmr.msra.gmra.mrb[0].mxu0 %v20806_v5  ;;  %v21230_v5 = vrot.slane %v26026_v13, 2  ;;  %v21250_v13 = vrot.slane %v1026_v27, 1  ;;  %v19537_v27 = vld [vmem:[%s26018_s26 + $0xd8] sm:$0xff]  }
 0x146   : > { %17553 = vmatpush3.bf16.msra.mxu0 %v20980_v6  ;;  %17516 = vmatprep.mubr.bf16.mxu0 %v20821_v15  ;;  %v760_v6 = vld [vmem:[%s20797_s27 + $0x9c] sm:$0xf] }
 0x147   : > { %17554 = vmatprep.subr.bf16.mxu0 %v19527_v23  ;;  %v21076_v52 = vcombine.low %v21001_v26, %v760_v6  ;;  %v19533_v6 = vld [vmem:[%s26018_s26 + $0xb8] sm:$0xff]   ;;  %v21105_v26 = vrot.slane %v902_v8, 2  ;;  %v21123_v8 = vrot.slane %v930_v37, 1  ;;  %v21141_v37 = vrot.slane %v946_v54, 1 }
 0x148   : > { %v21177_v54 = vrot.slane %v978_v41, 1  ;;  %v21195_v41 = vrot.slane %v26021_v3, 1  ;;  %v1598_v3 = vsel %vm1595_vm1, %v1596_v1, %v1597_v28  ;;  %v19536_v1 = vld [vmem:[%s26018_s26 + $0xd0] sm:$0xff]  }
 0x14a   : > { %17555 = vmatpush3.bf16.msra.mxu0 %v19527_v23 }
 0x14b   : > { %17556 = vmatprep.subr.bf16.mxu0 %v19528_v44 }
 0x14d   : > { %17517 = vmatmul.mubr.bf16.gmra.mrb[4].mxu0 %v20827_v17  ;;  %v21258_v17 = vrot.slane %v1034_v32, 1  ;;  %v1606_v32 = vsel %vm1595_vm1, %v1603_v57, %v1605_v58 }
 0x14e   : > { %17520 = vmatprep.mubr.bf16.mxu0 %v20839_v24  ;;  %17557 = vmatpush3.bf16.msra.mxu0 %v19528_v44  ;;  %v19532_v44 = vld [vmem:[%s26018_s26 + $0xb0] sm:$0xff]   ;;  %v26029_v24 = vshll.u32 %v20995_v7, 16 }
 0x14f   : > { %17558 = vmatprep.subr.bf16.mxu0 %v19529_v14 }
 0x152   : > { %17559 = vmatpush3.bf16.msra.mxu0 %v19529_v14  ;;  %v21089_v14 = vld [vmem:[%s20797_s27 + $0xa0] ss:$0 sps:$4 sm:$0x33]   ;;  %s26058_s27 = sld [smem:[#allocation38_spill]] }
 0x153   : > { %17560 = vmatprep.subr.bf16.mxu0 %v19530_v45 }
 0x155   : > { %17521 = vmatmul.mubr.bf16.gmra.mrb[8].mxu0 %v20849_v29  ;;  %v2024_v29 = vshrl.u32 %v21076_v52, 16 }
 0x156   : > { %17524 = vmatprep.mubr.bf16.mxu0 %v20853_v31  ;;  %17561 = vmatpush3.bf16.msra.mxu0 %v19530_v45  ;;  %v21101_v45 = vrot.slane %v906_v20, 1  ;;  %v21127_v20 = vrot.slane %v926_v30, 2  ;;  %v21145_v30 = vrot.slane %v942_v42, 2  ;;  %v21163_v42 = vrot.slane %v958_v51, 2 }
 0x157   : > { %17562 = vmatprep.subr.bf16.mxu0 %v19531_v4  ;;  %v21181_v51 = vrot.slane %v974_v9, 2  ;;  %v26022_v9 = vshll.u32 %v20911_v0, 16 }
 0x15a   : > { %17563 = vmatpush3.bf16.msra.mxu0 %v19531_v4  ;;  %v21109_v4 = vrot.slane %v914_v21, 1  ;;  %v21136_v21 = vrot.slane %v934_v38, 2  ;;  %v21154_v38 = vrot.slane %v950_v43, 2  ;;  %v21172_v43 = vrot.slane %v966_v59, 2 }
 0x15b   : > { %17564 = vmatprep.subr.bf16.mxu0 %v19532_v44  ;;  %v21190_v59 = vrot.slane %v26020_v62, 2  ;;  %v26024_v62 = vshll.u32 %v20926_v11, 16 }
 0x15d   : > { %17525 = vmatmul.mubr.bf16.gmra.mrb[12].mxu0 %v20858_v34  ;;  %v21208_v36 = vrot.slane %v26024_v62, 2  ;;  %v21226_v62 = vrot.slane %v1018_v16, 1  ;;  %v1602_v16 = vsel %vm1595_vm1, %v1599_v53, %v1601_v10 }
 0x15e   : > { %17528 = vmatprep.mubr.bf16.mxu0 %v20869_v40  ;;  %17565 = vmatpush3.bf16.msra.mxu0 %v19532_v44  ;;  %v21199_v44 = vrot.slane %v26022_v9, 2  ;;  %v21218_v9 = vrot.slane %v1010_v2, 1  ;;  %v1600_v2 = vsel %vm1595_vm1, %v1597_v28, %v1599_v53  ;;  %v26028_v28 = vshll.u32 %v20953_v33, 16 }
 0x15f   : > { %17566 = vmatprep.subr.bf16.mxu0 %v19533_v6 }
 0x160   : > { %v21262_v53 = vrot.slane %v26028_v28, 2 }
 0x162   : > { %17567 = vmatpush3.bf16.msra.mxu0 %v19533_v6  ;;  %v21204_v6 = vrot.slane %v26023_v46, 1  ;;  %v26025_v46 = vshll.u32 %v20935_v19, 16 }
 0x163   : > { %17608 = vmatprep.subr.bf16.mxu0 %v19534_v35 }
 0x164   : > { %v21222_v23 = vrot.slane %v26025_v46, 2  ;;  %v19538_v46 = vld [vmem:[%s26018_s26 + $0xe0] sm:$0xff]  }
 0x165   : > { %17529 = vmatmul.mubr.bf16.gmra.mrb[16].mxu0 %v20881_v47 }
 0x166   : > { %17532 = vmatprep.mubr.bf16.mxu0 %v20902_v60 }
 0x16d   : > { %17533 = vmatmul.mubr.bf16.gmra.mrb[20].mxu0 %v20908_v63 }
 0x16e   : > { %17536 = vmatprep.mubr.bf16.mxu0 %v20911_v0 }
 0x175   : > { %17537 = vmatmul.mubr.bf16.gmra.mrb[24].mxu0 %v20926_v11 }
 0x176   : > { %17540 = vmatprep.mubr.bf16.mxu0 %v20935_v19 }
 0x17d   : > { %17541 = vmatmul.mubr.bf16.gmra.mrb[28].mxu0 %v20938_v22 }
 0x17e   : > { %17544 = vmatprep.mubr.bf16.mxu0 %v20942_v25 }
 0x185   : > { %17545 = vmatmul.mubr.bf16.gmra.mrb[32].mxu0 %v20953_v33 }
 0x186   : > { %17548 = vmatprep.mubr.bf16.mxu0 %v20995_v7 }
 0x18d   : > { %17549 = vmatmul.mubr.bf16.gmra.mrb[40].mxu0 %v21013_v12  ;;  %v19535_v12 = vld [vmem:[%s26018_s26 + $0xc8] sm:$0xff]  }
 0x18e   : > { %17568 = vmatprep.mubr.bf16.mxu0 %v1598_v3  ;;  %v26027_v3 = vshll.u32 %v20942_v25, 16 }
 0x190   : > { %v21254_v15 = vrot.slane %v26027_v3, 2  ;;  %v26030_v3 = vrot.slane %v20858_v34, 1  ;;  %v19543_v34 = vld [vmem:[%s26018_s26 + $0xf8] sm:$0xff]  }
 0x192   : > { %v1608_v28 = vsel %vm1595_vm1, %v1605_v58, %v26030_v3 }
 0x195   : > { %17569 = vmatmul.mubr.bf16.vlgmr.msra.gmra.mrb[0].mxu0 %v1600_v2  ;;  %v21282_v2 = vrot.slane %v1042_v56, 1  ;;  %v19539_v56 = vld [vmem:[%s26018_s26 + $0xe8] sm:$0xff]  }
 0x196   : > { %17609 = vmatpush3.bf16.msra.mxu0 %v19534_v35  ;;  %17572 = vmatprep.mubr.bf16.mxu0 %v1602_v16  ;;  %v1604_v35 = vsel %vm1595_vm1, %v1601_v10, %v1603_v57  ;;  %v21286_v10 = vrot.slane %v26029_v24, 2  ;;  %v2027_v57 = vshll.u32 %v21076_v52, 16  ;;  %v19541_v24 = vld [vmem:[%s26018_s26 + $0xf0] sm:$0xff]  }
 0x197   : > { %17610 = vmatprep.subr.bf16.mxu0 %v19535_v12 }
 0x198   : > { %v21292_v16 = vrot.slane %v2027_v57, 2  ;;  %v2036_v57 = vshll.u32 %v21089_v14, 16 }
 0x19a   : > { %17611 = vmatpush3.bf16.msra.mxu0 %v19535_v12  ;;  %v21290_v12 = vrot.slane %v2024_v29, 1  ;;  %v2033_v29 = vshrl.u32 %v21089_v14, 16  ;;  %v21314_v58 = vrot.slane %v2036_v57, 2 }
 0x19b   : > { %17612 = vmatprep.subr.bf16.mxu0 %v19536_v1 }
 0x19c   : > { %v21312_v31 = vrot.slane %v2033_v29, 1 }
 0x19d   : > { %17573 = vmatmul.mubr.bf16.gmra.mrb[4].mxu0 %v1604_v35  ;;  %v26032_v35 = vmov %v26030_v3 }
 0x19e   : > { %17576 = vmatprep.mubr.bf16.mxu0 %v1606_v32  ;;  %17613 = vmatpush3.bf16.msra.mxu0 %v19536_v1  ;;  %v26031_v1 = vrot.slane %v20869_v40, 1 }
 0x19f   : > { %17614 = vmatprep.subr.bf16.mxu0 %v19537_v27 }
 0x1a0   : > { %v1610_v32 = vsel %vm1595_vm1, %v26032_v35, %v26031_v1  ;;  %v26034_v3 = vmov %v26031_v1  ;;  %v26035_v1 = vrot.slane %v20902_v60, 1 }
 0x1a2   : > { %17615 = vmatpush3.bf16.msra.mxu0 %v19537_v27  ;;  %v26033_v27 = vrot.slane %v20881_v47, 1  ;;  %v26038_v29 = vmov %v26035_v1 }
 0x1a3   : > { %17616 = vmatprep.subr.bf16.mxu0 %v19538_v46 }
 0x1a5   : > { %17577 = vmatmul.mubr.bf16.gmra.mrb[8].mxu0 %v1608_v28  ;;  %v1612_v28 = vsel %vm1595_vm1, %v26034_v3, %v26033_v27 }
 0x1a6   : > { %17580 = vmatprep.mubr.bf16.mxu0 %v1610_v32  ;;  %17617 = vmatpush3.bf16.msra.mxu0 %v19538_v46  ;;  %v26036_v46 = vmov %v26033_v27  ;;  %v26037_v32 = vrot.slane %v20908_v63, 1  ;;  %v26041_v27 = vrot.slane %v20926_v11, 1  ;;  %v26045_v63 = vrot.slane %v20938_v22, 1 }
 0x1a7   : > { %17618 = vmatprep.subr.bf16.mxu0 %v19539_v56  ;;  %v1614_v35 = vsel %vm1595_vm1, %v26036_v46, %v26035_v1  ;;  %v26049_v11 = vrot.slane %v20953_v33, 1  ;;  %v26053_v22 = vrot.slane %v21076_v52, 1  ;;  %v1954_v33 = vor.u32 %v21105_v26, %v21101_v45 }
 0x1a8   : > { %v1616_v40 = vsel %vm1595_vm1, %v26038_v29, %v26037_v32  ;;  %v26040_v57 = vmov %v26037_v32  ;;  %v26044_v60 = vmov %v26041_v27  ;;  %v1973_v26 = vor.u32 %v21145_v30, %v21141_v37 }
 0x1aa   : > { %17619 = vmatpush3.bf16.msra.mxu0 %v19539_v56  ;;  %v26039_v56 = vrot.slane %v20911_v0, 1  ;;  %v26048_v0 = vmov %v26045_v63 }
 0x1ab   : > { %17620 = vmatprep.subr.bf16.mxu0 %v19541_v24 }
 0x1ac   : > { %v1618_v47 = vsel %vm1595_vm1, %v26040_v57, %v26039_v56 }
 0x1ad   : > { %17581 = vmatmul.mubr.bf16.gmra.mrb[12].mxu0 %v1612_v28  ;;  %v26043_v28 = vrot.slane %v20935_v19, 1  ;;  %v26052_v19 = vmov %v26049_v11 }
 0x1ae   : > { %17584 = vmatprep.mubr.bf16.mxu0 %v1614_v35  ;;  %17621 = vmatpush3.bf16.msra.mxu0 %v19541_v24  ;;  %v26042_v24 = vmov %v26039_v56  ;;  %v26047_v35 = vrot.slane %v20942_v25, 1  ;;  %v26051_v56 = vrot.slane %v20995_v7, 1  ;;  %v26056_v25 = vmov %v26053_v22 }
 0x1af   : > { %17622 = vmatprep.subr.bf16.mxu0 %v19543_v34  ;;  %v1620_v3 = vsel %vm1595_vm1, %v26042_v24, %v26041_v27  ;;  %v26046_v1 = vmov %v26043_v28  ;;  %v26055_v24 = vrot.slane %v21089_v14, 1 }
 0x1b0   : > { %v1624_v46 = vsel %vm1595_vm1, %v26046_v1, %v26045_v63  ;;  %v1626_v32 = vsel %vm1595_vm1, %v26048_v0, %v26047_v35  ;;  %v26050_v29 = vmov %v26047_v35  ;;  %v1630_v57 = vsel %vm1595_vm1, %v26052_v19, %v26051_v56 }
 0x1b1   : > { %v26057_v7 = vmov %v26055_v24 }
 0x1b2   : > { %17623 = vmatpush3.bf16.msra.mxu0 %v19543_v34  ;;  %v1622_v34 = vsel %vm1595_vm1, %v26044_v60, %v26043_v28  ;;  %v1957_v28 = vor.u32 %v21114_v39, %v21109_v4  ;;  %v1969_v39 = vor.u32 %v21136_v21, %v21132_v18  ;;  %v1977_v4 = vor.u32 %v21154_v38, %v21150_v48 }
 0x1b3   : > { %v1985_v18 = vor.u32 %v21172_v43, %v21168_v50  ;;  %v1989_v21 = vor.u32 %v21181_v51, %v21177_v54  ;;  %v1993_v48 = vor.u32 %v21190_v59, %v21186_v55  ;;  %v1997_v38 = vor.u32 %v21199_v44, %v21195_v41 }
 0x1b4   : > { %v1958_v60 = vsel %vm1951_vm2, %v1954_v33, %v1957_v28  ;;  %v1962_v52 = vsel %vm1951_vm2, %v1957_v28, %v21118_v61  ;;  %v1974_v45 = vsel %vm1951_vm2, %v1969_v39, %v1973_v26  ;;  %v2001_v50 = vor.u32 %v21208_v36, %v21204_v6 }
 0x1b5   : > { %17585 = vmatmul.mubr.bf16.gmra.mrb[16].mxu0 %v1616_v40  ;;  %v1628_v40 = vsel %vm1595_vm1, %v26050_v29, %v26049_v11  ;;  %v1990_v30 = vsel %vm1951_vm2, %v1985_v18, %v1989_v21  ;;  %v2005_v43 = vor.u32 %v21222_v23, %v21218_v9  ;;  %v2009_v55 = vor.u32 %v21230_v5, %v21226_v62 }
 0x1b6   : > { %17588 = vmatprep.mubr.bf16.mxu0 %v1618_v47  ;;  %v26054_v47 = vmov %v26051_v56  ;;  %v2002_v54 = vsel %vm1951_vm2, %v1997_v38, %v2001_v50  ;;  %v2013_v59 = vor.u32 %v21254_v15, %v21250_v13  ;;  %v2017_v9 = vor.u32 %v21262_v53, %v21258_v17 }
 0x1b7   : > { %v1632_v27 = vsel %vm1595_vm1, %v26054_v47, %v26053_v22  ;;  %v2006_v51 = vsel %vm1951_vm2, %v2001_v50, %v2005_v43  ;;  %v2010_v36 = vsel %vm1951_vm2, %v2005_v43, %v2009_v55  ;;  %v2030_v13 = vor.u32 %v21292_v16, %v21290_v12 }
 0x1b8   : > { %v2014_v23 = vsel %vm1951_vm2, %v2009_v55, %v2013_v59  ;;  %v2018_v62 = vsel %vm1951_vm2, %v2013_v59, %v2017_v9  ;;  %v2039_v15 = vor.u32 %v21314_v58, %v21312_v31 }
 0x1ba   : > { %v2040_v0 = vsel %vm1951_vm2, %v2030_v13, %v2039_v15 }
 0x1bd   : > { %17589 = vmatmul.mubr.bf16.gmra.mrb[20].mxu0 %v1620_v3  ;;  %v1634_v3 = vsel %vm1595_vm1, %v26056_v25, %v26055_v24 }
 0x1be   : > { %17592 = vmatprep.mubr.bf16.mxu0 %v1622_v34  ;;  %v1965_v34 = vor.u32 %v21127_v20, %v21123_v8  ;;  %v1978_v8 = vsel %vm1951_vm2, %v1973_v26, %v1977_v4 }
 0x1c0   : > { %v1966_v63 = vsel %vm1951_vm2, %v21118_v61, %v1965_v34  ;;  %v1970_v14 = vsel %vm1951_vm2, %v1965_v34, %v1969_v39  ;;  %v1981_v61 = vor.u32 %v21163_v42, %v21159_v49  ;;  %v1994_v49 = vsel %vm1951_vm2, %v1989_v21, %v1993_v48 }
 0x1c1   : > { %v1998_v42 = vsel %vm1951_vm2, %v1993_v48, %v1997_v38 }
 0x1c2   : > { %v1982_v20 = vsel %vm1951_vm2, %v1977_v4, %v1981_v61  ;;  %v1986_v37 = vsel %vm1951_vm2, %v1981_v61, %v1985_v18 }
 0x1c5   : > { %17593 = vmatmul.mubr.bf16.gmra.mrb[24].mxu0 %v1624_v46  ;;  %v2021_v46 = vor.u32 %v21286_v10, %v21282_v2 }
 0x1c6   : > { %17596 = vmatprep.mubr.bf16.mxu0 %v1626_v32 }
 0x1c7   : > { %v2022_v5 = vsel %vm1951_vm2, %v2017_v9, %v2021_v46  ;;  %v2031_v35 = vsel %vm1951_vm2, %v2021_v46, %v2030_v13 }
 0x1cd   : > { %17597 = vmatmul.mubr.bf16.gmra.mrb[28].mxu0 %v1628_v40 }
 0x1ce   : > { %17600 = vmatprep.mubr.bf16.mxu0 %v1630_v57 }
 0x1d5   : > { %17601 = vmatmul.mubr.bf16.gmra.mrb[32].mxu0 %v1632_v27 }
 0x1d6   : > { %17604 = vmatprep.mubr.bf16.mxu0 %v1634_v3 }
 0x1dd   : > { %17605 = vmatmul.mubr.bf16.gmra.mrb[44].mxu0 %v26057_v7 }
 0x1de   : > { %17624 = vmatprep.mubr.bf16.mxu0 %v1958_v60 }
 0x1e5   : > { %17625 = vmatmul.mubr.bf16.vlgmr.msra.gmra.mrb[0].mxu0 %v1962_v52 }
 0x1e6   : > { %17628 = vmatprep.mubr.bf16.mxu0 %v1966_v63 }
 0x1ed   : > { %17629 = vmatmul.mubr.bf16.gmra.mrb[4].mxu0 %v1970_v14 }
 0x1ee   : > { %17632 = vmatprep.mubr.bf16.mxu0 %v1974_v45 }
 0x1f5   : > { %17633 = vmatmul.mubr.bf16.gmra.mrb[8].mxu0 %v1978_v8 }
 0x1f6   : > { %17636 = vmatprep.mubr.bf16.mxu0 %v1982_v20 }
 0x1fd   : > { %17637 = vmatmul.mubr.bf16.gmra.mrb[12].mxu0 %v1986_v37 }
 0x1fe   : > { %17640 = vmatprep.mubr.bf16.mxu0 %v1990_v30 }
 0x205   : > { %17641 = vmatmul.mubr.bf16.gmra.mrb[16].mxu0 %v1994_v49 }
 0x206   : > { %17644 = vmatprep.mubr.bf16.mxu0 %v1998_v42 }
 0x20d   : > { %17645 = vmatmul.mubr.bf16.gmra.mrb[20].mxu0 %v2002_v54 }
 0x20e   : > { %17648 = vmatprep.mubr.bf16.mxu0 %v2006_v51 }
 0x210   : > { %v17494_v41 = vpop.f32.mrb[36].mxu0 }
 0x211   : > { %v1298_v44 = vpop.f32.mrb[37].mxu0 }
 0x212   : > { %v17495_v1 = vpop.f32.mrb[38].mxu0 }
 0x213   : > { %v1301_v6 = vpop.f32.mrb[39].mxu0 }
 0x215   : > { %17649 = vmatmul.mubr.bf16.gmra.mrb[24].mxu0 %v2010_v36 }
 0x216   : > { %17652 = vmatprep.mubr.bf16.mxu0 %v2014_v23 }
 0x21d   : > { %17653 = vmatmul.mubr.bf16.gmra.mrb[28].mxu0 %v2018_v62 }
 0x21e   : > { %17656 = vmatprep.mubr.bf16.mxu0 %v2022_v5 }
 0x225   : > { %17657 = vmatmul.mubr.bf16.gmra.mrb[32].mxu0 %v2031_v35 }
 0x226   : > { %17660 = vmatprep.mubr.bf16.mxu0 %v2040_v0 }
 0x22d   : > { %17661 = vmatmul.mubr.bf16.gmra.mrb[48].mxu0 %v21312_v31  ;;  %v21450_v31 = vld [vmem:[%s26058_s27] ss:$0 sm:$0xff] }
 0x260   : > { %v17550_v17 = vpop.f32.mrb[40].mxu0 }
 0x261   : > { %v1567_v53 = vadd.f32 %v17550_v17, %v17494_v41  ;;  %v1558_v2 = vpop.f32.mrb[41].mxu0 }
 0x262   : > { %v1559_v10 = vadd.f32 %v1558_v2, %v1298_v44  ;;  %v17551_v32 = vpop.f32.mrb[42].mxu0 }
 0x263   : > { %v1561_v11 = vpop.f32.mrb[43].mxu0 }
 0x264   : > { %v1562_v29 = vadd.f32 %v1561_v11, %v1301_v6 }
 0x2b0   : > { %v17606_v40 = vpop.f32.mrb[44].mxu0 }
 0x2b1   : > { %v21441_v12 = vadd.f32 %v17606_v40, %v1567_v53  ;;  %v1881_v16 = vpop.f32.mrb[45].mxu0 }
 0x2b2   : > { %v21443_v58 = vadd.f32 %v1881_v16, %v1559_v10  ;;  %v17607_v56 = vpop.f32.mrb[46].mxu0 }
 0x2b3   : > { %v1884_v19 = vpop.f32.mrb[47].mxu0 }
 0x2b4   : > { %v21445_v57 = vadd.f32 %v1884_v19, %v1562_v29 }
 0x2b8   : > { %v17626_v22 = vpop.f32.mrb[0].mxu0 }
 0x2b9   : > { %v2349_v47 = vadd.f32 %v17626_v22, %v21450_v31  ;;  %v2143_v27 = vpop.f32.mrb[1].mxu0 }
 0x2ba   : > { %v2347_v24 = vadd.f32 %v21450_v31, %v2143_v27  ;;  %v17627_v25 = vpop.f32.mrb[2].mxu0 }
 0x2bb   : > { %v2350_v3 = vadd.f32 %v17627_v25, %v21450_v31  ;;  %v2146_v33 = vpop.f32.mrb[3].mxu0  ;;  %v2388_v60 = vmax.f32 %v2349_v47, 0.0 }
 0x2bc   : > { %v2348_v28 = vadd.f32 %v21450_v31, %v2146_v33  ;;  %v2386_v34 = vmax.f32 %v2347_v24, 0.0 }
 0x2bd   : > { %v2389_v7 = vmax.f32 %v2350_v3, 0.0 }
 0x2be   : > { %v2387_v52 = vmax.f32 %v2348_v28, 0.0 }
 0x2bf   : > { %v21456_v63 = vpack.c.bf16 %v2389_v7, %v2388_v60 }
 0x2c0   : > { %v2425_v39 = vpack.c.bf16 %v2387_v52, %v2386_v34  ;;  %v17630_v26 = vpop.f32.mrb[4].mxu0 }
 0x2c1   : > { %v2453_v14 = vshll.u32 %v21456_v63, 16  ;;  %v2457_v45 = vshrl.u32 %v21456_v63, 16  ;;  %v2632_v4 = vrot.slane %v21456_v63, 1  ;;  %v2353_v61 = vadd.f32 %v17630_v26, %v21450_v31  ;;  %v2159_v8 = vpop.f32.mrb[5].mxu0 }
 0x2c2   : > { %v2448_v20 = vshll.u32 %v2425_v39, 16  ;;  %v2631_v18 = vrot.slane %v2425_v39, 1  ;;  %v2351_v21 = vadd.f32 %v21450_v31, %v2159_v8  ;;  %v17631_v37 = vpop.f32.mrb[6].mxu0  ;;  %v2446_v30 = vshrl.u32 %v2425_v39, 16 }
 0x2c3   : > { %v2354_v48 = vadd.f32 %v17631_v37, %v21450_v31  ;;  %v2162_v38 = vpop.f32.mrb[7].mxu0  ;;  %v2455_v42 = vrot.slane %v2453_v14, 1  ;;  %v2392_v54 = vmax.f32 %v2353_v61, 0.0  ;;  %v21466_v55 = vrot.slane %v2457_v45, 1 }
 0x2c4   : > { %v2450_v49 = vrot.slane %v2448_v20, 1  ;;  %v2633_v50 = vsel %vm1595_vm1, %v2631_v18, %v2632_v4  ;;  %v2352_v43 = vadd.f32 %v21450_v31, %v2162_v38  ;;  %v21468_v59 = vrot.slane %v2453_v14, 2 }
 0x2c5   : > { %v2393_v51 = vmax.f32 %v2354_v48, 0.0  ;;  %v2390_v44 = vmax.f32 %v2351_v21, 0.0  ;;  %v2459_v23 = vor.u32 %v2457_v45, %v2455_v42  ;;  %v2827_v62 = vrot.slane %v21456_v63, 2 }
 0x2c6   : > { %v2451_v41 = vor.u32 %v2450_v49, %v2446_v30  ;;  %v2391_v1 = vmax.f32 %v2352_v43, 0.0  ;;  %v2722_v0 = vor.u32 %v21468_v59, %v21466_v55 }
 0x2c7   : > { %v21470_v36 = vpack.c.bf16 %v2393_v51, %v2392_v54 }
 0x2c8   : > { %v2456_v6 = vsel %vm893_vm0, %v2451_v41, %v2455_v42  ;;  %v21473_v9 = vpack.c.bf16 %v2391_v1, %v2390_v44  ;;  %v17634_v46 = vpop.f32.mrb[8].mxu0 }
 0x2c9   : > { %v2597_v5 = vmax.bf16 %v2456_v6, %v2425_v39  ;;  %v2357_v13 = vadd.f32 %v17634_v46, %v21450_v31  ;;  %v2175_v15 = vpop.f32.mrb[9].mxu0  ;;  %v21478_v35 = vshll.u32 %v21470_v36, 16  ;;  %v21492_v56 = vshrl.u32 %v21470_v36, 16 }
 0x2ca   : > { %v2355_v17 = vadd.f32 %v21450_v31, %v2175_v15  ;;  %v17635_v53 = vpop.f32.mrb[10].mxu0  ;;  %v21484_v2 = vshll.u32 %v21473_v9, 16  ;;  %v21487_v10 = vshrl.u32 %v21473_v9, 16  ;;  %v2634_v32 = vrot.slane %v21473_v9, 1 }
 0x2cb   : > { %v2681_v11 = vmax.bf16 %v2633_v50, %v2597_v5  ;;  %v2396_v29 = vmax.f32 %v2357_v13, 0.0  ;;  %v2358_v40 = vadd.f32 %v17635_v53, %v21450_v31  ;;  %v2178_v16 = vpop.f32.mrb[11].mxu0  ;;  %v2471_v47 = vrot.slane %v21478_v35, 1 }
 0x2cc   : > { %v2356_v19 = vadd.f32 %v21450_v31, %v2178_v16  ;;  %v2463_v22 = vrot.slane %v21484_v2, 1  ;;  %v2635_v27 = vsel %vm1595_vm1, %v2632_v4, %v2634_v32  ;;  %v2394_v24 = vmax.f32 %v2355_v17, 0.0  ;;  %v19546_v17 = vld [vmem:[#allocation9 + $0x4] ss:$12 sps:$4 sm:$0xff]  }
 0x2cd   : > { %v2397_v25 = vmax.f32 %v2358_v40, 0.0  ;;  %v2636_v3 = vrot.slane %v21470_v36, 1  ;;  %v2703_v33 = vmax.bf16 %v2681_v11, %v2635_v27  ;;  %v2723_v34 = vrot.slane %v21487_v10, 1  ;;  %3332 = vmatprep.mubr.bf16.mxu1 %v19546_v17 }
 0x2ce   : > { %v2395_v28 = vmax.f32 %v2356_v19, 0.0  ;;  %v2464_v60 = vsel %vm893_vm0, %v2459_v23, %v2463_v22  ;;  %v2467_v7 = vor.u32 %v21487_v10, %v2463_v22  ;;  %v2724_v14 = vrot.slane %v21484_v2, 2 }
 0x2cf   : > { %v21502_v52 = vpack.c.bf16 %v2397_v25, %v2396_v29  ;;  %v2598_v39 = vmax.bf16 %v2464_v60, %v21456_v63  ;;  %v2637_v26 = vsel %vm1595_vm1, %v2634_v32, %v2636_v3  ;;  %v2727_v8 = vrot.slane %v21492_v56, 1 }
 0x2d0   : > { %v21509_v45 = vpack.c.bf16 %v2395_v28, %v2394_v24  ;;  %v17638_v4 = vpop.f32.mrb[12].mxu0  ;;  %v2472_v61 = vsel %vm893_vm0, %v2467_v7, %v2471_v47  ;;  %v2728_v20 = vrot.slane %v21478_v35, 2  ;;  %v2725_v48 = vor.u32 %v2724_v14, %v2723_v34 }
 0x2d1   : > { %v2361_v18 = vadd.f32 %v17638_v4, %v21450_v31  ;;  %v2191_v21 = vpop.f32.mrb[13].mxu0  ;;  %v2599_v37 = vmax.bf16 %v2472_v61, %v21473_v9  ;;  %v2682_v30 = vmax.bf16 %v2635_v27, %v2598_v39  ;;  %v2828_v50 = vrot.slane %v21473_v9, 2 }
 0x2d2   : > { %v2359_v38 = vadd.f32 %v21450_v31, %v2191_v21  ;;  %v17639_v49 = vpop.f32.mrb[14].mxu0  ;;  %v21519_v42 = vor.u32 %v2728_v20, %v2727_v8  ;;  %v2830_v43 = vrot.slane %v21470_v36, 2  ;;  %v2726_v6 = vsel %vm1951_vm2, %v2722_v0, %v2725_v48 }
 0x2d3   : > { %v2400_v54 = vmax.f32 %v2361_v18, 0.0  ;;  %v2362_v51 = vadd.f32 %v17639_v49, %v21450_v31  ;;  %v2194_v55 = vpop.f32.mrb[15].mxu0  ;;  %v21524_v59 = vmax.bf16 %v2637_v26, %v2599_v37  ;;  %v2704_v41 = vmax.bf16 %v2682_v30, %v2637_v26 }
 0x2d4   : > { %v2398_v44 = vmax.f32 %v2359_v38, 0.0  ;;  %v2360_v1 = vadd.f32 %v21450_v31, %v2194_v55  ;;  %v2730_v23 = vsel %vm1951_vm2, %v2725_v48, %v21519_v42  ;;  %v2809_v5 = vmax.bf16 %v2726_v6, %v2703_v33 }
 0x2d5   : > { %v2401_v46 = vmax.f32 %v2362_v51, 0.0  ;;  %v2810_v13 = vmax.bf16 %v2730_v23, %v2704_v41  ;;  %v2829_v15 = vsel %vm2826_vm3, %v2827_v62, %v2828_v50  ;;  %v2831_v32 = vsel %vm2826_vm3, %v2828_v50, %v2830_v43 }
 0x2d6   : > { %v2399_v53 = vmax.f32 %v2360_v1, 0.0  ;;  %v2917_v11 = vrot.slane %v21487_v10, 2  ;;  %v2918_v29 = vrot.slane %v21484_v2, 3  ;;  %v2877_v0 = vmax.bf16 %v2829_v15, %v2809_v5 }
 0x2d7   : > { %v21536_v40 = vpack.c.bf16 %v2401_v46, %v2400_v54  ;;  %v2878_v16 = vmax.bf16 %v2831_v32, %v2810_v13  ;;  %v2920_v19 = vrot.slane %v21492_v56, 2  ;;  %v2921_v62 = vrot.slane %v21478_v35, 3 }
 0x2d8   : > { %v21539_v22 = vpack.c.bf16 %v2399_v53, %v2398_v44  ;;  %v17642_v63 = vpop.f32.mrb[16].mxu0  ;;  %v2919_v27 = vor.u32 %v2918_v29, %v2917_v11  ;;  %v3025_v24 = vrot.slane %v21473_v9, 3  ;;  %v2899_v33 = vmax.bf16 %v2877_v0, %v2831_v32 }
 0x2d9   : > { %v2365_v25 = vadd.f32 %v17642_v63, %v21450_v31  ;;  %v2207_v10 = vpop.f32.mrb[17].mxu0  ;;  %v3026_v2 = vrot.slane %v21470_v36, 3  ;;  %v21546_v28 = vshll.u32 %v21509_v45, 16  ;;  %v2922_v34 = vor.u32 %v2921_v62, %v2920_v19 }
 0x2da   : > { %v2363_v60 = vadd.f32 %v21450_v31, %v2207_v10  ;;  %v17643_v7 = vpop.f32.mrb[18].mxu0  ;;  %v21550_v39 = vshrl.u32 %v21509_v45, 16  ;;  %v25977_v26 = vrot.slane %v21509_v45, 2  ;;  %v25976_v54 = vrot.slane %v21509_v45, 3 }
 0x2db   : > { %v2366_v9 = vadd.f32 %v17643_v7, %v21450_v31  ;;  %v2210_v14 = vpop.f32.mrb[19].mxu0  ;;  %v3027_v4 = vsel %vm3024_vm4, %v3025_v24, %v3026_v2  ;;  %v2404_v61 = vmax.f32 %v2365_v25, 0.0  ;;  %v2923_v20 = vsel %vm2916_vm5, %v2919_v27, %v2922_v34 }
 0x2dc   : > { %v2364_v8 = vadd.f32 %v21450_v31, %v2210_v14  ;;  %v21560_v18 = vsel %vm2826_vm3, %v2830_v43, %v25977_v26  ;;  %v2402_v21 = vmax.f32 %v2363_v60, 0.0  ;;  %v3006_v30 = vmax.bf16 %v2923_v20, %v2899_v33 }
 0x2dd   : > { %v2405_v37 = vmax.f32 %v2366_v9, 0.0  ;;  %v21563_v48 = vmax.bf16 %v2878_v16, %v21560_v18  ;;  %v2924_v49 = vrot.slane %v21550_v39, 2  ;;  %v2925_v50 = vrot.slane %v21546_v28, 3 }
 0x2de   : > { %v2403_v38 = vmax.f32 %v2364_v8, 0.0  ;;  %v21570_v55 = vmax.bf16 %v3027_v4, %v3006_v30  ;;  %v21577_v44 = vor.u32 %v21492_v56, %v2471_v47  ;;  %v21583_v6 = vsel %vm3024_vm4, %v3026_v2, %v25976_v54 }
 0x2df   : > { %v21568_v51 = vpack.c.bf16 %v2405_v37, %v2404_v61  ;;  %v21592_v35 = vor.u32 %v2925_v50, %v2924_v49  ;;  %v21603_v0 = vshll.u32 %v21502_v52, 16  ;;  %v25975_v16 = vrot.slane %v21509_v45, 1 }
 0x2e0   : > { %v21572_v41 = vpack.c.bf16 %v2403_v38, %v2402_v21  ;;  %v17646_v43 = vpop.f32.mrb[20].mxu0 }
 0x2e1   : > { %v2369_v23 = vadd.f32 %v17646_v43, %v21450_v31  ;;  %v2223_v46 = vpop.f32.mrb[21].mxu0  ;;  %v21587_v5 = vshll.u32 %v21568_v51, 16  ;;  %v21590_v13 = vshrl.u32 %v21568_v51, 16  ;;  %v2648_v53 = vrot.slane %v21568_v51, 1 }
 0x2e2   : > { %v21595_v56 = vshll.u32 %v21572_v41, 16  ;;  %v2367_v47 = vadd.f32 %v21450_v31, %v2223_v46  ;;  %v17647_v15 = vpop.f32.mrb[22].mxu0  ;;  %v25974_v17 = vrot.slane %v21572_v41, 1  ;;  %v21607_v19 = vshrl.u32 %v21572_v41, 16 }
 0x2e3   : > { %v2370_v32 = vadd.f32 %v17647_v15, %v21450_v31  ;;  %v2226_v11 = vpop.f32.mrb[23].mxu0  ;;  %v2519_v29 = vrot.slane %v21587_v5, 1  ;;  %v2408_v63 = vmax.f32 %v2369_v23, 0.0  ;;  %v2751_v10 = vrot.slane %v21590_v13, 1 }
 0x2e4   : > { %v2368_v27 = vadd.f32 %v21450_v31, %v2226_v11  ;;  %v25973_v62 = vrot.slane %v21595_v56, 1  ;;  %v2406_v24 = vmax.f32 %v2367_v47, 0.0  ;;  %v2752_v33 = vrot.slane %v21587_v5, 2 }
 0x2e5   : > { %v2409_v25 = vmax.f32 %v2370_v32, 0.0  ;;  %v21619_v7 = vsel %vm1595_vm1, %v25974_v17, %v2648_v53  ;;  %v21623_v9 = vsel %vm2916_vm5, %v2922_v34, %v21592_v35  ;;  %v2523_v4 = vor.u32 %v21590_v13, %v2519_v29 }
 0x2e6   : > { %v2407_v2 = vmax.f32 %v2368_v27, 0.0  ;;  %v2515_v60 = vor.u32 %v21607_v19, %v25973_v62  ;;  %26059 = vst [vmem:[#allocation18_spill] sm:$0xff] %v21619_v7  ;;  %v21635_v8 = vsel %vm1595_vm1, %v2636_v3, %v25975_v16  ;;  %v25980_v37 = vrot.slane %v21568_v51, 2 }
 0x2e7   : > { %v21625_v14 = vpack.c.bf16 %v2409_v25, %v2408_v63  ;;  %v21648_v3 = vor.u32 %v2752_v33, %v2751_v10 }
 0x2e8   : > { %v21637_v20 = vpack.c.bf16 %v2407_v2, %v2406_v24  ;;  %v17650_v21 = vpop.f32.mrb[24].mxu0  ;;  %v2520_v34 = vsel %vm893_vm0, %v2515_v60, %v2519_v29 }
 0x2e9   : > { %v2373_v38 = vadd.f32 %v17650_v21, %v21450_v31  ;;  %v2239_v49 = vpop.f32.mrb[25].mxu0  ;;  %v21645_v50 = vshll.u32 %v21625_v14, 16  ;;  %v2605_v43 = vmax.bf16 %v2520_v34, %v21572_v41  ;;  %26061 = vst [vmem:[#allocation20_spill] sm:$0xff] %v21648_v3  ;;  %v21658_v27 = vshrl.u32 %v21625_v14, 16 }
 0x2ea   : > { %26060 = vst [vmem:[#allocation19_spill] sm:$0xff] %v21637_v20  ;;  %v2371_v23 = vadd.f32 %v21450_v31, %v2239_v49  ;;  %v17651_v46 = vpop.f32.mrb[26].mxu0  ;;  %v21652_v47 = vshll.u32 %v21637_v20, 16  ;;  %v2529_v15 = vshrl.u32 %v21637_v20, 16  ;;  %v2650_v32 = vrot.slane %v21637_v20, 1 }
 0x2eb   : > { %v2412_v11 = vmax.f32 %v2373_v38, 0.0  ;;  %v2374_v29 = vadd.f32 %v17651_v46, %v21450_v31  ;;  %v2242_v63 = vpop.f32.mrb[27].mxu0  ;;  %v25978_v24 = vrot.slane %v21625_v14, 1  ;;  %v25979_v33 = vrot.slane %v21645_v50, 1 }
 0x2ec   : > { %v2372_v25 = vadd.f32 %v21450_v31, %v2242_v63  ;;  %v2527_v10 = vrot.slane %v21652_v47, 1  ;;  %v2651_v2 = vsel %vm1595_vm1, %v2648_v53, %v2650_v32  ;;  %v2410_v60 = vmax.f32 %v2371_v23, 0.0 }
 0x2ed   : > { %v2413_v21 = vmax.f32 %v2374_v29, 0.0  ;;  %v2653_v34 = vsel %vm1595_vm1, %v2650_v32, %v25978_v24  ;;  %v2689_v38 = vmax.bf16 %v21619_v7, %v2605_v43  ;;  %v2755_v17 = vrot.slane %v2529_v15, 1 }
 0x2ee   : > { %v2411_v49 = vmax.f32 %v2372_v25, 0.0  ;;  %v2528_v46 = vsel %vm893_vm0, %v2523_v4, %v2527_v10  ;;  %v2531_v62 = vor.u32 %v2529_v15, %v2527_v10  ;;  %v2756_v53 = vrot.slane %v21652_v47, 2 }
 0x2ef   : > { %v21670_v63 = vpack.c.bf16 %v2413_v21, %v2412_v11  ;;  %v2606_v16 = vmax.bf16 %v2528_v46, %v21568_v51  ;;  %v2711_v54 = vmax.bf16 %v2689_v38, %v2651_v2  ;;  %v2759_v43 = vrot.slane %v21658_v27, 1 }
 0x2f0   : > { %v21674_v23 = vpack.c.bf16 %v2411_v49, %v2410_v60  ;;  %v17654_v29 = vpop.f32.mrb[28].mxu0  ;;  %v2536_v32 = vsel %vm893_vm0, %v2531_v62, %v25979_v33  ;;  %v2760_v4 = vrot.slane %v21645_v50, 2  ;;  %v2757_v38 = vor.u32 %v2756_v53, %v2755_v17 }
 0x2f1   : > { %v2377_v25 = vadd.f32 %v17654_v29, %v21450_v31  ;;  %v2255_v11 = vpop.f32.mrb[29].mxu0  ;;  %v2607_v10 = vmax.bf16 %v2536_v32, %v21637_v20  ;;  %v2690_v21 = vmax.bf16 %v2651_v2, %v2606_v16  ;;  %v2844_v30 = vrot.slane %v21637_v20, 2 }
 0x2f2   : > { %v2375_v46 = vadd.f32 %v21450_v31, %v2255_v11  ;;  %v17655_v60 = vpop.f32.mrb[30].mxu0  ;;  %v21684_v49 = vor.u32 %v2760_v4, %v2759_v43  ;;  %v2846_v62 = vrot.slane %v21625_v14, 2  ;;  %v2758_v17 = vsel %vm1951_vm2, %v21648_v3, %v2757_v38 }
 0x2f3   : > { %v2416_v26 = vmax.f32 %v2377_v25, 0.0  ;;  %v2378_v24 = vadd.f32 %v17655_v60, %v21450_v31  ;;  %v2258_v33 = vpop.f32.mrb[31].mxu0  ;;  %v21689_v61 = vmax.bf16 %v2653_v34, %v2607_v10  ;;  %v2712_v29 = vmax.bf16 %v2690_v21, %v2653_v34 }
 0x2f4   : > { %v2414_v1 = vmax.f32 %v2375_v46, 0.0  ;;  %v2376_v16 = vadd.f32 %v21450_v31, %v2258_v33  ;;  %v2762_v2 = vsel %vm1951_vm2, %v2757_v38, %v21684_v49  ;;  %v2817_v32 = vmax.bf16 %v2758_v17, %v2711_v54 }
 0x2f5   : > { %v2417_v53 = vmax.f32 %v2378_v24, 0.0  ;;  %v2818_v43 = vmax.bf16 %v2762_v2, %v2712_v29  ;;  %v21699_v4 = vsel %vm2826_vm3, %v25980_v37, %v2844_v30  ;;  %v2847_v34 = vsel %vm2826_vm3, %v2844_v30, %v2846_v62 }
 0x2f6   : > { %26062 = vst [vmem:[#allocation21_spill] sm:$0xff] %v21699_v4  ;;  %v2415_v25 = vmax.f32 %v2376_v16, 0.0  ;;  %v2948_v11 = vrot.slane %v2529_v15, 2  ;;  %v2949_v33 = vrot.slane %v21652_v47, 3  ;;  %v2885_v21 = vmax.bf16 %v21699_v4, %v2817_v32 }
 0x2f7   : > { %v21703_v10 = vpack.c.bf16 %v2417_v53, %v2416_v26  ;;  %v2886_v46 = vmax.bf16 %v2847_v34, %v2818_v43  ;;  %v2952_v24 = vrot.slane %v21658_v27, 2  ;;  %v2953_v29 = vrot.slane %v21645_v50, 3 }
 0x2f8   : > { %v21707_v54 = vpack.c.bf16 %v2415_v25, %v2414_v1  ;;  %v17658_v38 = vpop.f32.mrb[32].mxu0  ;;  %v21709_v60 = vor.u32 %v2949_v33, %v2948_v11  ;;  %v25986_v16 = vrot.slane %v21637_v20, 3  ;;  %v2907_v47 = vmax.bf16 %v2885_v21, %v2847_v34 }
 0x2f9   : > { %v2381_v30 = vadd.f32 %v17658_v38, %v21450_v31  ;;  %v2271_v15 = vpop.f32.mrb[33].mxu0  ;;  %v3042_v26 = vrot.slane %v21625_v14, 3  ;;  %v21716_v17 = vshll.u32 %v21674_v23, 16  ;;  %v2954_v53 = vor.u32 %v2953_v29, %v2952_v24 }
 0x2fa   : > { %26063 = vst [vmem:[#allocation22_spill] sm:$0xff] %v21709_v60  ;;  %v2379_v2 = vadd.f32 %v21450_v31, %v2271_v15  ;;  %v17659_v1 = vpop.f32.mrb[34].mxu0  ;;  %v21720_v32 = vshrl.u32 %v21674_v23, 16  ;;  %v2848_v43 = vrot.slane %v21674_v23, 2  ;;  %v21726_v21 = vshrl.u32 %v21502_v52, 16 }
 0x2fb   : > { %v2420_v25 = vmax.f32 %v2381_v30, 0.0  ;;  %v2382_v11 = vadd.f32 %v17659_v1, %v21450_v31  ;;  %v2274_v33 = vpop.f32.mrb[35].mxu0  ;;  %v2955_v15 = vsel %vm2916_vm5, %v21709_v60, %v2954_v53  ;;  %v3043_v24 = vsel %vm3024_vm4, %v25986_v16, %v3042_v26 }
 0x2fc   : > { %v2380_v38 = vadd.f32 %v21450_v31, %v2274_v33  ;;  %v21735_v29 = vsel %vm2826_vm3, %v2846_v62, %v2848_v43  ;;  %v2418_v30 = vmax.f32 %v2379_v2, 0.0  ;;  %v3014_v37 = vmax.bf16 %v2955_v15, %v2907_v47 }
 0x2fd   : > { %v2421_v1 = vmax.f32 %v2382_v11, 0.0  ;;  %v2908_v34 = vmax.bf16 %v2886_v46, %v21735_v29  ;;  %v2956_v3 = vrot.slane %v21720_v32, 2  ;;  %v2957_v33 = vrot.slane %v21716_v17, 3 }
 0x2fe   : > { %v2419_v4 = vmax.f32 %v2380_v38, 0.0  ;;  %v3044_v7 = vrot.slane %v21674_v23, 3  ;;  %v3085_v20 = vmax.bf16 %v3043_v24, %v3014_v37  ;;  %v26064_v16 = vrot.slane %v21546_v28, 1 }
 0x2ff   : > { %v21741_v60 = vpack.c.bf16 %v2421_v1, %v2420_v25  ;;  %v26065_v47 = vmax.bf16 %v21623_v9, %v21563_v48  ;;  %v2958_v11 = vor.u32 %v2957_v33, %v2956_v3  ;;  %v26066_v25 = vrot.slane %v21603_v0, 1 }
 0x300   : > { %v21746_v62 = vor.u32 %v21550_v39, %v26064_v16  ;;  %v21752_v2 = vpack.c.bf16 %v2419_v4, %v2418_v30  ;;  %v3045_v38 = vsel %vm3024_vm4, %v3042_v26, %v3044_v7  ;;  %v17662_v15 = vpop.f32.mrb[48].mxu0  ;;  %16754 = vmatprep.subr.bf16.mxu1 %v3085_v20  ;;  %v21762_v1 = vshll.u32 %v21670_v63, 16 }
 0x301   : > { %v3078_v46 = vmax.bf16 %v21583_v6, %v26065_v47  ;;  %v21758_v37 = vor.u32 %v21726_v21, %v26066_v25  ;;  %v2339_v16 = vadd.f32 %v17662_v15, %v21441_v12  ;;  %v2287_v24 = vpop.f32.mrb[49].mxu0  ;;  %v21765_v48 = vshrl.u32 %v21670_v63, 16  ;;  %16755 = vmatpush3.bf16.msra.mxu1 %v21570_v55 }
 0x302   : > { %v2654_v6 = vrot.slane %v21674_v23, 1  ;;  %v2959_v9 = vsel %vm2916_vm5, %v2954_v53, %v2958_v11  ;;  %v2337_v3 = vadd.f32 %v2287_v24, %v21443_v58  ;;  %v17663_v4 = vpop.f32.mrb[50].mxu0  ;;  %v2763_v20 = vrot.slane %v21720_v32, 1 }
 0x303   : > { %v2764_v12 = vrot.slane %v21716_v17, 2  ;;  %v26067_v26 = vrot.slane %v21645_v50, 1  ;;  %v2543_v33 = vrot.slane %v21716_v17, 1  ;;  %v3015_v47 = vmax.bf16 %v2959_v9, %v2908_v34  ;;  %v2290_v15 = vpop.f32.mrb[51].mxu0 }
 0x304   : > { %v26068_v55 = vrot.slane %v21625_v14, 1  ;;  %v2383_v58 = vadd.f32 %v21450_v31, %v2337_v3  ;;  %v2338_v25 = vadd.f32 %v2290_v15, %v21445_v57  ;;  %v2850_v17 = vrot.slane %v21670_v63, 2 }
 0x305   : > { %v2539_v30 = vor.u32 %v21658_v27, %v26067_v26  ;;  %v21785_v4 = vor.u32 %v2764_v12, %v2763_v20  ;;  %v3086_v50 = vmax.bf16 %v3045_v38, %v3015_v47  ;;  %v2551_v27 = vrot.slane %v21762_v1, 1 }
 0x306   : > { %v2655_v53 = vsel %vm1595_vm1, %v26068_v55, %v2654_v6  ;;  %v2960_v34 = vrot.slane %v21765_v48, 2  ;;  %v2385_v9 = vadd.f32 %v21450_v31, %v2339_v16  ;;  %v2384_v26 = vadd.f32 %v21450_v31, %v2338_v25 }
 0x307   : > { %v2713_v24 = vmax.bf16 %v21689_v61, %v2655_v53  ;;  %v2766_v3 = vsel %vm1951_vm2, %v21684_v49, %v21785_v4  ;;  %v2961_v57 = vrot.slane %v21762_v1, 3  ;;  %16756 = vmatprep.subr.bf16.mxu1 %v3086_v50  ;;  %v2422_v61 = vmax.f32 %v2383_v58, 0.0 }
 0x308   : > { %v21797_v38 = vsel %vm2826_vm3, %v2848_v43, %v2850_v17  ;;  %v3046_v12 = vrot.slane %v21670_v63, 3  ;;  %16757 = vmatpush3.bf16.msra.mxu1 %v3078_v46  ;;  %v2423_v47 = vmax.f32 %v2384_v26, 0.0  ;;  %v2731_v16 = vrot.slane %v21550_v39, 1 }
 0x309   : > { %v2819_v20 = vmax.bf16 %v2766_v3, %v2713_v24  ;;  %v2962_v15 = vor.u32 %v2961_v57, %v2960_v34  ;;  %v2732_v31 = vrot.slane %v21546_v28, 2  ;;  %v21803_v55 = vor.u32 %v21720_v32, %v2543_v33 }
 0x30a   : > { %v3047_v58 = vsel %vm3024_vm4, %v3044_v7, %v3046_v12  ;;  %v2834_v25 = vrot.slane %v21502_v52, 2  ;;  %v21808_v43 = vpack.c.bf16 %v2423_v47, %v2422_v61  ;;  %v2928_v50 = vrot.slane %v21726_v21, 2 }
 0x30b   : > { %v2887_v49 = vmax.bf16 %v21735_v29, %v2819_v20  ;;  %v2963_v24 = vsel %vm2916_vm5, %v2958_v11, %v2962_v15  ;;  %v21811_v46 = vor.u32 %v2732_v31, %v2731_v16  ;;  %v26069_v32 = vrot.slane %v21509_v45, 2 }
 0x30c   : > { %v2929_v7 = vrot.slane %v21603_v0, 3  ;;  %v3030_v34 = vrot.slane %v21502_v52, 3  ;;  %v2699_v26 = vrot.slane %v21741_v60, 1  ;;  %v2424_v11 = vmax.f32 %v2385_v9, 0.0 }
 0x30d   : > { %v2909_v39 = vmax.bf16 %v2887_v49, %v21797_v38  ;;  %v21820_v29 = vsel %vm2826_vm3, %v26069_v32, %v2834_v25  ;;  %v21828_v3 = vor.u32 %v21765_v48, %v2551_v27  ;;  %v2734_v57 = vsel %vm1951_vm2, %v21519_v42, %v21811_v46 }
 0x30e   : > { %v26070_v20 = vmax.bf16 %v21524_v59, %v21635_v8  ;;  %v21836_v16 = vor.u32 %v2929_v7, %v2928_v50  ;;  %v26071_v9 = vrot.slane %v21509_v45, 3  ;;  %v2544_v49 = vsel %vm893_vm0, %v2539_v30, %v2543_v33 }
 0x30f   : > { %v3016_v61 = vmax.bf16 %v2963_v24, %v2909_v39  ;;  %v21845_v32 = vshll.u32 %v21707_v54, 16  ;;  %v21848_v42 = vshrl.u32 %v21707_v54, 16  ;;  %v2656_v24 = vrot.slane %v21670_v63, 1 }
 0x310   : > { %v2811_v47 = vmax.bf16 %v2734_v57, %v26070_v20  ;;  %v3031_v31 = vsel %vm3024_vm4, %v26071_v9, %v3030_v34  ;;  %v2931_v39 = vsel %vm2916_vm5, %v21592_v35, %v21836_v16  ;;  %v2608_v7 = vmax.bf16 %v2544_v49, %v21625_v14 }
 0x311   : > { %v3087_v59 = vmax.bf16 %v3047_v58, %v3016_v61  ;;  %v21856_v57 = vpack.c.bf16 %v2424_v11, %v2424_v11  ;;  %v2657_v30 = vsel %vm1595_vm1, %v2654_v6, %v2656_v24  ;;  %v2767_v33 = vrot.slane %v21765_v48, 1 }
 0x312   : > { %v2879_v50 = vmax.bf16 %v21560_v18, %v2811_v47  ;;  %v2768_v58 = vrot.slane %v21762_v1, 2  ;;  %v2692_v61 = vmax.bf16 %v2655_v53, %v2608_v7  ;;  %v2852_v35 = vrot.slane %v21707_v54, 2 }
 0x313   : > { %16758 = vmatprep.subr.bf16.mxu1 %v3087_v59  ;;  %v2964_v14 = vrot.slane %v21848_v42, 2  ;;  %v2895_v11 = vrot.slane %v21808_v43, 2  ;;  %v2965_v47 = vrot.slane %v21845_v32, 3  ;;  %v3048_v6 = vrot.slane %v21707_v54, 3 }
 0x314   : > { %v2901_v18 = vmax.bf16 %v2879_v50, %v21820_v29  ;;  %v21869_v20 = vor.u32 %v2768_v58, %v2767_v33  ;;  %v2714_v48 = vmax.bf16 %v2692_v61, %v2657_v30  ;;  %v21876_v49 = vsel %vm2826_vm3, %v2850_v17, %v2852_v35 }
 0x315   : > { %v26072_v53 = vrot.slane %v21546_v28, 1  ;;  %v21885_v7 = vor.u32 %v2965_v47, %v2964_v14  ;;  %v3049_v33 = vsel %vm3024_vm4, %v3046_v12, %v3048_v6  ;;  %v21892_v17 = vshrl.u32 %v21539_v22, 16 }
 0x316   : > { %v3008_v9 = vmax.bf16 %v2931_v39, %v2901_v18  ;;  %v2770_v50 = vsel %vm1951_vm2, %v21785_v4, %v21869_v20  ;;  %v21889_v39 = vshll.u32 %v21539_v22, 16  ;;  %v2640_v4 = vrot.slane %v21502_v52, 1 }
 0x317   : > { %v2480_v59 = vsel %vm893_vm0, %v21577_v44, %v26072_v53  ;;  %v2820_v18 = vmax.bf16 %v2770_v50, %v2714_v48  ;;  %v2981_v44 = vshrl.u32 %v21808_v43, 16  ;;  %v2967_v61 = vsel %vm2916_vm5, %v2962_v15, %v21885_v7 }
 0x318   : > { %v3079_v58 = vmax.bf16 %v3031_v31, %v3008_v9  ;;  %v2600_v28 = vmax.bf16 %v2480_v59, %v21470_v36  ;;  %v2735_v14 = vrot.slane %v21726_v21, 1  ;;  %v2736_v47 = vrot.slane %v21603_v0, 2 }
 0x319   : > { %v2888_v12 = vmax.bf16 %v21797_v38, %v2820_v18  ;;  %v2836_v9 = vrot.slane %v21539_v22, 2  ;;  %v2559_v36 = vrot.slane %v21845_v32, 1  ;;  %v26073_v48 = vrot.slane %v21509_v45, 1 }
 0x31a   : > { %16759 = vmatpush3.bf16.msra.mxu1 %v3079_v58  ;;  %v2684_v31 = vmax.bf16 %v21635_v8, %v2600_v28  ;;  %v2932_v53 = vrot.slane %v21892_v17, 2  ;;  %v2933_v21 = vrot.slane %v21889_v39, 3  ;;  %v2737_v8 = vor.u32 %v2736_v47, %v2735_v14 }
 0x31b   : > { %v2641_v15 = vsel %vm1595_vm1, %v26073_v48, %v2640_v4  ;;  %v2910_v38 = vmax.bf16 %v2888_v12, %v21876_v49  ;;  %v21918_v50 = vsel %vm2826_vm3, %v2834_v25, %v2836_v9  ;;  %v3032_v18 = vrot.slane %v21539_v22, 3 }
 0x31c   : > { %v2706_v59 = vmax.bf16 %v2684_v31, %v2641_v15  ;;  %v21920_v58 = vor.u32 %v2933_v21, %v2932_v53  ;;  %v2552_v28 = vsel %vm893_vm0, %v21803_v55, %v2551_v27  ;;  %v21928_v12 = vshll.u32 %v21703_v10, 16 }
 0x31d   : > { %v3017_v14 = vmax.bf16 %v2967_v61, %v2910_v38  ;;  %v2738_v31 = vsel %vm1951_vm2, %v21811_v46, %v2737_v8  ;;  %v21933_v47 = vshrl.u32 %v21703_v10, 16  ;;  %v2609_v25 = vmax.bf16 %v2552_v28, %v21674_v23 }
 0x31e   : > { %v21939_v48 = vor.u32 %v21848_v42, %v2559_v36  ;;  %v2812_v1 = vmax.bf16 %v2738_v31, %v2706_v59  ;;  %v2935_v27 = vsel %vm2916_vm5, %v21836_v16, %v21920_v58  ;;  %v3033_v55 = vsel %vm3024_vm4, %v3030_v34, %v3032_v18 }
 0x31f   : > { %v3088_v46 = vmax.bf16 %v3049_v33, %v3017_v14  ;;  %v2658_v61 = vrot.slane %v21707_v54, 1  ;;  %v2693_v23 = vmax.bf16 %v2657_v30, %v2609_v25  ;;  %v2771_v53 = vrot.slane %v21848_v42, 1 }
 0x320   : > { %v2495_v21 = vrot.slane %v21889_v39, 1  ;;  %v2880_v38 = vmax.bf16 %v21820_v29, %v2812_v1  ;;  %v2772_v59 = vrot.slane %v21845_v32, 2  ;;  %v2854_v16 = vrot.slane %v21703_v10, 2 }
 0x321   : > { %16760 = vmatprep.subr.bf16.mxu1 %v3088_v46  ;;  %v2659_v34 = vsel %vm1595_vm1, %v2656_v24, %v2658_v61  ;;  %v2968_v33 = vrot.slane %v21933_v47, 2  ;;  %v2969_v30 = vrot.slane %v21928_v12, 3  ;;  %v3050_v42 = vrot.slane %v21703_v10, 3 }
 0x322   : > { %v2902_v28 = vmax.bf16 %v2880_v38, %v21918_v50  ;;  %v2715_v29 = vmax.bf16 %v2693_v23, %v2659_v34  ;;  %v2773_v14 = vor.u32 %v2772_v59, %v2771_v53  ;;  %v21969_v31 = vsel %vm2826_vm3, %v2852_v35, %v2854_v16 }
 0x323   : > { %v21971_v25 = vor.u32 %v2969_v30, %v2968_v33  ;;  %v3051_v24 = vsel %vm3024_vm4, %v3048_v6, %v3050_v42  ;;  %v26074_v1 = vrot.slane %v21603_v0, 1  ;;  %v21981_v23 = vshll.u32 %v21536_v40, 16 }
 0x324   : > { %v3009_v53 = vmax.bf16 %v2935_v27, %v2902_v28  ;;  %v2774_v38 = vsel %vm1951_vm2, %v21869_v20, %v2773_v14  ;;  %v21986_v35 = vshrl.u32 %v21536_v40, 16  ;;  %v21992_v6 = vor.u32 %v21892_v17, %v2495_v21 }
 0x325   : > { %v2488_v46 = vsel %vm893_vm0, %v21746_v62, %v26074_v1  ;;  %v2821_v0 = vmax.bf16 %v2774_v38, %v2715_v29  ;;  %v2971_v62 = vsel %vm2916_vm5, %v21885_v7, %v21971_v25  ;;  %v2642_v27 = vrot.slane %v21539_v22, 1 }
 0x326   : > { %v2601_v59 = vmax.bf16 %v2488_v46, %v21509_v45  ;;  %v3080_v33 = vmax.bf16 %v3033_v55, %v3009_v53  ;;  %v2739_v20 = vrot.slane %v21892_v17, 1  ;;  %v2740_v28 = vrot.slane %v21889_v39, 2 }
 0x327   : > { %v2567_v45 = vrot.slane %v21928_v12, 1  ;;  %v2889_v1 = vmax.bf16 %v21876_v49, %v2821_v0  ;;  %v2643_v29 = vsel %vm1595_vm1, %v2640_v4, %v2642_v27  ;;  %v2838_v46 = vrot.slane %v21536_v40, 2 }
 0x328   : > { %v2685_v30 = vmax.bf16 %v2641_v15, %v2601_v59  ;;  %16761 = vmatpush3.bf16.msra.mxu1 %v3080_v33  ;;  %v2741_v38 = vor.u32 %v2740_v28, %v2739_v20  ;;  %v2936_v55 = vrot.slane %v21986_v35, 2  ;;  %v2937_v15 = vrot.slane %v21981_v23, 3 }
 0x329   : > { %v2911_v17 = vmax.bf16 %v2889_v1, %v21969_v31  ;;  %v22014_v49 = vsel %vm2826_vm3, %v2836_v9, %v2838_v46  ;;  %v3034_v4 = vrot.slane %v21536_v40, 3  ;;  %v2560_v53 = vsel %vm893_vm0, %v21828_v3, %v2559_v36 }
 0x32a   : > { %v2707_v7 = vmax.bf16 %v2685_v30, %v2643_v29  ;;  %v2742_v59 = vsel %vm1951_vm2, %v2737_v8, %v2741_v38  ;;  %v22022_v0 = vor.u32 %v2937_v15, %v2936_v55  ;;  %v22025_v33 = vshll.u32 %v21752_v2, 16 }
 0x32b   : > { %v22028_v30 = vshrl.u32 %v21752_v2, 16  ;;  %v3018_v20 = vmax.bf16 %v2971_v62, %v2911_v17  ;;  %v3035_v32 = vsel %vm3024_vm4, %v3032_v18, %v3034_v4  ;;  %v2610_v3 = vmax.bf16 %v2560_v53, %v21670_v63 }
 0x32c   : > { %v2813_v9 = vmax.bf16 %v2742_v59, %v2707_v7  ;;  %v22039_v36 = vor.u32 %v21933_v47, %v2567_v45  ;;  %v2939_v8 = vsel %vm2916_vm5, %v21920_v58, %v22022_v0  ;;  %v2660_v62 = vrot.slane %v21703_v10, 1 }
 0x32d   : > { %v2775_v28 = vrot.slane %v21933_v47, 1  ;;  %v3089_v1 = vmax.bf16 %v3051_v24, %v3018_v20  ;;  %v2694_v55 = vmax.bf16 %v2659_v34, %v2610_v3  ;;  %v2776_v18 = vrot.slane %v21928_v12, 2 }
 0x32e   : > { %v2881_v7 = vmax.bf16 %v21918_v50, %v2813_v9  ;;  %v2503_v63 = vrot.slane %v21981_v23, 1  ;;  %v2661_v15 = vsel %vm1595_vm1, %v2658_v61, %v2660_v62  ;;  %v2856_v17 = vrot.slane %v21752_v2, 2 }
 0x32f   : > { %v2972_v58 = vrot.slane %v22028_v30, 2  ;;  %16762 = vmatprep.subr.bf16.mxu1 %v3089_v1  ;;  %v2716_v47 = vmax.bf16 %v2694_v55, %v2661_v15  ;;  %v2777_v24 = vor.u32 %v2776_v18, %v2775_v28  ;;  %v2973_v50 = vrot.slane %v22025_v33, 3 }
 0x330   : > { %v2903_v53 = vmax.bf16 %v2881_v7, %v22014_v49  ;;  %v22059_v34 = vsel %vm2826_vm3, %v2854_v16, %v2856_v17  ;;  %v3052_v59 = vrot.slane %v21752_v2, 3  ;;  %v2496_v61 = vsel %vm893_vm0, %v21758_v37, %v2495_v21 }
 0x331   : > { %v2644_v20 = vrot.slane %v21536_v40, 1  ;;  %v2778_v3 = vsel %vm1951_vm2, %v2773_v14, %v2777_v24  ;;  %v22068_v28 = vor.u32 %v2973_v50, %v2972_v58  ;;  %v2602_v1 = vmax.bf16 %v2496_v61, %v21502_v52 }
 0x332   : > { %v3010_v9 = vmax.bf16 %v2939_v8, %v2903_v53  ;;  %v2822_v7 = vmax.bf16 %v2778_v3, %v2716_v47  ;;  %v3053_v16 = vsel %vm3024_vm4, %v3050_v42, %v3052_v59  ;;  %v2743_v39 = vrot.slane %v21986_v35, 1 }
 0x333   : > { %v2645_v55 = vsel %vm1595_vm1, %v2642_v27, %v2644_v20  ;;  %v2975_v37 = vsel %vm2916_vm5, %v21971_v25, %v22068_v28  ;;  %v2686_v21 = vmax.bf16 %v2643_v29, %v2602_v1  ;;  %v2744_v14 = vrot.slane %v21981_v23, 2 }
 0x334   : > { %v3081_v18 = vmax.bf16 %v3035_v32, %v3010_v9  ;;  %v2890_v8 = vmax.bf16 %v21969_v31, %v2822_v7  ;;  %v2840_v52 = vrot.slane %v21572_v41, 2  ;;  %v2940_v58 = vrot.slane %v21607_v19, 2 }
 0x335   : > { %v2941_v42 = vrot.slane %v21595_v56, 3  ;;  %v2708_v27 = vmax.bf16 %v2686_v21, %v2645_v55  ;;  %v2745_v53 = vor.u32 %v2744_v14, %v2743_v39  ;;  %v3036_v32 = vrot.slane %v21572_v41, 3 }
 0x336   : > { %16763 = vmatpush3.bf16.msra.mxu1 %v3081_v18  ;;  %v2568_v25 = vsel %vm893_vm0, %v21939_v48, %v2567_v45  ;;  %v2575_v29 = vrot.slane %v22025_v33, 1  ;;  %v2912_v31 = vmax.bf16 %v2890_v8, %v22059_v34  ;;  %v22096_v47 = vsel %vm2826_vm3, %v2838_v46, %v2840_v52 }
 0x337   : > { %v2611_v50 = vmax.bf16 %v2568_v25, %v21707_v54  ;;  %v2746_v61 = vsel %vm1951_vm2, %v2741_v38, %v2745_v53  ;;  %v22100_v9 = vor.u32 %v2941_v42, %v2940_v58  ;;  %v22103_v12 = vrot.slane %v21752_v2, 1 }
 0x338   : > { %v2779_v48 = vrot.slane %v22028_v30, 1  ;;  %v3019_v45 = vmax.bf16 %v2975_v37, %v2912_v31  ;;  %v2814_v3 = vmax.bf16 %v2746_v61, %v2708_v27  ;;  %v3037_v46 = vsel %vm3024_vm4, %v3034_v4, %v3036_v32 }
 0x339   : > { %v2695_v1 = vmax.bf16 %v2661_v15, %v2611_v50  ;;  %v2663_v54 = vsel %vm1595_vm1, %v2660_v62, %v22103_v12  ;;  %v2780_v38 = vrot.slane %v22025_v33, 2  ;;  %v2784_v7 = vshrl.u32 %v21741_v60, 16 }
 0x33a   : > { %v2787_v39 = vshll.u32 %v21741_v60, 16  ;;  %v3090_v18 = vmax.bf16 %v3053_v16, %v3019_v45  ;;  %v2882_v37 = vmax.bf16 %v22014_v49, %v2814_v3  ;;  %v22118_v14 = vrot.slane %v21741_v60, 2 }
 0x33b   : > { %v2717_v21 = vmax.bf16 %v2695_v1, %v2663_v54  ;;  %v2943_v4 = vsel %vm2916_vm5, %v22022_v0, %v22100_v9  ;;  %v2781_v15 = vor.u32 %v2780_v38, %v2779_v48  ;;  %v2786_v8 = vrot.slane %v2784_v7, 1 }
 0x33c   : > { %v2976_v62 = vrot.slane %v2784_v7, 2  ;;  %16764 = vmatprep.subr.bf16.mxu1 %v3090_v18  ;;  %v2904_v33 = vmax.bf16 %v2882_v37, %v22096_v47  ;;  %v22126_v58 = vsel %vm2826_vm3, %v2856_v17, %v22118_v14  ;;  %v2977_v16 = vrot.slane %v2787_v39, 3 }
 0x33d   : > { %v3054_v49 = vrot.slane %v21741_v60, 3  ;;  %v2782_v42 = vsel %vm1951_vm2, %v2777_v24, %v2781_v15  ;;  %v2789_v27 = vrot.slane %v2787_v39, 2  ;;  %v2504_v0 = vsel %vm893_vm0, %v21992_v6, %v2503_v63 }
 0x33e   : > { %v2747_v25 = vrot.slane %v21607_v19, 1  ;;  %v3011_v31 = vmax.bf16 %v2943_v4, %v2904_v33  ;;  %v2823_v50 = vmax.bf16 %v2782_v42, %v2717_v21  ;;  %v2978_v61 = vor.u32 %v2977_v16, %v2976_v62 }
 0x33f   : > { %v3055_v48 = vsel %vm3024_vm4, %v3052_v59, %v3054_v49  ;;  %v2603_v17 = vmax.bf16 %v2504_v0, %v21539_v22  ;;  %v26075_v45 = vrot.slane %v21572_v41, 1  ;;  %v2748_v24 = vrot.slane %v21595_v56, 2 }
 0x340   : > { %v2944_v1 = vrot.slane %v21590_v13, 2  ;;  %v3082_v38 = vmax.bf16 %v3037_v46, %v3011_v31  ;;  %v2891_v6 = vmax.bf16 %v22059_v34, %v2823_v50  ;;  %v2979_v19 = vsel %vm2916_vm5, %v22068_v28, %v2978_v61 }
 0x341   : > { %v2647_v3 = vsel %vm1595_vm1, %v2644_v20, %v26075_v45  ;;  %v2945_v7 = vrot.slane %v21587_v5, 3  ;;  %v2984_v59 = vshll.u32 %v21808_v43, 16  ;;  %v2687_v39 = vmax.bf16 %v2645_v55, %v2603_v17 }
 0x342   : > { %v2749_v22 = vor.u32 %v2748_v24, %v2747_v25  ;;  %v2576_v18 = vsel %vm893_vm0, %v22039_v36, %v2575_v29  ;;  %v2507_v20 = vor.u32 %v21986_v35, %v2503_v63  ;;  %16765 = vmatpush3.bf16.msra.mxu1 %v3082_v38  ;;  %v2913_v13 = vmax.bf16 %v2891_v6, %v22126_v58 }
 0x343   : > { %v2612_v34 = vmax.bf16 %v2576_v18, %v21703_v10  ;;  %v2700_v5 = vsel %vm1595_vm1, %v22103_v12, %v2699_v26  ;;  %v2579_v28 = vor.u32 %v22028_v30, %v2575_v29  ;;  %v2709_v55 = vmax.bf16 %v2687_v39, %v2647_v3  ;;  %v26081_v39 = vld [vmem:[#allocation22_spill] sm:$0xff] }
 0x344   : > { %v2750_v46 = vsel %vm1951_vm2, %v2745_v53, %v2749_v22  ;;  %v2790_v36 = vor.u32 %v2789_v27, %v2786_v8  ;;  %v3020_v37 = vmax.bf16 %v2979_v19, %v2913_v13  ;;  %v2946_v23 = vor.u32 %v2945_v7, %v2944_v1  ;;  %v26080_v7 = vld [vmem:[#allocation21_spill] sm:$0xff] }
 0x345   : > { %v2696_v21 = vmax.bf16 %v2663_v54, %v2612_v34  ;;  %v2896_v35 = vsel %vm2826_vm3, %v22118_v14, %v2895_v11  ;;  %v2815_v10 = vmax.bf16 %v2750_v46, %v2709_v55  ;;  %v2983_v4 = vrot.slane %v2981_v44, 2  ;;  %v19544_v55 = vld [vmem:[#allocation9] ss:$12 sps:$4 sm:$0xff]  }
 0x346   : > { %v2791_v63 = vsel %vm1951_vm2, %v2781_v15, %v2790_v36  ;;  %v2986_v62 = vrot.slane %v2984_v59, 3  ;;  %v3091_v30 = vmax.bf16 %v3055_v48, %v3020_v37  ;;  %v3056_v53 = vrot.slane %v21808_v43, 3  ;;  %v19547_v37 = vld [vmem:[#allocation9 + $0x1c] ss:$12 sps:$4 sm:$0xff]   ;;  %v19549_v43 = vld [vmem:[#allocation9 + $0x18] ss:$12 sps:$4 sm:$0xff]  }
 0x347   : > { %v2718_v29 = vmax.bf16 %v2700_v5, %v2696_v21  ;;  %v26076_v8 = vrot.slane %v21595_v56, 1  ;;  %v3058_v33 = vrot.slane %v21856_v57, 3  ;;  %v2883_v16 = vmax.bf16 %v22096_v47, %v2815_v10  ;;  %v19552_v21 = vld [vmem:[#allocation9 + $0x30] ss:$12 sps:$4 sm:$0xff]   ;;  %v19555_v10 = vld [vmem:[#allocation9 + $0x48] ss:$12 sps:$4 sm:$0xff]  }
 0x348   : > { %v2987_v42 = vor.u32 %v2986_v62, %v2983_v4  ;;  %16766 = vmatprep.subr.bf16.mxu1 %v3091_v30  ;;  %v26077_v15 = vrot.slane %v21568_v51, 2  ;;  %v3038_v0 = vrot.slane %v21568_v51, 3  ;;  %v3057_v56 = vsel %vm3024_vm4, %v3054_v49, %v3056_v53  ;;  %v19558_v4 = vld [vmem:[#allocation9 + $0x60] ss:$12 sps:$4 sm:$0xff]   ;;  %v19559_v62 = vld [vmem:[#allocation9 + $0x7c] ss:$12 sps:$4 sm:$0xff]  }
 0x349   : > { %v2512_v54 = vsel %vm893_vm0, %v2507_v20, %v26076_v8  ;;  %v2824_v25 = vmax.bf16 %v2791_v63, %v2718_v29  ;;  %v2947_v47 = vsel %vm2916_vm5, %v22100_v9, %v2946_v23  ;;  %v2613_v48 = vmax.bf16 %v2579_v28, %v21752_v2  ;;  %v26082_v20 = vld [vmem:[#allocation19_spill] sm:$0xff]  ;;  %v19562_v29 = vld [vmem:[#allocation9 + $0x94] ss:$12 sps:$4 sm:$0xff]   ;;  %v19565_v8 = vld [vmem:[#allocation9 + $0xac] ss:$12 sps:$4 sm:$0xff]  }
 0x34a   : > { %v2604_v27 = vmax.bf16 %v2512_v54, %v21536_v40  ;;  %v2843_v44 = vsel %vm2826_vm3, %v2840_v52, %v26077_v15  ;;  %v2988_v57 = vsel %vm2916_vm5, %v2978_v61, %v2987_v42  ;;  %v3059_v17 = vsel %vm3024_vm4, %v3056_v53, %v3058_v33  ;;  %v26078_v52 = vld [vmem:[#allocation18_spill] sm:$0xff]  ;;  %v19556_v63 = vld [vmem:[#allocation9 + $0x64] ss:$12 sps:$4 sm:$0xff]   ;;  %v19567_v54 = vld [vmem:[#allocation9 + $0xa8] ss:$12 sps:$4 sm:$0xff]  }
 0x34b   : > { %v2905_v31 = vmax.bf16 %v2883_v16, %v2843_v44  ;;  %v2892_v40 = vmax.bf16 %v22126_v58, %v2824_v25  ;;  %v25988_v45 = vmov 0.0   ;;  %v3039_v49 = vsel %vm3024_vm4, %v3036_v32, %v3038_v0  ;;  %v19561_v30 = vld [vmem:[#allocation9 + $0x78] ss:$12 sps:$4 sm:$0xff]   ;;  %v19564_v53 = vld [vmem:[#allocation9 + $0x90] ss:$12 sps:$4 sm:$0xff]  }
 0x34c   : > { %v2688_v50 = vmax.bf16 %v2647_v3, %v2604_v27  ;;  %18416 = vmatprep.subr.bf16.mxu0 %v25988_v45  ;;  %v26079_v3 = vld [vmem:[#allocation20_spill] sm:$0xff]  ;;  %v2697_v58 = vmax.bf16 %v22103_v12, %v2613_v48  ;;  %18432 = vmatprep.mubr.msk.bf16.mxu0 %vm20472_vm6, %v25988_v45  ;;  %v2951_v12 = vsel %vm2916_vm5, %v2946_v23, %v26081_v39  ;;  %v26083_v13 = vrot.slane %v26082_v20, 3  ;;  %v19573_v15 = vld [vmem:[#allocation9 + $0x38] ss:$12 sps:$4 sm:$0xff]  }
 0x34d   : > { %v3012_v51 = vmax.bf16 %v2947_v47, %v2905_v31  ;;  %v2914_v61 = vmax.bf16 %v2896_v35, %v2892_v40  ;;  %v2754_v9 = vsel %vm1951_vm2, %v2749_v22, %v26079_v3  ;;  %v19553_v35 = vld [vmem:[#allocation9 + $0x4c] ss:$12 sps:$4 sm:$0xff]   ;;  %v19568_v33 = vld [vmem:[#allocation9 + $0xc4] ss:$12 sps:$4 sm:$0xff]   ;;  %v19579_v47 = vld [vmem:[#allocation9 + $0xc8] ss:$12 sps:$4 sm:$0xff]  }
 0x34e   : > { %v2710_v24 = vmax.bf16 %v2688_v50, %v26078_v52  ;;  %v2719_v6 = vmax.bf16 %v2699_v26, %v2697_v58  ;;  %v3041_v34 = vsel %vm3024_vm4, %v3038_v0, %v26083_v13  ;;  %v25987_v26 = vmov 65535   ;;  %v19570_v16 = vld [vmem:[#allocation9 + $0xc0] ss:$12 sps:$4 sm:$0xff]   ;;  %v19575_v0 = vld [vmem:[#allocation9 + $0x68] ss:$12 sps:$4 sm:$0xff]   ;;  %v19580_v31 = vld [vmem:[%s26084_s29 + $0x40] sm:$0xff]  }
 0x34f   : > { %v3083_v2 = vmax.bf16 %v3039_v49, %v3012_v51  ;;  %v3021_v38 = vmax.bf16 %v2988_v57, %v2914_v61  ;;  %v3295_v5 = vsel %vm3024_vm4, 4294967295, %v25987_v26  ;;  %v19572_v27 = vld [vmem:[#allocation9 + $0x20] ss:$12 sps:$4 sm:$0xff]   ;;  %v19578_v57 = vld [vmem:[#allocation9 + $0xb0] ss:$12 sps:$4 sm:$0xff]  }
 0x350   : > { %v2816_v1 = vmax.bf16 %v2754_v9, %v2710_v24  ;;  %v2825_v32 = vmax.bf16 %v2790_v36, %v2719_v6  ;;  %v3296_v36 = vsel %vm2826_vm3, %v3295_v5, 0  ;;  %v19576_v25 = vld [vmem:[#allocation9 + $0x80] ss:$12 sps:$4 sm:$0xff]   ;;  %v19583_v48 = vld [vmem:[%s26084_s29 + $0x58] sm:$0xff]   ;;  %v22266_v49 = vld [vmem:[%s26084_s29] sm:$0xff]  }
 0x351   : > { %16767 = vmatpush3.bf16.msra.mxu1 %v3083_v2  ;;  %v3092_v19 = vmax.bf16 %v3057_v56, %v3021_v38  ;;  %v19577_v56 = vld [vmem:[#allocation9 + $0x98] ss:$12 sps:$4 sm:$0xff]   ;;  %v19582_v40 = vld [vmem:[%s26084_s29 + $0x50] sm:$0xff]   ;;  %v19587_v24 = vld [vmem:[%s26084_s29 + $0x78] sm:$0xff]  }
 0x352   : > { %v2884_v41 = vmax.bf16 %v2843_v44, %v2816_v1  ;;  %v2893_v22 = vmax.bf16 %v22118_v14, %v2825_v32  ;;  %v19574_v44 = vld [vmem:[#allocation9 + $0x50] ss:$12 sps:$4 sm:$0xff]   ;;  %v19581_v50 = vld [vmem:[%s26084_s29 + $0x48] sm:$0xff]   ;;  %v19586_v52 = vld [vmem:[%s26084_s29 + $0x70] sm:$0xff]  }
 0x353   : > { %16768 = vmatprep.subr.bf16.mxu1 %v3092_v19  ;;  %v19585_v51 = vld [vmem:[%s26084_s29 + $0x68] sm:$0xff]  }
 0x354   : > { %v2906_v59 = vmax.bf16 %v2884_v41, %v26080_v7  ;;  %v2915_v60 = vmax.bf16 %v2895_v11, %v2893_v22  ;;  %v19550_v11 = vld [vmem:[#allocation9 + $0x34] ss:$12 sps:$4 sm:$0xff]  }
 0x356   : > { %v3013_v18 = vmax.bf16 %v2951_v12, %v2906_v59  ;;  %v3022_v46 = vmax.bf16 %v2987_v42, %v2915_v60  ;;  %v19571_v42 = vld [vmem:[#allocation9 + $0x8] ss:$12 sps:$4 sm:$0xff]  }
 0x358   : > { %v3084_v28 = vmax.bf16 %v3041_v34, %v3013_v18  ;;  %v3093_v14 = vmax.bf16 %v3059_v17, %v3022_v46  ;;  %v19584_v17 = vld [vmem:[%s26084_s29 + $0x60] sm:$0xff]  }
 0x35a   : > { %16769 = vmatpush3.bf16.msra.mxu1 %v3084_v28  ;;  %v3298_v23 = vand.u32 %v3296_v36, %v3093_v14 }
 0x35b   : > { %17664 = vmatprep.subr.bf16.mxu1 %v25988_v45 }
 0x35d   : > { %3333 = vmatmul.mubr.bf16.vlgmr.msra.gmra.mrb[0].mxu1 %v19544_v55 }
 0x35e   : > { %3340 = vmatprep.mubr.bf16.mxu1 %v19547_v37  ;;  %17665 = vmatpush3.bf16.msra.mxu1 %v3298_v23 }
 0x35f   : > { %17702 = vmatprep.subr.bf16.mxu1 %v19580_v31 }
 0x365   : > { %3341 = vmatmul.mubr.bf16.gmra.mrb[4].mxu1 %v19549_v43 }
 0x366   : > { %3348 = vmatprep.mubr.bf16.mxu1 %v19550_v11 }
 0x36d   : > { %3349 = vmatmul.mubr.bf16.gmra.mrb[8].mxu1 %v19552_v21 }
 0x36e   : > { %3356 = vmatprep.mubr.bf16.mxu1 %v19553_v35 }
 0x375   : > { %3357 = vmatmul.mubr.bf16.gmra.mrb[12].mxu1 %v19555_v10 }
 0x376   : > { %3364 = vmatprep.mubr.bf16.mxu1 %v19556_v63 }
 0x37d   : > { %3365 = vmatmul.mubr.bf16.gmra.mrb[16].mxu1 %v19558_v4 }
 0x37e   : > { %3372 = vmatprep.mubr.bf16.mxu1 %v19559_v62 }
 0x385   : > { %3373 = vmatmul.mubr.bf16.gmra.mrb[20].mxu1 %v19561_v30 }
 0x386   : > { %3380 = vmatprep.mubr.bf16.mxu1 %v19562_v29 }
 0x38d   : > { %3381 = vmatmul.mubr.bf16.gmra.mrb[24].mxu1 %v19564_v53 }
 0x38e   : > { %3388 = vmatprep.mubr.bf16.mxu1 %v19565_v8 }
 0x395   : > { %3389 = vmatmul.mubr.bf16.gmra.mrb[28].mxu1 %v19567_v54 }
 0x396   : > { %3396 = vmatprep.mubr.bf16.mxu1 %v19568_v33 }
 0x39d   : > { %3397 = vmatmul.mubr.bf16.gmra.mrb[32].mxu1 %v19570_v16 }
 0x39e   : > { %17666 = vmatprep.mubr.msk.bf16.mxu1 %vm20472_vm6, %v25988_v45 }
 0x3a5   : > { %17667 = vmatmul.mubr.msk.bf16.vlgmr.msra.gmra.mrb[36].mxu1 %vm3265_vm7, %v19571_v42 }
 0x3a6   : > { %17670 = vmatprep.mubr.msk.bf16.mxu1 %vm20472_vm6, %v25988_v45  ;;  %17703 = vmatpush3.bf16.msra.mxu1 %v19580_v31 }
 0x3a7   : > { %17704 = vmatprep.subr.bf16.mxu1 %v19581_v50 }
 0x3aa   : > { %17705 = vmatpush3.bf16.msra.mxu1 %v19581_v50 }
 0x3ab   : > { %17706 = vmatprep.subr.bf16.mxu1 %v19582_v40 }
 0x3ad   : > { %17671 = vmatmul.mubr.msk.bf16.gmra.mrb[40].mxu1 %vm3265_vm7, %v19572_v27 }
 0x3ae   : > { %17674 = vmatprep.mubr.msk.bf16.mxu1 %vm20472_vm6, %v25988_v45  ;;  %17707 = vmatpush3.bf16.msra.mxu1 %v19582_v40 }
 0x3af   : > { %17708 = vmatprep.subr.bf16.mxu1 %v19583_v48 }
 0x3b2   : > { %17709 = vmatpush3.bf16.msra.mxu1 %v19583_v48 }
 0x3b3   : > { %17710 = vmatprep.subr.bf16.mxu1 %v19584_v17 }
 0x3b5   : > { %17675 = vmatmul.mubr.msk.bf16.gmra.mrb[44].mxu1 %vm3265_vm7, %v19573_v15 }
 0x3b6   : > { %17678 = vmatprep.mubr.msk.bf16.mxu1 %vm20472_vm6, %v25988_v45  ;;  %17711 = vmatpush3.bf16.msra.mxu1 %v19584_v17 }
 0x3b7   : > { %17712 = vmatprep.subr.bf16.mxu1 %v19585_v51 }
 0x3ba   : > { %17713 = vmatpush3.bf16.msra.mxu1 %v19585_v51 }
 0x3bb   : > { %17714 = vmatprep.subr.bf16.mxu1 %v19586_v52 }
 0x3bd   : > { %17679 = vmatmul.mubr.msk.bf16.gmra.mrb[48].mxu1 %vm3265_vm7, %v19574_v44 }
 0x3be   : > { %17682 = vmatprep.mubr.msk.bf16.mxu1 %vm20472_vm6, %v25988_v45  ;;  %17715 = vmatpush3.bf16.msra.mxu1 %v19586_v52 }
 0x3bf   : > { %17716 = vmatprep.subr.bf16.mxu1 %v19587_v24 }
 0x3c2   : > { %17717 = vmatpush3.bf16.msra.mxu1 %v19587_v24 }
 0x3c3   : > { %17730 = vmatprep.subr.bf16.mxu1 %v22266_v49 }
 0x3c5   : > { %17683 = vmatmul.mubr.msk.bf16.gmra.mrb[52].mxu1 %vm3265_vm7, %v19575_v0 }
 0x3c6   : > { %17686 = vmatprep.mubr.msk.bf16.mxu1 %vm20472_vm6, %v25988_v45 }
 0x3cd   : > { %17687 = vmatmul.mubr.msk.bf16.gmra.mrb[56].mxu1 %vm3265_vm7, %v19576_v25 }
 0x3ce   : > { %17690 = vmatprep.mubr.msk.bf16.mxu1 %vm20472_vm6, %v25988_v45 }
 0x3d5   : > { %17691 = vmatmul.mubr.msk.bf16.gmra.mrb[60].mxu1 %vm3265_vm7, %v19577_v56 }
 0x3d6   : > { %17694 = vmatprep.mubr.msk.bf16.mxu1 %vm20472_vm6, %v25988_v45 }
 0x3dd   : > { %17695 = vmatmul.mubr.msk.bf16.gmra.mrb[64].mxu1 %vm3265_vm7, %v19578_v57 }
 0x3de   : > { %17698 = vmatprep.mubr.msk.bf16.mxu1 %vm20472_vm6, %v25988_v45 }
 0x3e5   : > { %17699 = vmatmul.mubr.msk.bf16.gmra.mrb[68].mxu1 %vm3265_vm7, %v19579_v47  ;;  %vm5695_vm7 = vcmask 1042432  }
 0x430   : > { %v16770_v61 = vpop.f32.mrb[0].mxu1 }
 0x431   : > { %v16771_v3 = vpop.f32.mrb[1].mxu1 }
 0x432   : > { %v16772_v9 = vadd.f32 %v16771_v3, %v16770_v61  ;;  %v16773_v58 = vpop.f32.mrb[2].mxu1 }
 0x433   : > { %v16774_v2 = vpop.f32.mrb[3].mxu1 }
 0x434   : > { %v16775_v1 = vadd.f32 %v16774_v2, %v16773_v58 }
 0x438   : > { %v16776_v38 = vpop.f32.mrb[4].mxu1 }
 0x439   : > { %v16777_v6 = vpop.f32.mrb[5].mxu1 }
 0x43a   : > { %v16778_v41 = vadd.f32 %v16777_v6, %v16776_v38  ;;  %v16779_v19 = vpop.f32.mrb[6].mxu1 }
 0x43b   : > { %v16780_v32 = vpop.f32.mrb[7].mxu1 }
 0x43c   : > { %v16781_v7 = vadd.f32 %v16780_v32, %v16779_v19 }
 0x440   : > { %v16782_v59 = vpop.f32.mrb[8].mxu1 }
 0x441   : > { %v16783_v39 = vpop.f32.mrb[9].mxu1 }
 0x442   : > { %v22269_v12 = vadd.f32 %v16783_v39, %v16782_v59  ;;  %v16785_v22 = vpop.f32.mrb[10].mxu1 }
 0x443   : > { %v16786_v18 = vpop.f32.mrb[11].mxu1 }
 0x444   : > { %v22271_v20 = vadd.f32 %v16786_v18, %v16785_v22 }
 0x448   : > { %v16788_v13 = vpop.f32.mrb[12].mxu1 }
 0x449   : > { %v16789_v34 = vpop.f32.mrb[13].mxu1 }
 0x44a   : > { %v22273_v60 = vadd.f32 %v16789_v34, %v16788_v13  ;;  %v16791_v5 = vpop.f32.mrb[14].mxu1 }
 0x44b   : > { %v16792_v28 = vpop.f32.mrb[15].mxu1 }
 0x44c   : > { %v22275_v55 = vadd.f32 %v16792_v28, %v16791_v5 }
 0x450   : > { %v16794_v46 = vpop.f32.mrb[16].mxu1 }
 0x451   : > { %v16795_v36 = vpop.f32.mrb[17].mxu1 }
 0x452   : > { %v22277_v37 = vadd.f32 %v16795_v36, %v16794_v46  ;;  %v16797_v14 = vpop.f32.mrb[18].mxu1 }
 0x453   : > { %v16798_v23 = vpop.f32.mrb[19].mxu1 }
 0x454   : > { %v22279_v43 = vadd.f32 %v16798_v23, %v16797_v14 }
 0x458   : > { %v16800_v11 = vpop.f32.mrb[20].mxu1 }
 0x459   : > { %v16801_v21 = vpop.f32.mrb[21].mxu1 }
 0x45a   : > { %v22281_v35 = vadd.f32 %v16801_v21, %v16800_v11  ;;  %v16803_v10 = vpop.f32.mrb[22].mxu1 }
 0x45b   : > { %v16804_v63 = vpop.f32.mrb[23].mxu1 }
 0x45c   : > { %v22283_v4 = vadd.f32 %v16804_v63, %v16803_v10 }
 0x460   : > { %v16806_v62 = vpop.f32.mrb[24].mxu1 }
 0x461   : > { %v16807_v30 = vpop.f32.mrb[25].mxu1 }
 0x462   : > { %v22285_v29 = vadd.f32 %v16807_v30, %v16806_v62  ;;  %v16809_v53 = vpop.f32.mrb[26].mxu1 }
 0x463   : > { %v16810_v8 = vpop.f32.mrb[27].mxu1 }
 0x464   : > { %v22287_v54 = vadd.f32 %v16810_v8, %v16809_v53 }
 0x468   : > { %v16812_v33 = vpop.f32.mrb[28].mxu1 }
 0x469   : > { %v16813_v16 = vpop.f32.mrb[29].mxu1 }
 0x46a   : > { %v22289_v42 = vadd.f32 %v16813_v16, %v16812_v33  ;;  %v16815_v27 = vpop.f32.mrb[30].mxu1 }
 0x46b   : > { %v16816_v15 = vpop.f32.mrb[31].mxu1 }
 0x46c   : > { %v22291_v44 = vadd.f32 %v16816_v15, %v16815_v27 }
 0x470   : > { %v16818_v0 = vpop.f32.mrb[32].mxu1 }
 0x471   : > { %v16819_v25 = vpop.f32.mrb[33].mxu1 }
 0x472   : > { %v22293_v56 = vadd.f32 %v16819_v25, %v16818_v0  ;;  %v16821_v31 = vpop.f32.mrb[34].mxu1 }
 0x473   : > { %v16822_v57 = vpop.f32.mrb[35].mxu1 }
 0x474   : > { %v22295_v50 = vadd.f32 %v16822_v57, %v16821_v31 }
 0x478   : > { %v3439_v47 = vpop.f32.mrb[36].mxu1 }
 0x479   : > { %v3440_v40 = vadd.f32 %v16772_v9, %v3439_v47  ;;  %v17668_v48 = vpop.f32.mrb[37].mxu1 }
 0x47a   : > { %v3442_v17 = vpop.f32.mrb[38].mxu1 }
 0x47b   : > { %v3443_v51 = vadd.f32 %v16775_v1, %v3442_v17  ;;  %v17669_v52 = vpop.f32.mrb[39].mxu1 }
 0x47d   : > { %v22297_v24 = vpack.c.bf16 %v3443_v51, %v3440_v40 }
 0x47f   : > { %v3553_v61 = vshrl.u32 %v22297_v24, 16  ;;  %v3555_v3 = vshll.u32 %v22297_v24, 16 }
 0x480   : > { %v3447_v58 = vpop.f32.mrb[40].mxu1 }
 0x481   : > { %v3448_v2 = vadd.f32 %v16778_v41, %v3447_v58  ;;  %v17672_v38 = vpop.f32.mrb[41].mxu1  ;;  %v4061_v6 = vrot.slane %v3553_v61, 1  ;;  %v4062_v19 = vrot.slane %v3555_v3, 2  ;;  %v4603_v59 = vrot.slane %v3553_v61, 6 }
 0x482   : > { %v3450_v32 = vpop.f32.mrb[42].mxu1  ;;  %v4604_v39 = vrot.slane %v3555_v3, 7  ;;  %v3557_v34 = vrot.slane %v3555_v3, 1  ;;  %v4978_v15 = vrot.slane %v3553_v61, 7 }
 0x483   : > { %v3451_v22 = vadd.f32 %v16781_v7, %v3450_v32  ;;  %v17673_v9 = vpop.f32.mrb[43].mxu1  ;;  %v4063_v18 = vor.u32 %v4062_v19, %v4061_v6 }
 0x484   : > { %v4605_v13 = vor.u32 %v4604_v39, %v4603_v59  ;;  %v3558_v14 = vor.u32 %v3557_v34, %v3553_v61 }
 0x485   : > { %v22301_v1 = vpack.c.bf16 %v3451_v22, %v3448_v2  ;;  %v19589_v2 = vld [vmem:[%s26084_s29 + $0x8] sm:$0xff]  }
 0x487   : > { %v22304_v5 = vshll.u32 %v22301_v1, 16  ;;  %v22307_v28 = vshrl.u32 %v22301_v1, 16 }
 0x488   : > { %v3455_v41 = vpop.f32.mrb[44].mxu1 }
 0x489   : > { %v3456_v46 = vadd.f32 %v22269_v12, %v3455_v41  ;;  %v17676_v36 = vpop.f32.mrb[45].mxu1  ;;  %v3562_v23 = vrot.slane %v22304_v5, 1  ;;  %v4064_v7 = vrot.slane %v22307_v28, 1  ;;  %v4065_v21 = vrot.slane %v22304_v5, 2 }
 0x48a   : > { %v3458_v11 = vpop.f32.mrb[46].mxu1  ;;  %v4606_v10 = vrot.slane %v22307_v28, 6  ;;  %v4607_v53 = vrot.slane %v22304_v5, 7  ;;  %v4979_v8 = vrot.slane %v22307_v28, 7  ;;  %v5499_v48 = vrot.slane %v22307_v28, 4 }
 0x48b   : > { %v3459_v63 = vadd.f32 %v22271_v20, %v3458_v11  ;;  %v17677_v62 = vpop.f32.mrb[47].mxu1  ;;  %v3563_v30 = vsel %vm893_vm0, %v3558_v14, %v3562_v23  ;;  %v4066_v12 = vor.u32 %v4065_v21, %v4064_v7  ;;  %v3566_v31 = vor.u32 %v22307_v28, %v3562_v23 }
 0x48c   : > { %17718 = vmatprep.mubr.bf16.mxu1 %v3563_v30  ;;  %v4608_v16 = vor.u32 %v4607_v53, %v4606_v10  ;;  %v4980_v20 = vor.u32 %v4979_v8, %v22304_v5  ;;  %v5500_v3 = vrot.slane %v22304_v5, 5 }
 0x48d   : > { %v22318_v33 = vpack.c.bf16 %v3459_v63, %v3456_v46  ;;  %v22321_v27 = vsel %vm1951_vm2, %v4063_v18, %v4066_v12 }
 0x48e   : > { %v22332_v47 = vsel %vm4602_vm8, %v4605_v13, %v4608_v16  ;;  %v22335_v40 = vsel %vm4977_vm9, %v4978_v15, %v4980_v20  ;;  %v22354_v13 = vor.u32 %v5500_v3, %v5499_v48 }
 0x48f   : > { %v22325_v0 = vshll.u32 %v22318_v33, 16  ;;  %v22328_v25 = vshrl.u32 %v22318_v33, 16 }
 0x490   : > { %v3463_v57 = vpop.f32.mrb[48].mxu1 }
 0x491   : > { %v3464_v17 = vadd.f32 %v22273_v60, %v3463_v57  ;;  %v17680_v51 = vpop.f32.mrb[49].mxu1  ;;  %v3570_v52 = vrot.slane %v22325_v0, 1  ;;  %v4068_v61 = vrot.slane %v22328_v25, 1  ;;  %v4069_v38 = vrot.slane %v22325_v0, 2 }
 0x492   : > { %v3466_v58 = vpop.f32.mrb[50].mxu1  ;;  %v4610_v6 = vrot.slane %v22328_v25, 6  ;;  %v4611_v59 = vrot.slane %v22325_v0, 7  ;;  %v4982_v22 = vrot.slane %v22328_v25, 7  ;;  %v5502_v11 = vrot.slane %v22328_v25, 4 }
 0x493   : > { %v3467_v19 = vadd.f32 %v22275_v55, %v3466_v58  ;;  %v17681_v32 = vpop.f32.mrb[51].mxu1  ;;  %v3571_v60 = vsel %vm893_vm0, %v3566_v31, %v3570_v52  ;;  %v4070_v39 = vor.u32 %v4069_v38, %v4068_v61  ;;  %v19590_v55 = vld [vmem:[%s26084_s29 + $0x10] sm:$0xff]   ;;  %v3574_v14 = vor.u32 %v22328_v25, %v3570_v52 }
 0x494   : > { %17719 = vmatmul.mubr.bf16.vlgmr.msra.gmra.mrb[72].mxu1 %v3571_v60  ;;  %v4612_v18 = vor.u32 %v4611_v59, %v4610_v6  ;;  %v4983_v41 = vor.u32 %v4982_v22, %v22325_v0  ;;  %v5503_v30 = vrot.slane %v22325_v0, 5 }
 0x495   : > { %v22351_v9 = vpack.c.bf16 %v3467_v19, %v3464_v17  ;;  %17731 = vmatpush3.bf16.msra.mxu1 %v22266_v49  ;;  %v22360_v34 = vsel %vm1951_vm2, %v4066_v12, %v4070_v39  ;;  %v19591_v12 = vld [vmem:[%s26084_s29 + $0x18] sm:$0xff]  }
 0x496   : > { %17732 = vmatprep.subr.bf16.mxu1 %v19589_v2  ;;  %v22371_v23 = vsel %vm4602_vm8, %v4608_v16, %v4612_v18  ;;  %v22374_v7 = vsel %vm4977_vm9, %v4979_v8, %v4983_v41  ;;  %v22392_v52 = vor.u32 %v5503_v30, %v5502_v11 }
 0x497   : > { %v22364_v46 = vshll.u32 %v22351_v9, 16  ;;  %v22367_v36 = vshrl.u32 %v22351_v9, 16 }
 0x498   : > { %v3471_v49 = vpop.f32.mrb[52].mxu1 }
 0x499   : > { %v3472_v21 = vadd.f32 %v22277_v37, %v3471_v49  ;;  %v17684_v10 = vpop.f32.mrb[53].mxu1  ;;  %17733 = vmatpush3.bf16.msra.mxu1 %v19589_v2  ;;  %v3578_v63 = vrot.slane %v22364_v46, 1  ;;  %v4072_v62 = vrot.slane %v22367_v36, 1  ;;  %v4073_v8 = vrot.slane %v22364_v46, 2 }
 0x49a   : > { %v3474_v53 = vpop.f32.mrb[54].mxu1  ;;  %17734 = vmatprep.subr.bf16.mxu1 %v19590_v55  ;;  %v4614_v16 = vrot.slane %v22367_v36, 6  ;;  %v4615_v31 = vrot.slane %v22364_v46, 7  ;;  %v4985_v48 = vrot.slane %v22367_v36, 7  ;;  %v5506_v60 = vrot.slane %v22367_v36, 4 }
 0x49b   : > { %v3475_v37 = vadd.f32 %v22279_v43, %v3474_v53  ;;  %v17685_v15 = vpop.f32.mrb[55].mxu1  ;;  %v3579_v20 = vsel %vm893_vm0, %v3574_v14, %v3578_v63  ;;  %v4074_v57 = vor.u32 %v4073_v8, %v4072_v62  ;;  %v19592_v43 = vld [vmem:[%s26084_s29 + $0x20] sm:$0xff]   ;;  %v3582_v6 = vor.u32 %v22367_v36, %v3578_v63 }
 0x49c   : > { %17722 = vmatprep.mubr.bf16.mxu1 %v3579_v20  ;;  %v4616_v51 = vor.u32 %v4615_v31, %v4614_v16  ;;  %v4986_v3 = vor.u32 %v4985_v48, %v22364_v46  ;;  %v5507_v49 = vrot.slane %v22364_v46, 5  ;;  %v19594_v16 = vld [vmem:[%s26084_s29 + $0x30] sm:$0xff]  }
 0x49d   : > { %v22390_v17 = vpack.c.bf16 %v3475_v37, %v3472_v21  ;;  %17735 = vmatpush3.bf16.msra.mxu1 %v19590_v55  ;;  %v22398_v61 = vsel %vm1951_vm2, %v4070_v39, %v4074_v57 }
 0x49e   : > { %17736 = vmatprep.subr.bf16.mxu1 %v19591_v12  ;;  %v22409_v19 = vsel %vm4602_vm8, %v4612_v18, %v4616_v51  ;;  %v22412_v32 = vsel %vm4977_vm9, %v4982_v22, %v4986_v3  ;;  %v19593_v18 = vld [vmem:[%s26084_s29 + $0x28] sm:$0xff]   ;;  %v5508_v8 = vor.u32 %v5507_v49, %v5506_v60 }
 0x49f   : > { %v22402_v58 = vshll.u32 %v22390_v17, 16  ;;  %v22405_v2 = vshrl.u32 %v22390_v17, 16 }
 0x4a0   : > { %v3479_v38 = vpop.f32.mrb[56].mxu1 }
 0x4a1   : > { %v3480_v59 = vadd.f32 %v22281_v35, %v3479_v38  ;;  %v17688_v39 = vpop.f32.mrb[57].mxu1  ;;  %17737 = vmatpush3.bf16.msra.mxu1 %v19591_v12  ;;  %v3586_v55 = vrot.slane %v22402_v58, 1  ;;  %v4076_v41 = vrot.slane %v22405_v2, 1  ;;  %v4077_v22 = vrot.slane %v22402_v58, 2 }
 0x4a2   : > { %v3482_v14 = vpop.f32.mrb[58].mxu1  ;;  %17738 = vmatprep.subr.bf16.mxu1 %v19592_v43  ;;  %v4618_v11 = vrot.slane %v22405_v2, 6  ;;  %v4619_v63 = vrot.slane %v22402_v58, 7  ;;  %v4988_v30 = vrot.slane %v22405_v2, 7 }
 0x4a3   : > { %v3483_v35 = vadd.f32 %v22283_v4, %v3482_v14  ;;  %v17689_v21 = vpop.f32.mrb[59].mxu1  ;;  %v22426_v10 = vsel %vm893_vm0, %v3582_v6, %v3586_v55  ;;  %v22430_v62 = vor.u32 %v4077_v22, %v4076_v41  ;;  %v22438_v4 = vsel %vm5498_vm10, %v22354_v13, %v22392_v52 }
 0x4a4   : > { %26085 = vst [vmem:[#allocation18_spill] sm:$0xff] %v22426_v10  ;;  %17723 = vmatmul.mubr.bf16.gmra.mrb[76].mxu1 %v22426_v10  ;;  %v4620_v12 = vor.u32 %v4619_v63, %v4618_v11  ;;  %v4989_v15 = vor.u32 %v4988_v30, %v22402_v58  ;;  %v22489_v63 = vsel %vm5498_vm10, %v22392_v52, %v5508_v8  ;;  %v3886_v10 = vrot.slane %v22297_v24, 1 }
 0x4a5   : > { %v22433_v53 = vpack.c.bf16 %v3483_v35, %v3480_v59  ;;  %17739 = vmatpush3.bf16.msra.mxu1 %v19592_v43  ;;  %v22445_v37 = vsel %vm1951_vm2, %v4074_v57, %v22430_v62  ;;  %v3590_v57 = vor.u32 %v22405_v2, %v3586_v55  ;;  %v19595_v55 = vld [vmem:[%s26084_s29 + $0x38] sm:$0xff]  }
 0x4a6   : > { %17740 = vmatprep.subr.bf16.mxu1 %v19593_v18  ;;  %v22455_v43 = vsel %vm4602_vm8, %v4616_v51, %v4620_v12  ;;  %v22458_v3 = vsel %vm4977_vm9, %v4985_v48, %v4989_v15  ;;  %v5511_v15 = vrot.slane %v22402_v58, 5 }
 0x4a7   : > { %v22449_v20 = vshll.u32 %v22433_v53, 16  ;;  %v22452_v31 = vshrl.u32 %v22433_v53, 16 }
 0x4a8   : > { %v3487_v13 = vpop.f32.mrb[60].mxu1 }
 0x4a9   : > { %v3488_v38 = vadd.f32 %v22285_v29, %v3487_v13  ;;  %v17692_v6 = vpop.f32.mrb[61].mxu1  ;;  %17741 = vmatpush3.bf16.msra.mxu1 %v19593_v18  ;;  %v3594_v60 = vrot.slane %v22449_v20, 1  ;;  %v4080_v59 = vrot.slane %v22452_v31, 1  ;;  %v4081_v41 = vrot.slane %v22449_v20, 2 }
 0x4aa   : > { %v3490_v39 = vpop.f32.mrb[62].mxu1  ;;  %17742 = vmatprep.subr.bf16.mxu1 %v19594_v16  ;;  %v4622_v51 = vrot.slane %v22452_v31, 6  ;;  %v4623_v18 = vrot.slane %v22449_v20, 7  ;;  %v4991_v11 = vrot.slane %v22452_v31, 7  ;;  %v5890_v45 = vrot.slane %v22449_v20, 6 }
 0x4ab   : > { %v3491_v49 = vadd.f32 %v22287_v54, %v3490_v39  ;;  %v22468_v48 = vsel %vm893_vm0, %v3590_v57, %v3594_v60  ;;  %v22471_v29 = vor.u32 %v22452_v31, %v3594_v60  ;;  %v17693_v14 = vpop.f32.mrb[63].mxu1  ;;  %v22478_v22 = vor.u32 %v4081_v41, %v4080_v59 }
 0x4ac   : > { %26086 = vst [vmem:[#allocation20_spill] sm:$0xff] %v22468_v48  ;;  %17726 = vmatprep.mubr.bf16.mxu1 %v22468_v48  ;;  %v5510_v54 = vrot.slane %v22405_v2, 4  ;;  %v22485_v21 = vor.u32 %v4623_v18, %v4622_v51  ;;  %v4992_v13 = vor.u32 %v4991_v11, %v22449_v20  ;;  %v5514_v51 = vrot.slane %v22452_v31, 4 }
 0x4ad   : > { %v22482_v35 = vpack.c.bf16 %v3491_v49, %v3488_v38  ;;  %17727 = vmatmul.mubr.bf16.gmra.mrb[80].mxu1 %v22471_v29  ;;  %v19596_v38 = vld [vmem:[%s26084_s29 + $0x80] sm:$0xff]  }
 0x4ae   : > { %17743 = vmatpush3.bf16.msra.mxu1 %v19594_v16  ;;  %17746 = vmatprep.mubr.bf16.mxu1 %v22297_v24  ;;  %v22499_v6 = vsel %vm4602_vm8, %v4620_v12, %v22485_v21  ;;  %v22508_v16 = vsel %vm4977_vm9, %v4988_v30, %v4992_v13  ;;  %v5512_v59 = vor.u32 %v5511_v15, %v5510_v54  ;;  %v19597_v30 = vld [vmem:[%s26084_s29 + $0x88] sm:$0xff]  }
 0x4af   : > { %17744 = vmatprep.subr.bf16.mxu1 %v19595_v55  ;;  %v22502_v57 = vshrl.u32 %v22482_v35, 16  ;;  %v22505_v60 = vshll.u32 %v22482_v35, 16 }
 0x4b0   : > { %v3495_v52 = vpop.f32.mrb[64].mxu1  ;;  %v22514_v14 = vsel %vm5498_vm10, %v5508_v8, %v5512_v59 }
 0x4b1   : > { %v3496_v39 = vadd.f32 %v22289_v42, %v3495_v52  ;;  %v17696_v41 = vpop.f32.mrb[65].mxu1  ;;  %v4994_v12 = vrot.slane %v22502_v57, 7  ;;  %v5515_v42 = vrot.slane %v22449_v20, 5  ;;  %v5518_v54 = vrot.slane %v22502_v57, 4 }
 0x4b2   : > { %17745 = vmatpush3.bf16.msra.mxu1 %v19595_v55  ;;  %v3498_v49 = vpop.f32.mrb[66].mxu1  ;;  %v5519_v15 = vrot.slane %v22505_v60, 5  ;;  %v5874_v52 = vrot.slane %v22307_v28, 5  ;;  %v5875_v41 = vrot.slane %v22304_v5, 6  ;;  %v5877_v5 = vrot.slane %v22328_v25, 5 }
 0x4b3   : > { %v3499_v18 = vadd.f32 %v22291_v44, %v3498_v49  ;;  %17758 = vmatprep.subr.bf16.mxu1 %v19596_v38  ;;  %v17697_v26 = vpop.f32.mrb[67].mxu1  ;;  %v4995_v55 = vor.u32 %v4994_v12, %v22505_v60  ;;  %v5516_v8 = vor.u32 %v5515_v42, %v5514_v51  ;;  %v5893_v48 = vrot.slane %v22502_v57, 5 }
 0x4b4   : > { %v22531_v44 = vor.u32 %v5519_v15, %v5518_v54  ;;  %v5878_v15 = vrot.slane %v22325_v0, 6 }
 0x4b5   : > { %v22524_v13 = vpack.c.bf16 %v3499_v18, %v3496_v39  ;;  %17747 = vmatmul.mubr.bf16.vlgmr.msra.gmra.mrb[72].mxu1 %v22301_v1  ;;  %v22529_v26 = vsel %vm4977_vm9, %v4991_v11, %v4995_v55  ;;  %v19598_v39 = vld [vmem:[%s26084_s29 + $0x90] sm:$0xff]   ;;  %v22539_v49 = vsel %vm5498_vm10, %v5512_v59, %v5516_v8  ;;  %v5876_v18 = vor.u32 %v5875_v41, %v5874_v52  ;;  %v19599_v59 = vld [vmem:[%s26084_s29 + $0x98] sm:$0xff]  }
 0x4b6   : > { %17759 = vmatpush3.bf16.msra.mxu1 %v19596_v38  ;;  %17750 = vmatprep.mubr.bf16.mxu1 %v22318_v33  ;;  %26087 = vst [vmem:[#allocation21_spill] sm:$0xff] %v22531_v44  ;;  %v22543_v51 = vsel %vm5498_vm10, %v5516_v8, %v22531_v44  ;;  %v5882_v8 = vrot.slane %v22364_v46, 6 }
 0x4b7   : > { %17760 = vmatprep.subr.bf16.mxu1 %v19597_v30  ;;  %26088 = vst [vmem:[#allocation22_spill] sm:$0xff] %v22543_v51  ;;  %v22552_v55 = vshrl.u32 %v22524_v13, 16 }
 0x4b8   : > { %v3503_v38 = vpop.f32.mrb[68].mxu1 }
 0x4b9   : > { %v3504_v11 = vadd.f32 %v22293_v56, %v3503_v38  ;;  %v17700_v12 = vpop.f32.mrb[69].mxu1  ;;  %v5881_v56 = vrot.slane %v22367_v36, 5  ;;  %v5879_v38 = vor.u32 %v5878_v15, %v5877_v5  ;;  %v5897_v15 = vrot.slane %v22552_v55, 5 }
 0x4ba   : > { %17761 = vmatpush3.bf16.msra.mxu1 %v19597_v30  ;;  %v3506_v28 = vpop.f32.mrb[70].mxu1  ;;  %v22557_v30 = vshll.u32 %v22524_v13, 16  ;;  %v5886_v12 = vrot.slane %v22402_v58, 6 }
 0x4bb   : > { %v3507_v42 = vadd.f32 %v22295_v50, %v3506_v28  ;;  %17762 = vmatprep.subr.bf16.mxu1 %v19598_v39  ;;  %v17701_v54 = vpop.f32.mrb[71].mxu1  ;;  %v5885_v50 = vrot.slane %v22405_v2, 5  ;;  %v5883_v28 = vor.u32 %v5882_v8, %v5881_v56 }
 0x4bc   : > { %v5889_v54 = vrot.slane %v22452_v31, 5  ;;  %v5898_v41 = vrot.slane %v22557_v30, 6 }
 0x4bd   : > { %v22561_v52 = vpack.c.bf16 %v3507_v42, %v3504_v11  ;;  %17751 = vmatmul.mubr.bf16.gmra.mrb[76].mxu1 %v22351_v9  ;;  %v19600_v11 = vld [vmem:[%s26084_s29 + $0xa0] sm:$0xff]   ;;  %v22574_v42 = vsel %vm5873_vm11, %v5876_v18, %v5879_v38  ;;  %v5887_v5 = vor.u32 %v5886_v12, %v5885_v50  ;;  %v22579_v56 = vsel %vm5873_vm11, %v5879_v38, %v5883_v28 }
 0x4be   : > { %17763 = vmatpush3.bf16.msra.mxu1 %v19598_v39  ;;  %17754 = vmatprep.mubr.bf16.mxu1 %v22390_v17  ;;  %26089 = vst [vmem:[#allocation19_spill] sm:$0xff] %v22574_v42  ;;  %v5894_v39 = vrot.slane %v22505_v60, 6  ;;  %26090 = vst [vmem:[#allocation23_spill] sm:$0xff] %v22579_v56  ;;  %v5891_v8 = vor.u32 %v5890_v45, %v5889_v54  ;;  %v5899_v50 = vor.u32 %v5898_v41, %v5897_v15  ;;  %v19601_v54 = vld [vmem:[%s26084_s29 + $0xa8] sm:$0xff]  }
 0x4bf   : > { %17764 = vmatprep.subr.bf16.mxu1 %v19599_v59  ;;  %v22584_v44 = vsel %vm5873_vm11, %v5883_v28, %v5887_v5  ;;  %v6391_v12 = vrot.slane %v22328_v25, 2  ;;  %v26093_v38 = vrot.slane %v22301_v1, 1  ;;  %v6394_v41 = vrot.slane %v22367_v36, 2 }
 0x4c0   : > { %26091 = vst [vmem:[#allocation24_spill] sm:$0xff] %v22584_v44  ;;  %v5895_v51 = vor.u32 %v5894_v39, %v5893_v48  ;;  %v22587_v18 = vsel %vm5873_vm11, %v5887_v5, %v5891_v8  ;;  %v6392_v48 = vrot.slane %v22325_v0, 3  ;;  %v6395_v5 = vrot.slane %v22364_v46, 3 }
 0x4c1   : > { %26092 = vst [vmem:[#allocation25_spill] sm:$0xff] %v22587_v18  ;;  %v3888_v45 = vsel %vm1595_vm1, %v3886_v10, %v26093_v38  ;;  %v6398_v39 = vrot.slane %v22405_v2, 2  ;;  %v6399_v15 = vrot.slane %v22402_v58, 3  ;;  %v6402_v38 = vrot.slane %v22452_v31, 2 }
 0x4c2   : > { %17765 = vmatpush3.bf16.msra.mxu1 %v19599_v59  ;;  %v22597_v28 = vsel %vm5873_vm11, %v5891_v8, %v5895_v51  ;;  %v22601_v59 = vsel %vm5873_vm11, %v5895_v51, %v5899_v50  ;;  %v6393_v10 = vor.u32 %v6392_v48, %v6391_v12  ;;  %v6403_v8 = vrot.slane %v22449_v20, 3  ;;  %v19602_v12 = vld [vmem:[%s26084_s29 + $0xb0] sm:$0xff]  }
 0x4c3   : > { %17766 = vmatprep.subr.bf16.mxu1 %v19600_v11  ;;  %26094 = vst [vmem:[#allocation26_spill] sm:$0xff] %v22597_v28  ;;  %26095 = vst [vmem:[#allocation27_spill] sm:$0xff] %v22601_v59  ;;  %v6396_v28 = vor.u32 %v6395_v5, %v6394_v41  ;;  %v6406_v51 = vrot.slane %v22502_v57, 2  ;;  %v6407_v50 = vrot.slane %v22505_v60, 3  ;;  %v6410_v59 = vrot.slane %v22552_v55, 2 }
 0x4c4   : > { %v6400_v48 = vor.u32 %v6399_v15, %v6398_v39  ;;  %v6404_v18 = vor.u32 %v6403_v8, %v6402_v38  ;;  %v6411_v44 = vrot.slane %v22557_v30, 3  ;;  %v19603_v39 = vld [vmem:[%s26084_s29 + $0xb8] sm:$0xff]   ;;  %v3889_v15 = vrot.slane %v22318_v33, 1 }
 0x4c5   : > { %17755 = vmatmul.mubr.bf16.gmra.mrb[80].mxu1 %v22433_v53  ;;  %v22618_v56 = vsel %vm2916_vm5, %v6393_v10, %v6396_v28  ;;  %v6769_v38 = vrot.slane %v22405_v2, 3  ;;  %v6770_v8 = vrot.slane %v22402_v58, 4  ;;  %v6781_v2 = vrot.slane %v22552_v55, 3 }
 0x4c6   : > { %17767 = vmatpush3.bf16.msra.mxu1 %v19600_v11  ;;  %17774 = vmatprep.mubr.bf16.mxu1 %v3888_v45  ;;  %v6408_v11 = vor.u32 %v6407_v50, %v6406_v51  ;;  %v22621_v45 = vsel %vm2916_vm5, %v6396_v28, %v6400_v48  ;;  %v22624_v41 = vsel %vm2916_vm5, %v6400_v48, %v6404_v18  ;;  %v6762_v28 = vrot.slane %v22328_v25, 3  ;;  %v19604_v25 = vld [vmem:[%s26084_s29 + $0xc0] sm:$0xff]  }
 0x4c7   : > { %17768 = vmatprep.subr.bf16.mxu1 %v19601_v54  ;;  %v22626_v5 = vor.u32 %v6411_v44, %v6410_v59  ;;  %v6763_v44 = vrot.slane %v22325_v0, 4  ;;  %v6766_v59 = vrot.slane %v22364_v46, 4  ;;  %v6773_v0 = vrot.slane %v22452_v31, 3 }
 0x4c8   : > { %v22629_v42 = vsel %vm2916_vm5, %v6404_v18, %v6408_v11  ;;  %v22643_v18 = vshll.u32 %v22561_v52, 16  ;;  %v6777_v50 = vrot.slane %v22502_v57, 3  ;;  %v6771_v48 = vor.u32 %v6770_v8, %v6769_v38 }
 0x4c9   : > { %26096 = vst [vmem:[#allocation28_spill] sm:$0xff] %v22626_v5  ;;  %v22636_v10 = vsel %vm2916_vm5, %v6408_v11, %v22626_v5  ;;  %v6764_v51 = vor.u32 %v6763_v44, %v6762_v28  ;;  %v6778_v46 = vrot.slane %v22505_v60, 4  ;;  %v3891_v58 = vrot.slane %v22351_v9, 1 }
 0x4ca   : > { %17769 = vmatpush3.bf16.msra.mxu1 %v19601_v54  ;;  %v6765_v54 = vrot.slane %v22367_v36, 3  ;;  %v6774_v36 = vrot.slane %v22449_v20, 4  ;;  %v6782_v5 = vrot.slane %v22557_v30, 4  ;;  %v26097_v44 = vrot.slane %v22301_v1, 1 }
 0x4cb   : > { %17770 = vmatprep.subr.bf16.mxu1 %v19602_v12  ;;  %v6779_v20 = vor.u32 %v6778_v46, %v6777_v50  ;;  %v7274_v8 = vrot.slane %v22505_v60, 1  ;;  %v7280_v50 = vrot.slane %v22643_v18, 1 }
 0x4cc   : > { %v6775_v11 = vor.u32 %v6774_v36, %v6773_v0  ;;  %v22680_v0 = vshrl.u32 %v22561_v52, 16  ;;  %v7277_v36 = vrot.slane %v22557_v30, 1 }
 0x4cd   : > { %v7276_v46 = vor.u32 %v7274_v8, %v22502_v57 }
 0x4ce   : > { %17771 = vmatpush3.bf16.msra.mxu1 %v19602_v12  ;;  %v6767_v12 = vor.u32 %v6766_v59, %v6765_v54  ;;  %v3890_v54 = vsel %vm1595_vm1, %v26097_v44, %v3889_v15  ;;  %v19605_v59 = vld [vmem:[%s26084_s29 + $0xc8] sm:$0xff]   ;;  %v22671_v38 = vsel %vm6761_vm12, %v6771_v48, %v6775_v11  ;;  %v3893_v44 = vrot.slane %v22390_v17, 1 }
 0x4cf   : > { %17772 = vmatprep.subr.bf16.mxu1 %v19603_v39 }
 0x4d0   : > { %v22659_v28 = vsel %vm6761_vm12, %v6764_v51, %v6767_v12  ;;  %v22662_v31 = vsel %vm6761_vm12, %v6767_v12, %v6771_v48  ;;  %v22677_v51 = vsel %vm6761_vm12, %v6775_v11, %v6779_v20  ;;  %v3892_v12 = vsel %vm1595_vm1, %v3889_v15, %v3891_v58  ;;  %v19606_v15 = vld [vmem:[%s26084_s29 + $0xd0] sm:$0xff]  }
 0x4d1   : > { %v22696_v11 = vor.u32 %v7280_v50, %v22680_v0 }
 0x4d2   : > { %17773 = vmatpush3.bf16.msra.mxu1 %v19603_v39  ;;  %v22673_v39 = vor.u32 %v6782_v5, %v6781_v2  ;;  %v22691_v5 = vsel %vm893_vm0, %v22471_v29, %v7274_v8  ;;  %v7279_v2 = vor.u32 %v7277_v36, %v22552_v55  ;;  %v7613_v29 = vrot.slane %v22502_v57, 1 }
 0x4d3   : > { %17786 = vmatprep.subr.bf16.mxu1 %v19604_v25  ;;  %26098 = vst [vmem:[#allocation29_spill] sm:$0xff] %v22691_v5  ;;  %26099 = vst [vmem:[#allocation30_spill] sm:$0xff] %v22696_v11  ;;  %v22711_v8 = vrot.slane %v22433_v53, 1  ;;  %v7618_v11 = vrot.slane %v22557_v30, 2  ;;  %v7621_v5 = vrot.slane %v22680_v0, 1 }
 0x4d4   : > { %v22687_v48 = vsel %vm6761_vm12, %v6779_v20, %v22673_v39  ;;  %v22702_v20 = vsel %vm893_vm0, %v7276_v46, %v7277_v36  ;;  %v7622_v46 = vrot.slane %v22643_v18, 2 }
 0x4d5   : > { %17775 = vmatmul.mubr.bf16.vlgmr.msra.gmra.mrb[72].mxu1 %v3890_v54  ;;  %26100 = vst [vmem:[#allocation31_spill] sm:$0xff] %v22702_v20  ;;  %v22707_v54 = vsel %vm893_vm0, %v7279_v2, %v7280_v50  ;;  %v19607_v50 = vld [vmem:[%s26084_s29 + $0xd8] sm:$0xff]  }
 0x4d6   : > { %17778 = vmatprep.mubr.bf16.mxu1 %v3892_v12  ;;  %17787 = vmatpush3.bf16.msra.mxu1 %v19604_v25  ;;  %26101 = vst [vmem:[#allocation32_spill] sm:$0xff] %v22707_v54  ;;  %v7614_v25 = vrot.slane %v22505_v60, 2  ;;  %v7617_v12 = vrot.slane %v22552_v55, 1  ;;  %v22723_v54 = vsel %vm1595_vm1, %v3891_v58, %v3893_v44  ;;  %v22725_v20 = vor.u32 %v7622_v46, %v7621_v5  ;;  %v19608_v58 = vld [vmem:[%s26084_s29 + $0xe0] sm:$0xff]   ;;  %v19609_v5 = vld [vmem:[%s26084_s29 + $0xe8] sm:$0xff]   ;;  %v19615_v46 = vld [vmem:[%s26084_s29 + $0x118] sm:$0xff]  }
 0x4d7   : > { %17788 = vmatprep.subr.bf16.mxu1 %v19605_v59 }
 0x4d8   : > { %v22716_v36 = vor.u32 %v7614_v25, %v7613_v29  ;;  %v7619_v2 = vor.u32 %v7618_v11, %v7617_v12  ;;  %26102 = vst [vmem:[#allocation33_spill] sm:$0xff] %v22725_v20  ;;  %v19612_v25 = vld [vmem:[%s26084_s29 + $0x100] sm:$0xff]   ;;  %v19614_v12 = vld [vmem:[%s26084_s29 + $0x110] sm:$0xff]  }
 0x4da   : > { %17789 = vmatpush3.bf16.msra.mxu1 %v19605_v59  ;;  %v22730_v59 = vsel %vm1595_vm1, %v3893_v44, %v22711_v8  ;;  %v22734_v29 = vsel %vm1951_vm2, %v22716_v36, %v7619_v2  ;;  %v22739_v11 = vsel %vm1951_vm2, %v7619_v2, %v22725_v20  ;;  %v19611_v44 = vld [vmem:[%s26084_s29 + $0xf8] sm:$0xff]   ;;  %v4248_v2 = vrot.slane %v22297_v24, 2 }
 0x4db   : > { %17790 = vmatprep.subr.bf16.mxu1 %v19606_v15  ;;  %26103 = vst [vmem:[#allocation34_spill] sm:$0xff] %v22734_v29  ;;  %26104 = vst [vmem:[#allocation35_spill] sm:$0xff] %v22739_v11  ;;  %v4432_v20 = vrot.slane %v22390_v17, 6  ;;  %v4434_v11 = vrot.slane %v22433_v53, 6  ;;  %v4436_v29 = vrot.slane %v22482_v35, 6 }
 0x4dd   : > { %17779 = vmatmul.mubr.bf16.gmra.mrb[76].mxu1 %v22723_v54 }
 0x4de   : > { %17782 = vmatprep.mubr.bf16.mxu1 %v22730_v59  ;;  %17791 = vmatpush3.bf16.msra.mxu1 %v19606_v15  ;;  %v19610_v15 = vld [vmem:[%s26084_s29 + $0xf0] sm:$0xff]  }
 0x4df   : > { %17792 = vmatprep.subr.bf16.mxu1 %v19607_v50 }
 0x4e2   : > { %17793 = vmatpush3.bf16.msra.mxu1 %v19607_v50  ;;  %v4249_v50 = vrot.slane %v22301_v1, 2 }
 0x4e3   : > { %17794 = vmatprep.subr.bf16.mxu1 %v19608_v58 }
 0x4e5   : > { %17783 = vmatmul.mubr.bf16.gmra.mrb[80].mxu1 %v22711_v8 }
 0x4e6   : > { %17795 = vmatpush3.bf16.msra.mxu1 %v19608_v58  ;;  %17802 = vmatprep.mubr.bf16.mxu1 %v22321_v27  ;;  %v19613_v27 = vld [vmem:[%s26084_s29 + $0x108] sm:$0xff]  }
 0x4e7   : > { %17796 = vmatprep.subr.bf16.mxu1 %v19609_v5  ;;  %v19617_v58 = vld [vmem:[%s26084_s29 + $0x128] sm:$0xff]  }
 0x4ea   : > { %17797 = vmatpush3.bf16.msra.mxu1 %v19609_v5  ;;  %v19618_v5 = vld [vmem:[%s26084_s29 + $0x130] sm:$0xff]  }
 0x4eb   : > { %17798 = vmatprep.subr.bf16.mxu1 %v19610_v15 }
 0x4ee   : > { %17799 = vmatpush3.bf16.msra.mxu1 %v19610_v15  ;;  %v19619_v15 = vld [vmem:[%s26084_s29 + $0x138] sm:$0xff]  }
 0x4ef   : > { %17800 = vmatprep.subr.bf16.mxu1 %v19611_v44 }
 0x4f2   : > { %17801 = vmatpush3.bf16.msra.mxu1 %v19611_v44  ;;  %v19620_v44 = vld [vmem:[%s26084_s29 + $0x140] sm:$0xff]  }
 0x4f3   : > { %17814 = vmatprep.subr.bf16.mxu1 %v19612_v25 }
 0x4f5   : > { %17803 = vmatmul.mubr.bf16.vlgmr.msra.gmra.mrb[72].mxu1 %v22360_v34  ;;  %v22773_v34 = vsel %vm1951_vm2, %v22430_v62, %v22478_v22  ;;  %v4250_v62 = vsel %vm2826_vm3, %v4248_v2, %v4249_v50  ;;  %v19622_v2 = vld [vmem:[%s26084_s29 + $0x150] sm:$0xff]  }
 0x4f6   : > { %17806 = vmatprep.mubr.bf16.mxu1 %v22398_v61  ;;  %17815 = vmatpush3.bf16.msra.mxu1 %v19612_v25  ;;  %v19616_v61 = vld [vmem:[%s26084_s29 + $0x120] sm:$0xff]   ;;  %v4251_v25 = vrot.slane %v22318_v33, 2 }
 0x4f7   : > { %17816 = vmatprep.subr.bf16.mxu1 %v19613_v27 }
 0x4fa   : > { %17817 = vmatpush3.bf16.msra.mxu1 %v19613_v27  ;;  %v4253_v27 = vrot.slane %v22351_v9, 2 }
 0x4fb   : > { %17818 = vmatprep.subr.bf16.mxu1 %v19614_v12 }
 0x4fd   : > { %17807 = vmatmul.mubr.bf16.gmra.mrb[76].mxu1 %v22445_v37 }
 0x4fe   : > { %17810 = vmatprep.mubr.bf16.mxu1 %v22773_v34  ;;  %17819 = vmatpush3.bf16.msra.mxu1 %v19614_v12  ;;  %v19621_v12 = vld [vmem:[%s26084_s29 + $0x148] sm:$0xff]  }
 0x4ff   : > { %17820 = vmatprep.subr.bf16.mxu1 %v19615_v46 }
 0x502   : > { %17821 = vmatpush3.bf16.msra.mxu1 %v19615_v46  ;;  %v4252_v46 = vsel %vm2826_vm3, %v4249_v50, %v4251_v25  ;;  %v19623_v50 = vld [vmem:[%s26084_s29 + $0x158] sm:$0xff]  }
 0x503   : > { %17822 = vmatprep.subr.bf16.mxu1 %v19616_v61 }
 0x505   : > { %17811 = vmatmul.mubr.bf16.gmra.mrb[80].mxu1 %v22478_v22 }
 0x506   : > { %17823 = vmatpush3.bf16.msra.mxu1 %v19616_v61  ;;  %17830 = vmatprep.mubr.bf16.mxu1 %v4250_v62  ;;  %v22802_v61 = vsel %vm2826_vm3, %v4251_v25, %v4253_v27  ;;  %v22810_v62 = vrot.slane %v22433_v53, 2  ;;  %v4426_v25 = vrot.slane %v22301_v1, 6 }
 0x507   : > { %17824 = vmatprep.subr.bf16.mxu1 %v19617_v58 }
 0x50a   : > { %17825 = vmatpush3.bf16.msra.mxu1 %v19617_v58  ;;  %v4255_v58 = vrot.slane %v22390_v17, 2 }
 0x50b   : > { %17826 = vmatprep.subr.bf16.mxu1 %v19618_v5 }
 0x50e   : > { %17827 = vmatpush3.bf16.msra.mxu1 %v19618_v5  ;;  %v22816_v5 = vsel %vm2826_vm3, %v4253_v27, %v4255_v58  ;;  %v4425_v27 = vrot.slane %v22297_v24, 6 }
 0x50f   : > { %17828 = vmatprep.subr.bf16.mxu1 %v19619_v15 }
 0x512   : > { %17829 = vmatpush3.bf16.msra.mxu1 %v19619_v15  ;;  %v22821_v15 = vsel %vm2826_vm3, %v4255_v58, %v22810_v62  ;;  %v19627_v58 = vld [vmem:[%s26084_s29 + $0x178] sm:$0xff]  }
 0x513   : > { %17842 = vmatprep.subr.bf16.mxu1 %v19620_v44 }
 0x515   : > { %17831 = vmatmul.mubr.bf16.vlgmr.msra.gmra.mrb[72].mxu1 %v4252_v46  ;;  %v4427_v46 = vsel %vm4424_vm13, %v4425_v27, %v4426_v25  ;;  %v4430_v27 = vrot.slane %v22351_v9, 6 }
 0x516   : > { %17834 = vmatprep.mubr.bf16.mxu1 %v22802_v61  ;;  %17843 = vmatpush3.bf16.msra.mxu1 %v19620_v44  ;;  %v19624_v44 = vld [vmem:[%s26084_s29 + $0x160] sm:$0xff]  }
 0x517   : > { %17844 = vmatprep.subr.bf16.mxu1 %v19621_v12 }
 0x51a   : > { %17845 = vmatpush3.bf16.msra.mxu1 %v19621_v12  ;;  %v19625_v12 = vld [vmem:[%s26084_s29 + $0x168] sm:$0xff]  }
 0x51b   : > { %17846 = vmatprep.subr.bf16.mxu1 %v19622_v2 }
 0x51d   : > { %17835 = vmatmul.mubr.bf16.gmra.mrb[76].mxu1 %v22816_v5 }
 0x51e   : > { %17838 = vmatprep.mubr.bf16.mxu1 %v22821_v15  ;;  %17847 = vmatpush3.bf16.msra.mxu1 %v19622_v2  ;;  %v19626_v2 = vld [vmem:[%s26084_s29 + $0x170] sm:$0xff]  }
 0x51f   : > { %17848 = vmatprep.subr.bf16.mxu1 %v19623_v50 }
 0x522   : > { %17849 = vmatpush3.bf16.msra.mxu1 %v19623_v50  ;;  %v19628_v50 = vld [vmem:[%s26084_s29 + $0x180] sm:$0xff]  }
 0x523   : > { %17850 = vmatprep.subr.bf16.mxu1 %v19624_v44 }
 0x525   : > { %17839 = vmatmul.mubr.bf16.gmra.mrb[80].mxu1 %v22810_v62 }
 0x526   : > { %17851 = vmatpush3.bf16.msra.mxu1 %v19624_v44  ;;  %17858 = vmatprep.mubr.bf16.mxu1 %v4427_v46  ;;  %v4428_v44 = vrot.slane %v22318_v33, 6 }
 0x527   : > { %17852 = vmatprep.subr.bf16.mxu1 %v19625_v12 }
 0x528   : > { %v22849_v46 = vsel %vm4424_vm13, %v4426_v25, %v4428_v44  ;;  %v19631_v25 = vld [vmem:[%s26084_s29 + $0x198] sm:$0xff]  }
 0x52a   : > { %17853 = vmatpush3.bf16.msra.mxu1 %v19625_v12  ;;  %v19629_v12 = vld [vmem:[%s26084_s29 + $0x188] sm:$0xff]  }
 0x52b   : > { %17854 = vmatprep.subr.bf16.mxu1 %v19626_v2 }
 0x52e   : > { %17855 = vmatpush3.bf16.msra.mxu1 %v19626_v2  ;;  %v22853_v2 = vsel %vm4424_vm13, %v4428_v44, %v4430_v27  ;;  %v22865_v44 = vsel %vm4424_vm13, %v4430_v27, %v4432_v20  ;;  %v19633_v27 = vld [vmem:[%s26084_s29 + $0x1a8] sm:$0xff]  }
 0x52f   : > { %17856 = vmatprep.subr.bf16.mxu1 %v19627_v58 }
 0x532   : > { %17857 = vmatpush3.bf16.msra.mxu1 %v19627_v58  ;;  %v19630_v58 = vld [vmem:[%s26084_s29 + $0x190] sm:$0xff]  }
 0x533   : > { %17870 = vmatprep.subr.bf16.mxu1 %v19628_v50 }
 0x535   : > { %17859 = vmatmul.mubr.bf16.vlgmr.msra.gmra.mrb[72].mxu1 %v22849_v46 }
 0x536   : > { %17862 = vmatprep.mubr.bf16.mxu1 %v22853_v2  ;;  %17871 = vmatpush3.bf16.msra.mxu1 %v19628_v50  ;;  %v22869_v50 = vsel %vm4424_vm13, %v4432_v20, %v4434_v11  ;;  %v22882_v20 = vsel %vm4424_vm13, %v4434_v11, %v4436_v29  ;;  %v19636_v11 = vld [vmem:[%s26084_s29 + $0x1c0] sm:$0xff]  }
 0x537   : > { %17872 = vmatprep.subr.bf16.mxu1 %v19629_v12 }
 0x53a   : > { %17873 = vmatpush3.bf16.msra.mxu1 %v19629_v12  ;;  %v19632_v12 = vld [vmem:[%s26084_s29 + $0x1a0] sm:$0xff]  }
 0x53b   : > { %17874 = vmatprep.subr.bf16.mxu1 %v19630_v58 }
 0x53d   : > { %17863 = vmatmul.mubr.bf16.gmra.mrb[76].mxu1 %v22865_v44 }
 0x53e   : > { %17866 = vmatprep.mubr.bf16.mxu1 %v22869_v50  ;;  %17875 = vmatpush3.bf16.msra.mxu1 %v19630_v58  ;;  %v19634_v58 = vld [vmem:[%s26084_s29 + $0x1b0] sm:$0xff]  }
 0x53f   : > { %17876 = vmatprep.subr.bf16.mxu1 %v19631_v25 }
 0x542   : > { %17877 = vmatpush3.bf16.msra.mxu1 %v19631_v25  ;;  %v19635_v25 = vld [vmem:[%s26084_s29 + $0x1b8] sm:$0xff]  }
 0x543   : > { %17878 = vmatprep.subr.bf16.mxu1 %v19632_v12 }
 0x545   : > { %17867 = vmatmul.mubr.bf16.gmra.mrb[80].mxu1 %v22882_v20 }
 0x546   : > { %17879 = vmatpush3.bf16.msra.mxu1 %v19632_v12  ;;  %17886 = vmatprep.mubr.bf16.mxu1 %v22332_v47  ;;  %v19637_v47 = vld [vmem:[%s26084_s29 + $0x1c8] sm:$0xff]   ;;  %v19638_v12 = vld [vmem:[%s26084_s29 + $0x1d0] sm:$0xff]  }
 0x547   : > { %17880 = vmatprep.subr.bf16.mxu1 %v19633_v27 }
 0x54a   : > { %17881 = vmatpush3.bf16.msra.mxu1 %v19633_v27  ;;  %v19639_v27 = vld [vmem:[%s26084_s29 + $0x1d8] sm:$0xff]  }
 0x54b   : > { %17882 = vmatprep.subr.bf16.mxu1 %v19634_v58 }
 0x54e   : > { %17883 = vmatpush3.bf16.msra.mxu1 %v19634_v58  ;;  %v4629_v58 = vrot.slane %v22502_v57, 6  ;;  %v4800_v57 = vrot.slane %v22297_v24, 7  ;;  %v19643_v24 = vld [vmem:[%s26084_s29 + $0x1f8] sm:$0xff]  }
 0x54f   : > { %17884 = vmatprep.subr.bf16.mxu1 %v19635_v25 }
 0x552   : > { %17885 = vmatpush3.bf16.msra.mxu1 %v19635_v25  ;;  %v4632_v25 = vrot.slane %v22505_v60, 7 }
 0x553   : > { %17898 = vmatprep.subr.bf16.mxu1 %v19636_v11 }
 0x555   : > { %17887 = vmatmul.mubr.bf16.vlgmr.msra.gmra.mrb[72].mxu1 %v22371_v23  ;;  %v19640_v23 = vld [vmem:[%s26084_s29 + $0x1e0] sm:$0xff]  }
 0x556   : > { %17890 = vmatprep.mubr.bf16.mxu1 %v22409_v19  ;;  %17899 = vmatpush3.bf16.msra.mxu1 %v19636_v11  ;;  %v4633_v19 = vor.u32 %v4632_v25, %v4629_v58  ;;  %v4801_v11 = vrot.slane %v22301_v1, 7  ;;  %v19645_v58 = vld [vmem:[%s26084_s29 + $0x208] sm:$0xff]  }
 0x557   : > { %17900 = vmatprep.subr.bf16.mxu1 %v19637_v47 }
 0x558   : > { %v4802_v60 = vsel %vm4799_vm14, %v4800_v57, %v4801_v11  ;;  %v4807_v57 = vrot.slane %v22390_v17, 7 }
 0x55a   : > { %17901 = vmatpush3.bf16.msra.mxu1 %v19637_v47  ;;  %v19642_v47 = vld [vmem:[%s26084_s29 + $0x1f0] sm:$0xff]  }
 0x55b   : > { %17902 = vmatprep.subr.bf16.mxu1 %v19638_v12 }
 0x55d   : > { %17891 = vmatmul.mubr.bf16.gmra.mrb[76].mxu1 %v22455_v43  ;;  %v19641_v43 = vld [vmem:[%s26084_s29 + $0x1e8] sm:$0xff]  }
 0x55e   : > { %17894 = vmatprep.mubr.bf16.mxu1 %v22499_v6  ;;  %17903 = vmatpush3.bf16.msra.mxu1 %v19638_v12  ;;  %v4634_v6 = vsel %vm4602_vm8, %v22485_v21, %v4633_v19  ;;  %v19644_v21 = vld [vmem:[%s26084_s29 + $0x200] sm:$0xff]   ;;  %v4803_v12 = vrot.slane %v22318_v33, 7  ;;  %v19646_v19 = vld [vmem:[%s26084_s29 + $0x210] sm:$0xff]  }
 0x55f   : > { %17904 = vmatprep.subr.bf16.mxu1 %v19639_v27 }
 0x560   : > { %v4804_v25 = vsel %vm4799_vm14, %v4801_v11, %v4803_v12  ;;  %v19647_v11 = vld [vmem:[%s26084_s29 + $0x218] sm:$0xff]  }
 0x562   : > { %17905 = vmatpush3.bf16.msra.mxu1 %v19639_v27  ;;  %v4805_v27 = vrot.slane %v22351_v9, 7 }
 0x563   : > { %17906 = vmatprep.subr.bf16.mxu1 %v19640_v23 }
 0x565   : > { %17895 = vmatmul.mubr.bf16.gmra.mrb[80].mxu1 %v4634_v6  ;;  %v4808_v6 = vsel %vm4799_vm14, %v4805_v27, %v4807_v57 }
 0x566   : > { %17907 = vmatpush3.bf16.msra.mxu1 %v19640_v23  ;;  %17914 = vmatprep.mubr.bf16.mxu1 %v4802_v60  ;;  %v4806_v23 = vsel %vm4799_vm14, %v4803_v12, %v4805_v27  ;;  %v19650_v27 = vld [vmem:[%s26084_s29 + $0x230] sm:$0xff]  }
 0x567   : > { %17908 = vmatprep.subr.bf16.mxu1 %v19641_v43 }
 0x56a   : > { %17909 = vmatpush3.bf16.msra.mxu1 %v19641_v43  ;;  %v4809_v43 = vrot.slane %v22433_v53, 7 }
 0x56b   : > { %17910 = vmatprep.subr.bf16.mxu1 %v19642_v47 }
 0x56c   : > { %v4810_v60 = vsel %vm4799_vm14, %v4807_v57, %v4809_v43  ;;  %v19661_v57 = vld [vmem:[%s26084_s29 + $0x288] sm:$0xff]  }
 0x56e   : > { %17911 = vmatpush3.bf16.msra.mxu1 %v19642_v47  ;;  %v19648_v47 = vld [vmem:[%s26084_s29 + $0x220] sm:$0xff]  }
 0x56f   : > { %17912 = vmatprep.subr.bf16.mxu1 %v19643_v24 }
 0x572   : > { %17913 = vmatpush3.bf16.msra.mxu1 %v19643_v24  ;;  %v4811_v24 = vrot.slane %v22482_v35, 7 }
 0x573   : > { %17926 = vmatprep.subr.bf16.mxu1 %v19644_v21 }
 0x574   : > { %v4812_v12 = vsel %vm4799_vm14, %v4809_v43, %v4811_v24  ;;  %v19662_v43 = vld [vmem:[%s26084_s29 + $0x290] sm:$0xff]   ;;  %v19665_v24 = vld [vmem:[%s26084_s29 + $0x2a8] sm:$0xff]  }
 0x575   : > { %17915 = vmatmul.mubr.bf16.vlgmr.msra.gmra.mrb[72].mxu1 %v4804_v25  ;;  %v19652_v25 = vld [vmem:[%s26084_s29 + $0x240] sm:$0xff]  }
 0x576   : > { %17918 = vmatprep.mubr.bf16.mxu1 %v4806_v23  ;;  %17927 = vmatpush3.bf16.msra.mxu1 %v19644_v21  ;;  %v19649_v21 = vld [vmem:[%s26084_s29 + $0x228] sm:$0xff]   ;;  %v19654_v23 = vld [vmem:[%s26084_s29 + $0x250] sm:$0xff]  }
 0x577   : > { %17928 = vmatprep.subr.bf16.mxu1 %v19645_v58 }
 0x57a   : > { %17929 = vmatpush3.bf16.msra.mxu1 %v19645_v58  ;;  %v19651_v58 = vld [vmem:[%s26084_s29 + $0x238] sm:$0xff]  }
 0x57b   : > { %17930 = vmatprep.subr.bf16.mxu1 %v19646_v19 }
 0x57d   : > { %17919 = vmatmul.mubr.bf16.gmra.mrb[76].mxu1 %v4808_v6  ;;  %v19664_v6 = vld [vmem:[%s26084_s29 + $0x2a0] sm:$0xff]  }
 0x57e   : > { %17922 = vmatprep.mubr.bf16.mxu1 %v4810_v60  ;;  %17931 = vmatpush3.bf16.msra.mxu1 %v19646_v19  ;;  %v19655_v19 = vld [vmem:[%s26084_s29 + $0x258] sm:$0xff]   ;;  %v5322_v60 = vrot.slane %v22318_v33, 4 }
 0x57f   : > { %17932 = vmatprep.subr.bf16.mxu1 %v19647_v11 }
 0x582   : > { %17933 = vmatpush3.bf16.msra.mxu1 %v19647_v11  ;;  %v19663_v11 = vld [vmem:[%s26084_s29 + $0x298] sm:$0xff]  }
 0x583   : > { %17934 = vmatprep.subr.bf16.mxu1 %v19648_v47 }
 0x585   : > { %17923 = vmatmul.mubr.bf16.gmra.mrb[80].mxu1 %v4812_v12  ;;  %v19666_v12 = vld [vmem:[%s26084_s29 + $0x2b0] sm:$0xff]  }
 0x586   : > { %17935 = vmatpush3.bf16.msra.mxu1 %v19648_v47  ;;  %17942 = vmatprep.mubr.bf16.mxu1 %v22335_v40  ;;  %v19653_v40 = vld [vmem:[%s26084_s29 + $0x248] sm:$0xff]   ;;  %v5321_v47 = vrot.slane %v22301_v1, 4 }
 0x587   : > { %17936 = vmatprep.subr.bf16.mxu1 %v19649_v21 }
 0x58a   : > { %17937 = vmatpush3.bf16.msra.mxu1 %v19649_v21  ;;  %v5323_v21 = vsel %vm5320_vm15, %v5321_v47, %v5322_v60 }
 0x58b   : > { %17938 = vmatprep.subr.bf16.mxu1 %v19650_v27 }
 0x58e   : > { %17939 = vmatpush3.bf16.msra.mxu1 %v19650_v27  ;;  %v19667_v27 = vld [vmem:[%s26084_s29 + $0x2b8] sm:$0xff]  }
 0x58f   : > { %17940 = vmatprep.subr.bf16.mxu1 %v19651_v58 }
 0x592   : > { %17941 = vmatpush3.bf16.msra.mxu1 %v19651_v58  ;;  %v19668_v58 = vld [vmem:[%s26084_s29 + $0x2c0] sm:$0xff]  }
 0x593   : > { %17954 = vmatprep.subr.bf16.mxu1 %v19652_v25 }
 0x595   : > { %17943 = vmatmul.mubr.bf16.vlgmr.msra.gmra.mrb[72].mxu1 %v22374_v7  ;;  %v19656_v7 = vld [vmem:[%s26084_s29 + $0x260] sm:$0xff]  }
 0x596   : > { %17946 = vmatprep.mubr.bf16.mxu1 %v22412_v32  ;;  %17955 = vmatpush3.bf16.msra.mxu1 %v19652_v25  ;;  %v19657_v32 = vld [vmem:[%s26084_s29 + $0x268] sm:$0xff]   ;;  %v5324_v25 = vrot.slane %v22351_v9, 4 }
 0x597   : > { %17956 = vmatprep.subr.bf16.mxu1 %v19653_v40 }
 0x59a   : > { %17957 = vmatpush3.bf16.msra.mxu1 %v19653_v40  ;;  %v5326_v40 = vrot.slane %v22390_v17, 4 }
 0x59b   : > { %17958 = vmatprep.subr.bf16.mxu1 %v19654_v23 }
 0x59d   : > { %17947 = vmatmul.mubr.bf16.gmra.mrb[76].mxu1 %v22458_v3  ;;  %v19658_v3 = vld [vmem:[%s26084_s29 + $0x270] sm:$0xff]  }
 0x59e   : > { %17950 = vmatprep.mubr.bf16.mxu1 %v22508_v16  ;;  %17959 = vmatpush3.bf16.msra.mxu1 %v19654_v23  ;;  %v19659_v16 = vld [vmem:[%s26084_s29 + $0x278] sm:$0xff]   ;;  %v19669_v23 = vld [vmem:[%s26084_s29 + $0x2c8] sm:$0xff]  }
 0x59f   : > { %17960 = vmatprep.subr.bf16.mxu1 %v19655_v19 }
 0x5a2   : > { %17961 = vmatpush3.bf16.msra.mxu1 %v19655_v19  ;;  %v23033_v19 = vsel %vm5320_vm15, %v5322_v60, %v5324_v25  ;;  %v19673_v60 = vld [vmem:[%s26084_s29 + $0x2e8] sm:$0xff]  }
 0x5a3   : > { %17962 = vmatprep.subr.bf16.mxu1 %v19656_v7 }
 0x5a5   : > { %17951 = vmatmul.mubr.bf16.gmra.mrb[80].mxu1 %v22529_v26  ;;  %v19660_v26 = vld [vmem:[%s26084_s29 + $0x280] sm:$0xff]  }
 0x5a6   : > { %17963 = vmatpush3.bf16.msra.mxu1 %v19656_v7  ;;  %17970 = vmatprep.mubr.bf16.mxu1 %v22301_v1  ;;  %v23037_v7 = vsel %vm5320_vm15, %v5324_v25, %v5326_v40  ;;  %v5525_v25 = vrot.slane %v22552_v55, 4  ;;  %v5696_v55 = vrot.slane %v22301_v1, 5  ;;  %v19683_v1 = vld [vmem:[%s26084_s29 + $0x338] sm:$0xff]  }
 0x5a7   : > { %17964 = vmatprep.subr.bf16.mxu1 %v19657_v32 }
 0x5aa   : > { %17965 = vmatpush3.bf16.msra.mxu1 %v19657_v32  ;;  %v19670_v32 = vld [vmem:[%s26084_s29 + $0x2d0] sm:$0xff]  }
 0x5ab   : > { %17966 = vmatprep.subr.bf16.mxu1 %v19658_v3 }
 0x5ae   : > { %17967 = vmatpush3.bf16.msra.mxu1 %v19658_v3  ;;  %v5328_v3 = vrot.slane %v22433_v53, 4 }
 0x5af   : > { %17968 = vmatprep.subr.bf16.mxu1 %v19659_v16 }
 0x5b2   : > { %17969 = vmatpush3.bf16.msra.mxu1 %v19659_v16  ;;  %v5330_v16 = vrot.slane %v22482_v35, 4 }
 0x5b3   : > { %17982 = vmatprep.subr.bf16.mxu1 %v19660_v26 }
 0x5b5   : > { %17971 = vmatmul.mubr.bf16.vlgmr.msra.gmra.mrb[72].mxu1 %v22318_v33 }
 0x5b6   : > { %17974 = vmatprep.mubr.bf16.mxu1 %v22351_v9  ;;  %17983 = vmatpush3.bf16.msra.mxu1 %v19660_v26  ;;  %v19671_v26 = vld [vmem:[%s26084_s29 + $0x2d8] sm:$0xff]  }
 0x5b7   : > { %17984 = vmatprep.subr.bf16.mxu1 %v19661_v57 }
 0x5ba   : > { %17985 = vmatpush3.bf16.msra.mxu1 %v19661_v57  ;;  %v23049_v57 = vsel %vm5320_vm15, %v5326_v40, %v5328_v3  ;;  %v5528_v40 = vrot.slane %v22557_v30, 5  ;;  %v26106_v30 = vld [vmem:[#allocation21_spill] sm:$0xff] }
 0x5bb   : > { %17986 = vmatprep.subr.bf16.mxu1 %v19662_v43 }
 0x5bd   : > { %17975 = vmatmul.mubr.bf16.gmra.mrb[76].mxu1 %v22390_v17 }
 0x5be   : > { %17978 = vmatprep.mubr.bf16.mxu1 %v22433_v53  ;;  %17987 = vmatpush3.bf16.msra.mxu1 %v19662_v43  ;;  %v23053_v43 = vsel %vm5320_vm15, %v5328_v3, %v5330_v16 }
 0x5bf   : > { %17988 = vmatprep.subr.bf16.mxu1 %v19663_v11 }
 0x5c2   : > { %17989 = vmatpush3.bf16.msra.mxu1 %v19663_v11  ;;  %v19672_v11 = vld [vmem:[%s26084_s29 + $0x2e0] sm:$0xff]  }
 0x5c3   : > { %17990 = vmatprep.subr.bf16.mxu1 %v19664_v6 }
 0x5c5   : > { %17979 = vmatmul.mubr.bf16.gmra.mrb[80].mxu1 %v22482_v35 }
 0x5c6   : > { %17991 = vmatpush3.bf16.msra.mxu1 %v19664_v6  ;;  %17998 = vmatprep.mubr.bf16.mxu1 %v5323_v21  ;;  %v5332_v6 = vrot.slane %v22524_v13, 4  ;;  %v19675_v21 = vld [vmem:[%s26084_s29 + $0x2f8] sm:$0xff]  }
 0x5c7   : > { %17992 = vmatprep.subr.bf16.mxu1 %v19665_v24 }
 0x5c8   : > { %v23066_v47 = vsel %vm5320_vm15, %v5330_v16, %v5332_v6 }
 0x5ca   : > { %17993 = vmatpush3.bf16.msra.mxu1 %v19665_v24  ;;  %v19674_v24 = vld [vmem:[%s26084_s29 + $0x2f0] sm:$0xff]  }
 0x5cb   : > { %17994 = vmatprep.subr.bf16.mxu1 %v19666_v12 }
 0x5ce   : > { %17995 = vmatpush3.bf16.msra.mxu1 %v19666_v12  ;;  %v19676_v12 = vld [vmem:[%s26084_s29 + $0x300] sm:$0xff]  }
 0x5cf   : > { %17996 = vmatprep.subr.bf16.mxu1 %v19667_v27 }
 0x5d2   : > { %17997 = vmatpush3.bf16.msra.mxu1 %v19667_v27  ;;  %v19678_v27 = vld [vmem:[%s26084_s29 + $0x310] sm:$0xff]  }
 0x5d3   : > { %18010 = vmatprep.subr.bf16.mxu1 %v19668_v58 }
 0x5d5   : > { %17999 = vmatmul.mubr.bf16.vlgmr.msra.gmra.mrb[72].mxu1 %v23033_v19 }
 0x5d6   : > { %18002 = vmatprep.mubr.bf16.mxu1 %v23037_v7  ;;  %18011 = vmatpush3.bf16.msra.mxu1 %v19668_v58  ;;  %v19679_v58 = vld [vmem:[%s26084_s29 + $0x318] sm:$0xff]  }
 0x5d7   : > { %18012 = vmatprep.subr.bf16.mxu1 %v19669_v23 }
 0x5da   : > { %18013 = vmatpush3.bf16.msra.mxu1 %v19669_v23  ;;  %v5529_v23 = vor.u32 %v5528_v40, %v5525_v25  ;;  %v5705_v25 = vrot.slane %v22482_v35, 5  ;;  %v19687_v40 = vld [vmem:[%s26084_s29 + $0x358] sm:$0xff]  }
 0x5db   : > { %18014 = vmatprep.subr.bf16.mxu1 %v19670_v32 }
 0x5dc   : > { %v5530_v3 = vsel %vm5498_vm10, %v26106_v30, %v5529_v23  ;;  %v19688_v23 = vld [vmem:[%s26084_s29 + $0x360] sm:$0xff]   ;;  %v26107_v30 = vld [vmem:[#allocation19_spill] sm:$0xff] }
 0x5dd   : > { %18003 = vmatmul.mubr.bf16.gmra.mrb[76].mxu1 %v23049_v57 }
 0x5de   : > { %18006 = vmatprep.mubr.bf16.mxu1 %v23053_v43  ;;  %18015 = vmatpush3.bf16.msra.mxu1 %v19670_v32  ;;  %v5697_v32 = vrot.slane %v22318_v33, 5 }
 0x5df   : > { %18016 = vmatprep.subr.bf16.mxu1 %v19671_v26 }
 0x5e0   : > { %v5698_v16 = vsel %vm5695_vm7, %v5696_v55, %v5697_v32  ;;  %v19689_v55 = vld [vmem:[%s26084_s29 + $0x368] sm:$0xff]  }
 0x5e2   : > { %18017 = vmatpush3.bf16.msra.mxu1 %v19671_v26  ;;  %v19682_v26 = vld [vmem:[%s26084_s29 + $0x330] sm:$0xff]  }
 0x5e3   : > { %18018 = vmatprep.subr.bf16.mxu1 %v19672_v11 }
 0x5e5   : > { %18007 = vmatmul.mubr.bf16.gmra.mrb[80].mxu1 %v23066_v47 }
 0x5e6   : > { %18019 = vmatpush3.bf16.msra.mxu1 %v19672_v11  ;;  %18026 = vmatprep.mubr.bf16.mxu1 %v22438_v4  ;;  %v19677_v4 = vld [vmem:[%s26084_s29 + $0x308] sm:$0xff]   ;;  %v19684_v11 = vld [vmem:[%s26084_s29 + $0x340] sm:$0xff]  }
 0x5e7   : > { %18020 = vmatprep.subr.bf16.mxu1 %v19673_v60 }
 0x5ea   : > { %18021 = vmatpush3.bf16.msra.mxu1 %v19673_v60  ;;  %v5699_v60 = vrot.slane %v22351_v9, 5 }
 0x5eb   : > { %18022 = vmatprep.subr.bf16.mxu1 %v19674_v24 }
 0x5ee   : > { %18023 = vmatpush3.bf16.msra.mxu1 %v19674_v24  ;;  %v5701_v24 = vrot.slane %v22390_v17, 5 }
 0x5ef   : > { %18024 = vmatprep.subr.bf16.mxu1 %v19675_v21 }
 0x5f2   : > { %18025 = vmatpush3.bf16.msra.mxu1 %v19675_v21  ;;  %v19685_v21 = vld [vmem:[%s26084_s29 + $0x348] sm:$0xff]  }
 0x5f3   : > { %18038 = vmatprep.subr.bf16.mxu1 %v19676_v12 }
 0x5f5   : > { %18027 = vmatmul.mubr.bf16.vlgmr.msra.gmra.mrb[72].mxu1 %v22489_v63  ;;  %v26105_v63 = vld [vmem:[#allocation22_spill] sm:$0xff] }
 0x5f6   : > { %18030 = vmatprep.mubr.bf16.mxu1 %v22514_v14  ;;  %18039 = vmatpush3.bf16.msra.mxu1 %v19676_v12  ;;  %v19680_v14 = vld [vmem:[%s26084_s29 + $0x320] sm:$0xff]   ;;  %v5700_v12 = vsel %vm5695_vm7, %v5697_v32, %v5699_v60  ;;  %v5707_v32 = vrot.slane %v22524_v13, 5 }
 0x5f7   : > { %18040 = vmatprep.subr.bf16.mxu1 %v19677_v4 }
 0x5fa   : > { %18041 = vmatpush3.bf16.msra.mxu1 %v19677_v4  ;;  %v5702_v4 = vsel %vm5695_vm7, %v5699_v60, %v5701_v24  ;;  %v26109_v60 = vld [vmem:[#allocation24_spill] sm:$0xff] }
 0x5fb   : > { %18042 = vmatprep.subr.bf16.mxu1 %v19678_v27 }
 0x5fd   : > { %18031 = vmatmul.mubr.bf16.gmra.mrb[76].mxu1 %v22539_v49  ;;  %v19681_v49 = vld [vmem:[%s26084_s29 + $0x328] sm:$0xff]  }
 0x5fe   : > { %18034 = vmatprep.mubr.bf16.mxu1 %v26105_v63  ;;  %18043 = vmatpush3.bf16.msra.mxu1 %v19678_v27  ;;  %v19686_v27 = vld [vmem:[%s26084_s29 + $0x350] sm:$0xff]  }
 0x5ff   : > { %18044 = vmatprep.subr.bf16.mxu1 %v19679_v58 }
 0x602   : > { %18045 = vmatpush3.bf16.msra.mxu1 %v19679_v58  ;;  %v5703_v58 = vrot.slane %v22433_v53, 5 }
 0x603   : > { %18046 = vmatprep.subr.bf16.mxu1 %v19680_v14 }
 0x604   : > { %v5704_v63 = vsel %vm5695_vm7, %v5701_v24, %v5703_v58  ;;  %v19694_v24 = vld [vmem:[%s26084_s29 + $0x390] sm:$0xff]  }
 0x605   : > { %18035 = vmatmul.mubr.bf16.gmra.mrb[80].mxu1 %v5530_v3  ;;  %v19690_v3 = vld [vmem:[%s26084_s29 + $0x370] sm:$0xff]  }
 0x606   : > { %18047 = vmatpush3.bf16.msra.mxu1 %v19680_v14  ;;  %18054 = vmatprep.mubr.bf16.mxu1 %v5698_v16  ;;  %v5706_v14 = vsel %vm5695_vm7, %v5703_v58, %v5705_v25  ;;  %v19691_v16 = vld [vmem:[%s26084_s29 + $0x378] sm:$0xff]   ;;  %v19697_v58 = vld [vmem:[%s26084_s29 + $0x3a8] sm:$0xff]  }
 0x607   : > { %18048 = vmatprep.subr.bf16.mxu1 %v19681_v49 }
 0x60a   : > { %18049 = vmatpush3.bf16.msra.mxu1 %v19681_v49  ;;  %v5708_v49 = vsel %vm5695_vm7, %v5705_v25, %v5707_v32  ;;  %v26112_v25 = vld [vmem:[#allocation27_spill] sm:$0xff]  ;;  %v19703_v32 = vld [vmem:[%s26084_s29 + $0x3d8] sm:$0xff]  }
 0x60b   : > { %18050 = vmatprep.subr.bf16.mxu1 %v19682_v26 }
 0x60e   : > { %18051 = vmatpush3.bf16.msra.mxu1 %v19682_v26  ;;  %v19692_v26 = vld [vmem:[%s26084_s29 + $0x380] sm:$0xff]  }
 0x60f   : > { %18052 = vmatprep.subr.bf16.mxu1 %v19683_v1 }
 0x612   : > { %18053 = vmatpush3.bf16.msra.mxu1 %v19683_v1  ;;  %v19693_v1 = vld [vmem:[%s26084_s29 + $0x388] sm:$0xff]  }
 0x613   : > { %18066 = vmatprep.subr.bf16.mxu1 %v19684_v11 }
 0x615   : > { %18055 = vmatmul.mubr.bf16.vlgmr.msra.gmra.mrb[72].mxu1 %v5700_v12  ;;  %v26110_v12 = vld [vmem:[#allocation25_spill] sm:$0xff] }
 0x616   : > { %18058 = vmatprep.mubr.bf16.mxu1 %v5702_v4  ;;  %18067 = vmatpush3.bf16.msra.mxu1 %v19684_v11  ;;  %v26108_v11 = vld [vmem:[#allocation23_spill] sm:$0xff]  ;;  %v26111_v4 = vld [vmem:[#allocation26_spill] sm:$0xff] }
 0x617   : > { %18068 = vmatprep.subr.bf16.mxu1 %v19685_v21 }
 0x61a   : > { %18069 = vmatpush3.bf16.msra.mxu1 %v19685_v21  ;;  %v19695_v21 = vld [vmem:[%s26084_s29 + $0x398] sm:$0xff]  }
 0x61b   : > { %18070 = vmatprep.subr.bf16.mxu1 %v19686_v27 }
 0x61d   : > { %18059 = vmatmul.mubr.bf16.gmra.mrb[76].mxu1 %v5704_v63  ;;  %v19699_v63 = vld [vmem:[%s26084_s29 + $0x3b8] sm:$0xff]  }
 0x61e   : > { %18062 = vmatprep.mubr.bf16.mxu1 %v5706_v14  ;;  %18071 = vmatpush3.bf16.msra.mxu1 %v19686_v27  ;;  %v19696_v27 = vld [vmem:[%s26084_s29 + $0x3a0] sm:$0xff]  }
 0x61f   : > { %18072 = vmatprep.subr.bf16.mxu1 %v19687_v40  ;;  %v19700_v14 = vld [vmem:[%s26084_s29 + $0x3c0] sm:$0xff]  }
 0x622   : > { %18073 = vmatpush3.bf16.msra.mxu1 %v19687_v40  ;;  %v19698_v40 = vld [vmem:[%s26084_s29 + $0x3b0] sm:$0xff]  }
 0x623   : > { %18074 = vmatprep.subr.bf16.mxu1 %v19688_v23 }
 0x625   : > { %18063 = vmatmul.mubr.bf16.gmra.mrb[80].mxu1 %v5708_v49  ;;  %v19707_v49 = vld [vmem:[%s26084_s29 + $0x3f8] sm:$0xff]  }
 0x626   : > { %18075 = vmatpush3.bf16.msra.mxu1 %v19688_v23  ;;  %18082 = vmatprep.mubr.bf16.mxu1 %v26107_v30  ;;  %v19702_v23 = vld [vmem:[%s26084_s29 + $0x3d0] sm:$0xff]  }
 0x627   : > { %18076 = vmatprep.subr.bf16.mxu1 %v19689_v55  ;;  %v19710_v30 = vld [vmem:[%s26084_s29 + $0x410] sm:$0xff]  }
 0x62a   : > { %18077 = vmatpush3.bf16.msra.mxu1 %v19689_v55  ;;  %v19705_v55 = vld [vmem:[%s26084_s29 + $0x3e8] sm:$0xff]  }
 0x62b   : > { %18078 = vmatprep.subr.bf16.mxu1 %v19690_v3 }
 0x62e   : > { %18079 = vmatpush3.bf16.msra.mxu1 %v19690_v3  ;;  %v6226_v3 = vrot.slane %v22482_v35, 2 }
 0x62f   : > { %18080 = vmatprep.subr.bf16.mxu1 %v19691_v16 }
 0x632   : > { %18081 = vmatpush3.bf16.msra.mxu1 %v19691_v16  ;;  %v23222_v16 = vrot.slane %v22524_v13, 2 }
 0x633   : > { %18094 = vmatprep.subr.bf16.mxu1 %v19692_v26 }
 0x635   : > { %18083 = vmatmul.mubr.bf16.vlgmr.msra.gmra.mrb[72].mxu1 %v26108_v11  ;;  %v23234_v11 = vsel %vm2826_vm3, %v6226_v3, %v23222_v16 }
 0x636   : > { %18086 = vmatprep.mubr.bf16.mxu1 %v26109_v60  ;;  %18095 = vmatpush3.bf16.msra.mxu1 %v19692_v26  ;;  %v19711_v26 = vld [vmem:[%s26084_s29 + $0x418] sm:$0xff]   ;;  %v19712_v60 = vld [vmem:[%s26084_s29 + $0x420] sm:$0xff]  }
 0x637   : > { %18096 = vmatprep.subr.bf16.mxu1 %v19693_v1 }
 0x63a   : > { %18097 = vmatpush3.bf16.msra.mxu1 %v19693_v1  ;;  %v23229_v1 = vsel %vm2826_vm3, %v22810_v62, %v6226_v3  ;;  %v19713_v62 = vld [vmem:[%s26084_s29 + $0x428] sm:$0xff]   ;;  %v19728_v3 = vld [vmem:[%s26084_s29 + $0x4a0] sm:$0xff]  }
 0x63b   : > { %18098 = vmatprep.subr.bf16.mxu1 %v19694_v24 }
 0x63d   : > { %18087 = vmatmul.mubr.bf16.gmra.mrb[76].mxu1 %v26110_v12  ;;  %v19716_v12 = vld [vmem:[%s26084_s29 + $0x440] sm:$0xff]  }
 0x63e   : > { %18090 = vmatprep.mubr.bf16.mxu1 %v26111_v4  ;;  %18099 = vmatpush3.bf16.msra.mxu1 %v19694_v24  ;;  %v19714_v24 = vld [vmem:[%s26084_s29 + $0x430] sm:$0xff]  }
 0x63f   : > { %18100 = vmatprep.subr.bf16.mxu1 %v19695_v21  ;;  %v19718_v4 = vld [vmem:[%s26084_s29 + $0x450] sm:$0xff]  }
 0x642   : > { %18101 = vmatpush3.bf16.msra.mxu1 %v19695_v21  ;;  %v19715_v21 = vld [vmem:[%s26084_s29 + $0x438] sm:$0xff]  }
 0x643   : > { %18102 = vmatprep.subr.bf16.mxu1 %v19696_v27 }
 0x645   : > { %18091 = vmatmul.mubr.bf16.gmra.mrb[80].mxu1 %v26112_v25  ;;  %v6584_v25 = vrot.slane %v22318_v33, 3  ;;  %v19723_v33 = vld [vmem:[%s26084_s29 + $0x478] sm:$0xff]  }
 0x646   : > { %18103 = vmatpush3.bf16.msra.mxu1 %v19696_v27  ;;  %18110 = vmatprep.mubr.bf16.mxu1 %v22849_v46  ;;  %v19701_v46 = vld [vmem:[%s26084_s29 + $0x3c8] sm:$0xff]   ;;  %v19719_v27 = vld [vmem:[%s26084_s29 + $0x458] sm:$0xff]  }
 0x647   : > { %18104 = vmatprep.subr.bf16.mxu1 %v19697_v58 }
 0x64a   : > { %18105 = vmatpush3.bf16.msra.mxu1 %v19697_v58  ;;  %v6585_v58 = vrot.slane %v22351_v9, 3 }
 0x64b   : > { %18106 = vmatprep.subr.bf16.mxu1 %v19698_v40 }
 0x64e   : > { %18107 = vmatpush3.bf16.msra.mxu1 %v19698_v40  ;;  %v26113_v40 = vld [vmem:[#allocation28_spill] sm:$0xff] }
 0x64f   : > { %18108 = vmatprep.subr.bf16.mxu1 %v19699_v63 }
 0x652   : > { %18109 = vmatpush3.bf16.msra.mxu1 %v19699_v63  ;;  %v6586_v63 = vsel %vm3024_vm4, %v6584_v25, %v6585_v58  ;;  %v19745_v25 = vld [vmem:[%s26084_s29 + $0x528] sm:$0xff]  }
 0x653   : > { %18122 = vmatprep.subr.bf16.mxu1 %v19700_v14 }
 0x655   : > { %18111 = vmatmul.mubr.bf16.vlgmr.msra.gmra.mrb[72].mxu1 %v22853_v2  ;;  %v19704_v2 = vld [vmem:[%s26084_s29 + $0x3e0] sm:$0xff]  }
 0x656   : > { %18114 = vmatprep.mubr.bf16.mxu1 %v22865_v44  ;;  %18123 = vmatpush3.bf16.msra.mxu1 %v19700_v14  ;;  %v6065_v44 = vrot.slane %v22524_v13, 6  ;;  %v19722_v14 = vld [vmem:[%s26084_s29 + $0x470] sm:$0xff]  }
 0x657   : > { %18124 = vmatprep.subr.bf16.mxu1 %v19701_v46 }
 0x65a   : > { %18125 = vmatpush3.bf16.msra.mxu1 %v19701_v46  ;;  %v19724_v46 = vld [vmem:[%s26084_s29 + $0x480] sm:$0xff]  }
 0x65b   : > { %18126 = vmatprep.subr.bf16.mxu1 %v19702_v23 }
 0x65d   : > { %18115 = vmatmul.mubr.bf16.gmra.mrb[76].mxu1 %v22869_v50  ;;  %v6066_v50 = vsel %vm4424_vm13, %v4436_v29, %v6065_v44  ;;  %v19708_v29 = vld [vmem:[%s26084_s29 + $0x400] sm:$0xff]  }
 0x65e   : > { %18118 = vmatprep.mubr.bf16.mxu1 %v22882_v20  ;;  %18127 = vmatpush3.bf16.msra.mxu1 %v19702_v23  ;;  %v19706_v20 = vld [vmem:[%s26084_s29 + $0x3f0] sm:$0xff]   ;;  %v6587_v23 = vrot.slane %v22390_v17, 3 }
 0x65f   : > { %18128 = vmatprep.subr.bf16.mxu1 %v19703_v32 }
 0x660   : > { %v6588_v44 = vsel %vm3024_vm4, %v6585_v58, %v6587_v23  ;;  %v19743_v58 = vld [vmem:[%s26084_s29 + $0x518] sm:$0xff]  }
 0x662   : > { %18129 = vmatpush3.bf16.msra.mxu1 %v19703_v32  ;;  %v6589_v32 = vrot.slane %v22433_v53, 3 }
 0x663   : > { %18130 = vmatprep.subr.bf16.mxu1 %v19704_v2 }
 0x665   : > { %18119 = vmatmul.mubr.bf16.gmra.mrb[80].mxu1 %v6066_v50  ;;  %v19726_v50 = vld [vmem:[%s26084_s29 + $0x490] sm:$0xff]  }
 0x666   : > { %18131 = vmatpush3.bf16.msra.mxu1 %v19704_v2  ;;  %18138 = vmatprep.mubr.bf16.mxu1 %v22802_v61  ;;  %v19709_v61 = vld [vmem:[%s26084_s29 + $0x408] sm:$0xff]  }
 0x667   : > { %18132 = vmatprep.subr.bf16.mxu1 %v19705_v55  ;;  %v19725_v2 = vld [vmem:[%s26084_s29 + $0x488] sm:$0xff]  }
 0x66a   : > { %18133 = vmatpush3.bf16.msra.mxu1 %v19705_v55  ;;  %v6590_v55 = vsel %vm3024_vm4, %v6587_v23, %v6589_v32  ;;  %v19757_v23 = vld [vmem:[%s26084_s29 + $0x588] sm:$0xff]  }
 0x66b   : > { %18134 = vmatprep.subr.bf16.mxu1 %v19706_v20 }
 0x66e   : > { %18135 = vmatpush3.bf16.msra.mxu1 %v19706_v20  ;;  %v6591_v20 = vrot.slane %v22482_v35, 3 }
 0x66f   : > { %18136 = vmatprep.subr.bf16.mxu1 %v19707_v49 }
 0x672   : > { %18137 = vmatpush3.bf16.msra.mxu1 %v19707_v49  ;;  %v6593_v49 = vrot.slane %v22524_v13, 3 }
 0x673   : > { %18150 = vmatprep.subr.bf16.mxu1 %v19708_v29 }
 0x675   : > { %18139 = vmatmul.mubr.bf16.vlgmr.msra.gmra.mrb[72].mxu1 %v22816_v5 }
 0x676   : > { %18142 = vmatprep.mubr.bf16.mxu1 %v22821_v15  ;;  %18151 = vmatpush3.bf16.msra.mxu1 %v19708_v29  ;;  %v19727_v29 = vld [vmem:[%s26084_s29 + $0x498] sm:$0xff]  }
 0x677   : > { %18152 = vmatprep.subr.bf16.mxu1 %v19709_v61 }
 0x67a   : > { %18153 = vmatpush3.bf16.msra.mxu1 %v19709_v61  ;;  %v6592_v61 = vsel %vm3024_vm4, %v6589_v32, %v6591_v20  ;;  %v26115_v32 = vld [vmem:[#allocation20_spill] sm:$0xff] }
 0x67b   : > { %18154 = vmatprep.subr.bf16.mxu1 %v19710_v30 }
 0x67d   : > { %18143 = vmatmul.mubr.bf16.gmra.mrb[76].mxu1 %v23229_v1 }
 0x67e   : > { %18146 = vmatprep.mubr.bf16.mxu1 %v23234_v11  ;;  %18155 = vmatpush3.bf16.msra.mxu1 %v19710_v30  ;;  %v6594_v30 = vsel %vm3024_vm4, %v6591_v20, %v6593_v49  ;;  %v26118_v20 = vld [vmem:[#allocation32_spill] sm:$0xff] }
 0x67f   : > { %18156 = vmatprep.subr.bf16.mxu1 %v19711_v26 }
 0x682   : > { %18157 = vmatpush3.bf16.msra.mxu1 %v19711_v26  ;;  %v6595_v26 = vrot.slane %v22561_v52, 3 }
 0x683   : > { %18158 = vmatprep.subr.bf16.mxu1 %v19712_v60 }
 0x685   : > { %18147 = vmatmul.mubr.bf16.gmra.mrb[80].mxu1 %v23222_v16 }
 0x686   : > { %18159 = vmatpush3.bf16.msra.mxu1 %v19712_v60  ;;  %18166 = vmatprep.mubr.bf16.mxu1 %v22618_v56  ;;  %v19717_v56 = vld [vmem:[%s26084_s29 + $0x448] sm:$0xff]  }
 0x687   : > { %18160 = vmatprep.subr.bf16.mxu1 %v19713_v62  ;;  %v19729_v60 = vld [vmem:[%s26084_s29 + $0x4a8] sm:$0xff]  }
 0x68a   : > { %18161 = vmatpush3.bf16.msra.mxu1 %v19713_v62  ;;  %v6596_v62 = vsel %vm3024_vm4, %v6593_v49, %v6595_v26  ;;  %v19760_v49 = vld [vmem:[%s26084_s29 + $0x5a0] sm:$0xff]  }
 0x68b   : > { %18162 = vmatprep.subr.bf16.mxu1 %v19714_v24  ;;  %v19764_v26 = vld [vmem:[%s26084_s29 + $0x5c0] sm:$0xff]  }
 0x68e   : > { %18163 = vmatpush3.bf16.msra.mxu1 %v19714_v24  ;;  %v19730_v24 = vld [vmem:[%s26084_s29 + $0x4b0] sm:$0xff]  }
 0x68f   : > { %18164 = vmatprep.subr.bf16.mxu1 %v19715_v21 }
 0x692   : > { %18165 = vmatpush3.bf16.msra.mxu1 %v19715_v21  ;;  %v19731_v21 = vld [vmem:[%s26084_s29 + $0x4b8] sm:$0xff]  }
 0x693   : > { %18178 = vmatprep.subr.bf16.mxu1 %v19716_v12 }
 0x695   : > { %18167 = vmatmul.mubr.bf16.vlgmr.msra.gmra.mrb[72].mxu1 %v22621_v45  ;;  %v19720_v45 = vld [vmem:[%s26084_s29 + $0x460] sm:$0xff]  }
 0x696   : > { %18170 = vmatprep.mubr.bf16.mxu1 %v22624_v41  ;;  %18179 = vmatpush3.bf16.msra.mxu1 %v19716_v12  ;;  %v6417_v41 = vrot.slane %v22643_v18, 3  ;;  %v19732_v12 = vld [vmem:[%s26084_s29 + $0x4c0] sm:$0xff]  }
 0x697   : > { %18180 = vmatprep.subr.bf16.mxu1 %v19717_v56 }
 0x69a   : > { %18181 = vmatpush3.bf16.msra.mxu1 %v19717_v56  ;;  %v19734_v56 = vld [vmem:[%s26084_s29 + $0x4d0] sm:$0xff]  }
 0x69b   : > { %18182 = vmatprep.subr.bf16.mxu1 %v19718_v4 }
 0x69d   : > { %18171 = vmatmul.mubr.bf16.gmra.mrb[76].mxu1 %v22629_v42  ;;  %v19721_v42 = vld [vmem:[%s26084_s29 + $0x468] sm:$0xff]  }
 0x69e   : > { %18174 = vmatprep.mubr.bf16.mxu1 %v22636_v10  ;;  %18183 = vmatpush3.bf16.msra.mxu1 %v19718_v4  ;;  %v6418_v10 = vsel %vm2916_vm5, %v26113_v40, %v6417_v41  ;;  %v19735_v4 = vld [vmem:[%s26084_s29 + $0x4d8] sm:$0xff]   ;;  %v19737_v41 = vld [vmem:[%s26084_s29 + $0x4e8] sm:$0xff]   ;;  %v19750_v40 = vld [vmem:[%s26084_s29 + $0x550] sm:$0xff]  }
 0x69f   : > { %18184 = vmatprep.subr.bf16.mxu1 %v19719_v27 }
 0x6a2   : > { %18185 = vmatpush3.bf16.msra.mxu1 %v19719_v27  ;;  %v6787_v27 = vrot.slane %v22680_v0, 3  ;;  %v19739_v0 = vld [vmem:[%s26084_s29 + $0x4f8] sm:$0xff]  }
 0x6a3   : > { %18186 = vmatprep.subr.bf16.mxu1 %v19720_v45 }
 0x6a5   : > { %18175 = vmatmul.mubr.bf16.gmra.mrb[80].mxu1 %v6418_v10  ;;  %v19751_v10 = vld [vmem:[%s26084_s29 + $0x558] sm:$0xff]  }
 0x6a6   : > { %18187 = vmatpush3.bf16.msra.mxu1 %v19720_v45  ;;  %18194 = vmatprep.mubr.bf16.mxu1 %v6586_v63  ;;  %v6788_v45 = vrot.slane %v22643_v18, 4  ;;  %v26114_v63 = vld [vmem:[#allocation18_spill] sm:$0xff] }
 0x6a7   : > { %18188 = vmatprep.subr.bf16.mxu1 %v19721_v42 }
 0x6aa   : > { %18189 = vmatpush3.bf16.msra.mxu1 %v19721_v42  ;;  %v19747_v42 = vld [vmem:[%s26084_s29 + $0x538] sm:$0xff]  }
 0x6ab   : > { %18190 = vmatprep.subr.bf16.mxu1 %v19722_v14 }
 0x6ae   : > { %18191 = vmatpush3.bf16.msra.mxu1 %v19722_v14  ;;  %v19754_v14 = vld [vmem:[%s26084_s29 + $0x570] sm:$0xff]  }
 0x6af   : > { %18192 = vmatprep.subr.bf16.mxu1 %v19723_v33 }
 0x6b2   : > { %18193 = vmatpush3.bf16.msra.mxu1 %v19723_v33  ;;  %v19755_v33 = vld [vmem:[%s26084_s29 + $0x578] sm:$0xff]  }
 0x6b3   : > { %18206 = vmatprep.subr.bf16.mxu1 %v19724_v46 }
 0x6b5   : > { %18195 = vmatmul.mubr.bf16.vlgmr.msra.gmra.mrb[72].mxu1 %v6588_v44  ;;  %v19758_v44 = vld [vmem:[%s26084_s29 + $0x590] sm:$0xff]  }
 0x6b6   : > { %18198 = vmatprep.mubr.bf16.mxu1 %v6590_v55  ;;  %18207 = vmatpush3.bf16.msra.mxu1 %v19724_v46  ;;  %v19756_v46 = vld [vmem:[%s26084_s29 + $0x580] sm:$0xff]   ;;  %v19759_v55 = vld [vmem:[%s26084_s29 + $0x598] sm:$0xff]  }
 0x6b7   : > { %18208 = vmatprep.subr.bf16.mxu1 %v19725_v2 }
 0x6ba   : > { %18209 = vmatpush3.bf16.msra.mxu1 %v19725_v2  ;;  %v26116_v2 = vld [vmem:[#allocation29_spill] sm:$0xff] }
 0x6bb   : > { %18210 = vmatprep.subr.bf16.mxu1 %v19726_v50 }
 0x6bd   : > { %18199 = vmatmul.mubr.bf16.gmra.mrb[76].mxu1 %v6592_v61  ;;  %v26119_v61 = vld [vmem:[#allocation30_spill] sm:$0xff] }
 0x6be   : > { %18202 = vmatprep.mubr.bf16.mxu1 %v6594_v30  ;;  %18211 = vmatpush3.bf16.msra.mxu1 %v19726_v50  ;;  %v26117_v50 = vld [vmem:[#allocation31_spill] sm:$0xff] }
 0x6bf   : > { %18212 = vmatprep.subr.bf16.mxu1 %v19727_v29  ;;  %v19762_v30 = vld [vmem:[%s26084_s29 + $0x5b0] sm:$0xff]  }
 0x6c2   : > { %18213 = vmatpush3.bf16.msra.mxu1 %v19727_v29  ;;  %v19761_v29 = vld [vmem:[%s26084_s29 + $0x5a8] sm:$0xff]  }
 0x6c3   : > { %18214 = vmatprep.subr.bf16.mxu1 %v19728_v3 }
 0x6c5   : > { %18203 = vmatmul.mubr.bf16.gmra.mrb[80].mxu1 %v6596_v62 }
 0x6c6   : > { %18215 = vmatpush3.bf16.msra.mxu1 %v19728_v3  ;;  %18222 = vmatprep.mubr.bf16.mxu1 %v22659_v28  ;;  %v19733_v28 = vld [vmem:[%s26084_s29 + $0x4c8] sm:$0xff]   ;;  %v19763_v3 = vld [vmem:[%s26084_s29 + $0x5b8] sm:$0xff]  }
 0x6c7   : > { %18216 = vmatprep.subr.bf16.mxu1 %v19729_v60 }
 0x6ca   : > { %18217 = vmatpush3.bf16.msra.mxu1 %v19729_v60  ;;  %v7445_v60 = vrot.slane %v22482_v35, 1 }
 0x6cb   : > { %18218 = vmatprep.subr.bf16.mxu1 %v19730_v24 }
 0x6cc   : > { %v7446_v62 = vsel %vm1595_vm1, %v22711_v8, %v7445_v60 }
 0x6ce   : > { %18219 = vmatpush3.bf16.msra.mxu1 %v19730_v24  ;;  %v19766_v24 = vld [vmem:[%s26084_s29 + $0x5d0] sm:$0xff]  }
 0x6cf   : > { %18220 = vmatprep.subr.bf16.mxu1 %v19731_v21 }
 0x6d2   : > { %18221 = vmatpush3.bf16.msra.mxu1 %v19731_v21  ;;  %v7449_v21 = vrot.slane %v22561_v52, 1 }
 0x6d3   : > { %18234 = vmatprep.subr.bf16.mxu1 %v19732_v12 }
 0x6d5   : > { %18223 = vmatmul.mubr.bf16.vlgmr.msra.gmra.mrb[72].mxu1 %v22662_v31  ;;  %v19736_v31 = vld [vmem:[%s26084_s29 + $0x4e0] sm:$0xff]  }
 0x6d6   : > { %18226 = vmatprep.mubr.bf16.mxu1 %v22671_v38  ;;  %18235 = vmatpush3.bf16.msra.mxu1 %v19732_v12  ;;  %v6789_v38 = vor.u32 %v6788_v45, %v6787_v27  ;;  %v19772_v27 = vld [vmem:[%s26084_s29 + $0x600] sm:$0xff]   ;;  %v7616_v45 = vsel %vm1951_vm2, %v22478_v22, %v22716_v36  ;;  %v19777_v36 = vld [vmem:[%s26084_s29 + $0x628] sm:$0xff]   ;;  %vm8196_vm2 = vcmask 539648  }
 0x6d7   : > { %18236 = vmatprep.subr.bf16.mxu1 %v19733_v28  ;;  %v19776_v22 = vld [vmem:[%s26084_s29 + $0x620] sm:$0xff]  }
 0x6d8   : > { %v6790_v18 = vsel %vm6761_vm12, %v22673_v39, %v6789_v38  ;;  %v19740_v39 = vld [vmem:[%s26084_s29 + $0x500] sm:$0xff]   ;;  %v19775_v38 = vld [vmem:[%s26084_s29 + $0x618] sm:$0xff]  }
 0x6da   : > { %18237 = vmatpush3.bf16.msra.mxu1 %v19733_v28  ;;  %v19769_v28 = vld [vmem:[%s26084_s29 + $0x5e8] sm:$0xff]  }
 0x6db   : > { %18238 = vmatprep.subr.bf16.mxu1 %v19734_v56 }
 0x6dd   : > { %18227 = vmatmul.mubr.bf16.gmra.mrb[76].mxu1 %v22677_v51  ;;  %v19738_v51 = vld [vmem:[%s26084_s29 + $0x4f0] sm:$0xff]  }
 0x6de   : > { %18230 = vmatprep.mubr.bf16.mxu1 %v22687_v48  ;;  %18239 = vmatpush3.bf16.msra.mxu1 %v19734_v56  ;;  %v19741_v48 = vld [vmem:[%s26084_s29 + $0x508] sm:$0xff]   ;;  %v19770_v56 = vld [vmem:[%s26084_s29 + $0x5f0] sm:$0xff]  }
 0x6df   : > { %18240 = vmatprep.subr.bf16.mxu1 %v19735_v4 }
 0x6e2   : > { %18241 = vmatpush3.bf16.msra.mxu1 %v19735_v4  ;;  %v19771_v4 = vld [vmem:[%s26084_s29 + $0x5f8] sm:$0xff]  }
 0x6e3   : > { %18242 = vmatprep.subr.bf16.mxu1 %v19736_v31 }
 0x6e5   : > { %18231 = vmatmul.mubr.bf16.gmra.mrb[80].mxu1 %v6790_v18  ;;  %v26122_v18 = vld [vmem:[#allocation33_spill] sm:$0xff] }
 0x6e6   : > { %18243 = vmatpush3.bf16.msra.mxu1 %v19736_v31  ;;  %18250 = vmatprep.mubr.bf16.mxu1 %v23033_v19  ;;  %v19742_v19 = vld [vmem:[%s26084_s29 + $0x510] sm:$0xff]  }
 0x6e7   : > { %18244 = vmatprep.subr.bf16.mxu1 %v19737_v41  ;;  %v19774_v31 = vld [vmem:[%s26084_s29 + $0x610] sm:$0xff]  }
 0x6ea   : > { %18245 = vmatpush3.bf16.msra.mxu1 %v19737_v41  ;;  %v26120_v41 = vld [vmem:[#allocation34_spill] sm:$0xff] }
 0x6eb   : > { %18246 = vmatprep.subr.bf16.mxu1 %v19738_v51 }
 0x6ee   : > { %18247 = vmatpush3.bf16.msra.mxu1 %v19738_v51  ;;  %v19778_v51 = vld [vmem:[%s26084_s29 + $0x630] sm:$0xff]  }
 0x6ef   : > { %18248 = vmatprep.subr.bf16.mxu1 %v19739_v0 }
 0x6f2   : > { %18249 = vmatpush3.bf16.msra.mxu1 %v19739_v0  ;;  %v19779_v0 = vld [vmem:[%s26084_s29 + $0x638] sm:$0xff]  }
 0x6f3   : > { %18262 = vmatprep.subr.bf16.mxu1 %v19740_v39 }
 0x6f5   : > { %18251 = vmatmul.mubr.bf16.vlgmr.msra.gmra.mrb[72].mxu1 %v23037_v7  ;;  %v19744_v7 = vld [vmem:[%s26084_s29 + $0x520] sm:$0xff]  }
 0x6f6   : > { %18254 = vmatprep.mubr.bf16.mxu1 %v23049_v57  ;;  %18263 = vmatpush3.bf16.msra.mxu1 %v19740_v39  ;;  %v6955_v57 = vrot.slane %v22561_v52, 4 }
 0x6f7   : > { %18264 = vmatprep.subr.bf16.mxu1 %v19741_v48 }
 0x6fa   : > { %18265 = vmatpush3.bf16.msra.mxu1 %v19741_v48  ;;  %v19780_v48 = vld [vmem:[%s25947_s12] sm:$0xff]  }
 0x6fb   : > { %18266 = vmatprep.subr.bf16.mxu1 %v19742_v19 }
 0x6fd   : > { %18255 = vmatmul.mubr.bf16.gmra.mrb[76].mxu1 %v23053_v43  ;;  %v6956_v43 = vsel %vm5320_vm15, %v5332_v6, %v6955_v57  ;;  %v19748_v6 = vld [vmem:[%s26084_s29 + $0x540] sm:$0xff]  }
 0x6fe   : > { %18258 = vmatprep.mubr.bf16.mxu1 %v23066_v47  ;;  %18267 = vmatpush3.bf16.msra.mxu1 %v19742_v19  ;;  %v19746_v47 = vld [vmem:[%s26084_s29 + $0x530] sm:$0xff]   ;;  %v19786_v19 = vld [vmem:[%s25940_s5 + $0x60] sm:$0xff]  }
 0x6ff   : > { %18268 = vmatprep.subr.bf16.mxu1 %v19743_v58  ;;  %v23549_v57 = vld [vmem:[#allocation2] ss:$0 sm:$0xff] }
 0x702   : > { %18269 = vmatpush3.bf16.msra.mxu1 %v19743_v58  ;;  %v19787_v58 = vld [vmem:[%s25940_s5 + $0x68] sm:$0xff]  }
 0x703   : > { %18270 = vmatprep.subr.bf16.mxu1 %v19744_v7 }
 0x705   : > { %18259 = vmatmul.mubr.bf16.gmra.mrb[80].mxu1 %v6956_v43 }
 0x706   : > { %18271 = vmatpush3.bf16.msra.mxu1 %v19744_v7  ;;  %18278 = vmatprep.mubr.bf16.mxu1 %v22351_v9  ;;  %v19749_v9 = vld [vmem:[%s26084_s29 + $0x548] sm:$0xff]   ;;  %v19788_v7 = vld [vmem:[%s25940_s5 + $0x70] sm:$0xff]  }
 0x707   : > { %18272 = vmatprep.subr.bf16.mxu1 %v19745_v25 }
 0x70a   : > { %18273 = vmatpush3.bf16.msra.mxu1 %v19745_v25 }
 0x70b   : > { %18274 = vmatprep.subr.bf16.mxu1 %v19746_v47 }
 0x70e   : > { %18275 = vmatpush3.bf16.msra.mxu1 %v19746_v47 }
 0x70f   : > { %18276 = vmatprep.subr.bf16.mxu1 %v19747_v42 }
 0x712   : > { %18277 = vmatpush3.bf16.msra.mxu1 %v19747_v42 }
 0x713   : > { %18290 = vmatprep.subr.bf16.mxu1 %v19748_v6 }
 0x715   : > { %18279 = vmatmul.mubr.bf16.vlgmr.msra.gmra.mrb[72].mxu1 %v22390_v17  ;;  %v19752_v17 = vld [vmem:[%s26084_s29 + $0x560] sm:$0xff]  }
 0x716   : > { %18282 = vmatprep.mubr.bf16.mxu1 %v22433_v53  ;;  %18291 = vmatpush3.bf16.msra.mxu1 %v19748_v6  ;;  %v19753_v53 = vld [vmem:[%s26084_s29 + $0x568] sm:$0xff]  }
 0x717   : > { %18292 = vmatprep.subr.bf16.mxu1 %v19749_v9 }
 0x71a   : > { %18293 = vmatpush3.bf16.msra.mxu1 %v19749_v9 }
 0x71b   : > { %18294 = vmatprep.subr.bf16.mxu1 %v19750_v40 }
 0x71d   : > { %18283 = vmatmul.mubr.bf16.gmra.mrb[76].mxu1 %v22482_v35  ;;  %v7447_v35 = vrot.slane %v22524_v13, 1 }
 0x71e   : > { %18286 = vmatprep.mubr.bf16.mxu1 %v22524_v13  ;;  %18295 = vmatpush3.bf16.msra.mxu1 %v19750_v40  ;;  %v19768_v13 = vld [vmem:[%s26084_s29 + $0x5e0] sm:$0xff]  }
 0x71f   : > { %18296 = vmatprep.subr.bf16.mxu1 %v19751_v10  ;;  %v7448_v12 = vsel %vm1595_vm1, %v7445_v60, %v7447_v35  ;;  %v7450_v8 = vsel %vm1595_vm1, %v7447_v35, %v7449_v21 }
 0x722   : > { %18297 = vmatpush3.bf16.msra.mxu1 %v19751_v10 }
 0x723   : > { %18298 = vmatprep.subr.bf16.mxu1 %v19752_v17 }
 0x725   : > { %18287 = vmatmul.mubr.bf16.gmra.mrb[80].mxu1 %v22561_v52 }
 0x726   : > { %18299 = vmatpush3.bf16.msra.mxu1 %v19752_v17  ;;  %18306 = vmatprep.mubr.bf16.mxu1 %v26114_v63 }
 0x727   : > { %18300 = vmatprep.subr.bf16.mxu1 %v19753_v53 }
 0x72a   : > { %18301 = vmatpush3.bf16.msra.mxu1 %v19753_v53 }
 0x72b   : > { %18302 = vmatprep.subr.bf16.mxu1 %v19754_v14 }
 0x72e   : > { %18303 = vmatpush3.bf16.msra.mxu1 %v19754_v14 }
 0x72f   : > { %18304 = vmatprep.subr.bf16.mxu1 %v19755_v33 }
 0x732   : > { %18305 = vmatpush3.bf16.msra.mxu1 %v19755_v33 }
 0x733   : > { %18318 = vmatprep.subr.bf16.mxu1 %v19756_v46 }
 0x735   : > { %18307 = vmatmul.mubr.bf16.vlgmr.msra.gmra.mrb[72].mxu1 %v26115_v32 }
 0x736   : > { %18310 = vmatprep.mubr.bf16.mxu1 %v26116_v2  ;;  %18319 = vmatpush3.bf16.msra.mxu1 %v19756_v46 }
 0x737   : > { %18320 = vmatprep.subr.bf16.mxu1 %v19757_v23 }
 0x73a   : > { %18321 = vmatpush3.bf16.msra.mxu1 %v19757_v23 }
 0x73b   : > { %18322 = vmatprep.subr.bf16.mxu1 %v19758_v44 }
 0x73d   : > { %18311 = vmatmul.mubr.bf16.gmra.mrb[76].mxu1 %v26117_v50 }
 0x73e   : > { %18314 = vmatprep.mubr.bf16.mxu1 %v26118_v20  ;;  %18323 = vmatpush3.bf16.msra.mxu1 %v19758_v44 }
 0x73f   : > { %18324 = vmatprep.subr.bf16.mxu1 %v19759_v55 }
 0x742   : > { %18325 = vmatpush3.bf16.msra.mxu1 %v19759_v55 }
 0x743   : > { %18326 = vmatprep.subr.bf16.mxu1 %v19760_v49 }
 0x745   : > { %18315 = vmatmul.mubr.bf16.gmra.mrb[80].mxu1 %v26119_v61 }
 0x746   : > { %18327 = vmatpush3.bf16.msra.mxu1 %v19760_v49  ;;  %18334 = vmatprep.mubr.bf16.mxu1 %v22723_v54  ;;  %v19765_v54 = vld [vmem:[%s26084_s29 + $0x5c8] sm:$0xff]  }
 0x747   : > { %18328 = vmatprep.subr.bf16.mxu1 %v19761_v29 }
 0x74a   : > { %18329 = vmatpush3.bf16.msra.mxu1 %v19761_v29 }
 0x74b   : > { %18330 = vmatprep.subr.bf16.mxu1 %v19762_v30 }
 0x74e   : > { %18331 = vmatpush3.bf16.msra.mxu1 %v19762_v30 }
 0x74f   : > { %18332 = vmatprep.subr.bf16.mxu1 %v19763_v3 }
 0x752   : > { %18333 = vmatpush3.bf16.msra.mxu1 %v19763_v3 }
 0x753   : > { %18346 = vmatprep.subr.bf16.mxu1 %v19764_v26 }
 0x755   : > { %18335 = vmatmul.mubr.bf16.vlgmr.msra.gmra.mrb[72].mxu1 %v22730_v59  ;;  %v19767_v59 = vld [vmem:[%s26084_s29 + $0x5d8] sm:$0xff]  }
 0x756   : > { %18338 = vmatprep.mubr.bf16.mxu1 %v7446_v62  ;;  %18347 = vmatpush3.bf16.msra.mxu1 %v19764_v26 }
 0x757   : > { %18348 = vmatprep.subr.bf16.mxu1 %v19765_v54 }
 0x75a   : > { %18349 = vmatpush3.bf16.msra.mxu1 %v19765_v54 }
 0x75b   : > { %18350 = vmatprep.subr.bf16.mxu1 %v19766_v24 }
 0x75d   : > { %18339 = vmatmul.mubr.bf16.gmra.mrb[76].mxu1 %v7448_v12 }
 0x75e   : > { %18342 = vmatprep.mubr.bf16.mxu1 %v7450_v8  ;;  %18351 = vmatpush3.bf16.msra.mxu1 %v19766_v24 }
 0x75f   : > { %18352 = vmatprep.subr.bf16.mxu1 %v19767_v59 }
 0x762   : > { %18353 = vmatpush3.bf16.msra.mxu1 %v19767_v59 }
 0x763   : > { %18354 = vmatprep.subr.bf16.mxu1 %v19768_v13 }
 0x765   : > { %18343 = vmatmul.mubr.bf16.gmra.mrb[80].mxu1 %v7449_v21 }
 0x766   : > { %18355 = vmatpush3.bf16.msra.mxu1 %v19768_v13  ;;  %18362 = vmatprep.mubr.bf16.mxu1 %v22445_v37  ;;  %v19773_v37 = vld [vmem:[%s26084_s29 + $0x608] sm:$0xff]  }
 0x767   : > { %18356 = vmatprep.subr.bf16.mxu1 %v19769_v28 }
 0x76a   : > { %18357 = vmatpush3.bf16.msra.mxu1 %v19769_v28 }
 0x76b   : > { %18358 = vmatprep.subr.bf16.mxu1 %v19770_v56 }
 0x76e   : > { %18359 = vmatpush3.bf16.msra.mxu1 %v19770_v56 }
 0x76f   : > { %18360 = vmatprep.subr.bf16.mxu1 %v19771_v4 }
 0x772   : > { %18361 = vmatpush3.bf16.msra.mxu1 %v19771_v4 }
 0x773   : > { %18374 = vmatprep.subr.bf16.mxu1 %v19772_v27 }
 0x775   : > { %18363 = vmatmul.mubr.bf16.vlgmr.msra.gmra.mrb[72].mxu1 %v22773_v34  ;;  %v26121_v34 = vld [vmem:[#allocation35_spill] sm:$0xff] }
 0x776   : > { %18366 = vmatprep.mubr.bf16.mxu1 %v7616_v45  ;;  %18375 = vmatpush3.bf16.msra.mxu1 %v19772_v27 }
 0x777   : > { %18376 = vmatprep.subr.bf16.mxu1 %v19773_v37 }
 0x77a   : > { %18377 = vmatpush3.bf16.msra.mxu1 %v19773_v37 }
 0x77b   : > { %18378 = vmatprep.subr.bf16.mxu1 %v19774_v31 }
 0x77d   : > { %18367 = vmatmul.mubr.bf16.gmra.mrb[76].mxu1 %v26120_v41 }
 0x77e   : > { %18370 = vmatprep.mubr.bf16.mxu1 %v26121_v34  ;;  %18379 = vmatpush3.bf16.msra.mxu1 %v19774_v31 }
 0x77f   : > { %18380 = vmatprep.subr.bf16.mxu1 %v19775_v38 }
 0x782   : > { %18381 = vmatpush3.bf16.msra.mxu1 %v19775_v38 }
 0x783   : > { %18382 = vmatprep.subr.bf16.mxu1 %v19776_v22 }
 0x785   : > { %18371 = vmatmul.mubr.bf16.gmra.mrb[80].mxu1 %v26122_v18 }
 0x786   : > { %18383 = vmatpush3.bf16.msra.mxu1 %v19776_v22  ;;  %18390 = vmatprep.mubr.bf16.mxu1 %v22816_v5  ;;  %v7787_v5 = vrot.slane %v22561_v52, 2  ;;  %v19783_v52 = vld [vmem:[%s25940_s5 + $0x48] sm:$0xff]  }
 0x787   : > { %18384 = vmatprep.subr.bf16.mxu1 %v19777_v36 }
 0x788   : > { %v7788_v39 = vsel %vm2826_vm3, %v23222_v16, %v7787_v5  ;;  %v19784_v16 = vld [vmem:[%s25940_s5 + $0x50] sm:$0xff]  }
 0x78a   : > { %18385 = vmatpush3.bf16.msra.mxu1 %v19777_v36 }
 0x78b   : > { %18386 = vmatprep.subr.bf16.mxu1 %v19778_v51 }
 0x78e   : > { %18387 = vmatpush3.bf16.msra.mxu1 %v19778_v51 }
 0x78f   : > { %18388 = vmatprep.subr.bf16.mxu1 %v19779_v0 }
 0x792   : > { %18389 = vmatpush3.bf16.msra.mxu1 %v19779_v0 }
 0x795   : > { %18391 = vmatmul.mubr.bf16.vlgmr.msra.gmra.mrb[72].mxu1 %v22821_v15  ;;  %v19782_v15 = vld [vmem:[%s25940_s5 + $0x40] sm:$0xff]  }
 0x796   : > { %18394 = vmatprep.mubr.bf16.mxu1 %v23229_v1  ;;  %18417 = vmatpush3.bf16.msra.mxu0 %v19782_v15  ;;  %v26123_v1 = vmov 0.0  }
 0x797   : > { %18418 = vmatprep.subr.bf16.mxu0 %v26123_v1 }
 0x79a   : > { %18419 = vmatpush3.bf16.msra.mxu0 %v19783_v52 }
 0x79b   : > { %18420 = vmatprep.subr.bf16.mxu0 %v26123_v1 }
 0x79d   : > { %18395 = vmatmul.mubr.bf16.gmra.mrb[76].mxu1 %v23234_v11  ;;  %v19785_v11 = vld [vmem:[%s25940_s5 + $0x58] sm:$0xff]  }
 0x79e   : > { %18398 = vmatprep.mubr.bf16.mxu1 %v7788_v39  ;;  %18421 = vmatpush3.bf16.msra.mxu0 %v19784_v16 }
 0x79f   : > { %18422 = vmatprep.subr.bf16.mxu0 %v26123_v1 }
 0x7a2   : > { %18423 = vmatpush3.bf16.msra.mxu0 %v19785_v11 }
 0x7a3   : > { %18424 = vmatprep.subr.bf16.mxu0 %v26123_v1 }
 0x7a5   : > { %18399 = vmatmul.mubr.bf16.gmra.mrb[80].mxu1 %v7787_v5 }
 0x7a6   : > { %18412 = vmatprep.mubr.msk.bf16.mxu1 %vm8196_vm2, %v19780_v48  ;;  %18425 = vmatpush3.bf16.msra.mxu0 %v19786_v19 }
 0x7a7   : > { %18426 = vmatprep.subr.bf16.mxu0 %v26123_v1 }
 0x7aa   : > { %18427 = vmatpush3.bf16.msra.mxu0 %v19787_v58 }
 0x7ab   : > { %18428 = vmatprep.subr.bf16.mxu0 %v26123_v1 }
 0x7ae   : > { %18429 = vmatpush3.bf16.msra.mxu0 %v19788_v7 }
 0x7af   : > { %18430 = vmatprep.subr.bf16.mxu0 %v26123_v1 }
 0x868   : > { %v18392_v25 = vpop.f32.mrb[72].mxu1 }
 0x869   : > { %v7941_v43 = vadd.f32 %v18392_v25, %v23549_v57  ;;  %v7873_v47 = vpop.f32.mrb[73].mxu1 }
 0x86a   : > { %v7939_v42 = vadd.f32 %v23549_v57, %v7873_v47  ;;  %v18393_v6 = vpop.f32.mrb[74].mxu1 }
 0x86b   : > { %v7942_v9 = vadd.f32 %v18393_v6, %v23549_v57  ;;  %v7876_v40 = vpop.f32.mrb[75].mxu1  ;;  %v7953_v17 = vmax.f32 %v7941_v43, 0.0 }
 0x86c   : > { %v7940_v10 = vadd.f32 %v23549_v57, %v7876_v40  ;;  %v7951_v63 = vmax.f32 %v7939_v42, 0.0 }
 0x86d   : > { %v7954_v53 = vmax.f32 %v7942_v9, 0.0 }
 0x86e   : > { %v7952_v14 = vmax.f32 %v7940_v10, 0.0 }
 0x86f   : > { %v23555_v33 = vpack.c.bf16 %v7954_v53, %v7953_v17 }
 0x870   : > { %v7963_v46 = vpack.c.bf16 %v7952_v14, %v7951_v63  ;;  %v18396_v23 = vpop.f32.mrb[76].mxu1 }
 0x871   : > { %v7945_v32 = vadd.f32 %v18396_v23, %v23549_v57  ;;  %v7889_v2 = vpop.f32.mrb[77].mxu1  ;;  %v23559_v44 = vshll.u32 %v23555_v33, 16  ;;  %v23562_v55 = vshrl.u32 %v23555_v33, 16  ;;  %v8024_v50 = vrot.slane %v23555_v33, 1 }
 0x872   : > { %v7970_v20 = vshrl.u32 %v7963_v46, 16  ;;  %v7972_v49 = vshll.u32 %v7963_v46, 16  ;;  %v8023_v29 = vrot.slane %v7963_v46, 1  ;;  %v7943_v61 = vadd.f32 %v23549_v57, %v7889_v2  ;;  %v18397_v30 = vpop.f32.mrb[78].mxu1 }
 0x873   : > { %v7957_v3 = vmax.f32 %v7945_v32, 0.0  ;;  %v7946_v26 = vadd.f32 %v18397_v30, %v23549_v57  ;;  %v7892_v60 = vpop.f32.mrb[79].mxu1  ;;  %v7979_v54 = vrot.slane %v23559_v44, 1  ;;  %v8042_v62 = vrot.slane %v7963_v46, 6 }
 0x874   : > { %v7974_v24 = vrot.slane %v7972_v49, 1  ;;  %v7955_v35 = vmax.f32 %v7943_v61, 0.0  ;;  %v7944_v21 = vadd.f32 %v23549_v57, %v7892_v60  ;;  %v8025_v59 = vsel %vm1595_vm1, %v8023_v29, %v8024_v50 }
 0x875   : > { %v7958_v12 = vmax.f32 %v7946_v26, 0.0  ;;  %v7983_v8 = vor.u32 %v23562_v55, %v7979_v54  ;;  %v8043_v13 = vrot.slane %v23555_v33, 6  ;;  %v8061_v28 = vrot.slane %v7970_v20, 6 }
 0x876   : > { %v7975_v56 = vor.u32 %v7974_v24, %v7970_v20  ;;  %v7956_v4 = vmax.f32 %v7944_v21, 0.0  ;;  %v8062_v27 = vrot.slane %v7972_v49, 7  ;;  %v8064_v37 = vrot.slane %v23562_v55, 6 }
 0x877   : > { %v23575_v45 = vpack.c.bf16 %v7958_v12, %v7957_v3  ;;  %v8044_v31 = vsel %vm4424_vm13, %v8042_v62, %v8043_v13  ;;  %v8065_v38 = vrot.slane %v23559_v44, 7  ;;  %v8090_v41 = vrot.slane %v7963_v46, 7 }
 0x878   : > { %v23581_v34 = vpack.c.bf16 %v7956_v4, %v7955_v35  ;;  %v18400_v22 = vpop.f32.mrb[80].mxu1  ;;  %v7980_v36 = vsel %vm893_vm0, %v7975_v56, %v7979_v54  ;;  %v8063_v18 = vor.u32 %v8062_v27, %v8061_v28  ;;  %v8091_v51 = vrot.slane %v23555_v33, 7 }
 0x879   : > { %v7949_v0 = vadd.f32 %v18400_v22, %v23549_v57  ;;  %v7905_v5 = vpop.f32.mrb[81].mxu1  ;;  %v8013_v39 = vmax.bf16 %v7980_v36, %v7963_v46  ;;  %v23586_v48 = vor.u32 %v8065_v38, %v8064_v37  ;;  %v8110_v15 = vrot.slane %v23555_v33, 4 }
 0x87a   : > { %v7947_v52 = vadd.f32 %v23549_v57, %v7905_v5  ;;  %v18401_v16 = vpop.f32.mrb[82].mxu1  ;;  %v7985_v11 = vshll.u32 %v23581_v34, 16  ;;  %v7989_v19 = vshrl.u32 %v23581_v34, 16  ;;  %v8092_v58 = vsel %vm4799_vm14, %v8090_v41, %v8091_v51 }
 0x87b   : > { %v7961_v7 = vmax.f32 %v7949_v0, 0.0  ;;  %v7950_v25 = vadd.f32 %v18401_v16, %v23549_v57  ;;  %v7908_v43 = vpop.f32.mrb[83].mxu1  ;;  %v8037_v47 = vmax.bf16 %v8025_v59, %v8013_v39  ;;  %v8067_v42 = vsel %vm4602_vm8, %v8063_v18, %v23586_v48 }
 0x87c   : > { %v7959_v6 = vmax.f32 %v7947_v52, 0.0  ;;  %v7948_v9 = vadd.f32 %v23549_v57, %v7908_v43  ;;  %v7987_v40 = vrot.slane %v7985_v11, 1  ;;  %v8111_v10 = vrot.slane %v23581_v34, 4 }
 0x87d   : > { %v7962_v17 = vmax.f32 %v7950_v25, 0.0  ;;  %v8056_v53 = vmax.bf16 %v8044_v31, %v8037_v47  ;;  %v8129_v63 = vrot.slane %v23562_v55, 4  ;;  %v8130_v14 = vrot.slane %v23559_v44, 5 }
 0x87e   : > { %v7960_v46 = vmax.f32 %v7948_v9, 0.0  ;;  %v7991_v23 = vor.u32 %v7989_v19, %v7987_v40  ;;  %v8112_v32 = vsel %vm5320_vm15, %v8110_v15, %v8111_v10  ;;  %v8132_v2 = vrot.slane %v7989_v19, 4 }
 0x87f   : > { %v23603_v20 = vpack.c.bf16 %v7962_v17, %v7961_v7  ;;  %v8085_v49 = vmax.bf16 %v8067_v42, %v8056_v53  ;;  %v8131_v29 = vor.u32 %v8130_v14, %v8129_v63  ;;  %v8133_v61 = vrot.slane %v7985_v11, 5 }
 0x880   : > { %v23605_v57 = vpack.c.bf16 %v7960_v46, %v7959_v6  ;;  %v8163_v30 = vrot.slane %v23555_v33, 5  ;;  %v8164_v3 = vrot.slane %v23581_v34, 5  ;;  %v7988_v55 = vsel %vm893_vm0, %v7983_v8, %v7987_v40 }
 0x881   : > { %v8117_v44 = vrot.slane %v23603_v20, 4  ;;  %v8145_v26 = vshrl.u32 %v23603_v20, 16  ;;  %v8148_v60 = vshll.u32 %v23603_v20, 16  ;;  %v8104_v54 = vmax.bf16 %v8092_v58, %v8085_v49 }
 0x882   : > { %v8134_v62 = vor.u32 %v8133_v61, %v8132_v2  ;;  %v8165_v24 = vsel %vm5695_vm7, %v8163_v30, %v8164_v3  ;;  %v7993_v35 = vshll.u32 %v23575_v45, 16  ;;  %v7997_v21 = vshrl.u32 %v23575_v45, 16 }
 0x883   : > { %v23616_v59 = vrot.slane %v8145_v26, 4  ;;  %v23618_v12 = vrot.slane %v8148_v60, 5  ;;  %v8124_v28 = vmax.bf16 %v8112_v32, %v8104_v54  ;;  %v8014_v8 = vmax.bf16 %v7988_v55, %v23555_v33 }
 0x884   : > { %v8135_v56 = vsel %vm5498_vm10, %v8131_v29, %v8134_v62  ;;  %v7995_v4 = vrot.slane %v7993_v35, 1  ;;  %v8026_v27 = vrot.slane %v23581_v34, 1  ;;  %v8045_v37 = vrot.slane %v23581_v34, 6 }
 0x885   : > { %v8158_v31 = vmax.bf16 %v8135_v56, %v8124_v28  ;;  %v8068_v38 = vrot.slane %v7989_v19, 6  ;;  %v8069_v41 = vrot.slane %v7985_v11, 7  ;;  %v8093_v22 = vrot.slane %v23581_v34, 7 }
 0x886   : > { %v7999_v36 = vor.u32 %v7997_v21, %v7995_v4  ;;  %v8027_v18 = vsel %vm1595_vm1, %v8024_v50, %v8026_v27  ;;  %v8046_v0 = vsel %vm4424_vm13, %v8043_v13, %v8045_v37  ;;  %v8113_v5 = vrot.slane %v23575_v45, 4 }
 0x887   : > { %v8177_v39 = vmax.bf16 %v8165_v24, %v8158_v31  ;;  %v8038_v15 = vmax.bf16 %v8027_v18, %v8014_v8  ;;  %v8070_v52 = vor.u32 %v8069_v41, %v8068_v38  ;;  %v8094_v16 = vsel %vm4799_vm14, %v8091_v51, %v8093_v22 }
 0x888   : > { %v8114_v11 = vsel %vm5320_vm15, %v8111_v10, %v8113_v5  ;;  %v8136_v19 = vrot.slane %v7997_v21, 4  ;;  %v8137_v58 = vrot.slane %v7993_v35, 5  ;;  %v8166_v7 = vrot.slane %v23575_v45, 5 }
 0x889   : > { %18402 = vmatprep.subr.bf16.mxu1 %v8177_v39  ;;  %v8057_v50 = vmax.bf16 %v8046_v0, %v8038_v15  ;;  %v8071_v13 = vsel %vm4602_vm8, %v23586_v48, %v8070_v52  ;;  %v7996_v25 = vsel %vm893_vm0, %v7991_v23, %v7995_v4  ;;  %v8001_v43 = vshll.u32 %v23605_v57, 16 }
 0x88a   : > { %18403 = vmatpush3.bf16.msra.mxu1 %v8177_v39  ;;  %v8138_v47 = vor.u32 %v8137_v58, %v8136_v19  ;;  %v8167_v33 = vsel %vm5695_vm7, %v8164_v3, %v8166_v7  ;;  %v8005_v51 = vshrl.u32 %v23605_v57, 16  ;;  %v8015_v42 = vmax.bf16 %v7996_v25, %v23581_v34 }
 0x88b   : > { %v8086_v6 = vmax.bf16 %v8071_v13, %v8057_v50  ;;  %v8003_v9 = vrot.slane %v8001_v43, 1  ;;  %v8028_v40 = vrot.slane %v23575_v45, 1  ;;  %v8047_v10 = vrot.slane %v23575_v45, 6 }
 0x88c   : > { %v8139_v48 = vsel %vm5498_vm10, %v8134_v62, %v8138_v47  ;;  %v8072_v17 = vrot.slane %v7997_v21, 6  ;;  %v8073_v53 = vrot.slane %v7993_v35, 7  ;;  %v8095_v63 = vrot.slane %v23575_v45, 7 }
 0x88d   : > { %v8105_v14 = vmax.bf16 %v8094_v16, %v8086_v6  ;;  %v8007_v46 = vor.u32 %v8005_v51, %v8003_v9  ;;  %v8029_v23 = vsel %vm1595_vm1, %v8026_v27, %v8028_v40  ;;  %v8048_v32 = vsel %vm4424_vm13, %v8045_v37, %v8047_v10 }
 0x88e   : > { %v8039_v2 = vmax.bf16 %v8029_v23, %v8015_v42  ;;  %v8074_v34 = vor.u32 %v8073_v53, %v8072_v17  ;;  %v8096_v49 = vsel %vm4799_vm14, %v8093_v22, %v8095_v63  ;;  %v8115_v29 = vrot.slane %v23605_v57, 4  ;;  %v19781_v17 = vld [vmem:[%s25947_s12 + $0x8] sm:$0x1f]  }
 0x88f   : > { %v8125_v61 = vmax.bf16 %v8114_v11, %v8105_v14  ;;  %v8140_v30 = vrot.slane %v8005_v51, 4  ;;  %v8141_v3 = vrot.slane %v8001_v43, 5  ;;  %v8168_v55 = vrot.slane %v23605_v57, 5 }
 0x890   : > { %v8058_v26 = vmax.bf16 %v8048_v32, %v8039_v2  ;;  %v8075_v60 = vsel %vm4602_vm8, %v8070_v52, %v8074_v34  ;;  %v8116_v54 = vsel %vm5320_vm15, %v8113_v5, %v8115_v29  ;;  %v8004_v62 = vsel %vm893_vm0, %v7999_v36, %v8003_v9 }
 0x891   : > { %v8159_v24 = vmax.bf16 %v8139_v48, %v8125_v61  ;;  %v8142_v35 = vor.u32 %v8141_v3, %v8140_v30  ;;  %v8169_v21 = vsel %vm5695_vm7, %v8166_v7, %v8168_v55  ;;  %v8016_v28 = vmax.bf16 %v8004_v62, %v23575_v45 }
 0x892   : > { %v8087_v8 = vmax.bf16 %v8075_v60, %v8058_v26  ;;  %v8030_v56 = vrot.slane %v23605_v57, 1  ;;  %v8049_v4 = vrot.slane %v23605_v57, 6  ;;  %v8076_v27 = vrot.slane %v8005_v51, 6 }
 0x893   : > { %v8178_v37 = vmax.bf16 %v8167_v33, %v8159_v24  ;;  %v8143_v31 = vsel %vm5498_vm10, %v8138_v47, %v8142_v35  ;;  %v8077_v38 = vrot.slane %v8001_v43, 7  ;;  %v8097_v41 = vrot.slane %v23605_v57, 7 }
 0x894   : > { %v8106_v22 = vmax.bf16 %v8096_v49, %v8087_v8  ;;  %v8031_v36 = vsel %vm1595_vm1, %v8028_v40, %v8030_v56  ;;  %v8050_v18 = vsel %vm4424_vm13, %v8047_v10, %v8049_v4  ;;  %v8118_v45 = vsel %vm5320_vm15, %v8115_v29, %v8117_v44 }
 0x895   : > { %18404 = vmatprep.subr.bf16.mxu1 %v8178_v37  ;;  %v8040_v0 = vmax.bf16 %v8031_v36, %v8016_v28  ;;  %v8078_v5 = vor.u32 %v8077_v38, %v8076_v27  ;;  %v8098_v39 = vsel %vm4799_vm14, %v8095_v63, %v8097_v41  ;;  %v8151_v15 = vor.u32 %v23618_v12, %v23616_v59 }
 0x896   : > { %18405 = vmatpush3.bf16.msra.mxu1 %v8178_v37  ;;  %v8126_v52 = vmax.bf16 %v8116_v54, %v8106_v22  ;;  %v8170_v16 = vrot.slane %v23603_v20, 5  ;;  %v8017_v11 = vmax.bf16 %v8007_v46, %v23605_v57  ;;  %v19789_v20 = vld [vmem:[%s25940_s5 + $0x78] sm:$0xff]   ;;  %vm9304_vm0 = vcmask 105472  }
 0x897   : > { %v8059_v19 = vmax.bf16 %v8050_v18, %v8040_v0  ;;  %v8079_v58 = vsel %vm4602_vm8, %v8074_v34, %v8078_v5  ;;  %v8152_v7 = vsel %vm5498_vm10, %v8142_v35, %v8151_v15  ;;  %18431 = vmatpush3.bf16.msra.mxu0 %v19789_v20  ;;  %v19809_v20 = vld [vmem:[%s25940_s5 + $0xd8] sm:$0xff]  }
 0x898   : > { %v8160_v50 = vmax.bf16 %v8143_v31, %v8126_v52  ;;  %v8171_v13 = vsel %vm5695_vm7, %v8168_v55, %v8170_v16  ;;  %v8041_v25 = vmax.bf16 %v8030_v56, %v8017_v11  ;;  %18436 = vmatprep.subr.bf16.mxu0 %v26123_v1 }
 0x899   : > { %v8088_v43 = vmax.bf16 %v8079_v58, %v8059_v19 }
 0x89a   : > { %v8179_v47 = vmax.bf16 %v8169_v21, %v8160_v50  ;;  %v8060_v33 = vmax.bf16 %v8049_v4, %v8041_v25  ;;  %v19790_v21 = vld [vmem:[%s25940_s5] sm:$0xff]   ;;  %v19793_v50 = vld [vmem:[%s25940_s5 + $0x18] sm:$0xff]   ;;  %v19795_v25 = vld [vmem:[%s25940_s5 + $0x28] sm:$0xff]  }
 0x89b   : > { %v8107_v51 = vmax.bf16 %v8098_v39, %v8088_v43  ;;  %v19796_v43 = vld [vmem:[%s25940_s5 + $0x30] sm:$0xff]  }
 0x89c   : > { %18406 = vmatprep.subr.bf16.mxu1 %v8179_v47  ;;  %v8089_v59 = vmax.bf16 %v8078_v5, %v8060_v33  ;;  %v19798_v33 = vld [vmem:[%s25940_s5 + $0x80] sm:$0xff]  }
 0x89d   : > { %18407 = vmatpush3.bf16.msra.mxu1 %v8179_v47  ;;  %v8127_v12 = vmax.bf16 %v8118_v45, %v8107_v51  ;;  %v19797_v47 = vld [vmem:[%s25940_s5 + $0x38] sm:$0xff]   ;;  %v19799_v51 = vld [vmem:[%s25940_s5 + $0x88] sm:$0xff]  }
 0x89e   : > { %v8108_v42 = vmax.bf16 %v8097_v41, %v8089_v59  ;;  %v19800_v59 = vld [vmem:[%s25940_s5 + $0x90] sm:$0xff]  }
 0x89f   : > { %v8161_v6 = vmax.bf16 %v8152_v7, %v8127_v12  ;;  %v19792_v7 = vld [vmem:[%s25940_s5 + $0x10] sm:$0xff]   ;;  %v19801_v12 = vld [vmem:[%s25940_s5 + $0x98] sm:$0xff]  }
 0x8a0   : > { %v8128_v57 = vmax.bf16 %v8117_v44, %v8108_v42  ;;  %v19802_v42 = vld [vmem:[%s25940_s5 + $0xa0] sm:$0xff]  }
 0x8a1   : > { %v8180_v9 = vmax.bf16 %v8171_v13, %v8161_v6  ;;  %v19794_v13 = vld [vmem:[%s25940_s5 + $0x20] sm:$0xff]   ;;  %v19803_v6 = vld [vmem:[%s25940_s5 + $0xa8] sm:$0xff]  }
 0x8a2   : > { %v8162_v40 = vmax.bf16 %v8151_v15, %v8128_v57  ;;  %v19791_v15 = vld [vmem:[%s25940_s5 + $0x8] sm:$0xff]   ;;  %v19804_v57 = vld [vmem:[%s25940_s5 + $0xb0] sm:$0xff]  }
 0x8a3   : > { %18408 = vmatprep.subr.bf16.mxu1 %v8180_v9 }
 0x8a4   : > { %18409 = vmatpush3.bf16.msra.mxu1 %v8180_v9  ;;  %v8181_v10 = vmax.bf16 %v8170_v16, %v8162_v40  ;;  %v19805_v9 = vld [vmem:[%s25940_s5 + $0xb8] sm:$0xff]   ;;  %v19806_v40 = vld [vmem:[%s25940_s5 + $0xc0] sm:$0xff]  }
 0x8a6   : > { %19400 = vmatprep.subr.msk.bf16.mxu1 %vm4799_vm14, %v8181_v10  ;;  %v8205_v48 = vsel %vm4799_vm14, %v8181_v10, 0 }
 0x8a8   : > { %18411 = vmatpush3.bf16.msra.mxu1 %v8205_v48  ;;  %v19807_v48 = vld [vmem:[%s25940_s5 + $0xc8] sm:$0xff]  }
 0x8a9   : > { %18808 = vmatprep.subr.bf16.mxu1 %v26123_v1 }
 0x8ab   : > { %18413 = vmatmul.mubr.msk.bf16.vlgmr.msra.gmra.mrb[84].mxu1 %vm8196_vm2, %v19781_v17  ;;  %v19808_v17 = vld [vmem:[%s25940_s5 + $0xd0] sm:$0xff]  }
 0x8ac   : > { %18824 = vmatprep.mubr.msk.bf16.mxu1 %vm20472_vm6, %v26123_v1 }
 0x97e   : > { %v18414_v44 = vpop.f32.mrb[84].mxu1 }
 0x97f   : > { %v8241_v53 = vpop.f32.mrb[85].mxu1 }
 0x980   : > { %v18415_v63 = vpop.f32.mrb[86].mxu1 }
 0x981   : > { %v8257_v14 = vpack.c.bf16 %v18415_v63, %v18414_v44  ;;  %v8244_v46 = vpop.f32.mrb[87].mxu1  ;;  %v19810_v44 = vld [vmem:[%s25940_s5 + $0xe0] sm:$0xff]   ;;  %v19812_v63 = vld [vmem:[%s25940_s5 + $0xf0] sm:$0xff]  }
 0x982   : > { %v23690_v23 = vpack.c.bf16 %v8244_v46, %v8241_v53  ;;  %v19811_v53 = vld [vmem:[%s25940_s5 + $0xe8] sm:$0xff]   ;;  %v19814_v46 = vld [vmem:[%s25940_s5 + $0x100] sm:$0xff]  }
 0x983   : > { %v8609_v32 = vshrl.u32 %v8257_v14, 16  ;;  %v8612_v2 = vshll.u32 %v8257_v14, 16  ;;  %v8728_v34 = vrot.slane %v8257_v14, 3  ;;  %v8956_v30 = vrot.slane %v8257_v14, 5 }
 0x984   : > { %v8292_v49 = vshrl.u32 %v23690_v23, 16  ;;  %v8294_v29 = vshll.u32 %v23690_v23, 16  ;;  %v8727_v61 = vrot.slane %v23690_v23, 3  ;;  %v8955_v31 = vrot.slane %v23690_v23, 5 }
 0x985   : > { %v8611_v3 = vrot.slane %v8609_v32, 2  ;;  %v8614_v55 = vrot.slane %v8612_v2, 3  ;;  %v8842_v26 = vrot.slane %v8609_v32, 3  ;;  %v8843_v60 = vrot.slane %v8612_v2, 4 }
 0x986   : > { %v8296_v54 = vrot.slane %v8294_v29, 1  ;;  %v8605_v62 = vrot.slane %v8292_v49, 2  ;;  %v8606_v24 = vrot.slane %v8294_v29, 3  ;;  %v23696_v35 = vsel %vm3024_vm4, %v8727_v61, %v8728_v34  ;;  %v19818_v34 = vld [vmem:[%s25940_s5 + $0x120] sm:$0xff]   ;;  %v19821_v61 = vld [vmem:[%s25940_s5 + $0x138] sm:$0xff]  }
 0x987   : > { %v8615_v28 = vor.u32 %v8614_v55, %v8611_v3  ;;  %v8839_v8 = vrot.slane %v8292_v49, 3  ;;  %v8840_v56 = vrot.slane %v8294_v29, 4  ;;  %v8844_v4 = vor.u32 %v8843_v60, %v8842_v26  ;;  %v19823_v3 = vld [vmem:[%s25940_s5 + $0x148] sm:$0xff]   ;;  %v19824_v55 = vld [vmem:[%s25940_s5 + $0x150] sm:$0xff]   ;;  %v19825_v26 = vld [vmem:[%s25940_s5 + $0x158] sm:$0xff]  }
 0x988   : > { %v8297_v27 = vor.u32 %v8296_v54, %v8292_v49  ;;  %v8607_v37 = vor.u32 %v8606_v24, %v8605_v62  ;;  %v9067_v38 = vrot.slane %v8292_v49, 5  ;;  %v9068_v22 = vrot.slane %v8294_v29, 6  ;;  %v19819_v49 = vld [vmem:[%s25940_s5 + $0x128] sm:$0xff]   ;;  %v19820_v29 = vld [vmem:[%s25940_s5 + $0x130] sm:$0xff]   ;;  %v19826_v60 = vld [vmem:[%s25940_s5 + $0x160] sm:$0xff]  }
 0x989   : > { %v8841_v41 = vor.u32 %v8840_v56, %v8839_v8  ;;  %v9070_v36 = vrot.slane %v8609_v32, 5  ;;  %v9071_v18 = vrot.slane %v8612_v2, 6  ;;  %v23706_v0 = vsel %vm5695_vm7, %v8955_v31, %v8956_v30  ;;  %v19816_v32 = vld [vmem:[%s25940_s5 + $0x110] sm:$0xff]   ;;  %v19817_v2 = vld [vmem:[%s25940_s5 + $0x118] sm:$0xff]   ;;  %v19822_v30 = vld [vmem:[%s25940_s5 + $0x140] sm:$0xff]  }
 0x98a   : > { %18433 = vmatmul.mubr.bf16.vlgmr.msra.gmra.mrb[52].mxu0 %v8297_v27  ;;  %v23703_v45 = vsel %vm2916_vm5, %v8607_v37, %v8615_v28  ;;  %v9183_v5 = vrot.slane %v23690_v23, 6  ;;  %v9184_v39 = vrot.slane %v8257_v14, 6  ;;  %v9069_v16 = vor.u32 %v9068_v22, %v9067_v38  ;;  %v19813_v14 = vld [vmem:[%s25940_s5 + $0xf8] sm:$0xff]   ;;  %v19827_v54 = vld [vmem:[%s25940_s5 + $0x168] sm:$0xff]   ;;  %v19828_v62 = vld [vmem:[%s25940_s5 + $0x170] sm:$0xff]  }
 0x98b   : > { %18437 = vmatpush3.bf16.msra.mxu0 %v19790_v21  ;;  %18452 = vmatprep.mubr.msk.bf16.mxu0 %vm20472_vm6, %v26123_v1  ;;  %v23715_v52 = vsel %vm6761_vm12, %v8841_v41, %v8844_v4  ;;  %v9072_v11 = vor.u32 %v9071_v18, %v9070_v36  ;;  %v8495_v10 = vrot.slane %v23690_v23, 1  ;;  %v19829_v24 = vld [vmem:[%s25940_s5 + $0x178] sm:$0xff]   ;;  %v19831_v21 = vld [vmem:[%s25940_s5 + $0x188] sm:$0xff]   ;;  %v19832_v28 = vld [vmem:[%s25940_s5 + $0x190] sm:$0xff]  }
 0x98c   : > { %18438 = vmatprep.subr.bf16.mxu0 %v26123_v1  ;;  %v23719_v19 = vsel %vm4424_vm13, %v9183_v5, %v9184_v39  ;;  %v19833_v8 = vld [vmem:[%s25940_s5 + $0x198] sm:$0xff]   ;;  %v19834_v56 = vld [vmem:[%s25940_s5 + $0x1a0] sm:$0xff]   ;;  %v19835_v4 = vld [vmem:[%s25940_s5 + $0x1a8] sm:$0xff]  }
 0x98d   : > { %v23722_v58 = vsel %vm5873_vm11, %v9069_v16, %v9072_v11  ;;  %v19836_v27 = vld [vmem:[%s25940_s5 + $0x1b0] sm:$0xff]   ;;  %v19837_v37 = vld [vmem:[%s25940_s5 + $0x1b8] sm:$0xff]   ;;  %v19838_v31 = vld [vmem:[%s25940_s5 + $0x1c0] sm:$0xff]  }
 0x98e   : > { %v19839_v38 = vld [vmem:[%s25940_s5 + $0x1c8] sm:$0xff]   ;;  %v19840_v41 = vld [vmem:[%s25940_s5 + $0x1d0] sm:$0xff]   ;;  %v19841_v22 = vld [vmem:[%s25940_s5 + $0x1d8] sm:$0xff]  }
 0x98f   : > { %18439 = vmatpush3.bf16.msra.mxu0 %v19791_v15  ;;  %v19842_v36 = vld [vmem:[%s25940_s5 + $0x1e0] sm:$0xff]   ;;  %v19843_v18 = vld [vmem:[%s25940_s5 + $0x1e8] sm:$0xff]   ;;  %v19844_v39 = vld [vmem:[%s25940_s5 + $0x1f0] sm:$0xff]  }
 0x990   : > { %18440 = vmatprep.subr.bf16.mxu0 %v26123_v1  ;;  %v19846_v16 = vld [vmem:[%s25940_s5 + $0x200] sm:$0xff]   ;;  %v19847_v11 = vld [vmem:[%s25940_s5 + $0x208] sm:$0xff]  }
 0x993   : > { %18441 = vmatpush3.bf16.msra.mxu0 %v19792_v7  ;;  %v19848_v7 = vld [vmem:[%s25940_s5 + $0x210] sm:$0xff]  }
 0x994   : > { %18442 = vmatprep.subr.bf16.mxu0 %v26123_v1 }
 0x997   : > { %18443 = vmatpush3.bf16.msra.mxu0 %v19793_v50  ;;  %v19850_v50 = vld [vmem:[%s25940_s5 + $0x220] sm:$0xff]  }
 0x998   : > { %18444 = vmatprep.subr.bf16.mxu0 %v26123_v1 }
 0x99b   : > { %18445 = vmatpush3.bf16.msra.mxu0 %v19794_v13  ;;  %v19851_v13 = vld [vmem:[%s25940_s5 + $0x228] sm:$0xff]  }
 0x99c   : > { %18446 = vmatprep.subr.bf16.mxu0 %v26123_v1 }
 0x99f   : > { %18447 = vmatpush3.bf16.msra.mxu0 %v19795_v25 }
 0x9a0   : > { %18448 = vmatprep.subr.bf16.mxu0 %v26123_v1 }
 0x9a3   : > { %18449 = vmatpush3.bf16.msra.mxu0 %v19796_v43 }
 0x9a4   : > { %18450 = vmatprep.subr.bf16.mxu0 %v26123_v1 }
 0x9a7   : > { %18451 = vmatpush3.bf16.msra.mxu0 %v19797_v47 }
 0x9a8   : > { %18456 = vmatprep.subr.bf16.mxu0 %v26123_v1 }
 0x9aa   : > { %18453 = vmatmul.mubr.bf16.vlgmr.msra.gmra.mrb[56].mxu0 %v23690_v23  ;;  %v19815_v23 = vld [vmem:[%s25940_s5 + $0x108] sm:$0xff]  }
 0x9ab   : > { %18457 = vmatpush3.bf16.msra.mxu0 %v19798_v33  ;;  %18472 = vmatprep.mubr.msk.bf16.mxu0 %vm20472_vm6, %v26123_v1 }
 0x9ac   : > { %18458 = vmatprep.subr.bf16.mxu0 %v26123_v1 }
 0x9af   : > { %18459 = vmatpush3.bf16.msra.mxu0 %v19799_v51  ;;  %v19852_v51 = vld [vmem:[%s25940_s5 + $0x230] sm:$0xff]  }
 0x9b0   : > { %18460 = vmatprep.subr.bf16.mxu0 %v26123_v1 }
 0x9b3   : > { %18461 = vmatpush3.bf16.msra.mxu0 %v19800_v59 }
 0x9b4   : > { %18462 = vmatprep.subr.bf16.mxu0 %v26123_v1 }
 0x9b7   : > { %18463 = vmatpush3.bf16.msra.mxu0 %v19801_v12 }
 0x9b8   : > { %18464 = vmatprep.subr.bf16.mxu0 %v26123_v1 }
 0x9bb   : > { %18465 = vmatpush3.bf16.msra.mxu0 %v19802_v42  ;;  %v19853_v42 = vld [vmem:[%s25940_s5 + $0x238] sm:$0xff]  }
 0x9bc   : > { %18466 = vmatprep.subr.bf16.mxu0 %v26123_v1 }
 0x9bf   : > { %18467 = vmatpush3.bf16.msra.mxu0 %v19803_v6 }
 0x9c0   : > { %18468 = vmatprep.subr.bf16.mxu0 %v26123_v1 }
 0x9c3   : > { %18469 = vmatpush3.bf16.msra.mxu0 %v19804_v57 }
 0x9c4   : > { %18470 = vmatprep.subr.bf16.mxu0 %v26123_v1 }
 0x9c7   : > { %18471 = vmatpush3.bf16.msra.mxu0 %v19805_v9 }
 0x9c8   : > { %18476 = vmatprep.subr.bf16.mxu0 %v26123_v1 }
 0x9ca   : > { %18473 = vmatmul.mubr.bf16.vlgmr.msra.gmra.mrb[60].mxu0 %v8495_v10 }
 0x9cb   : > { %18477 = vmatpush3.bf16.msra.mxu0 %v19806_v40  ;;  %18492 = vmatprep.mubr.msk.bf16.mxu0 %vm20472_vm6, %v26123_v1 }
 0x9cc   : > { %18478 = vmatprep.subr.bf16.mxu0 %v26123_v1 }
 0x9cf   : > { %18479 = vmatpush3.bf16.msra.mxu0 %v19807_v48 }
 0x9d0   : > { %18480 = vmatprep.subr.bf16.mxu0 %v26123_v1 }
 0x9d3   : > { %18481 = vmatpush3.bf16.msra.mxu0 %v19808_v17 }
 0x9d4   : > { %18482 = vmatprep.subr.bf16.mxu0 %v26123_v1 }
 0x9d7   : > { %18483 = vmatpush3.bf16.msra.mxu0 %v19809_v20 }
 0x9d8   : > { %18484 = vmatprep.subr.bf16.mxu0 %v26123_v1 }
 0x9db   : > { %18485 = vmatpush3.bf16.msra.mxu0 %v19810_v44 }
 0x9dc   : > { %18486 = vmatprep.subr.bf16.mxu0 %v26123_v1 }
 0x9df   : > { %18487 = vmatpush3.bf16.msra.mxu0 %v19811_v53 }
 0x9e0   : > { %18488 = vmatprep.subr.bf16.mxu0 %v26123_v1 }
 0x9e3   : > { %18489 = vmatpush3.bf16.msra.mxu0 %v19812_v63 }
 0x9e4   : > { %18490 = vmatprep.subr.bf16.mxu0 %v26123_v1 }
 0x9e7   : > { %18491 = vmatpush3.bf16.msra.mxu0 %v19813_v14 }
 0x9e8   : > { %18496 = vmatprep.subr.bf16.mxu0 %v26123_v1 }
 0x9ea   : > { %18493 = vmatmul.mubr.bf16.vlgmr.msra.gmra.mrb[64].mxu0 %v23703_v45 }
 0x9eb   : > { %18497 = vmatpush3.bf16.msra.mxu0 %v19814_v46  ;;  %18512 = vmatprep.mubr.msk.bf16.mxu0 %vm20472_vm6, %v26123_v1 }
 0x9ec   : > { %18498 = vmatprep.subr.bf16.mxu0 %v26123_v1 }
 0x9ef   : > { %18499 = vmatpush3.bf16.msra.mxu0 %v19815_v23 }
 0x9f0   : > { %18500 = vmatprep.subr.bf16.mxu0 %v26123_v1 }
 0x9f3   : > { %18501 = vmatpush3.bf16.msra.mxu0 %v19816_v32 }
 0x9f4   : > { %18502 = vmatprep.subr.bf16.mxu0 %v26123_v1 }
 0x9f7   : > { %18503 = vmatpush3.bf16.msra.mxu0 %v19817_v2 }
 0x9f8   : > { %18504 = vmatprep.subr.bf16.mxu0 %v26123_v1 }
 0x9fb   : > { %18505 = vmatpush3.bf16.msra.mxu0 %v19818_v34 }
 0x9fc   : > { %18506 = vmatprep.subr.bf16.mxu0 %v26123_v1 }
 0x9ff   : > { %18507 = vmatpush3.bf16.msra.mxu0 %v19819_v49 }
 0xa00   : > { %18508 = vmatprep.subr.bf16.mxu0 %v26123_v1 }
 0xa03   : > { %18509 = vmatpush3.bf16.msra.mxu0 %v19820_v29 }
 0xa04   : > { %18510 = vmatprep.subr.bf16.mxu0 %v26123_v1 }
 0xa07   : > { %18511 = vmatpush3.bf16.msra.mxu0 %v19821_v61 }
 0xa08   : > { %18516 = vmatprep.subr.bf16.mxu0 %v26123_v1 }
 0xa0a   : > { %18513 = vmatmul.mubr.bf16.vlgmr.msra.gmra.mrb[68].mxu0 %v23696_v35  ;;  %v19830_v35 = vld [vmem:[%s25940_s5 + $0x180] sm:$0xff]  }
 0xa0b   : > { %18517 = vmatpush3.bf16.msra.mxu0 %v19822_v30  ;;  %18532 = vmatprep.mubr.msk.bf16.mxu0 %vm20472_vm6, %v26123_v1 }
 0xa0c   : > { %18518 = vmatprep.subr.bf16.mxu0 %v26123_v1 }
 0xa0f   : > { %18519 = vmatpush3.bf16.msra.mxu0 %v19823_v3 }
 0xa10   : > { %18520 = vmatprep.subr.bf16.mxu0 %v26123_v1 }
 0xa13   : > { %18521 = vmatpush3.bf16.msra.mxu0 %v19824_v55 }
 0xa14   : > { %18522 = vmatprep.subr.bf16.mxu0 %v26123_v1 }
 0xa17   : > { %18523 = vmatpush3.bf16.msra.mxu0 %v19825_v26 }
 0xa18   : > { %18524 = vmatprep.subr.bf16.mxu0 %v26123_v1 }
 0xa1b   : > { %18525 = vmatpush3.bf16.msra.mxu0 %v19826_v60 }
 0xa1c   : > { %18526 = vmatprep.subr.bf16.mxu0 %v26123_v1 }
 0xa1f   : > { %18527 = vmatpush3.bf16.msra.mxu0 %v19827_v54 }
 0xa20   : > { %18528 = vmatprep.subr.bf16.mxu0 %v26123_v1 }
 0xa23   : > { %18529 = vmatpush3.bf16.msra.mxu0 %v19828_v62 }
 0xa24   : > { %18530 = vmatprep.subr.bf16.mxu0 %v26123_v1 }
 0xa27   : > { %18531 = vmatpush3.bf16.msra.mxu0 %v19829_v24 }
 0xa28   : > { %18536 = vmatprep.subr.bf16.mxu0 %v26123_v1 }
 0xa2a   : > { %18533 = vmatmul.mubr.bf16.vlgmr.msra.gmra.mrb[72].mxu0 %v23715_v52  ;;  %v19845_v52 = vld [vmem:[%s25940_s5 + $0x1f8] sm:$0xff]  }
 0xa2b   : > { %18537 = vmatpush3.bf16.msra.mxu0 %v19830_v35  ;;  %18552 = vmatprep.mubr.msk.bf16.mxu0 %vm20472_vm6, %v26123_v1 }
 0xa2c   : > { %18538 = vmatprep.subr.bf16.mxu0 %v26123_v1 }
 0xa2f   : > { %18539 = vmatpush3.bf16.msra.mxu0 %v19831_v21 }
 0xa30   : > { %18540 = vmatprep.subr.bf16.mxu0 %v26123_v1 }
 0xa33   : > { %18541 = vmatpush3.bf16.msra.mxu0 %v19832_v28 }
 0xa34   : > { %18542 = vmatprep.subr.bf16.mxu0 %v26123_v1 }
 0xa37   : > { %18543 = vmatpush3.bf16.msra.mxu0 %v19833_v8 }
 0xa38   : > { %18544 = vmatprep.subr.bf16.mxu0 %v26123_v1 }
 0xa3b   : > { %18545 = vmatpush3.bf16.msra.mxu0 %v19834_v56 }
 0xa3c   : > { %18546 = vmatprep.subr.bf16.mxu0 %v26123_v1 }
 0xa3f   : > { %18547 = vmatpush3.bf16.msra.mxu0 %v19835_v4 }
 0xa40   : > { %18548 = vmatprep.subr.bf16.mxu0 %v26123_v1 }
 0xa43   : > { %18549 = vmatpush3.bf16.msra.mxu0 %v19836_v27 }
 0xa44   : > { %18550 = vmatprep.subr.bf16.mxu0 %v26123_v1 }
 0xa47   : > { %18551 = vmatpush3.bf16.msra.mxu0 %v19837_v37 }
 0xa48   : > { %18556 = vmatprep.subr.bf16.mxu0 %v26123_v1 }
 0xa4a   : > { %18553 = vmatmul.mubr.bf16.vlgmr.msra.gmra.mrb[76].mxu0 %v23706_v0 }
 0xa4b   : > { %18557 = vmatpush3.bf16.msra.mxu0 %v19838_v31  ;;  %18572 = vmatprep.mubr.msk.bf16.mxu0 %vm20472_vm6, %v26123_v1 }
 0xa4c   : > { %18558 = vmatprep.subr.bf16.mxu0 %v26123_v1 }
 0xa4f   : > { %18559 = vmatpush3.bf16.msra.mxu0 %v19839_v38  ;;  %v15815_v38 = vld [vmem:[#allocation4] ss:$0 sm:$0xff] }
 0xa50   : > { %18560 = vmatprep.subr.bf16.mxu0 %v26123_v1 }
 0xa53   : > { %18561 = vmatpush3.bf16.msra.mxu0 %v19840_v41 }
 0xa54   : > { %18562 = vmatprep.subr.bf16.mxu0 %v26123_v1 }
 0xa57   : > { %18563 = vmatpush3.bf16.msra.mxu0 %v19841_v22 }
 0xa58   : > { %18564 = vmatprep.subr.bf16.mxu0 %v26123_v1 }
 0xa5b   : > { %18565 = vmatpush3.bf16.msra.mxu0 %v19842_v36 }
 0xa5c   : > { %18566 = vmatprep.subr.bf16.mxu0 %v26123_v1 }
 0xa5d   : > { %v8381_v45 = vpop.f32.mrb[52].mxu0 }
 0xa5e   : > { %v18434_v0 = vpop.f32.mrb[53].mxu0 }
 0xa5f   : > { %18567 = vmatpush3.bf16.msra.mxu0 %v19843_v18  ;;  %v8384_v5 = vpop.f32.mrb[54].mxu0 }
 0xa60   : > { %v18435_v15 = vpop.f32.mrb[55].mxu0  ;;  %18568 = vmatprep.subr.bf16.mxu0 %v26123_v1 }
 0xa63   : > { %18569 = vmatpush3.bf16.msra.mxu0 %v19844_v39  ;;  %v26124_v39 = vmov 65535  }
 0xa64   : > { %18570 = vmatprep.subr.bf16.mxu0 %v26123_v1  ;;  %v9312_v15 = vsel %vm2826_vm3, 4294967295, %v26124_v39  ;;  %v19868_v39 = vld [vmem:[%s25942_s7 + $0x20] sm:$0xff]  }
 0xa67   : > { %18571 = vmatpush3.bf16.msra.mxu0 %v19845_v52 }
 0xa68   : > { %18576 = vmatprep.subr.bf16.mxu0 %v26123_v1 }
 0xa6a   : > { %18573 = vmatmul.mubr.bf16.vlgmr.msra.gmra.mrb[80].mxu0 %v23722_v58  ;;  %v19849_v58 = vld [vmem:[%s25940_s5 + $0x218] sm:$0xff]  }
 0xa6b   : > { %18577 = vmatpush3.bf16.msra.mxu0 %v19846_v16  ;;  %18592 = vmatprep.mubr.msk.bf16.mxu0 %vm20472_vm6, %v26123_v1 }
 0xa6c   : > { %18578 = vmatprep.subr.bf16.mxu0 %v26123_v1 }
 0xa6f   : > { %18579 = vmatpush3.bf16.msra.mxu0 %v19847_v11  ;;  %v24004_v11 = vsel %vm1595_vm1, %v9312_v15, 0  ;;  %v19869_v15 = vld [vmem:[%s25942_s7 + $0x28] sm:$0xff]  }
 0xa70   : > { %18580 = vmatprep.subr.bf16.mxu0 %v26123_v1 }
 0xa73   : > { %18581 = vmatpush3.bf16.msra.mxu0 %v19848_v7 }
 0xa74   : > { %18582 = vmatprep.subr.bf16.mxu0 %v26123_v1 }
 0xa77   : > { %18583 = vmatpush3.bf16.msra.mxu0 %v19849_v58 }
 0xa78   : > { %18584 = vmatprep.subr.bf16.mxu0 %v26123_v1 }
 0xa7b   : > { %18585 = vmatpush3.bf16.msra.mxu0 %v19850_v50  ;;  %v24010_v50 = vld [vmem:[%s25948_s13 + $0x8] sm:$0x1f]  }
 0xa7c   : > { %18586 = vmatprep.subr.bf16.mxu0 %v26123_v1 }
 0xa7d   : > { %v8470_v25 = vpop.f32.mrb[56].mxu0 }
 0xa7e   : > { %v8471_v43 = vadd.f32 %v8470_v25, %v8381_v45  ;;  %v18454_v47 = vpop.f32.mrb[57].mxu0  ;;  %v19857_v25 = vld [vmem:[%s25942_s7 + $0x48] sm:$0xff]  }
 0xa7f   : > { %v8473_v33 = vpop.f32.mrb[58].mxu0  ;;  %18587 = vmatpush3.bf16.msra.mxu0 %v19851_v13  ;;  %v19856_v13 = vld [vmem:[%s25942_s7 + $0x40] sm:$0xff]   ;;  %v19859_v47 = vld [vmem:[%s25942_s7 + $0x58] sm:$0xff]  }
 0xa80   : > { %v8474_v59 = vadd.f32 %v8473_v33, %v8384_v5  ;;  %v18455_v12 = vpop.f32.mrb[59].mxu0  ;;  %18588 = vmatprep.subr.bf16.mxu0 %v26123_v1  ;;  %v19860_v33 = vld [vmem:[%s25942_s7 + $0x60] sm:$0xff]  }
 0xa81   : > { %v19863_v12 = vld [vmem:[%s25942_s7 + $0x78] sm:$0xff]  }
 0xa83   : > { %18589 = vmatpush3.bf16.msra.mxu0 %v19852_v51  ;;  %v19861_v51 = vld [vmem:[%s25942_s7 + $0x68] sm:$0xff]  }
 0xa84   : > { %18590 = vmatprep.subr.bf16.mxu0 %v26123_v1 }
 0xa87   : > { %18591 = vmatpush3.bf16.msra.mxu0 %v19853_v42 }
 0xa8a   : > { %18593 = vmatmul.mubr.bf16.vlgmr.msra.gmra.mrb[84].mxu0 %v23719_v19  ;;  %v23997_v19 = vld [vmem:[%s25948_s13] sm:$0xff]  }
 0xa8b   : > { %18598 = vmatprep.mubr.msk.bf16.mxu0 %vm9304_vm0, %v23997_v19 }
 0xa9d   : > { %v8579_v6 = vpop.f32.mrb[60].mxu0 }
 0xa9e   : > { %v8586_v57 = vadd.f32 %v8579_v6, %v8471_v43  ;;  %v18474_v9 = vpop.f32.mrb[61].mxu0  ;;  %v19858_v43 = vld [vmem:[%s25942_s7 + $0x50] sm:$0xff]  }
 0xa9f   : > { %v8582_v40 = vpop.f32.mrb[62].mxu0 }
 0xaa0   : > { %v8587_v10 = vadd.f32 %v8582_v40, %v8474_v59  ;;  %v18475_v48 = vpop.f32.mrb[63].mxu0  ;;  %v19862_v59 = vld [vmem:[%s25942_s7 + $0x70] sm:$0xff]  }
 0xabd   : > { %v8700_v17 = vpop.f32.mrb[64].mxu0 }
 0xabe   : > { %v8707_v20 = vadd.f32 %v8700_v17, %v8586_v57  ;;  %v18494_v44 = vpop.f32.mrb[65].mxu0 }
 0xabf   : > { %v8703_v53 = vpop.f32.mrb[66].mxu0 }
 0xac0   : > { %v8708_v63 = vadd.f32 %v8703_v53, %v8587_v10  ;;  %v18495_v14 = vpop.f32.mrb[67].mxu0 }
 0xadd   : > { %v8813_v46 = vpop.f32.mrb[68].mxu0 }
 0xade   : > { %v8820_v23 = vadd.f32 %v8813_v46, %v8707_v20  ;;  %v18514_v32 = vpop.f32.mrb[69].mxu0 }
 0xadf   : > { %v8816_v2 = vpop.f32.mrb[70].mxu0 }
 0xae0   : > { %v8821_v34 = vadd.f32 %v8816_v2, %v8708_v63  ;;  %v18515_v49 = vpop.f32.mrb[71].mxu0 }
 0xafd   : > { %v8929_v29 = vpop.f32.mrb[72].mxu0 }
 0xafe   : > { %v8936_v61 = vadd.f32 %v8929_v29, %v8820_v23  ;;  %v18534_v30 = vpop.f32.mrb[73].mxu0 }
 0xaff   : > { %v8932_v3 = vpop.f32.mrb[74].mxu0  ;;  %v19864_v30 = vld [vmem:[%s25942_s7] sm:$0xff]  }
 0xb00   : > { %v8937_v55 = vadd.f32 %v8932_v3, %v8821_v34  ;;  %v18535_v26 = vpop.f32.mrb[75].mxu0 }
 0xb1d   : > { %v9041_v60 = vpop.f32.mrb[76].mxu0 }
 0xb1e   : > { %v9048_v54 = vadd.f32 %v9041_v60, %v8936_v61  ;;  %v18554_v62 = vpop.f32.mrb[77].mxu0 }
 0xb1f   : > { %v9044_v24 = vpop.f32.mrb[78].mxu0 }
 0xb20   : > { %v9049_v35 = vadd.f32 %v9044_v24, %v8937_v55  ;;  %v18555_v21 = vpop.f32.mrb[79].mxu0 }
 0xb3d   : > { %v9157_v28 = vpop.f32.mrb[80].mxu0 }
 0xb3e   : > { %v9164_v8 = vadd.f32 %v9157_v28, %v9048_v54  ;;  %v18574_v56 = vpop.f32.mrb[81].mxu0 }
 0xb3f   : > { %v9160_v4 = vpop.f32.mrb[82].mxu0 }
 0xb40   : > { %v9165_v27 = vadd.f32 %v9160_v4, %v9049_v35  ;;  %v18575_v37 = vpop.f32.mrb[83].mxu0 }
 0xb5d   : > { %v9269_v31 = vpop.f32.mrb[84].mxu0 }
 0xb5e   : > { %v9276_v41 = vadd.f32 %v9269_v31, %v9164_v8  ;;  %v18594_v22 = vpop.f32.mrb[85].mxu0 }
 0xb5f   : > { %v9272_v36 = vpop.f32.mrb[86].mxu0 }
 0xb60   : > { %v9285_v18 = vadd.f32 %v15815_v38, %v9276_v41  ;;  %v9277_v45 = vadd.f32 %v9272_v36, %v9165_v27  ;;  %v18595_v0 = vpop.f32.mrb[87].mxu0 }
 0xb61   : > { %v19866_v0 = vld [vmem:[%s25942_s7 + $0x10] sm:$0xff]  }
 0xb62   : > { %v9286_v5 = vadd.f32 %v15815_v38, %v9277_v45  ;;  %v9287_v52 = vmax.f32 %v9285_v18, 0.0  ;;  %v19865_v38 = vld [vmem:[%s25942_s7 + $0x8] sm:$0xff]  }
 0xb64   : > { %v9288_v16 = vmax.f32 %v9286_v5, 0.0  ;;  %v19867_v5 = vld [vmem:[%s25942_s7 + $0x18] sm:$0xff]  }
 0xb66   : > { %v9289_v7 = vpack.c.bf16 %v9288_v16, %v9287_v52  ;;  %v19870_v52 = vld [vmem:[%s25942_s7 + $0x30] sm:$0xff]   ;;  %v19871_v16 = vld [vmem:[%s25942_s7 + $0x38] sm:$0xff]  }
 0xb68   : > { %v9315_v58 = vand.u32 %v24004_v11, %v9289_v7  ;;  %v19872_v7 = vld [vmem:[%s25942_s7 + $0x80] sm:$0xff]  }
 0xb6a   : > { %18596 = vmatprep.subr.bf16.mxu0 %v9315_v58 }
 0xb6b   : > { %18597 = vmatpush3.bf16.msra.mxu0 %v9315_v58  ;;  %v19873_v58 = vld [vmem:[%s25942_s7 + $0x88] sm:$0xff]  }
 0xb6c   : > { %18602 = vmatprep.subr.bf16.mxu0 %v26123_v1 }
 0xb6e   : > { %18599 = vmatmul.mubr.msk.bf16.vlgmr.msra.gmra.mrb[88].mxu0 %vm9304_vm0, %v24010_v50 }
 0xb6f   : > { %18603 = vmatpush3.bf16.msra.mxu0 %v19856_v13  ;;  %18618 = vmatprep.mubr.msk.bf16.mxu0 %vm20472_vm6, %v26123_v1  ;;  %v19874_v13 = vld [vmem:[%s25942_s7 + $0x90] sm:$0xff]  }
 0xb70   : > { %18604 = vmatprep.subr.bf16.mxu0 %v26123_v1 }
 0xb73   : > { %18605 = vmatpush3.bf16.msra.mxu0 %v19857_v25  ;;  %v19875_v25 = vld [vmem:[%s25942_s7 + $0x98] sm:$0xff]  }
 0xb74   : > { %18606 = vmatprep.subr.bf16.mxu0 %v26123_v1 }
 0xb77   : > { %18607 = vmatpush3.bf16.msra.mxu0 %v19858_v43  ;;  %v19876_v43 = vld [vmem:[%s25942_s7 + $0xa0] sm:$0xff]  }
 0xb78   : > { %18608 = vmatprep.subr.bf16.mxu0 %v26123_v1 }
 0xb7b   : > { %18609 = vmatpush3.bf16.msra.mxu0 %v19859_v47  ;;  %v19877_v47 = vld [vmem:[%s25942_s7 + $0xa8] sm:$0xff]  }
 0xb7c   : > { %18610 = vmatprep.subr.bf16.mxu0 %v26123_v1 }
 0xb7f   : > { %18611 = vmatpush3.bf16.msra.mxu0 %v19860_v33  ;;  %v19878_v33 = vld [vmem:[%s25942_s7 + $0xb0] sm:$0xff]  }
 0xb80   : > { %18612 = vmatprep.subr.bf16.mxu0 %v26123_v1 }
 0xb83   : > { %18613 = vmatpush3.bf16.msra.mxu0 %v19861_v51  ;;  %v19879_v51 = vld [vmem:[%s25942_s7 + $0xb8] sm:$0xff]  }
 0xb84   : > { %18614 = vmatprep.subr.bf16.mxu0 %v26123_v1 }
 0xb87   : > { %18615 = vmatpush3.bf16.msra.mxu0 %v19862_v59  ;;  %v19880_v59 = vld [vmem:[%s25942_s7 + $0xc0] sm:$0xff]  }
 0xb88   : > { %18616 = vmatprep.subr.bf16.mxu0 %v26123_v1 }
 0xb8b   : > { %18617 = vmatpush3.bf16.msra.mxu0 %v19863_v12 }
 0xb8c   : > { %18622 = vmatprep.subr.bf16.mxu0 %v26123_v1 }
 0xc41   : > { %v18600_v42 = vpop.f32.mrb[88].mxu0 }
 0xc42   : > { %v9351_v6 = vpop.f32.mrb[89].mxu0 }
 0xc43   : > { %v18601_v57 = vpop.f32.mrb[90].mxu0 }
 0xc44   : > { %v9367_v9 = vpack.c.bf16 %v18601_v57, %v18600_v42  ;;  %v9354_v40 = vpop.f32.mrb[91].mxu0  ;;  %v19881_v42 = vld [vmem:[%s25942_s7 + $0xc8] sm:$0xff]   ;;  %v19883_v57 = vld [vmem:[%s25942_s7 + $0xd8] sm:$0xff]  }
 0xc45   : > { %v24049_v10 = vpack.c.bf16 %v9354_v40, %v9351_v6  ;;  %v19882_v6 = vld [vmem:[%s25942_s7 + $0xd0] sm:$0xff]   ;;  %v19885_v40 = vld [vmem:[%s25942_s7 + $0xe8] sm:$0xff]  }
 0xc46   : > { %v9719_v48 = vshrl.u32 %v9367_v9, 16  ;;  %v9722_v17 = vshll.u32 %v9367_v9, 16  ;;  %v9838_v20 = vrot.slane %v9367_v9, 3  ;;  %v10066_v14 = vrot.slane %v9367_v9, 5 }
 0xc47   : > { %v9402_v44 = vshrl.u32 %v24049_v10, 16  ;;  %v9404_v53 = vshll.u32 %v24049_v10, 16  ;;  %v9837_v63 = vrot.slane %v24049_v10, 3  ;;  %v10065_v24 = vrot.slane %v24049_v10, 5 }
 0xc48   : > { %v9721_v46 = vrot.slane %v9719_v48, 2  ;;  %v9724_v23 = vrot.slane %v9722_v17, 3  ;;  %v9952_v32 = vrot.slane %v9719_v48, 3  ;;  %v9953_v2 = vrot.slane %v9722_v17, 4 }
 0xc49   : > { %v9406_v34 = vrot.slane %v9404_v53, 1  ;;  %v9715_v49 = vrot.slane %v9402_v44, 2  ;;  %v9716_v29 = vrot.slane %v9404_v53, 3  ;;  %v24055_v61 = vsel %vm3024_vm4, %v9837_v63, %v9838_v20  ;;  %v19889_v20 = vld [vmem:[%s25942_s7 + $0x108] sm:$0xff]   ;;  %v19892_v63 = vld [vmem:[%s25942_s7 + $0x120] sm:$0xff]  }
 0xc4a   : > { %v9725_v3 = vor.u32 %v9724_v23, %v9721_v46  ;;  %v9949_v55 = vrot.slane %v9402_v44, 3  ;;  %v9950_v26 = vrot.slane %v9404_v53, 4  ;;  %v9954_v60 = vor.u32 %v9953_v2, %v9952_v32  ;;  %v19894_v46 = vld [vmem:[%s25942_s7 + $0x130] sm:$0xff]   ;;  %v19895_v23 = vld [vmem:[%s25942_s7 + $0x138] sm:$0xff]   ;;  %v19896_v32 = vld [vmem:[%s25942_s7 + $0x140] sm:$0xff]  }
 0xc4b   : > { %v9407_v54 = vor.u32 %v9406_v34, %v9402_v44  ;;  %v9717_v62 = vor.u32 %v9716_v29, %v9715_v49  ;;  %v10177_v35 = vrot.slane %v9402_v44, 5  ;;  %v10178_v28 = vrot.slane %v9404_v53, 6  ;;  %v19890_v44 = vld [vmem:[%s25942_s7 + $0x110] sm:$0xff]   ;;  %v19891_v53 = vld [vmem:[%s25942_s7 + $0x118] sm:$0xff]   ;;  %v19897_v2 = vld [vmem:[%s25942_s7 + $0x148] sm:$0xff]  }
 0xc4c   : > { %v9951_v21 = vor.u32 %v9950_v26, %v9949_v55  ;;  %v10180_v8 = vrot.slane %v9719_v48, 5  ;;  %v10181_v56 = vrot.slane %v9722_v17, 6  ;;  %v24065_v27 = vsel %vm5695_vm7, %v10065_v24, %v10066_v14  ;;  %v19887_v48 = vld [vmem:[%s25942_s7 + $0xf8] sm:$0xff]   ;;  %v19888_v17 = vld [vmem:[%s25942_s7 + $0x100] sm:$0xff]   ;;  %v19893_v14 = vld [vmem:[%s25942_s7 + $0x128] sm:$0xff]  }
 0xc4d   : > { %18619 = vmatmul.mubr.bf16.vlgmr.msra.gmra.mrb[92].mxu0 %v9407_v54  ;;  %v24062_v4 = vsel %vm2916_vm5, %v9717_v62, %v9725_v3  ;;  %v10293_v37 = vrot.slane %v24049_v10, 6  ;;  %v10294_v31 = vrot.slane %v9367_v9, 6  ;;  %v10179_v22 = vor.u32 %v10178_v28, %v10177_v35  ;;  %v19884_v9 = vld [vmem:[%s25942_s7 + $0xe0] sm:$0xff]   ;;  %v19898_v34 = vld [vmem:[%s25942_s7 + $0x150] sm:$0xff]   ;;  %v19899_v49 = vld [vmem:[%s25942_s7 + $0x158] sm:$0xff]  }
 0xc4e   : > { %18623 = vmatpush3.bf16.msra.mxu0 %v19864_v30  ;;  %18638 = vmatprep.mubr.msk.bf16.mxu0 %vm20472_vm6, %v26123_v1  ;;  %v24074_v41 = vsel %vm6761_vm12, %v9951_v21, %v9954_v60  ;;  %v10182_v36 = vor.u32 %v10181_v56, %v10180_v8  ;;  %v9605_v12 = vrot.slane %v24049_v10, 1  ;;  %v19900_v29 = vld [vmem:[%s25942_s7 + $0x160] sm:$0xff]   ;;  %v19902_v30 = vld [vmem:[%s25942_s7 + $0x170] sm:$0xff]   ;;  %v19903_v3 = vld [vmem:[%s25942_s7 + $0x178] sm:$0xff]  }
 0xc4f   : > { %18624 = vmatprep.subr.bf16.mxu0 %v26123_v1  ;;  %v24078_v18 = vsel %vm4424_vm13, %v10293_v37, %v10294_v31  ;;  %v19904_v55 = vld [vmem:[%s25942_s7 + $0x180] sm:$0xff]   ;;  %v19905_v26 = vld [vmem:[%s25942_s7 + $0x188] sm:$0xff]   ;;  %v19906_v60 = vld [vmem:[%s25942_s7 + $0x190] sm:$0xff]  }
 0xc50   : > { %v24081_v45 = vsel %vm5873_vm11, %v10179_v22, %v10182_v36  ;;  %v19907_v54 = vld [vmem:[%s25942_s7 + $0x198] sm:$0xff]   ;;  %v19908_v62 = vld [vmem:[%s25942_s7 + $0x1a0] sm:$0xff]   ;;  %v19909_v24 = vld [vmem:[%s25942_s7 + $0x1a8] sm:$0xff]  }
 0xc51   : > { %v19910_v35 = vld [vmem:[%s25942_s7 + $0x1b0] sm:$0xff]   ;;  %v19911_v21 = vld [vmem:[%s25942_s7 + $0x1b8] sm:$0xff]   ;;  %v19912_v28 = vld [vmem:[%s25942_s7 + $0x1c0] sm:$0xff]  }
 0xc52   : > { %18625 = vmatpush3.bf16.msra.mxu0 %v19865_v38  ;;  %v19913_v8 = vld [vmem:[%s25942_s7 + $0x1c8] sm:$0xff]   ;;  %v19914_v56 = vld [vmem:[%s25942_s7 + $0x1d0] sm:$0xff]  }
 0xc53   : > { %18626 = vmatprep.subr.bf16.mxu0 %v26123_v1  ;;  %v19917_v37 = vld [vmem:[%s25942_s7 + $0x1e8] sm:$0xff]   ;;  %v19918_v22 = vld [vmem:[%s25942_s7 + $0x1f0] sm:$0xff]  }
 0xc56   : > { %18627 = vmatpush3.bf16.msra.mxu0 %v19866_v0  ;;  %v19919_v0 = vld [vmem:[%s25942_s7 + $0x1f8] sm:$0xff]  }
 0xc57   : > { %18628 = vmatprep.subr.bf16.mxu0 %v26123_v1 }
 0xc5a   : > { %18629 = vmatpush3.bf16.msra.mxu0 %v19867_v5  ;;  %v19920_v5 = vld [vmem:[%s25942_s7 + $0x200] sm:$0xff]  }
 0xc5b   : > { %18630 = vmatprep.subr.bf16.mxu0 %v26123_v1 }
 0xc5e   : > { %18631 = vmatpush3.bf16.msra.mxu0 %v19868_v39  ;;  %v19921_v39 = vld [vmem:[%s25942_s7 + $0x208] sm:$0xff]  }
 0xc5f   : > { %18632 = vmatprep.subr.bf16.mxu0 %v26123_v1 }
 0xc62   : > { %18633 = vmatpush3.bf16.msra.mxu0 %v19869_v15  ;;  %v19922_v15 = vld [vmem:[%s25942_s7 + $0x210] sm:$0xff]  }
 0xc63   : > { %18634 = vmatprep.subr.bf16.mxu0 %v26123_v1 }
 0xc66   : > { %18635 = vmatpush3.bf16.msra.mxu0 %v19870_v52  ;;  %v19924_v52 = vld [vmem:[%s25942_s7 + $0x220] sm:$0xff]  }
 0xc67   : > { %18636 = vmatprep.subr.bf16.mxu0 %v26123_v1 }
 0xc6a   : > { %18637 = vmatpush3.bf16.msra.mxu0 %v19871_v16  ;;  %v19925_v16 = vld [vmem:[%s25942_s7 + $0x228] sm:$0xff]  }
 0xc6b   : > { %18642 = vmatprep.subr.bf16.mxu0 %v26123_v1 }
 0xc6d   : > { %18639 = vmatmul.mubr.bf16.vlgmr.msra.gmra.mrb[96].mxu0 %v24049_v10  ;;  %v19886_v10 = vld [vmem:[%s25942_s7 + $0xf0] sm:$0xff]  }
 0xc6e   : > { %18643 = vmatpush3.bf16.msra.mxu0 %v19872_v7  ;;  %18658 = vmatprep.mubr.msk.bf16.mxu0 %vm20472_vm6, %v26123_v1 }
 0xc6f   : > { %18644 = vmatprep.subr.bf16.mxu0 %v26123_v1 }
 0xc72   : > { %18645 = vmatpush3.bf16.msra.mxu0 %v19873_v58 }
 0xc73   : > { %18646 = vmatprep.subr.bf16.mxu0 %v26123_v1 }
 0xc76   : > { %18647 = vmatpush3.bf16.msra.mxu0 %v19874_v13 }
 0xc77   : > { %18648 = vmatprep.subr.bf16.mxu0 %v26123_v1 }
 0xc7a   : > { %18649 = vmatpush3.bf16.msra.mxu0 %v19875_v25 }
 0xc7b   : > { %18650 = vmatprep.subr.bf16.mxu0 %v26123_v1 }
 0xc7e   : > { %18651 = vmatpush3.bf16.msra.mxu0 %v19876_v43  ;;  %v19926_v43 = vld [vmem:[%s25942_s7 + $0x230] sm:$0xff]  }
 0xc7f   : > { %18652 = vmatprep.subr.bf16.mxu0 %v26123_v1 }
 0xc82   : > { %18653 = vmatpush3.bf16.msra.mxu0 %v19877_v47 }
 0xc83   : > { %18654 = vmatprep.subr.bf16.mxu0 %v26123_v1 }
 0xc86   : > { %18655 = vmatpush3.bf16.msra.mxu0 %v19878_v33 }
 0xc87   : > { %18656 = vmatprep.subr.bf16.mxu0 %v26123_v1 }
 0xc8a   : > { %18657 = vmatpush3.bf16.msra.mxu0 %v19879_v51  ;;  %v19927_v51 = vld [vmem:[%s25942_s7 + $0x238] sm:$0xff]  }
 0xc8b   : > { %18662 = vmatprep.subr.bf16.mxu0 %v26123_v1 }
 0xc8d   : > { %18659 = vmatmul.mubr.bf16.vlgmr.msra.gmra.mrb[100].mxu0 %v9605_v12 }
 0xc8e   : > { %18663 = vmatpush3.bf16.msra.mxu0 %v19880_v59  ;;  %18678 = vmatprep.mubr.msk.bf16.mxu0 %vm20472_vm6, %v26123_v1 }
 0xc8f   : > { %18664 = vmatprep.subr.bf16.mxu0 %v26123_v1 }
 0xc92   : > { %18665 = vmatpush3.bf16.msra.mxu0 %v19881_v42 }
 0xc93   : > { %18666 = vmatprep.subr.bf16.mxu0 %v26123_v1 }
 0xc96   : > { %18667 = vmatpush3.bf16.msra.mxu0 %v19882_v6 }
 0xc97   : > { %18668 = vmatprep.subr.bf16.mxu0 %v26123_v1 }
 0xc9a   : > { %18669 = vmatpush3.bf16.msra.mxu0 %v19883_v57 }
 0xc9b   : > { %18670 = vmatprep.subr.bf16.mxu0 %v26123_v1 }
 0xc9e   : > { %18671 = vmatpush3.bf16.msra.mxu0 %v19884_v9 }
 0xc9f   : > { %18672 = vmatprep.subr.bf16.mxu0 %v26123_v1 }
 0xca2   : > { %18673 = vmatpush3.bf16.msra.mxu0 %v19885_v40 }
 0xca3   : > { %18674 = vmatprep.subr.bf16.mxu0 %v26123_v1 }
 0xca6   : > { %18675 = vmatpush3.bf16.msra.mxu0 %v19886_v10 }
 0xca7   : > { %18676 = vmatprep.subr.bf16.mxu0 %v26123_v1 }
 0xcaa   : > { %18677 = vmatpush3.bf16.msra.mxu0 %v19887_v48 }
 0xcab   : > { %18682 = vmatprep.subr.bf16.mxu0 %v26123_v1 }
 0xcad   : > { %18679 = vmatmul.mubr.bf16.vlgmr.msra.gmra.mrb[104].mxu0 %v24062_v4  ;;  %v19915_v4 = vld [vmem:[%s25942_s7 + $0x1d8] sm:$0xff]  }
 0xcae   : > { %18683 = vmatpush3.bf16.msra.mxu0 %v19888_v17  ;;  %18698 = vmatprep.mubr.msk.bf16.mxu0 %vm20472_vm6, %v26123_v1 }
 0xcaf   : > { %18684 = vmatprep.subr.bf16.mxu0 %v26123_v1 }
 0xcb2   : > { %18685 = vmatpush3.bf16.msra.mxu0 %v19889_v20 }
 0xcb3   : > { %18686 = vmatprep.subr.bf16.mxu0 %v26123_v1 }
 0xcb6   : > { %18687 = vmatpush3.bf16.msra.mxu0 %v19890_v44 }
 0xcb7   : > { %18688 = vmatprep.subr.bf16.mxu0 %v26123_v1 }
 0xcba   : > { %18689 = vmatpush3.bf16.msra.mxu0 %v19891_v53 }
 0xcbb   : > { %18690 = vmatprep.subr.bf16.mxu0 %v26123_v1 }
 0xcbe   : > { %18691 = vmatpush3.bf16.msra.mxu0 %v19892_v63 }
 0xcbf   : > { %18692 = vmatprep.subr.bf16.mxu0 %v26123_v1 }
 0xcc2   : > { %18693 = vmatpush3.bf16.msra.mxu0 %v19893_v14 }
 0xcc3   : > { %18694 = vmatprep.subr.bf16.mxu0 %v26123_v1 }
 0xcc6   : > { %18695 = vmatpush3.bf16.msra.mxu0 %v19894_v46 }
 0xcc7   : > { %18696 = vmatprep.subr.bf16.mxu0 %v26123_v1 }
 0xcca   : > { %18697 = vmatpush3.bf16.msra.mxu0 %v19895_v23 }
 0xccb   : > { %18702 = vmatprep.subr.bf16.mxu0 %v26123_v1 }
 0xccd   : > { %18699 = vmatmul.mubr.bf16.vlgmr.msra.gmra.mrb[108].mxu0 %v24055_v61  ;;  %v19901_v61 = vld [vmem:[%s25942_s7 + $0x168] sm:$0xff]  }
 0xcce   : > { %18703 = vmatpush3.bf16.msra.mxu0 %v19896_v32  ;;  %18718 = vmatprep.mubr.msk.bf16.mxu0 %vm20472_vm6, %v26123_v1  ;;  %v19929_v32 = vld [vmem:[%s25944_s9 + $0x8] sm:$0xff]  }
 0xccf   : > { %18704 = vmatprep.subr.bf16.mxu0 %v26123_v1 }
 0xcd2   : > { %18705 = vmatpush3.bf16.msra.mxu0 %v19897_v2  ;;  %v19931_v2 = vld [vmem:[%s25944_s9 + $0x10] sm:$0xff]  }
 0xcd3   : > { %18706 = vmatprep.subr.bf16.mxu0 %v26123_v1 }
 0xcd6   : > { %18707 = vmatpush3.bf16.msra.mxu0 %v19898_v34  ;;  %v19933_v34 = vld [vmem:[%s25944_s9 + $0x18] sm:$0xff]  }
 0xcd7   : > { %18708 = vmatprep.subr.bf16.mxu0 %v26123_v1 }
 0xcda   : > { %18709 = vmatpush3.bf16.msra.mxu0 %v19899_v49  ;;  %v19935_v49 = vld [vmem:[%s25944_s9 + $0x20] sm:$0xff]  }
 0xcdb   : > { %18710 = vmatprep.subr.bf16.mxu0 %v26123_v1 }
 0xcde   : > { %18711 = vmatpush3.bf16.msra.mxu0 %v19900_v29 }
 0xcdf   : > { %18712 = vmatprep.subr.bf16.mxu0 %v26123_v1 }
 0xce2   : > { %18713 = vmatpush3.bf16.msra.mxu0 %v19901_v61 }
 0xce3   : > { %18714 = vmatprep.subr.bf16.mxu0 %v26123_v1 }
 0xce6   : > { %18715 = vmatpush3.bf16.msra.mxu0 %v19902_v30 }
 0xce7   : > { %18716 = vmatprep.subr.bf16.mxu0 %v26123_v1 }
 0xcea   : > { %18717 = vmatpush3.bf16.msra.mxu0 %v19903_v3 }
 0xceb   : > { %18722 = vmatprep.subr.bf16.mxu0 %v26123_v1 }
 0xced   : > { %18719 = vmatmul.mubr.bf16.vlgmr.msra.gmra.mrb[112].mxu0 %v24074_v41 }
 0xcee   : > { %18723 = vmatpush3.bf16.msra.mxu0 %v19904_v55  ;;  %18738 = vmatprep.mubr.msk.bf16.mxu0 %vm20472_vm6, %v26123_v1 }
 0xcef   : > { %18724 = vmatprep.subr.bf16.mxu0 %v26123_v1 }
 0xcf2   : > { %18725 = vmatpush3.bf16.msra.mxu0 %v19905_v26 }
 0xcf3   : > { %18726 = vmatprep.subr.bf16.mxu0 %v26123_v1 }
 0xcf6   : > { %18727 = vmatpush3.bf16.msra.mxu0 %v19906_v60  ;;  %v19937_v60 = vld [vmem:[%s25944_s9 + $0x28] sm:$0xff]  }
 0xcf7   : > { %18728 = vmatprep.subr.bf16.mxu0 %v26123_v1 }
 0xcfa   : > { %18729 = vmatpush3.bf16.msra.mxu0 %v19907_v54  ;;  %v19939_v54 = vld [vmem:[%s25944_s9 + $0x30] sm:$0xff]  }
 0xcfb   : > { %18730 = vmatprep.subr.bf16.mxu0 %v26123_v1 }
 0xcfe   : > { %18731 = vmatpush3.bf16.msra.mxu0 %v19908_v62 }
 0xcff   : > { %18732 = vmatprep.subr.bf16.mxu0 %v26123_v1 }
 0xd02   : > { %18733 = vmatpush3.bf16.msra.mxu0 %v19909_v24 }
 0xd03   : > { %18734 = vmatprep.subr.bf16.mxu0 %v26123_v1 }
 0xd06   : > { %18735 = vmatpush3.bf16.msra.mxu0 %v19910_v35 }
 0xd07   : > { %18736 = vmatprep.subr.bf16.mxu0 %v26123_v1 }
 0xd0a   : > { %18737 = vmatpush3.bf16.msra.mxu0 %v19911_v21 }
 0xd0b   : > { %18742 = vmatprep.subr.bf16.mxu0 %v26123_v1 }
 0xd0d   : > { %18739 = vmatmul.mubr.bf16.vlgmr.msra.gmra.mrb[116].mxu0 %v24065_v27  ;;  %v19916_v27 = vld [vmem:[%s25942_s7 + $0x1e0] sm:$0xff]  }
 0xd0e   : > { %18743 = vmatpush3.bf16.msra.mxu0 %v19912_v28  ;;  %18758 = vmatprep.mubr.msk.bf16.mxu0 %vm20472_vm6, %v26123_v1 }
 0xd0f   : > { %18744 = vmatprep.subr.bf16.mxu0 %v26123_v1 }
 0xd12   : > { %18745 = vmatpush3.bf16.msra.mxu0 %v19913_v8 }
 0xd13   : > { %18746 = vmatprep.subr.bf16.mxu0 %v26123_v1 }
 0xd16   : > { %18747 = vmatpush3.bf16.msra.mxu0 %v19914_v56 }
 0xd17   : > { %18748 = vmatprep.subr.bf16.mxu0 %v26123_v1 }
 0xd1a   : > { %18749 = vmatpush3.bf16.msra.mxu0 %v19915_v4 }
 0xd1b   : > { %18750 = vmatprep.subr.bf16.mxu0 %v26123_v1 }
 0xd1e   : > { %18751 = vmatpush3.bf16.msra.mxu0 %v19916_v27 }
 0xd1f   : > { %18752 = vmatprep.subr.bf16.mxu0 %v26123_v1 }
 0xd20   : > { %v9491_v31 = vpop.f32.mrb[92].mxu0 }
 0xd21   : > { %v18620_v38 = vpop.f32.mrb[93].mxu0 }
 0xd22   : > { %18753 = vmatpush3.bf16.msra.mxu0 %v19917_v37  ;;  %v9494_v41 = vpop.f32.mrb[94].mxu0 }
 0xd23   : > { %v18621_v36 = vpop.f32.mrb[95].mxu0  ;;  %18754 = vmatprep.subr.bf16.mxu0 %v26123_v1 }
 0xd26   : > { %18755 = vmatpush3.bf16.msra.mxu0 %v19918_v22  ;;  %v16020_v22 = vld [vmem:[#allocation6] ss:$0 sm:$0xff] }
 0xd27   : > { %18756 = vmatprep.subr.bf16.mxu0 %v26123_v1 }
 0xd2a   : > { %18757 = vmatpush3.bf16.msra.mxu0 %v19919_v0 }
 0xd2b   : > { %18762 = vmatprep.subr.bf16.mxu0 %v26123_v1 }
 0xd2d   : > { %18759 = vmatmul.mubr.bf16.vlgmr.msra.gmra.mrb[120].mxu0 %v24081_v45  ;;  %v19923_v45 = vld [vmem:[%s25942_s7 + $0x218] sm:$0xff]  }
 0xd2e   : > { %18763 = vmatpush3.bf16.msra.mxu0 %v19920_v5  ;;  %18778 = vmatprep.mubr.msk.bf16.mxu0 %vm20472_vm6, %v26123_v1 }
 0xd2f   : > { %18764 = vmatprep.subr.bf16.mxu0 %v26123_v1 }
 0xd32   : > { %18765 = vmatpush3.bf16.msra.mxu0 %v19921_v39 }
 0xd33   : > { %18766 = vmatprep.subr.bf16.mxu0 %v26123_v1 }
 0xd36   : > { %18767 = vmatpush3.bf16.msra.mxu0 %v19922_v15 }
 0xd37   : > { %18768 = vmatprep.subr.bf16.mxu0 %v26123_v1 }
 0xd3a   : > { %18769 = vmatpush3.bf16.msra.mxu0 %v19923_v45 }
 0xd3b   : > { %18770 = vmatprep.subr.bf16.mxu0 %v26123_v1 }
 0xd3e   : > { %18771 = vmatpush3.bf16.msra.mxu0 %v19924_v52 }
 0xd3f   : > { %18772 = vmatprep.subr.bf16.mxu0 %v26123_v1 }
 0xd40   : > { %v9580_v7 = vpop.f32.mrb[96].mxu0 }
 0xd41   : > { %v9581_v58 = vadd.f32 %v9580_v7, %v9491_v31  ;;  %v18640_v13 = vpop.f32.mrb[97].mxu0 }
 0xd42   : > { %v9583_v25 = vpop.f32.mrb[98].mxu0  ;;  %18773 = vmatpush3.bf16.msra.mxu0 %v19925_v16 }
 0xd43   : > { %v9584_v47 = vadd.f32 %v9583_v25, %v9494_v41  ;;  %v18641_v33 = vpop.f32.mrb[99].mxu0  ;;  %18774 = vmatprep.subr.bf16.mxu0 %v26123_v1  ;;  %v19930_v25 = vld [vmem:[%s25944_s9 + $0x40] sm:$0xff]  }
 0xd44   : > { %v19940_v33 = vld [vmem:[%s25944_s9 + $0x68] sm:$0xff]  }
 0xd46   : > { %18775 = vmatpush3.bf16.msra.mxu0 %v19926_v43  ;;  %v19932_v43 = vld [vmem:[%s25944_s9 + $0x48] sm:$0xff]  }
 0xd47   : > { %18776 = vmatprep.subr.bf16.mxu0 %v26123_v1 }
 0xd4a   : > { %18777 = vmatpush3.bf16.msra.mxu0 %v19927_v51  ;;  %v19941_v51 = vld [vmem:[%s25944_s9 + $0x38] sm:$0xff]  }
 0xd4d   : > { %18779 = vmatmul.mubr.bf16.vlgmr.msra.gmra.mrb[124].mxu0 %v24078_v18 }
 0xd4e   : > { %18784 = vmatprep.mubr.msk.bf16.mxu0 %vm9304_vm0, %v23997_v19  ;;  %v19928_v19 = vld [vmem:[%s25944_s9] sm:$0xff]  }
 0xd4f   : > { %18809 = vmatpush3.bf16.msra.mxu1 %v19928_v19 }
 0xd50   : > { %18810 = vmatprep.subr.bf16.mxu1 %v26123_v1 }
 0xd53   : > { %18811 = vmatpush3.bf16.msra.mxu1 %v19929_v32 }
 0xd54   : > { %18812 = vmatprep.subr.bf16.mxu1 %v26123_v1 }
 0xd57   : > { %18813 = vmatpush3.bf16.msra.mxu1 %v19931_v2 }
 0xd58   : > { %18814 = vmatprep.subr.bf16.mxu1 %v26123_v1 }
 0xd5b   : > { %18815 = vmatpush3.bf16.msra.mxu1 %v19933_v34 }
 0xd5c   : > { %18816 = vmatprep.subr.bf16.mxu1 %v26123_v1 }
 0xd5f   : > { %18817 = vmatpush3.bf16.msra.mxu1 %v19935_v49 }
 0xd60   : > { %v9689_v59 = vpop.f32.mrb[100].mxu0  ;;  %18818 = vmatprep.subr.bf16.mxu1 %v26123_v1 }
 0xd61   : > { %v9696_v12 = vadd.f32 %v9689_v59, %v9581_v58  ;;  %v18660_v42 = vpop.f32.mrb[101].mxu0  ;;  %v19942_v59 = vld [vmem:[%s25944_s9 + $0x70] sm:$0xff]  }
 0xd62   : > { %v9692_v6 = vpop.f32.mrb[102].mxu0 }
 0xd63   : > { %v9697_v57 = vadd.f32 %v9692_v6, %v9584_v47  ;;  %v18661_v9 = vpop.f32.mrb[103].mxu0  ;;  %18819 = vmatpush3.bf16.msra.mxu1 %v19937_v60  ;;  %v19938_v47 = vld [vmem:[%s25944_s9 + $0x60] sm:$0xff]  }
 0xd64   : > { %18820 = vmatprep.subr.bf16.mxu1 %v26123_v1 }
 0xd67   : > { %18821 = vmatpush3.bf16.msra.mxu1 %v19939_v54 }
 0xd68   : > { %18822 = vmatprep.subr.bf16.mxu1 %v26123_v1 }
 0xd6b   : > { %18823 = vmatpush3.bf16.msra.mxu1 %v19941_v51  ;;  %v19962_v51 = vld [vmem:[%s25944_s9 + $0x100] sm:$0xff]  }
 0xd6c   : > { %18848 = vmatprep.subr.bf16.mxu1 %v26123_v1 }
 0xd80   : > { %v9810_v40 = vpop.f32.mrb[104].mxu0 }
 0xd81   : > { %v9817_v10 = vadd.f32 %v9810_v40, %v9696_v12  ;;  %v18680_v48 = vpop.f32.mrb[105].mxu0  ;;  %v19944_v12 = vld [vmem:[%s25944_s9 + $0x78] sm:$0xff]  }
 0xd82   : > { %v9813_v17 = vpop.f32.mrb[106].mxu0 }
 0xd83   : > { %v9818_v20 = vadd.f32 %v9813_v17, %v9697_v57  ;;  %v18681_v44 = vpop.f32.mrb[107].mxu0 }
 0xda0   : > { %v9923_v53 = vpop.f32.mrb[108].mxu0 }
 0xda1   : > { %v9930_v63 = vadd.f32 %v9923_v53, %v9817_v10  ;;  %v18700_v14 = vpop.f32.mrb[109].mxu0  ;;  %v19943_v10 = vld [vmem:[%s25944_s9 + $0xc0] sm:$0xff]  }
 0xda2   : > { %v9926_v46 = vpop.f32.mrb[110].mxu0 }
 0xda3   : > { %v9931_v18 = vadd.f32 %v9926_v46, %v9818_v20  ;;  %v18701_v23 = vpop.f32.mrb[111].mxu0 }
 0xdc0   : > { %v10039_v29 = vpop.f32.mrb[112].mxu0 }
 0xdc1   : > { %v10046_v61 = vadd.f32 %v10039_v29, %v9930_v63  ;;  %v18720_v30 = vpop.f32.mrb[113].mxu0 }
 0xdc2   : > { %v10042_v3 = vpop.f32.mrb[114].mxu0  ;;  %v19946_v30 = vld [vmem:[%s25944_s9 + $0x80] sm:$0xff]  }
 0xdc3   : > { %v10047_v55 = vadd.f32 %v10042_v3, %v9931_v18  ;;  %v18721_v26 = vpop.f32.mrb[115].mxu0  ;;  %v19945_v18 = vld [vmem:[%s25944_s9 + $0xc8] sm:$0xff]  }
 0xde0   : > { %v10151_v62 = vpop.f32.mrb[116].mxu0 }
 0xde1   : > { %v10158_v24 = vadd.f32 %v10151_v62, %v10046_v61  ;;  %v18740_v35 = vpop.f32.mrb[117].mxu0 }
 0xde2   : > { %v10154_v21 = vpop.f32.mrb[118].mxu0 }
 0xde3   : > { %v10159_v28 = vadd.f32 %v10154_v21, %v10047_v55  ;;  %v18741_v8 = vpop.f32.mrb[119].mxu0  ;;  %v19947_v21 = vld [vmem:[%s25944_s9 + $0xd0] sm:$0xff]  }
 0xe00   : > { %v10267_v56 = vpop.f32.mrb[120].mxu0 }
 0xe01   : > { %v10274_v4 = vadd.f32 %v10267_v56, %v10158_v24  ;;  %v18760_v27 = vpop.f32.mrb[121].mxu0 }
 0xe02   : > { %v10270_v37 = vpop.f32.mrb[122].mxu0 }
 0xe03   : > { %v10275_v31 = vadd.f32 %v10270_v37, %v10159_v28  ;;  %v18761_v38 = vpop.f32.mrb[123].mxu0 }
 0xe20   : > { %v10379_v41 = vpop.f32.mrb[124].mxu0 }
 0xe21   : > { %v10386_v36 = vadd.f32 %v10379_v41, %v10274_v4  ;;  %v18780_v0 = vpop.f32.mrb[125].mxu0  ;;  %v19948_v41 = vld [vmem:[%s25944_s9 + $0x88] sm:$0xff]  }
 0xe22   : > { %v10382_v5 = vpop.f32.mrb[126].mxu0 }
 0xe23   : > { %v10395_v39 = vadd.f32 %v16020_v22, %v10386_v36  ;;  %v10387_v15 = vadd.f32 %v10382_v5, %v10275_v31  ;;  %v18781_v45 = vpop.f32.mrb[127].mxu0 }
 0xe24   : > { %v19950_v45 = vld [vmem:[%s25944_s9 + $0x90] sm:$0xff]  }
 0xe25   : > { %v10396_v52 = vadd.f32 %v16020_v22, %v10387_v15  ;;  %v10397_v16 = vmax.f32 %v10395_v39, 0.0  ;;  %v19949_v39 = vld [vmem:[%s25944_s9 + $0xd8] sm:$0xff]  }
 0xe27   : > { %v10398_v7 = vmax.f32 %v10396_v52, 0.0  ;;  %v19951_v52 = vld [vmem:[%s25944_s9 + $0xe0] sm:$0xff]  }
 0xe29   : > { %v10399_v58 = vpack.c.bf16 %v10398_v7, %v10397_v16  ;;  %v19952_v16 = vld [vmem:[%s25944_s9 + $0x98] sm:$0xff]   ;;  %v19953_v7 = vld [vmem:[%s25944_s9 + $0xe8] sm:$0xff]  }
 0xe2b   : > { %v10401_v13 = vand.u32 %v10399_v58, %v24004_v11  ;;  %v19934_v11 = vld [vmem:[%s25944_s9 + $0x50] sm:$0xff]   ;;  %v19954_v58 = vld [vmem:[%s25944_s9 + $0xa0] sm:$0xff]  }
 0xe2d   : > { %18782 = vmatprep.subr.bf16.mxu0 %v10401_v13 }
 0xe2e   : > { %18783 = vmatpush3.bf16.msra.mxu0 %v10401_v13  ;;  %v19955_v13 = vld [vmem:[%s25944_s9 + $0xf0] sm:$0xff]  }
 0xe2f   : > { %18788 = vmatprep.subr.bf16.mxu0 %v26123_v1 }
 0xe31   : > { %18785 = vmatmul.mubr.msk.bf16.vlgmr.msra.gmra.mrb[128].mxu0 %vm9304_vm0, %v24010_v50  ;;  %v19936_v50 = vld [vmem:[%s25944_s9 + $0x58] sm:$0xff]  }
 0xe32   : > { %18789 = vmatpush3.bf16.msra.mxu0 %v19930_v25  ;;  %18804 = vmatprep.mubr.msk.bf16.mxu0 %vm20472_vm6, %v26123_v1  ;;  %v19956_v25 = vld [vmem:[%s25944_s9 + $0xa8] sm:$0xff]  }
 0xe33   : > { %18790 = vmatprep.subr.bf16.mxu0 %v26123_v1 }
 0xe36   : > { %18791 = vmatpush3.bf16.msra.mxu0 %v19932_v43  ;;  %v19957_v43 = vld [vmem:[%s25944_s9 + $0xf8] sm:$0xff]  }
 0xe37   : > { %18792 = vmatprep.subr.bf16.mxu0 %v26123_v1 }
 0xe3a   : > { %18793 = vmatpush3.bf16.msra.mxu0 %v19934_v11  ;;  %v19958_v11 = vld [vmem:[%s25944_s9 + $0xb0] sm:$0xff]  }
 0xe3b   : > { %18794 = vmatprep.subr.bf16.mxu0 %v26123_v1 }
 0xe3e   : > { %18795 = vmatpush3.bf16.msra.mxu0 %v19936_v50  ;;  %v19959_v50 = vld [vmem:[%s25944_s9 + $0x140] sm:$0xff]  }
 0xe3f   : > { %18796 = vmatprep.subr.bf16.mxu0 %v26123_v1 }
 0xe42   : > { %18797 = vmatpush3.bf16.msra.mxu0 %v19938_v47  ;;  %v19960_v47 = vld [vmem:[%s25944_s9 + $0xb8] sm:$0xff]  }
 0xe43   : > { %18798 = vmatprep.subr.bf16.mxu0 %v26123_v1 }
 0xe46   : > { %18799 = vmatpush3.bf16.msra.mxu0 %v19940_v33  ;;  %v19961_v33 = vld [vmem:[%s25944_s9 + $0x148] sm:$0xff]  }
 0xe47   : > { %18800 = vmatprep.subr.bf16.mxu0 %v26123_v1 }
 0xe4a   : > { %18801 = vmatpush3.bf16.msra.mxu0 %v19942_v59 }
 0xe4b   : > { %18802 = vmatprep.subr.bf16.mxu0 %v26123_v1 }
 0xe4e   : > { %18803 = vmatpush3.bf16.msra.mxu0 %v19944_v12  ;;  %v19963_v12 = vld [vmem:[%s25944_s9 + $0x150] sm:$0xff]  }
 0xe4f   : > { %18828 = vmatprep.subr.bf16.mxu0 %v26123_v1 }
 0xf04   : > { %v18786_v42 = vpop.f32.mrb[128].mxu0 }
 0xf05   : > { %v10437_v6 = vpop.f32.mrb[129].mxu0 }
 0xf06   : > { %v18787_v57 = vpop.f32.mrb[130].mxu0 }
 0xf07   : > { %v10453_v9 = vpack.c.bf16 %v18787_v57, %v18786_v42  ;;  %v10440_v40 = vpop.f32.mrb[131].mxu0  ;;  %v19964_v42 = vld [vmem:[%s25944_s9 + $0x108] sm:$0xff]   ;;  %v19966_v57 = vld [vmem:[%s25944_s9 + $0x110] sm:$0xff]  }
 0xf08   : > { %v24428_v48 = vpack.c.bf16 %v10440_v40, %v10437_v6  ;;  %v19965_v6 = vld [vmem:[%s25944_s9 + $0x158] sm:$0xff]  }
 0xf09   : > { %v10805_v17 = vshrl.u32 %v10453_v9, 16  ;;  %v10808_v20 = vshll.u32 %v10453_v9, 16  ;;  %v10924_v44 = vrot.slane %v10453_v9, 3  ;;  %v11152_v46 = vrot.slane %v10453_v9, 5  ;;  %v19968_v40 = vld [vmem:[%s25944_s9 + $0x118] sm:$0xff]  }
 0xf0a   : > { %18825 = vmatmul.mubr.bf16.vlgmr.msra.gmra.mrb[88].mxu1 %v24428_v48  ;;  %v10488_v53 = vshrl.u32 %v24428_v48, 16  ;;  %v10490_v63 = vshll.u32 %v24428_v48, 16  ;;  %v10923_v14 = vrot.slane %v24428_v48, 3  ;;  %v11151_v4 = vrot.slane %v24428_v48, 5 }
 0xf0b   : > { %18849 = vmatpush3.bf16.msra.mxu1 %v19943_v10  ;;  %18864 = vmatprep.mubr.msk.bf16.mxu1 %vm20472_vm6, %v26123_v1  ;;  %v10807_v23 = vrot.slane %v10805_v17, 2  ;;  %v10810_v19 = vrot.slane %v10808_v20, 3  ;;  %v11038_v32 = vrot.slane %v10805_v17, 3  ;;  %v11039_v2 = vrot.slane %v10808_v20, 4  ;;  %v19969_v10 = vld [vmem:[%s25944_s9 + $0x168] sm:$0xff]  }
 0xf0c   : > { %18850 = vmatprep.subr.bf16.mxu1 %v26123_v1  ;;  %v10492_v34 = vrot.slane %v10490_v63, 1  ;;  %v10801_v49 = vrot.slane %v10488_v53, 2  ;;  %v10802_v29 = vrot.slane %v10490_v63, 3  ;;  %v11035_v61 = vrot.slane %v10488_v53, 3 }
 0xf0d   : > { %v10811_v3 = vor.u32 %v10810_v19, %v10807_v23  ;;  %v11036_v55 = vrot.slane %v10490_v63, 4  ;;  %v11040_v26 = vor.u32 %v11039_v2, %v11038_v32  ;;  %v24444_v60 = vsel %vm3024_vm4, %v10923_v14, %v10924_v44  ;;  %v19973_v44 = vld [vmem:[%s25944_s9 + $0x178] sm:$0xff]   ;;  %v19979_v23 = vld [vmem:[%s25944_s9 + $0x1d0] sm:$0xff]   ;;  %v19980_v19 = vld [vmem:[%s25944_s9 + $0x188] sm:$0xff]  }
 0xf0e   : > { %v10493_v54 = vor.u32 %v10492_v34, %v10488_v53  ;;  %v10803_v62 = vor.u32 %v10802_v29, %v10801_v49  ;;  %v11263_v24 = vrot.slane %v10488_v53, 5  ;;  %v11264_v35 = vrot.slane %v10490_v63, 6  ;;  %v19974_v53 = vld [vmem:[%s25944_s9 + $0x130] sm:$0xff]   ;;  %v19975_v63 = vld [vmem:[%s25944_s9 + $0x1c0] sm:$0xff]   ;;  %v19976_v14 = vld [vmem:[%s25944_s9 + $0x138] sm:$0xff]  }
 0xf0f   : > { %18851 = vmatpush3.bf16.msra.mxu1 %v19945_v18  ;;  %v11037_v28 = vor.u32 %v11036_v55, %v11035_v61  ;;  %v11266_v8 = vrot.slane %v10805_v17, 5  ;;  %v11267_v56 = vrot.slane %v10808_v20, 6  ;;  %v11379_v31 = vrot.slane %v24428_v48, 6  ;;  %v19971_v17 = vld [vmem:[%s25944_s9 + $0x170] sm:$0xff]   ;;  %v19972_v20 = vld [vmem:[%s25944_s9 + $0x128] sm:$0xff]   ;;  %v19978_v18 = vld [vmem:[%s25944_s9 + $0x180] sm:$0xff]  }
 0xf10   : > { %18805 = vmatmul.mubr.bf16.vlgmr.msra.gmra.mrb[132].mxu0 %v10493_v54  ;;  %18852 = vmatprep.subr.bf16.mxu1 %v26123_v1  ;;  %v10812_v27 = vsel %vm2916_vm5, %v10803_v62, %v10811_v3  ;;  %v11265_v37 = vor.u32 %v11264_v35, %v11263_v24  ;;  %v11380_v38 = vrot.slane %v10453_v9, 6  ;;  %v24462_v0 = vsel %vm5695_vm7, %v11151_v4, %v11152_v46  ;;  %v19967_v9 = vld [vmem:[%s25944_s9 + $0x160] sm:$0xff]   ;;  %v19977_v46 = vld [vmem:[%s25944_s9 + $0x1c8] sm:$0xff]   ;;  %v19981_v32 = vld [vmem:[%s25944_s9 + $0x1d8] sm:$0xff]  }
 0xf11   : > { %18829 = vmatpush3.bf16.msra.mxu0 %v19946_v30  ;;  %18844 = vmatprep.mubr.msk.bf16.mxu0 %vm20472_vm6, %v26123_v1  ;;  %v24459_v22 = vsel %vm6761_vm12, %v11037_v28, %v11040_v26  ;;  %v11268_v36 = vor.u32 %v11267_v56, %v11266_v8  ;;  %v10691_v59 = vrot.slane %v24428_v48, 1  ;;  %v19970_v48 = vld [vmem:[%s25944_s9 + $0x120] sm:$0xff]   ;;  %v19982_v2 = vld [vmem:[%s25944_s9 + $0x190] sm:$0xff]   ;;  %v19984_v49 = vld [vmem:[%s25944_s9 + $0x198] sm:$0xff]  }
 0xf12   : > { %18830 = vmatprep.subr.bf16.mxu0 %v26123_v1  ;;  %v24466_v5 = vsel %vm4424_vm13, %v11379_v31, %v11380_v38  ;;  %v19983_v34 = vld [vmem:[%s25944_s9 + $0x1e0] sm:$0xff]   ;;  %v19985_v29 = vld [vmem:[%s25944_s9 + $0x1e8] sm:$0xff]   ;;  %v19987_v30 = vld [vmem:[%s25944_s9 + $0x1f0] sm:$0xff]  }
 0xf13   : > { %18853 = vmatpush3.bf16.msra.mxu1 %v19947_v21  ;;  %v24472_v15 = vsel %vm5873_vm11, %v11265_v37, %v11268_v36  ;;  %v19986_v61 = vld [vmem:[%s25944_s9 + $0x1a0] sm:$0xff]   ;;  %v19988_v3 = vld [vmem:[%s25944_s9 + $0x1a8] sm:$0xff]   ;;  %v19989_v55 = vld [vmem:[%s25944_s9 + $0x1f8] sm:$0xff]  }
 0xf14   : > { %18854 = vmatprep.subr.bf16.mxu1 %v26123_v1  ;;  %v19990_v26 = vld [vmem:[%s25944_s9 + $0x1b0] sm:$0xff]   ;;  %v19992_v54 = vld [vmem:[%s25944_s9 + $0x200] sm:$0xff]   ;;  %v19993_v62 = vld [vmem:[%s25944_s9 + $0x208] sm:$0xff]  }
 0xf15   : > { %18831 = vmatpush3.bf16.msra.mxu0 %v19948_v41  ;;  %v19994_v24 = vld [vmem:[%s25944_s9 + $0x210] sm:$0xff]   ;;  %v19995_v35 = vld [vmem:[%s25944_s9 + $0x218] sm:$0xff]   ;;  %v19996_v21 = vld [vmem:[%s25944_s9 + $0x220] sm:$0xff]  }
 0xf16   : > { %18832 = vmatprep.subr.bf16.mxu0 %v26123_v1  ;;  %v19997_v28 = vld [vmem:[%s25944_s9 + $0x228] sm:$0xff]   ;;  %v19998_v8 = vld [vmem:[%s25944_s9 + $0x230] sm:$0xff]   ;;  %v19999_v56 = vld [vmem:[%s25944_s9 + $0x238] sm:$0xff]  }
 0xf17   : > { %18855 = vmatpush3.bf16.msra.mxu1 %v19949_v39  ;;  %v20000_v4 = vld [vmem:[#allocation10] ss:$16 sps:$4 sm:$0xff]   ;;  %v20003_v37 = vld [vmem:[#allocation10 + $0x8] ss:$16 sps:$4 sm:$0xff]   ;;  %v20005_v31 = vld [vmem:[#allocation10 + $0xc] ss:$16 sps:$4 sm:$0xff]  }
 0xf18   : > { %18856 = vmatprep.subr.bf16.mxu1 %v26123_v1 }
 0xf19   : > { %18833 = vmatpush3.bf16.msra.mxu0 %v19950_v45 }
 0xf1a   : > { %18834 = vmatprep.subr.bf16.mxu0 %v26123_v1 }
 0xf1b   : > { %18857 = vmatpush3.bf16.msra.mxu1 %v19951_v52  ;;  %v20006_v52 = vld [vmem:[#allocation10 + $0x20] ss:$16 sps:$4 sm:$0xff]  }
 0xf1c   : > { %18858 = vmatprep.subr.bf16.mxu1 %v26123_v1 }
 0xf1d   : > { %18835 = vmatpush3.bf16.msra.mxu0 %v19952_v16  ;;  %v20008_v16 = vld [vmem:[#allocation10 + $0x24] ss:$16 sps:$4 sm:$0xff]  }
 0xf1e   : > { %18836 = vmatprep.subr.bf16.mxu0 %v26123_v1 }
 0xf1f   : > { %18859 = vmatpush3.bf16.msra.mxu1 %v19953_v7  ;;  %v20009_v7 = vld [vmem:[#allocation10 + $0x28] ss:$16 sps:$4 sm:$0xff]  }
 0xf20   : > { %18860 = vmatprep.subr.bf16.mxu1 %v26123_v1 }
 0xf21   : > { %18837 = vmatpush3.bf16.msra.mxu0 %v19954_v58  ;;  %v20011_v58 = vld [vmem:[#allocation10 + $0x2c] ss:$16 sps:$4 sm:$0xff]  }
 0xf22   : > { %18838 = vmatprep.subr.bf16.mxu0 %v26123_v1 }
 0xf23   : > { %18861 = vmatpush3.bf16.msra.mxu1 %v19955_v13  ;;  %v20012_v13 = vld [vmem:[#allocation10 + $0x40] ss:$16 sps:$4 sm:$0xff]  }
 0xf24   : > { %18862 = vmatprep.subr.bf16.mxu1 %v26123_v1 }
 0xf25   : > { %18839 = vmatpush3.bf16.msra.mxu0 %v19956_v25  ;;  %v20014_v25 = vld [vmem:[#allocation10 + $0x44] ss:$16 sps:$4 sm:$0xff]  }
 0xf26   : > { %18840 = vmatprep.subr.bf16.mxu0 %v26123_v1 }
 0xf27   : > { %18863 = vmatpush3.bf16.msra.mxu1 %v19957_v43  ;;  %v20015_v43 = vld [vmem:[#allocation10 + $0x48] ss:$16 sps:$4 sm:$0xff]  }
 0xf28   : > { %18888 = vmatprep.subr.bf16.mxu1 %v26123_v1 }
 0xf29   : > { %18841 = vmatpush3.bf16.msra.mxu0 %v19958_v11  ;;  %v20017_v11 = vld [vmem:[#allocation10 + $0x4c] ss:$16 sps:$4 sm:$0xff]  }
 0xf2a   : > { %18865 = vmatmul.mubr.bf16.vlgmr.msra.gmra.mrb[92].mxu1 %v10812_v27  ;;  %18842 = vmatprep.subr.bf16.mxu0 %v26123_v1  ;;  %v20002_v27 = vld [vmem:[#allocation10 + $0x4] ss:$16 sps:$4 sm:$0xff]  }
 0xf2b   : > { %18889 = vmatpush3.bf16.msra.mxu1 %v19959_v50  ;;  %18904 = vmatprep.mubr.msk.bf16.mxu1 %vm20472_vm6, %v26123_v1  ;;  %v20020_v50 = vld [vmem:[#allocation10 + $0x64] ss:$16 sps:$4 sm:$0xff]  }
 0xf2c   : > { %18890 = vmatprep.subr.bf16.mxu1 %v26123_v1 }
 0xf2d   : > { %18843 = vmatpush3.bf16.msra.mxu0 %v19960_v47  ;;  %v20023_v47 = vld [vmem:[#allocation10 + $0x6c] ss:$16 sps:$4 sm:$0xff]  }
 0xf2e   : > { %18868 = vmatprep.subr.bf16.mxu0 %v26123_v1 }
 0xf2f   : > { %18891 = vmatpush3.bf16.msra.mxu1 %v19961_v33  ;;  %v20018_v33 = vld [vmem:[#allocation10 + $0x60] ss:$16 sps:$4 sm:$0xff]  }
 0xf30   : > { %18845 = vmatmul.mubr.bf16.vlgmr.msra.gmra.mrb[136].mxu0 %v10691_v59  ;;  %18892 = vmatprep.subr.bf16.mxu1 %v26123_v1  ;;  %v20026_v59 = vld [vmem:[#allocation10 + $0x84] ss:$16 sps:$4 sm:$0xff]  }
 0xf31   : > { %18869 = vmatpush3.bf16.msra.mxu0 %v19962_v51  ;;  %18884 = vmatprep.mubr.msk.bf16.mxu0 %vm20472_vm6, %v26123_v1  ;;  %v20021_v51 = vld [vmem:[#allocation10 + $0x68] ss:$16 sps:$4 sm:$0xff]  }
 0xf32   : > { %18870 = vmatprep.subr.bf16.mxu0 %v26123_v1 }
 0xf33   : > { %18893 = vmatpush3.bf16.msra.mxu1 %v19963_v12  ;;  %v20029_v12 = vld [vmem:[#allocation10 + $0x8c] ss:$16 sps:$4 sm:$0xff]  }
 0xf34   : > { %18894 = vmatprep.subr.bf16.mxu1 %v26123_v1 }
 0xf35   : > { %18871 = vmatpush3.bf16.msra.mxu0 %v19964_v42  ;;  %v20024_v42 = vld [vmem:[#allocation10 + $0x80] ss:$16 sps:$4 sm:$0xff]  }
 0xf36   : > { %18872 = vmatprep.subr.bf16.mxu0 %v26123_v1 }
 0xf37   : > { %18895 = vmatpush3.bf16.msra.mxu1 %v19965_v6  ;;  %v20027_v6 = vld [vmem:[#allocation10 + $0x88] ss:$16 sps:$4 sm:$0xff]  }
 0xf38   : > { %18896 = vmatprep.subr.bf16.mxu1 %v26123_v1 }
 0xf39   : > { %18873 = vmatpush3.bf16.msra.mxu0 %v19966_v57  ;;  %v20032_v57 = vld [vmem:[#allocation10 + $0xa4] ss:$16 sps:$4 sm:$0xff]  }
 0xf3a   : > { %18874 = vmatprep.subr.bf16.mxu0 %v26123_v1 }
 0xf3b   : > { %18897 = vmatpush3.bf16.msra.mxu1 %v19967_v9  ;;  %v20035_v9 = vld [vmem:[#allocation10 + $0xac] ss:$16 sps:$4 sm:$0xff]  }
 0xf3c   : > { %18898 = vmatprep.subr.bf16.mxu1 %v26123_v1 }
 0xf3d   : > { %18875 = vmatpush3.bf16.msra.mxu0 %v19968_v40  ;;  %v20474_v40 = vmov 0  }
 0xf3e   : > { %18876 = vmatprep.subr.bf16.mxu0 %v26123_v1 }
 0xf3f   : > { %18899 = vmatpush3.bf16.msra.mxu1 %v19969_v10  ;;  %v20030_v10 = vld [vmem:[#allocation10 + $0xa0] ss:$16 sps:$4 sm:$0xff]  }
 0xf40   : > { %18900 = vmatprep.subr.bf16.mxu1 %v26123_v1 }
 0xf41   : > { %18877 = vmatpush3.bf16.msra.mxu0 %v19970_v48  ;;  %v20033_v48 = vld [vmem:[#allocation10 + $0xa8] ss:$16 sps:$4 sm:$0xff]  }
 0xf42   : > { %18878 = vmatprep.subr.bf16.mxu0 %v26123_v1 }
 0xf43   : > { %18901 = vmatpush3.bf16.msra.mxu1 %v19971_v17  ;;  %v20038_v17 = vld [vmem:[#allocation10 + $0xc4] ss:$16 sps:$4 sm:$0xff]  }
 0xf44   : > { %18902 = vmatprep.subr.bf16.mxu1 %v26123_v1 }
 0xf45   : > { %18879 = vmatpush3.bf16.msra.mxu0 %v19972_v20  ;;  %v20041_v20 = vld [vmem:[#allocation10 + $0xcc] ss:$16 sps:$4 sm:$0xff]  }
 0xf46   : > { %18880 = vmatprep.subr.bf16.mxu0 %v26123_v1 }
 0xf47   : > { %18903 = vmatpush3.bf16.msra.mxu1 %v19973_v44  ;;  %v20036_v44 = vld [vmem:[#allocation10 + $0xc0] ss:$16 sps:$4 sm:$0xff]  }
 0xf48   : > { %18928 = vmatprep.subr.bf16.mxu1 %v26123_v1 }
 0xf49   : > { %18881 = vmatpush3.bf16.msra.mxu0 %v19974_v53  ;;  %v20039_v53 = vld [vmem:[#allocation10 + $0xc8] ss:$16 sps:$4 sm:$0xff]  }
 0xf4a   : > { %18905 = vmatmul.mubr.bf16.vlgmr.msra.gmra.mrb[96].mxu1 %v24459_v22  ;;  %18882 = vmatprep.subr.bf16.mxu0 %v26123_v1 }
 0xf4b   : > { %18929 = vmatpush3.bf16.msra.mxu1 %v19975_v63  ;;  %18944 = vmatprep.mubr.msk.bf16.mxu1 %vm20472_vm6, %v26123_v1  ;;  %v20044_v63 = vld [vmem:[#allocation10 + $0xe4] ss:$16 sps:$4 sm:$0xff]  }
 0xf4c   : > { %18930 = vmatprep.subr.bf16.mxu1 %v26123_v1 }
 0xf4d   : > { %18883 = vmatpush3.bf16.msra.mxu0 %v19976_v14 }
 0xf4e   : > { %18908 = vmatprep.subr.bf16.mxu0 %v26123_v1 }
 0xf4f   : > { %18931 = vmatpush3.bf16.msra.mxu1 %v19977_v46  ;;  %v20047_v46 = vld [vmem:[#allocation10 + $0xec] ss:$16 sps:$4 sm:$0xff]  }
 0xf50   : > { %18885 = vmatmul.mubr.bf16.vlgmr.msra.gmra.mrb[140].mxu0 %v24444_v60  ;;  %18932 = vmatprep.subr.bf16.mxu1 %v26123_v1  ;;  %v19991_v60 = vld [vmem:[%s25944_s9 + $0x1b8] sm:$0xff]  }
 0xf51   : > { %18909 = vmatpush3.bf16.msra.mxu0 %v19978_v18  ;;  %18924 = vmatprep.mubr.msk.bf16.mxu0 %vm20472_vm6, %v26123_v1 }
 0xf52   : > { %18910 = vmatprep.subr.bf16.mxu0 %v26123_v1 }
 0xf53   : > { %18933 = vmatpush3.bf16.msra.mxu1 %v19979_v23 }
 0xf54   : > { %18934 = vmatprep.subr.bf16.mxu1 %v26123_v1 }
 0xf55   : > { %18911 = vmatpush3.bf16.msra.mxu0 %v19980_v19  ;;  %v20042_v19 = vld [vmem:[#allocation10 + $0xe0] ss:$16 sps:$4 sm:$0xff]  }
 0xf56   : > { %18912 = vmatprep.subr.bf16.mxu0 %v26123_v1 }
 0xf57   : > { %18935 = vmatpush3.bf16.msra.mxu1 %v19981_v32 }
 0xf58   : > { %18936 = vmatprep.subr.bf16.mxu1 %v26123_v1 }
 0xf59   : > { %18913 = vmatpush3.bf16.msra.mxu0 %v19982_v2  ;;  %v20045_v2 = vld [vmem:[#allocation10 + $0xe8] ss:$16 sps:$4 sm:$0xff]  }
 0xf5a   : > { %18914 = vmatprep.subr.bf16.mxu0 %v26123_v1 }
 0xf5b   : > { %18937 = vmatpush3.bf16.msra.mxu1 %v19983_v34  ;;  %v20050_v34 = vld [vmem:[%s25951_s16 + $0x4] ss:$16 sps:$4 sm:$0xff]  }
 0xf5c   : > { %18938 = vmatprep.subr.bf16.mxu1 %v26123_v1 }
 0xf5d   : > { %18915 = vmatpush3.bf16.msra.mxu0 %v19984_v49  ;;  %v20053_v49 = vld [vmem:[%s25951_s16 + $0xc] ss:$16 sps:$4 sm:$0xff]  }
 0xf5e   : > { %18916 = vmatprep.subr.bf16.mxu0 %v26123_v1 }
 0xf5f   : > { %18939 = vmatpush3.bf16.msra.mxu1 %v19985_v29 }
 0xf60   : > { %18940 = vmatprep.subr.bf16.mxu1 %v26123_v1 }
 0xf61   : > { %18917 = vmatpush3.bf16.msra.mxu0 %v19986_v61 }
 0xf62   : > { %18918 = vmatprep.subr.bf16.mxu0 %v26123_v1 }
 0xf63   : > { %18941 = vmatpush3.bf16.msra.mxu1 %v19987_v30 }
 0xf64   : > { %18942 = vmatprep.subr.bf16.mxu1 %v26123_v1 }
 0xf65   : > { %18919 = vmatpush3.bf16.msra.mxu0 %v19988_v3 }
 0xf66   : > { %18920 = vmatprep.subr.bf16.mxu0 %v26123_v1 }
 0xf67   : > { %18943 = vmatpush3.bf16.msra.mxu1 %v19989_v55 }
 0xf68   : > { %11727 = vmatprep.subr.bf16.mxu1 %v20002_v27 }
 0xf69   : > { %18921 = vmatpush3.bf16.msra.mxu0 %v19990_v26 }
 0xf6a   : > { %18945 = vmatmul.mubr.bf16.vlgmr.msra.gmra.mrb[100].mxu1 %v24472_v15  ;;  %18922 = vmatprep.subr.bf16.mxu0 %v26123_v1 }
 0xf6b   : > { %11728 = vmatpush1.bf16.msra.mxu1 %v20000_v4  ;;  %11759 = vmatprep.mubr.bf16.mxu1 %v20474_v40 }
 0xf6c   : > { %11729 = vmatprep.subr.bf16.mxu1 %v20008_v16 }
 0xf6d   : > { %18923 = vmatpush3.bf16.msra.mxu0 %v19991_v60 }
 0xf6e   : > { %18948 = vmatprep.subr.bf16.mxu0 %v26123_v1 }
 0xf6f   : > { %11730 = vmatpush1.bf16.msra.mxu1 %v20006_v52 }
 0xf70   : > { %18925 = vmatmul.mubr.bf16.vlgmr.msra.gmra.mrb[144].mxu0 %v24462_v0  ;;  %11731 = vmatprep.subr.bf16.mxu1 %v20014_v25 }
 0xf71   : > { %18949 = vmatpush3.bf16.msra.mxu0 %v19992_v54  ;;  %18964 = vmatprep.mubr.msk.bf16.mxu0 %vm20472_vm6, %v26123_v1 }
 0xf72   : > { %18950 = vmatprep.subr.bf16.mxu0 %v26123_v1 }
 0xf73   : > { %11732 = vmatpush1.bf16.msra.mxu1 %v20012_v13  ;;  %v16223_v13 = vld [vmem:[#allocation7] ss:$0 sm:$0xff] }
 0xf74   : > { %11733 = vmatprep.subr.bf16.mxu1 %v20020_v50 }
 0xf75   : > { %18951 = vmatpush3.bf16.msra.mxu0 %v19993_v62 }
 0xf76   : > { %18952 = vmatprep.subr.bf16.mxu0 %v26123_v1 }
 0xf77   : > { %11734 = vmatpush1.bf16.msra.mxu1 %v20018_v33 }
 0xf78   : > { %11735 = vmatprep.subr.bf16.mxu1 %v20026_v59 }
 0xf79   : > { %18953 = vmatpush3.bf16.msra.mxu0 %v19994_v24 }
 0xf7a   : > { %18954 = vmatprep.subr.bf16.mxu0 %v26123_v1 }
 0xf7b   : > { %11736 = vmatpush1.bf16.msra.mxu1 %v20024_v42 }
 0xf7c   : > { %11737 = vmatprep.subr.bf16.mxu1 %v20032_v57 }
 0xf7d   : > { %18955 = vmatpush3.bf16.msra.mxu0 %v19995_v35 }
 0xf7e   : > { %18956 = vmatprep.subr.bf16.mxu0 %v26123_v1 }
 0xf7f   : > { %11738 = vmatpush1.bf16.msra.mxu1 %v20030_v10 }
 0xf80   : > { %11739 = vmatprep.subr.bf16.mxu1 %v20038_v17 }
 0xf81   : > { %18957 = vmatpush3.bf16.msra.mxu0 %v19996_v21 }
 0xf82   : > { %18958 = vmatprep.subr.bf16.mxu0 %v26123_v1 }
 0xf83   : > { %11740 = vmatpush1.bf16.msra.mxu1 %v20036_v44 }
 0xf84   : > { %11741 = vmatprep.subr.bf16.mxu1 %v20044_v63 }
 0xf85   : > { %18959 = vmatpush3.bf16.msra.mxu0 %v19997_v28 }
 0xf86   : > { %18960 = vmatprep.subr.bf16.mxu0 %v26123_v1 }
 0xf87   : > { %11742 = vmatpush1.bf16.msra.mxu1 %v20042_v19  ;;  %v20048_v19 = vld [vmem:[%s25951_s16] ss:$16 sps:$4 sm:$0xff]  }
 0xf88   : > { %12607 = vmatprep.subr.bf16.mxu1 %v20050_v34  ;;  %v20056_v34 = vld [vmem:[%s25951_s16 + $0x24] ss:$16 sps:$4 sm:$0xff]  }
 0xf89   : > { %18961 = vmatpush3.bf16.msra.mxu0 %v19998_v8 }
 0xf8a   : > { %18962 = vmatprep.subr.bf16.mxu0 %v26123_v1 }
 0xf8d   : > { %18963 = vmatpush3.bf16.msra.mxu0 %v19999_v56 }
 0xf8e   : > { %11768 = vmatprep.subr.bf16.mxu0 %v20005_v31 }
 0xf90   : > { %18965 = vmatmul.mubr.bf16.vlgmr.msra.gmra.mrb[148].mxu0 %v24466_v5 }
 0xf91   : > { %11769 = vmatpush1.bf16.msra.mxu0 %v20003_v37  ;;  %11800 = vmatprep.mubr.bf16.mxu0 %v20474_v40 }
 0xf92   : > { %11770 = vmatprep.subr.bf16.mxu0 %v20011_v58 }
 0xf95   : > { %11771 = vmatpush1.bf16.msra.mxu0 %v20009_v7 }
 0xf96   : > { %11772 = vmatprep.subr.bf16.mxu0 %v20017_v11 }
 0xf99   : > { %11773 = vmatpush1.bf16.msra.mxu0 %v20015_v43 }
 0xf9a   : > { %11774 = vmatprep.subr.bf16.mxu0 %v20023_v47 }
 0xf9d   : > { %11775 = vmatpush1.bf16.msra.mxu0 %v20021_v51 }
 0xf9e   : > { %11776 = vmatprep.subr.bf16.mxu0 %v20029_v12 }
 0xfa1   : > { %11777 = vmatpush1.bf16.msra.mxu0 %v20027_v6 }
 0xfa2   : > { %11778 = vmatprep.subr.bf16.mxu0 %v20035_v9 }
 0xfa5   : > { %11779 = vmatpush1.bf16.msra.mxu0 %v20033_v48 }
 0xfa6   : > { %11780 = vmatprep.subr.bf16.mxu0 %v20041_v20 }
 0xfa9   : > { %11781 = vmatpush1.bf16.msra.mxu0 %v20039_v53 }
 0xfaa   : > { %11782 = vmatprep.subr.bf16.mxu0 %v20047_v46 }
 0xfad   : > { %11783 = vmatpush1.bf16.msra.mxu0 %v20045_v2 }
 0xfae   : > { %12689 = vmatprep.subr.bf16.mxu0 %v20053_v49  ;;  %v20059_v49 = vld [vmem:[%s25951_s16 + $0x2c] ss:$16 sps:$4 sm:$0xff]  }
 0xfdd   : > { %v10666_v38 = vpop.f32.mrb[88].mxu1 }
 0xfde   : > { %v18826_v41 = vpop.f32.mrb[89].mxu1 }
 0xfdf   : > { %v10669_v22 = vpop.f32.mrb[90].mxu1 }
 0xfe0   : > { %v18827_v36 = vpop.f32.mrb[91].mxu1 }
 0xfe3   : > { %v10577_v0 = vpop.f32.mrb[132].mxu0 }
 0xfe4   : > { %v24691_v39 = vadd.f32 %v10666_v38, %v10577_v0  ;;  %v18806_v15 = vpop.f32.mrb[133].mxu0 }
 0xfe5   : > { %v10580_v1 = vpop.f32.mrb[134].mxu0 }
 0xfe6   : > { %v24693_v45 = vadd.f32 %v10669_v22, %v10580_v1  ;;  %v18807_v5 = vpop.f32.mrb[135].mxu0 }
 0xffd   : > { %v10896_v14 = vpop.f32.mrb[92].mxu1 }
 0xffe   : > { %v18866_v18 = vpop.f32.mrb[93].mxu1 }
 0xfff   : > { %v10899_v23 = vpop.f32.mrb[94].mxu1 }
0x1000   : > { %v18867_v32 = vpop.f32.mrb[95].mxu1 }
0x1001   : > { %v20051_v32 = vld [vmem:[%s25951_s16 + $0x8] ss:$16 sps:$4 sm:$0xff]  }
0x1003   : > { %v10775_v29 = vpop.f32.mrb[136].mxu0 }
0x1004   : > { %v10782_v61 = vadd.f32 %v10775_v29, %v24691_v39  ;;  %v18846_v30 = vpop.f32.mrb[137].mxu0  ;;  %v20054_v29 = vld [vmem:[%s25951_s16 + $0x20] ss:$16 sps:$4 sm:$0xff]  }
0x1005   : > { %v10778_v3 = vpop.f32.mrb[138].mxu0  ;;  %v20062_v30 = vld [vmem:[%s25951_s16 + $0x44] ss:$16 sps:$4 sm:$0xff]  }
0x1006   : > { %v10783_v55 = vadd.f32 %v10778_v3, %v24693_v45  ;;  %v18847_v26 = vpop.f32.mrb[139].mxu0  ;;  %v10903_v60 = vadd.f32 %v10896_v14, %v10782_v61  ;;  %v20057_v61 = vld [vmem:[%s25951_s16 + $0x28] ss:$16 sps:$4 sm:$0xff]   ;;  %v20065_v3 = vld [vmem:[%s25951_s16 + $0x4c] ss:$16 sps:$4 sm:$0xff]  }
0x1007   : > { %v20063_v26 = vld [vmem:[%s25951_s16 + $0x48] ss:$16 sps:$4 sm:$0xff]  }
0x1008   : > { %v10904_v54 = vadd.f32 %v10899_v23, %v10783_v55  ;;  %v20060_v55 = vld [vmem:[%s25951_s16 + $0x40] ss:$16 sps:$4 sm:$0xff]  }
0x101d   : > { %v11125_v62 = vpop.f32.mrb[96].mxu1 }
0x101e   : > { %v18906_v24 = vpop.f32.mrb[97].mxu1 }
0x101f   : > { %v11128_v35 = vpop.f32.mrb[98].mxu1  ;;  %v20069_v24 = vld [vmem:[%s25951_s16 + $0x68] ss:$16 sps:$4 sm:$0xff]  }
0x1020   : > { %v18907_v21 = vpop.f32.mrb[99].mxu1 }
0x1021   : > { %v20077_v21 = vld [vmem:[%s25951_s16 + $0x8c] ss:$16 sps:$4 sm:$0xff]  }
0x1023   : > { %v11009_v28 = vpop.f32.mrb[140].mxu0 }
0x1024   : > { %v11016_v8 = vadd.f32 %v11009_v28, %v10903_v60  ;;  %v18886_v56 = vpop.f32.mrb[141].mxu0  ;;  %v20068_v60 = vld [vmem:[%s25951_s16 + $0x64] ss:$16 sps:$4 sm:$0xff]   ;;  %v20072_v28 = vld [vmem:[%s25951_s16 + $0x80] ss:$16 sps:$4 sm:$0xff]  }
0x1025   : > { %v11012_v4 = vpop.f32.mrb[142].mxu0  ;;  %v20080_v56 = vld [vmem:[%s25951_s16 + $0xa4] ss:$16 sps:$4 sm:$0xff]  }
0x1026   : > { %v11017_v27 = vadd.f32 %v11012_v4, %v10904_v54  ;;  %v18887_v37 = vpop.f32.mrb[143].mxu0  ;;  %v11132_v31 = vadd.f32 %v11125_v62, %v11016_v8  ;;  %v20071_v54 = vld [vmem:[%s25951_s16 + $0x6c] ss:$16 sps:$4 sm:$0xff]   ;;  %v20066_v62 = vld [vmem:[%s25951_s16 + $0x60] ss:$16 sps:$4 sm:$0xff]  }
0x1027   : > { %v20075_v8 = vld [vmem:[%s25951_s16 + $0x88] ss:$16 sps:$4 sm:$0xff]   ;;  %v20083_v4 = vld [vmem:[%s25951_s16 + $0xac] ss:$16 sps:$4 sm:$0xff]  }
0x1028   : > { %v11133_v38 = vadd.f32 %v11128_v35, %v11017_v27  ;;  %v20074_v35 = vld [vmem:[%s25951_s16 + $0x84] ss:$16 sps:$4 sm:$0xff]   ;;  %v20078_v27 = vld [vmem:[%s25951_s16 + $0xa0] ss:$16 sps:$4 sm:$0xff]   ;;  %v20081_v37 = vld [vmem:[%s25951_s16 + $0xa8] ss:$16 sps:$4 sm:$0xff]  }
0x103d   : > { %v11353_v41 = vpop.f32.mrb[100].mxu1 }
0x103e   : > { %v18946_v22 = vpop.f32.mrb[101].mxu1 }
0x103f   : > { %v11356_v36 = vpop.f32.mrb[102].mxu1  ;;  %v20087_v22 = vld [vmem:[%s25951_s16 + $0xc8] ss:$16 sps:$4 sm:$0xff]  }
0x1040   : > { %v18947_v0 = vpop.f32.mrb[103].mxu1 }
0x1041   : > { %v20095_v0 = vld [vmem:[%s25951_s16 + $0xec] ss:$16 sps:$4 sm:$0xff]  }
0x1043   : > { %v11237_v39 = vpop.f32.mrb[144].mxu0 }
0x1044   : > { %v11244_v15 = vadd.f32 %v11237_v39, %v11132_v31  ;;  %v18926_v1 = vpop.f32.mrb[145].mxu0  ;;  %v20086_v31 = vld [vmem:[%s25951_s16 + $0xc4] ss:$16 sps:$4 sm:$0xff]   ;;  %v20090_v39 = vld [vmem:[%s25951_s16 + $0xe0] ss:$16 sps:$4 sm:$0xff]  }
0x1045   : > { %v11240_v45 = vpop.f32.mrb[146].mxu0  ;;  %v20098_v1 = vld [vmem:[%s25951_s16 + $0x104] ss:$16 sps:$4 sm:$0xff]  }
0x1046   : > { %v11245_v5 = vadd.f32 %v11240_v45, %v11133_v38  ;;  %v18927_v52 = vpop.f32.mrb[147].mxu0  ;;  %v11360_v16 = vadd.f32 %v11353_v41, %v11244_v15  ;;  %v20089_v38 = vld [vmem:[%s25951_s16 + $0xcc] ss:$16 sps:$4 sm:$0xff]   ;;  %v20084_v41 = vld [vmem:[%s25951_s16 + $0xc0] ss:$16 sps:$4 sm:$0xff]  }
0x1047   : > { %v20093_v15 = vld [vmem:[%s25951_s16 + $0xe8] ss:$16 sps:$4 sm:$0xff]   ;;  %v20101_v45 = vld [vmem:[%s25951_s16 + $0x10c] ss:$16 sps:$4 sm:$0xff]  }
0x1048   : > { %v11361_v7 = vadd.f32 %v11356_v36, %v11245_v5  ;;  %v20092_v36 = vld [vmem:[%s25951_s16 + $0xe4] ss:$16 sps:$4 sm:$0xff]   ;;  %v20096_v5 = vld [vmem:[%s25951_s16 + $0x100] ss:$16 sps:$4 sm:$0xff]   ;;  %v20099_v52 = vld [vmem:[%s25951_s16 + $0x108] ss:$16 sps:$4 sm:$0xff]  }
0x1063   : > { %v11465_v58 = vpop.f32.mrb[148].mxu0 }
0x1064   : > { %v11472_v25 = vadd.f32 %v11465_v58, %v11360_v16  ;;  %v18966_v43 = vpop.f32.mrb[149].mxu0  ;;  %v20104_v16 = vld [vmem:[%s25951_s16 + $0x124] ss:$16 sps:$4 sm:$0xff]   ;;  %v20102_v58 = vld [vmem:[%s25951_s16 + $0x120] ss:$16 sps:$4 sm:$0xff]  }
0x1065   : > { %v11468_v11 = vpop.f32.mrb[150].mxu0  ;;  %v20113_v43 = vld [vmem:[%s25951_s16 + $0x14c] ss:$16 sps:$4 sm:$0xff]  }
0x1066   : > { %v11481_v50 = vadd.f32 %v16223_v13, %v11472_v25  ;;  %v11473_v47 = vadd.f32 %v11468_v11, %v11361_v7  ;;  %v18967_v33 = vpop.f32.mrb[151].mxu0  ;;  %v20107_v7 = vld [vmem:[%s25951_s16 + $0x12c] ss:$16 sps:$4 sm:$0xff]   ;;  %v20110_v25 = vld [vmem:[%s25951_s16 + $0x144] ss:$16 sps:$4 sm:$0xff]  }
0x1067   : > { %v20108_v11 = vld [vmem:[%s25951_s16 + $0x140] ss:$16 sps:$4 sm:$0xff]   ;;  %v20119_v33 = vld [vmem:[%s25951_s16 + $0x16c] ss:$16 sps:$4 sm:$0xff]  }
0x1068   : > { %v11482_v51 = vadd.f32 %v16223_v13, %v11473_v47  ;;  %v11483_v59 = vmax.f32 %v11481_v50, 0.0  ;;  %v20105_v13 = vld [vmem:[%s25951_s16 + $0x128] ss:$16 sps:$4 sm:$0xff]   ;;  %v20116_v47 = vld [vmem:[%s25951_s16 + $0x164] ss:$16 sps:$4 sm:$0xff]  }
0x1069   : > { %v20111_v50 = vld [vmem:[%s25951_s16 + $0x148] ss:$16 sps:$4 sm:$0xff]  }
0x106a   : > { %v11484_v12 = vmax.f32 %v11482_v51, 0.0  ;;  %v20114_v51 = vld [vmem:[%s25951_s16 + $0x160] ss:$16 sps:$4 sm:$0xff]  }
0x106c   : > { %v11485_v42 = vpack.c.bf16 %v11484_v12, %v11483_v59  ;;  %v20117_v59 = vld [vmem:[%s25951_s16 + $0x168] ss:$16 sps:$4 sm:$0xff]   ;;  %v20122_v12 = vld [vmem:[%s25951_s16 + $0x184] ss:$16 sps:$4 sm:$0xff]  }
0x106e   : > { %v11487_v6 = vshrl.u32 %v11485_v42, 16  ;;  %v11492_v9 = vrot.slane %v11485_v42, 1  ;;  %v11498_v17 = vrot.slane %v11485_v42, 3  ;;  %v11504_v63 = vrot.slane %v11485_v42, 5 }
0x106f   : > { %v11510_v23 = vrot.slane %v11485_v42, 6 }
0x1070   : > { %v11490_v57 = vmax.bf16 %v11487_v6, %v11485_v42  ;;  %v11495_v10 = vrot.slane %v11487_v6, 2  ;;  %v11501_v44 = vrot.slane %v11487_v6, 3  ;;  %v11507_v46 = vrot.slane %v11487_v6, 5  ;;  %v20125_v42 = vld [vmem:[%s25951_s16 + $0x18c] ss:$16 sps:$4 sm:$0xff]  }
0x1071   : > { %v20120_v6 = vld [vmem:[%s25951_s16 + $0x180] ss:$16 sps:$4 sm:$0xff]  }
0x1072   : > { %v11494_v40 = vmax.bf16 %v11492_v9, %v11490_v57  ;;  %v20123_v57 = vld [vmem:[%s25951_s16 + $0x188] ss:$16 sps:$4 sm:$0xff]   ;;  %v20128_v9 = vld [vmem:[%s25951_s16 + $0x1a4] ss:$16 sps:$4 sm:$0xff]  }
0x1074   : > { %v11497_v48 = vmax.bf16 %v11495_v10, %v11494_v40  ;;  %v20131_v40 = vld [vmem:[%s25951_s16 + $0x1ac] ss:$16 sps:$4 sm:$0xff]   ;;  %v20126_v10 = vld [vmem:[%s25951_s16 + $0x1a0] ss:$16 sps:$4 sm:$0xff]  }
0x1076   : > { %v11500_v20 = vmax.bf16 %v11498_v17, %v11497_v48  ;;  %v20129_v48 = vld [vmem:[%s25951_s16 + $0x1a8] ss:$16 sps:$4 sm:$0xff]   ;;  %v20132_v17 = vld [vmem:[%s25951_s16 + $0x1c0] ss:$16 sps:$4 sm:$0xff]  }
0x1078   : > { %v11503_v53 = vmax.bf16 %v11501_v44, %v11500_v20  ;;  %v20134_v20 = vld [vmem:[%s25951_s16 + $0x1c4] ss:$16 sps:$4 sm:$0xff]   ;;  %v20135_v44 = vld [vmem:[%s25951_s16 + $0x1c8] ss:$16 sps:$4 sm:$0xff]  }
0x107a   : > { %v11506_v14 = vmax.bf16 %v11504_v63, %v11503_v53  ;;  %v20137_v53 = vld [vmem:[%s25951_s16 + $0x1cc] ss:$16 sps:$4 sm:$0xff]   ;;  %v20140_v63 = vld [vmem:[%s25951_s16 + $0x1e4] ss:$16 sps:$4 sm:$0xff]  }
0x107c   : > { %v11509_v18 = vmax.bf16 %v11507_v46, %v11506_v14  ;;  %v20138_v14 = vld [vmem:[%s25951_s16 + $0x1e0] ss:$16 sps:$4 sm:$0xff]   ;;  %v20143_v46 = vld [vmem:[%s25951_s16 + $0x1ec] ss:$16 sps:$4 sm:$0xff]  }
0x107e   : > { %v11512_v2 = vmax.bf16 %v11510_v23, %v11509_v18  ;;  %v20141_v18 = vld [vmem:[%s25951_s16 + $0x1e8] ss:$16 sps:$4 sm:$0xff]   ;;  %v20146_v23 = vld [vmem:[%s25951_s16 + $0x204] ss:$16 sps:$4 sm:$0xff]  }
0x1080   : > { %11760 = vmatmul.mubr.bf16.vlgmr.msra.gmra.mrb[104].mxu1 %v11512_v2  ;;  %11801 = vmatmul.mubr.bf16.vlgmr.msra.gmra.mrb[152].mxu0 %v11512_v2 }
0x1081   : > { %12608 = vmatpush1.bf16.msra.mxu1 %v20048_v19  ;;  %12690 = vmatpush1.bf16.msra.mxu0 %v20051_v32  ;;  %v20149_v19 = vld [vmem:[%s25951_s16 + $0x20c] ss:$16 sps:$4 sm:$0xff]   ;;  %v11707_v32 = vlaneseq }
0x1082   : > { %12609 = vmatprep.subr.bf16.mxu1 %v20056_v34  ;;  %12691 = vmatprep.subr.bf16.mxu0 %v20059_v49  ;;  %v24903_v49 = vld [vmem:[%s25950_s15] sm:$0xf] }
0x1083   : > { %v24895_v2 = vshrl.u32 %v11707_v32, 7  ;;  %v20206_v32 = vld [vmem:[%s25951_s16 + $0x344] ss:$16 sps:$4 sm:$0xff]  }
0x1085   : > { %12610 = vmatpush1.bf16.msra.mxu1 %v20054_v29  ;;  %12692 = vmatpush1.bf16.msra.mxu0 %v20057_v61  ;;  %v24898_v34 = vsub.s32 0, %v24895_v2  ;;  %v24906_v29 = vsub.s32 1, %v24895_v2  ;;  %v24909_v61 = vsub.s32 3, %v24895_v2 }
0x1086   : > { %12611 = vmatprep.subr.bf16.mxu1 %v20062_v30  ;;  %12693 = vmatprep.subr.bf16.mxu0 %v20065_v3 }
0x1087   : > { %v11710_v30 = vrot.slane %v24903_v49, %v24898_v34  ;;  %v11714_v3 = vrot.slane %v24903_v49, %v24906_v29 }
0x1089   : > { %12612 = vmatpush1.bf16.msra.mxu1 %v20060_v55  ;;  %12694 = vmatpush1.bf16.msra.mxu0 %v20063_v26  ;;  %v11722_v55 = vrot.slane %v24903_v49, %v24909_v61 }
0x108a   : > { %12613 = vmatprep.subr.bf16.mxu1 %v20068_v60  ;;  %12695 = vmatprep.subr.bf16.mxu0 %v20071_v54 }
0x108d   : > { %12614 = vmatpush1.bf16.msra.mxu1 %v20066_v62  ;;  %12696 = vmatpush1.bf16.msra.mxu0 %v20069_v24 }
0x108e   : > { %12615 = vmatprep.subr.bf16.mxu1 %v20074_v35  ;;  %12697 = vmatprep.subr.bf16.mxu0 %v20077_v21 }
0x1091   : > { %12616 = vmatpush1.bf16.msra.mxu1 %v20072_v28  ;;  %12698 = vmatpush1.bf16.msra.mxu0 %v20075_v8 }
0x1092   : > { %12617 = vmatprep.subr.bf16.mxu1 %v20080_v56  ;;  %12699 = vmatprep.subr.bf16.mxu0 %v20083_v4 }
0x1095   : > { %12618 = vmatpush1.bf16.msra.mxu1 %v20078_v27  ;;  %12700 = vmatpush1.bf16.msra.mxu0 %v20081_v37 }
0x1096   : > { %12619 = vmatprep.subr.bf16.mxu1 %v20086_v31  ;;  %12701 = vmatprep.subr.bf16.mxu0 %v20089_v38 }
0x1099   : > { %12620 = vmatpush1.bf16.msra.mxu1 %v20084_v41  ;;  %12702 = vmatpush1.bf16.msra.mxu0 %v20087_v22  ;;  %v20144_v41 = vld [vmem:[%s25951_s16 + $0x200] ss:$16 sps:$4 sm:$0xff]   ;;  %v20147_v22 = vld [vmem:[%s25951_s16 + $0x208] ss:$16 sps:$4 sm:$0xff]  }
0x109a   : > { %12621 = vmatprep.subr.bf16.mxu1 %v20092_v36  ;;  %12703 = vmatprep.subr.bf16.mxu0 %v20095_v0  ;;  %v20152_v0 = vld [vmem:[%s25951_s16 + $0x224] ss:$16 sps:$4 sm:$0xff]  }
0x109d   : > { %12622 = vmatpush1.bf16.msra.mxu1 %v20090_v39  ;;  %12704 = vmatpush1.bf16.msra.mxu0 %v20093_v15  ;;  %v20155_v39 = vld [vmem:[%s25951_s16 + $0x22c] ss:$16 sps:$4 sm:$0xff]  }
0x109e   : > { %12623 = vmatprep.subr.bf16.mxu1 %v20098_v1  ;;  %12705 = vmatprep.subr.bf16.mxu0 %v20101_v45  ;;  %v20150_v1 = vld [vmem:[%s25951_s16 + $0x220] ss:$16 sps:$4 sm:$0xff]   ;;  %v20153_v45 = vld [vmem:[%s25951_s16 + $0x228] ss:$16 sps:$4 sm:$0xff]  }
0x10a1   : > { %12624 = vmatpush1.bf16.msra.mxu1 %v20096_v5  ;;  %12706 = vmatpush1.bf16.msra.mxu0 %v20099_v52  ;;  %v20158_v5 = vld [vmem:[%s25951_s16 + $0x244] ss:$16 sps:$4 sm:$0xff]   ;;  %v20161_v52 = vld [vmem:[%s25951_s16 + $0x24c] ss:$16 sps:$4 sm:$0xff]  }
0x10a2   : > { %12625 = vmatprep.subr.bf16.mxu1 %v20104_v16  ;;  %12707 = vmatprep.subr.bf16.mxu0 %v20107_v7  ;;  %v20156_v16 = vld [vmem:[%s25951_s16 + $0x240] ss:$16 sps:$4 sm:$0xff]   ;;  %v20159_v7 = vld [vmem:[%s25951_s16 + $0x248] ss:$16 sps:$4 sm:$0xff]  }
0x10a5   : > { %12626 = vmatpush1.bf16.msra.mxu1 %v20102_v58  ;;  %12708 = vmatpush1.bf16.msra.mxu0 %v20105_v13  ;;  %v20164_v58 = vld [vmem:[%s25951_s16 + $0x264] ss:$16 sps:$4 sm:$0xff]   ;;  %v20167_v13 = vld [vmem:[%s25951_s16 + $0x26c] ss:$16 sps:$4 sm:$0xff]  }
0x10a6   : > { %12627 = vmatprep.subr.bf16.mxu1 %v20110_v25  ;;  %12709 = vmatprep.subr.bf16.mxu0 %v20113_v43  ;;  %v20162_v25 = vld [vmem:[%s25951_s16 + $0x260] ss:$16 sps:$4 sm:$0xff]   ;;  %v20165_v43 = vld [vmem:[%s25951_s16 + $0x268] ss:$16 sps:$4 sm:$0xff]  }
0x10a9   : > { %12628 = vmatpush1.bf16.msra.mxu1 %v20108_v11  ;;  %12710 = vmatpush1.bf16.msra.mxu0 %v20111_v50  ;;  %v20170_v11 = vld [vmem:[%s25951_s16 + $0x284] ss:$16 sps:$4 sm:$0xff]   ;;  %v20173_v50 = vld [vmem:[%s25951_s16 + $0x28c] ss:$16 sps:$4 sm:$0xff]  }
0x10aa   : > { %12629 = vmatprep.subr.bf16.mxu1 %v20116_v47  ;;  %12711 = vmatprep.subr.bf16.mxu0 %v20119_v33  ;;  %v20168_v47 = vld [vmem:[%s25951_s16 + $0x280] ss:$16 sps:$4 sm:$0xff]   ;;  %v20171_v33 = vld [vmem:[%s25951_s16 + $0x288] ss:$16 sps:$4 sm:$0xff]  }
0x10ad   : > { %12630 = vmatpush1.bf16.msra.mxu1 %v20114_v51  ;;  %12712 = vmatpush1.bf16.msra.mxu0 %v20117_v59  ;;  %v20176_v51 = vld [vmem:[%s25951_s16 + $0x2a4] ss:$16 sps:$4 sm:$0xff]   ;;  %v20179_v59 = vld [vmem:[%s25951_s16 + $0x2ac] ss:$16 sps:$4 sm:$0xff]  }
0x10ae   : > { %12631 = vmatprep.subr.bf16.mxu1 %v20122_v12  ;;  %12713 = vmatprep.subr.bf16.mxu0 %v20125_v42  ;;  %v20174_v12 = vld [vmem:[%s25951_s16 + $0x2a0] ss:$16 sps:$4 sm:$0xff]   ;;  %v20177_v42 = vld [vmem:[%s25951_s16 + $0x2a8] ss:$16 sps:$4 sm:$0xff]  }
0x10b1   : > { %12632 = vmatpush1.bf16.msra.mxu1 %v20120_v6  ;;  %12714 = vmatpush1.bf16.msra.mxu0 %v20123_v57  ;;  %v20182_v6 = vld [vmem:[%s25951_s16 + $0x2c4] ss:$16 sps:$4 sm:$0xff]   ;;  %v20185_v57 = vld [vmem:[%s25951_s16 + $0x2cc] ss:$16 sps:$4 sm:$0xff]  }
0x10b2   : > { %12633 = vmatprep.subr.bf16.mxu1 %v20128_v9  ;;  %12715 = vmatprep.subr.bf16.mxu0 %v20131_v40  ;;  %v20180_v9 = vld [vmem:[%s25951_s16 + $0x2c0] ss:$16 sps:$4 sm:$0xff]   ;;  %v20183_v40 = vld [vmem:[%s25951_s16 + $0x2c8] ss:$16 sps:$4 sm:$0xff]  }
0x10b5   : > { %12634 = vmatpush1.bf16.msra.mxu1 %v20126_v10  ;;  %12716 = vmatpush1.bf16.msra.mxu0 %v20129_v48  ;;  %v20188_v10 = vld [vmem:[%s25951_s16 + $0x2e4] ss:$16 sps:$4 sm:$0xff]   ;;  %v20191_v48 = vld [vmem:[%s25951_s16 + $0x2ec] ss:$16 sps:$4 sm:$0xff]  }
0x10b6   : > { %12635 = vmatprep.subr.bf16.mxu1 %v20134_v20  ;;  %12717 = vmatprep.subr.bf16.mxu0 %v20137_v53  ;;  %v20189_v20 = vld [vmem:[%s25951_s16 + $0x2e8] ss:$16 sps:$4 sm:$0xff]   ;;  %v20197_v53 = vld [vmem:[%s25951_s16 + $0x30c] ss:$16 sps:$4 sm:$0xff]  }
0x10b9   : > { %12636 = vmatpush1.bf16.msra.mxu1 %v20132_v17  ;;  %12718 = vmatpush1.bf16.msra.mxu0 %v20135_v44  ;;  %v20186_v17 = vld [vmem:[%s25951_s16 + $0x2e0] ss:$16 sps:$4 sm:$0xff]   ;;  %v20194_v44 = vld [vmem:[%s25951_s16 + $0x304] ss:$16 sps:$4 sm:$0xff]  }
0x10ba   : > { %12637 = vmatprep.subr.bf16.mxu1 %v20140_v63  ;;  %12719 = vmatprep.subr.bf16.mxu0 %v20143_v46  ;;  %v20192_v63 = vld [vmem:[%s25951_s16 + $0x300] ss:$16 sps:$4 sm:$0xff]   ;;  %v20200_v46 = vld [vmem:[%s25951_s16 + $0x324] ss:$16 sps:$4 sm:$0xff]  }
0x10bd   : > { %12638 = vmatpush1.bf16.msra.mxu1 %v20138_v14  ;;  %12720 = vmatpush1.bf16.msra.mxu0 %v20141_v18  ;;  %v20195_v14 = vld [vmem:[%s25951_s16 + $0x308] ss:$16 sps:$4 sm:$0xff]   ;;  %v20203_v18 = vld [vmem:[%s25951_s16 + $0x32c] ss:$16 sps:$4 sm:$0xff]  }
0x10be   : > { %12648 = vmatprep.subr.bf16.mxu1 %v20146_v23  ;;  %12730 = vmatprep.subr.bf16.mxu0 %v20149_v19  ;;  %v20198_v23 = vld [vmem:[%s25951_s16 + $0x320] ss:$16 sps:$4 sm:$0xff]   ;;  %v20201_v19 = vld [vmem:[%s25951_s16 + $0x328] ss:$16 sps:$4 sm:$0xff]  }
0x1153   : > { %v11761_v26 = vpop.f32.mrb[104].mxu1  ;;  %v24917_v60 = vpop.f32.mrb[152].mxu0 }
0x1154   : > { %v11762_v54 = vadd.f32 %v11761_v26, %v11710_v30  ;;  %v11763_v62 = vpop.f32.mrb[105].mxu1  ;;  %v11804_v24 = vpop.f32.mrb[153].mxu0  ;;  %v20209_v30 = vld [vmem:[%s25951_s16 + $0x34c] ss:$16 sps:$4 sm:$0xff]   ;;  %v20212_v26 = vld [vmem:[%s25951_s16 + $0x364] ss:$16 sps:$4 sm:$0xff]  }
0x1155   : > { %v11764_v35 = vadd.f32 %v11763_v62, %v11714_v3  ;;  %v11805_v21 = vadd.f32 %v11804_v24, %v11722_v55  ;;  %v11765_v28 = vpop.f32.mrb[106].mxu1  ;;  %v11806_v8 = vpop.f32.mrb[154].mxu0  ;;  %v20204_v3 = vld [vmem:[%s25951_s16 + $0x340] ss:$16 sps:$4 sm:$0xff]   ;;  %v20207_v55 = vld [vmem:[%s25951_s16 + $0x348] ss:$16 sps:$4 sm:$0xff]  }
0x1156   : > { %v11809_v56 = vmax.f32 %v11762_v54, 0.0  ;;  %v11766_v4 = vpop.f32.mrb[107].mxu1  ;;  %v11807_v27 = vpop.f32.mrb[155].mxu0  ;;  %v20215_v54 = vld [vmem:[%s25951_s16 + $0x36c] ss:$16 sps:$4 sm:$0xff]  }
0x1157   : > { %v11810_v37 = vmax.f32 %v11764_v35, 0.0  ;;  %v11812_v31 = vmax.f32 %v11805_v21, 0.0  ;;  %v20210_v62 = vld [vmem:[%s25951_s16 + $0x360] ss:$16 sps:$4 sm:$0xff]   ;;  %v20213_v24 = vld [vmem:[%s25951_s16 + $0x368] ss:$16 sps:$4 sm:$0xff]  }
0x1158   : > { %v11813_v36 = vpack.c.bf16 %v11809_v56, %v11809_v56  ;;  %v20218_v35 = vld [vmem:[%s25951_s16 + $0x384] ss:$16 sps:$4 sm:$0xff]   ;;  %v20221_v21 = vld [vmem:[%s25951_s16 + $0x38c] ss:$16 sps:$4 sm:$0xff]   ;;  %v20216_v28 = vld [vmem:[%s25951_s16 + $0x380] ss:$16 sps:$4 sm:$0xff]  }
0x1159   : > { %v11814_v38 = vpack.c.bf16 %v11810_v37, %v11810_v37  ;;  %v11816_v15 = vpack.c.bf16 %v11812_v31, %v11812_v31  ;;  %v20219_v8 = vld [vmem:[%s25951_s16 + $0x388] ss:$16 sps:$4 sm:$0xff]   ;;  %v25070_v56 = vsub.s32 2, %v24895_v2  ;;  %v20224_v4 = vld [vmem:[%s25951_s16 + $0x3a4] ss:$16 sps:$4 sm:$0xff]  }
0x115a   : > { %v20227_v27 = vld [vmem:[%s25951_s16 + $0x3ac] ss:$16 sps:$4 sm:$0xff]   ;;  %v20222_v37 = vld [vmem:[%s25951_s16 + $0x3a0] ss:$16 sps:$4 sm:$0xff]   ;;  %v20225_v31 = vld [vmem:[%s25951_s16 + $0x3a8] ss:$16 sps:$4 sm:$0xff]  }
0x115b   : > { %12639 = vmatprep.mubr.bf16.mxu1 %v11814_v38  ;;  %12721 = vmatprep.mubr.bf16.mxu0 %v11814_v38  ;;  %v11718_v38 = vrot.slane %v24903_v49, %v25070_v56  ;;  %v20231_v49 = vld [vmem:[%s25951_s16 + $0x3c8] ss:$16 sps:$4 sm:$0xff]  }
0x115c   : > { %12640 = vmatmul.mubr.bf16.vlgmr.msra.gmra.mrb[108].mxu1 %v11813_v36  ;;  %12722 = vmatmul.mubr.bf16.vlgmr.msra.gmra.mrb[156].mxu0 %v11813_v36  ;;  %v20228_v36 = vld [vmem:[%s25951_s16 + $0x3c0] ss:$16 sps:$4 sm:$0xff]  }
0x115d   : > { %12649 = vmatpush1.bf16.msra.mxu1 %v20144_v41  ;;  %12731 = vmatpush1.bf16.msra.mxu0 %v20147_v22  ;;  %v20230_v41 = vld [vmem:[%s25951_s16 + $0x3c4] ss:$16 sps:$4 sm:$0xff]   ;;  %v20233_v22 = vld [vmem:[%s25951_s16 + $0x3cc] ss:$16 sps:$4 sm:$0xff]  }
0x115e   : > { %12680 = vmatprep.mubr.bf16.mxu1 %v11816_v15  ;;  %12762 = vmatprep.mubr.bf16.mxu0 %v11816_v15  ;;  %v20239_v15 = vld [vmem:[%s25951_s16 + $0x3ec] ss:$16 sps:$4 sm:$0xff]  }
0x115f   : > { %12650 = vmatprep.subr.bf16.mxu1 %v20152_v0  ;;  %12732 = vmatprep.subr.bf16.mxu0 %v20155_v39  ;;  %v11803_v0 = vadd.f32 %v24917_v60, %v11718_v38  ;;  %v20236_v39 = vld [vmem:[%s25951_s16 + $0x3e4] ss:$16 sps:$4 sm:$0xff]   ;;  %v12780_v60 = vld [vmem:[%s25953_s18 + $0x8] sm:$0xff] }
0x1160   : > { %v12831_v38 = vld [vmem:[%s25953_s18 + $0x1a0] sm:$0xff] }
0x1161   : > { %12651 = vmatpush1.bf16.msra.mxu1 %v20150_v1  ;;  %12733 = vmatpush1.bf16.msra.mxu0 %v20153_v45  ;;  %v12779_v1 = vld [vmem:[%s25953_s18] sm:$0xff] }
0x1162   : > { %12652 = vmatprep.subr.bf16.mxu1 %v20158_v5  ;;  %12734 = vmatprep.subr.bf16.mxu0 %v20161_v52  ;;  %v12783_v45 = vld [vmem:[%s25953_s18 + $0x20] sm:$0xff]  ;;  %v12784_v5 = vld [vmem:[%s25953_s18 + $0x28] sm:$0xff] }
0x1163   : > { %v20234_v52 = vld [vmem:[%s25951_s16 + $0x3e0] ss:$16 sps:$4 sm:$0xff]  }
0x1165   : > { %12653 = vmatpush1.bf16.msra.mxu1 %v20156_v16  ;;  %12735 = vmatpush1.bf16.msra.mxu0 %v20159_v7  ;;  %v20237_v16 = vld [vmem:[%s25951_s16 + $0x3e8] ss:$16 sps:$4 sm:$0xff]   ;;  %v11811_v7 = vmax.f32 %v11803_v0, 0.0 }
0x1166   : > { %12654 = vmatprep.subr.bf16.mxu1 %v20164_v58  ;;  %12736 = vmatprep.subr.bf16.mxu0 %v20167_v13  ;;  %v16385_v58 = vcombine.high %v12779_v1, %v12783_v45  ;;  %v16387_v13 = vcombine.high %v12780_v60, %v12784_v5 }
0x1169   : > { %12655 = vmatpush1.bf16.msra.mxu1 %v20162_v25  ;;  %12737 = vmatpush1.bf16.msra.mxu0 %v20165_v43  ;;  %v12787_v25 = vld [vmem:[%s25953_s18 + $0x40] sm:$0xff] }
0x116a   : > { %12656 = vmatprep.subr.bf16.mxu1 %v20170_v11  ;;  %12738 = vmatprep.subr.bf16.mxu0 %v20173_v50  ;;  %v12791_v43 = vld [vmem:[%s25953_s18 + $0x60] sm:$0xff]  ;;  %v12788_v11 = vld [vmem:[%s25953_s18 + $0x48] sm:$0xff] }
0x116b   : > { %v12792_v50 = vld [vmem:[%s25953_s18 + $0x68] sm:$0xff] }
0x116d   : > { %12657 = vmatpush1.bf16.msra.mxu1 %v20168_v47  ;;  %12739 = vmatpush1.bf16.msra.mxu0 %v20171_v33  ;;  %v16384_v47 = vcombine.low %v12779_v1, %v12783_v45  ;;  %v16386_v33 = vcombine.low %v12780_v60, %v12784_v5  ;;  %v12839_v1 = vld [vmem:[%s25953_s18 + $0x1e0] sm:$0xff]  ;;  %v12836_v45 = vld [vmem:[%s25953_s18 + $0x1c8] sm:$0xff] }
0x116e   : > { %12658 = vmatprep.subr.bf16.mxu1 %v20176_v51  ;;  %12740 = vmatprep.subr.bf16.mxu0 %v20179_v59  ;;  %v11815_v51 = vpack.c.bf16 %v11811_v7, %v11811_v7  ;;  %v16393_v59 = vcombine.high %v12787_v25, %v12791_v43  ;;  %v12840_v60 = vld [vmem:[%s25953_s18 + $0x1e8] sm:$0xff] }
0x116f   : > { %v16443_v7 = vcombine.high %v12836_v45, %v12840_v60 }
0x1171   : > { %12659 = vmatpush1.bf16.msra.mxu1 %v20174_v12  ;;  %12741 = vmatpush1.bf16.msra.mxu0 %v20177_v42  ;;  %v16395_v12 = vcombine.high %v12788_v11, %v12792_v50  ;;  %v12795_v42 = vld [vmem:[%s25953_s18 + $0x80] sm:$0xff] }
0x1172   : > { %12660 = vmatprep.subr.bf16.mxu1 %v20182_v6  ;;  %12742 = vmatprep.subr.bf16.mxu0 %v20185_v57  ;;  %v12799_v6 = vld [vmem:[%s25953_s18 + $0xa0] sm:$0xff]  ;;  %v12796_v57 = vld [vmem:[%s25953_s18 + $0x88] sm:$0xff] }
0x1175   : > { %12661 = vmatpush1.bf16.msra.mxu1 %v20180_v9  ;;  %12743 = vmatpush1.bf16.msra.mxu0 %v20183_v40  ;;  %v12800_v9 = vld [vmem:[%s25953_s18 + $0xa8] sm:$0xff]  ;;  %v16392_v40 = vcombine.low %v12787_v25, %v12791_v43 }
0x1176   : > { %12662 = vmatprep.subr.bf16.mxu1 %v20188_v10  ;;  %12744 = vmatprep.subr.bf16.mxu0 %v20191_v48  ;;  %v16394_v10 = vcombine.low %v12788_v11, %v12792_v50  ;;  %v16401_v48 = vcombine.high %v12795_v42, %v12799_v6  ;;  %v12844_v25 = vld [vmem:[%s25953_s18 + $0x208] sm:$0xff]  ;;  %v16442_v50 = vcombine.low %v12836_v45, %v12840_v60 }
0x1177   : > { %v12848_v43 = vld [vmem:[%s25953_s18 + $0x228] sm:$0xff] }
0x1179   : > { %12663 = vmatpush1.bf16.msra.mxu1 %v20186_v17  ;;  %12745 = vmatpush1.bf16.msra.mxu0 %v20189_v20  ;;  %v16403_v17 = vcombine.high %v12796_v57, %v12800_v9  ;;  %v12803_v20 = vld [vmem:[%s25953_s18 + $0xc0] sm:$0xff] }
0x117a   : > { %12664 = vmatprep.subr.bf16.mxu1 %v20194_v44  ;;  %12746 = vmatprep.subr.bf16.mxu0 %v20197_v53  ;;  %v12807_v44 = vld [vmem:[%s25953_s18 + $0xe0] sm:$0xff]  ;;  %v12804_v53 = vld [vmem:[%s25953_s18 + $0xc8] sm:$0xff] }
0x117d   : > { %12665 = vmatpush1.bf16.msra.mxu1 %v20192_v63  ;;  %12747 = vmatpush1.bf16.msra.mxu0 %v20195_v14  ;;  %v12808_v63 = vld [vmem:[%s25953_s18 + $0xe8] sm:$0xff]  ;;  %v16400_v14 = vcombine.low %v12795_v42, %v12799_v6 }
0x117e   : > { %12666 = vmatprep.subr.bf16.mxu1 %v20200_v46  ;;  %12748 = vmatprep.subr.bf16.mxu0 %v20203_v18  ;;  %v16402_v46 = vcombine.low %v12796_v57, %v12800_v9  ;;  %v16409_v18 = vcombine.high %v12803_v20, %v12807_v44  ;;  %v12856_v42 = vld [vmem:[%s25953_s18 + $0x268] sm:$0xff]  ;;  %v16450_v57 = vcombine.low %v12844_v25, %v12848_v43 }
0x1181   : > { %12667 = vmatpush1.bf16.msra.mxu1 %v20198_v23  ;;  %12749 = vmatpush1.bf16.msra.mxu0 %v20201_v19  ;;  %v16411_v23 = vcombine.high %v12804_v53, %v12808_v63  ;;  %v12811_v19 = vld [vmem:[%s25953_s18 + $0x100] sm:$0xff] }
0x1182   : > { %12668 = vmatprep.subr.bf16.mxu1 %v20206_v32  ;;  %12750 = vmatprep.subr.bf16.mxu0 %v20209_v30  ;;  %v12815_v32 = vld [vmem:[%s25953_s18 + $0x120] sm:$0xff]  ;;  %v12812_v30 = vld [vmem:[%s25953_s18 + $0x108] sm:$0xff] }
0x1185   : > { %12669 = vmatpush1.bf16.msra.mxu1 %v20204_v3  ;;  %12751 = vmatpush1.bf16.msra.mxu0 %v20207_v55  ;;  %v12816_v3 = vld [vmem:[%s25953_s18 + $0x128] sm:$0xff]  ;;  %v16408_v55 = vcombine.low %v12803_v20, %v12807_v44 }
0x1186   : > { %12670 = vmatprep.subr.bf16.mxu1 %v20212_v26  ;;  %12752 = vmatprep.subr.bf16.mxu0 %v20215_v54  ;;  %v16410_v26 = vcombine.low %v12804_v53, %v12808_v63  ;;  %v16417_v54 = vcombine.high %v12811_v19, %v12815_v32  ;;  %v12864_v20 = vld [vmem:[%s25953_s18 + $0x2a8] sm:$0xff] }
0x1189   : > { %12671 = vmatpush1.bf16.msra.mxu1 %v20210_v62  ;;  %12753 = vmatpush1.bf16.msra.mxu0 %v20213_v24  ;;  %v16419_v62 = vcombine.high %v12812_v30, %v12816_v3  ;;  %v12819_v24 = vld [vmem:[%s25953_s18 + $0x140] sm:$0xff] }
0x118a   : > { %12672 = vmatprep.subr.bf16.mxu1 %v20218_v35  ;;  %12754 = vmatprep.subr.bf16.mxu0 %v20221_v21  ;;  %v12823_v35 = vld [vmem:[%s25953_s18 + $0x160] sm:$0xff]  ;;  %v12820_v21 = vld [vmem:[%s25953_s18 + $0x148] sm:$0xff] }
0x118d   : > { %12673 = vmatpush1.bf16.msra.mxu1 %v20216_v28  ;;  %12755 = vmatpush1.bf16.msra.mxu0 %v20219_v8  ;;  %v12824_v28 = vld [vmem:[%s25953_s18 + $0x168] sm:$0xff]  ;;  %v16416_v8 = vcombine.low %v12811_v19, %v12815_v32 }
0x118e   : > { %12674 = vmatprep.subr.bf16.mxu1 %v20224_v4  ;;  %12756 = vmatprep.subr.bf16.mxu0 %v20227_v27  ;;  %v16418_v4 = vcombine.low %v12812_v30, %v12816_v3  ;;  %v16425_v27 = vcombine.high %v12819_v24, %v12823_v35  ;;  %v12872_v19 = vld [vmem:[%s25953_s18 + $0x2e8] sm:$0xff] }
0x1191   : > { %12675 = vmatpush1.bf16.msra.mxu1 %v20222_v37  ;;  %12757 = vmatpush1.bf16.msra.mxu0 %v20225_v31  ;;  %v16427_v37 = vcombine.high %v12820_v21, %v12824_v28  ;;  %v12827_v31 = vld [vmem:[%s25953_s18 + $0x180] sm:$0xff] }
0x1192   : > { %12676 = vmatprep.subr.bf16.mxu1 %v20230_v41  ;;  %12758 = vmatprep.subr.bf16.mxu0 %v20233_v22  ;;  %v12828_v41 = vld [vmem:[%s25953_s18 + $0x188] sm:$0xff]  ;;  %v16433_v0 = vcombine.high %v12827_v31, %v12831_v38  ;;  %v16432_v5 = vcombine.low %v12827_v31, %v12831_v38 }
0x1193   : > { %v12832_v22 = vld [vmem:[%s25953_s18 + $0x1a8] sm:$0xff] }
0x1194   : > { %v12888_v31 = vld [vmem:[%s25953_s18 + $0x368] sm:$0xff] }
0x1195   : > { %12677 = vmatpush1.bf16.msra.mxu1 %v20228_v36  ;;  %12759 = vmatpush1.bf16.msra.mxu0 %v20231_v49  ;;  %v16424_v36 = vcombine.low %v12819_v24, %v12823_v35  ;;  %v16426_v49 = vcombine.low %v12820_v21, %v12824_v28  ;;  %v12880_v24 = vld [vmem:[%s25953_s18 + $0x328] sm:$0xff] }
0x1196   : > { %12678 = vmatprep.subr.bf16.mxu1 %v20236_v39  ;;  %12760 = vmatprep.subr.bf16.mxu0 %v20239_v15  ;;  %v16435_v39 = vcombine.high %v12828_v41, %v12832_v22  ;;  %v12835_v15 = vld [vmem:[%s25953_s18 + $0x1c0] sm:$0xff] }
0x1197   : > { %v16440_v11 = vcombine.low %v12835_v15, %v12839_v1 }
0x1199   : > { %12679 = vmatpush1.bf16.msra.mxu1 %v20234_v52  ;;  %12761 = vmatpush1.bf16.msra.mxu0 %v20237_v16  ;;  %v16434_v52 = vcombine.low %v12828_v41, %v12832_v22  ;;  %v16441_v16 = vcombine.high %v12835_v15, %v12839_v1  ;;  %v12895_v15 = vld [vmem:[%s25953_s18 + $0x3a0] sm:$0xff]  ;;  %v12892_v1 = vld [vmem:[%s25953_s18 + $0x388] sm:$0xff] }
0x119a   : > { %14357 = vmatprep.subr.bf16.mxu1 %v16385_v58  ;;  %14439 = vmatprep.subr.bf16.mxu0 %v16387_v13  ;;  %v12843_v58 = vld [vmem:[%s25953_s18 + $0x200] sm:$0xff] }
0x119b   : > { %v12847_v13 = vld [vmem:[%s25953_s18 + $0x220] sm:$0xff] }
0x119c   : > { %12681 = vmatmul.mubr.bf16.vlgmr.msra.gmra.mrb[108].mxu1 %v11815_v51  ;;  %12763 = vmatmul.mubr.bf16.vlgmr.msra.gmra.mrb[156].mxu0 %v11815_v51  ;;  %v12851_v51 = vld [vmem:[%s25953_s18 + $0x240] sm:$0xff]  ;;  %v16448_v6 = vcombine.low %v12843_v58, %v12847_v13 }
0x119d   : > { %14358 = vmatpush1.bf16.msra.mxu1 %v16384_v47  ;;  %14440 = vmatpush1.bf16.msra.mxu0 %v16386_v33  ;;  %v16449_v47 = vcombine.high %v12843_v58, %v12847_v13  ;;  %v16451_v33 = vcombine.high %v12844_v25, %v12848_v43  ;;  %v12900_v25 = vld [vmem:[%s25953_s18 + $0x3c8] sm:$0xff] }
0x119e   : > { %14359 = vmatprep.subr.bf16.mxu1 %v16393_v59  ;;  %14441 = vmatprep.subr.bf16.mxu0 %v16395_v12  ;;  %v12855_v59 = vld [vmem:[%s25953_s18 + $0x260] sm:$0xff]  ;;  %v12852_v12 = vld [vmem:[%s25953_s18 + $0x248] sm:$0xff] }
0x119f   : > { %v16457_v9 = vcombine.high %v12851_v51, %v12855_v59  ;;  %v16456_v44 = vcombine.low %v12851_v51, %v12855_v59  ;;  %v16458_v53 = vcombine.low %v12852_v12, %v12856_v42  ;;  %v12904_v43 = vld [vmem:[%s25953_s18 + $0x3e8] sm:$0xff] }
0x11a1   : > { %14360 = vmatpush1.bf16.msra.mxu1 %v16392_v40  ;;  %14442 = vmatpush1.bf16.msra.mxu0 %v16394_v10  ;;  %v16459_v40 = vcombine.high %v12852_v12, %v12856_v42  ;;  %v12859_v10 = vld [vmem:[%s25953_s18 + $0x280] sm:$0xff]  ;;  %v12912_v12 = vld [vmem:[%s25953_s18 + $0x428] sm:$0xff]  ;;  %v16506_v42 = vcombine.low %v12900_v25, %v12904_v43 }
0x11a2   : > { %14361 = vmatprep.subr.bf16.mxu1 %v16401_v48  ;;  %14443 = vmatprep.subr.bf16.mxu0 %v16403_v17  ;;  %v12863_v48 = vld [vmem:[%s25953_s18 + $0x2a0] sm:$0xff]  ;;  %v12860_v17 = vld [vmem:[%s25953_s18 + $0x288] sm:$0xff] }
0x11a3   : > { %v16465_v63 = vcombine.high %v12859_v10, %v12863_v48  ;;  %v16464_v32 = vcombine.low %v12859_v10, %v12863_v48  ;;  %v16466_v30 = vcombine.low %v12860_v17, %v12864_v20 }
0x11a5   : > { %14362 = vmatpush1.bf16.msra.mxu1 %v16400_v14  ;;  %14444 = vmatpush1.bf16.msra.mxu0 %v16402_v46  ;;  %v16467_v14 = vcombine.high %v12860_v17, %v12864_v20  ;;  %v12867_v46 = vld [vmem:[%s25953_s18 + $0x2c0] sm:$0xff] }
0x11a6   : > { %14363 = vmatprep.subr.bf16.mxu1 %v16409_v18  ;;  %14445 = vmatprep.subr.bf16.mxu0 %v16411_v23  ;;  %v12871_v18 = vld [vmem:[%s25953_s18 + $0x2e0] sm:$0xff]  ;;  %v12868_v23 = vld [vmem:[%s25953_s18 + $0x2c8] sm:$0xff] }
0x11a7   : > { %v16473_v3 = vcombine.high %v12867_v46, %v12871_v18  ;;  %v16472_v35 = vcombine.low %v12867_v46, %v12871_v18  ;;  %v16474_v21 = vcombine.low %v12868_v23, %v12872_v19 }
0x11a9   : > { %14364 = vmatpush1.bf16.msra.mxu1 %v16408_v55  ;;  %14446 = vmatpush1.bf16.msra.mxu0 %v16410_v26  ;;  %v16475_v55 = vcombine.high %v12868_v23, %v12872_v19  ;;  %v12875_v26 = vld [vmem:[%s25953_s18 + $0x300] sm:$0xff] }
0x11aa   : > { %14365 = vmatprep.subr.bf16.mxu1 %v16417_v54  ;;  %14447 = vmatprep.subr.bf16.mxu0 %v16419_v62  ;;  %v12879_v54 = vld [vmem:[%s25953_s18 + $0x320] sm:$0xff]  ;;  %v12876_v62 = vld [vmem:[%s25953_s18 + $0x308] sm:$0xff] }
0x11ab   : > { %v16481_v28 = vcombine.high %v12875_v26, %v12879_v54  ;;  %v16480_v38 = vcombine.low %v12875_v26, %v12879_v54  ;;  %v16482_v41 = vcombine.low %v12876_v62, %v12880_v24  ;;  %v12915_v26 = vld [vmem:[%s25953_s18 + $0x440] sm:$0xff] }
0x11ad   : > { %14366 = vmatpush1.bf16.msra.mxu1 %v16416_v8  ;;  %14448 = vmatpush1.bf16.msra.mxu0 %v16418_v4  ;;  %v16483_v8 = vcombine.high %v12876_v62, %v12880_v24  ;;  %v12883_v4 = vld [vmem:[%s25953_s18 + $0x340] sm:$0xff]  ;;  %v12916_v24 = vld [vmem:[%s25953_s18 + $0x448] sm:$0xff] }
0x11ae   : > { %14367 = vmatprep.subr.bf16.mxu1 %v16425_v27  ;;  %14449 = vmatprep.subr.bf16.mxu0 %v16427_v37  ;;  %v12887_v27 = vld [vmem:[%s25953_s18 + $0x360] sm:$0xff]  ;;  %v12884_v37 = vld [vmem:[%s25953_s18 + $0x348] sm:$0xff] }
0x11af   : > { %v16489_v22 = vcombine.high %v12883_v4, %v12887_v27  ;;  %v12919_v62 = vld [vmem:[%s25953_s18 + $0x460] sm:$0xff] }
0x11b1   : > { %14368 = vmatpush1.bf16.msra.mxu1 %v16424_v36  ;;  %14450 = vmatpush1.bf16.msra.mxu0 %v16426_v49  ;;  %v16491_v36 = vcombine.high %v12884_v37, %v12888_v31  ;;  %v16488_v49 = vcombine.low %v12883_v4, %v12887_v27  ;;  %v16521_v4 = vcombine.high %v12915_v26, %v12919_v62 }
0x11b2   : > { %14369 = vmatprep.subr.bf16.mxu1 %v16433_v0  ;;  %14451 = vmatprep.subr.bf16.mxu0 %v16435_v39  ;;  %v16490_v0 = vcombine.low %v12884_v37, %v12888_v31  ;;  %v12891_v39 = vld [vmem:[%s25953_s18 + $0x380] sm:$0xff]  ;;  %v12924_v31 = vld [vmem:[%s25953_s18 + $0x488] sm:$0xff] }
0x11b3   : > { %v16496_v45 = vcombine.low %v12891_v39, %v12895_v15  ;;  %v16497_v60 = vcombine.high %v12891_v39, %v12895_v15  ;;  %v12927_v37 = vld [vmem:[%s25953_s18 + $0x4a0] sm:$0xff] }
0x11b4   : > { %v12931_v39 = vld [vmem:[%s25953_s18 + $0x4c0] sm:$0xff] }
0x11b5   : > { %14370 = vmatpush1.bf16.msra.mxu1 %v16432_v5  ;;  %14452 = vmatpush1.bf16.msra.mxu0 %v16434_v52  ;;  %v12896_v5 = vld [vmem:[%s25953_s18 + $0x3a8] sm:$0xff]  ;;  %v12899_v52 = vld [vmem:[%s25953_s18 + $0x3c0] sm:$0xff] }
0x11b6   : > { %14371 = vmatprep.subr.bf16.mxu1 %v16441_v16  ;;  %14453 = vmatprep.subr.bf16.mxu0 %v16443_v7  ;;  %v12903_v16 = vld [vmem:[%s25953_s18 + $0x3e0] sm:$0xff]  ;;  %v16498_v7 = vcombine.low %v12892_v1, %v12896_v5  ;;  %v16499_v58 = vcombine.high %v12892_v1, %v12896_v5  ;;  %v12932_v1 = vld [vmem:[%s25953_s18 + $0x4c8] sm:$0xff] }
0x11b7   : > { %v16505_v13 = vcombine.high %v12899_v52, %v12903_v16  ;;  %v16504_v51 = vcombine.low %v12899_v52, %v12903_v16  ;;  %v12935_v15 = vld [vmem:[%s25953_s18 + $0x4e0] sm:$0xff] }
0x11b8   : > { %v16537_v52 = vcombine.high %v12931_v39, %v12935_v15 }
0x11b9   : > { %14372 = vmatpush1.bf16.msra.mxu1 %v16440_v11  ;;  %14454 = vmatpush1.bf16.msra.mxu0 %v16442_v50  ;;  %v16507_v11 = vcombine.high %v12900_v25, %v12904_v43  ;;  %v12907_v50 = vld [vmem:[%s25953_s18 + $0x400] sm:$0xff]  ;;  %v12944_v25 = vld [vmem:[%s25953_s18 + $0x528] sm:$0xff]  ;;  %v16536_v43 = vcombine.low %v12931_v39, %v12935_v15 }
0x11ba   : > { %14373 = vmatprep.subr.bf16.mxu1 %v16449_v47  ;;  %14455 = vmatprep.subr.bf16.mxu0 %v16451_v33  ;;  %v12911_v47 = vld [vmem:[%s25953_s18 + $0x420] sm:$0xff]  ;;  %v12908_v33 = vld [vmem:[%s25953_s18 + $0x408] sm:$0xff] }
0x11bb   : > { %v16512_v59 = vcombine.low %v12907_v50, %v12911_v47 }
0x11bd   : > { %14374 = vmatpush1.bf16.msra.mxu1 %v16448_v6  ;;  %14456 = vmatpush1.bf16.msra.mxu0 %v16450_v57  ;;  %v16513_v6 = vcombine.high %v12907_v50, %v12911_v47  ;;  %v16514_v57 = vcombine.low %v12908_v33, %v12912_v12 }
0x11be   : > { %14375 = vmatprep.subr.bf16.mxu1 %v16457_v9  ;;  %14457 = vmatprep.subr.bf16.mxu0 %v16459_v40  ;;  %v16515_v9 = vcombine.high %v12908_v33, %v12912_v12  ;;  %v25315_v40 = vld [vmem:[#allocation12] sm:$0xf]  ;;  %v12952_v12 = vld [vmem:[%s25953_s18 + $0x568] sm:$0xff] }
0x11bf   : > { %v12590_v10 = vrot.slane %v25315_v40, %v24898_v34  ;;  %v12594_v48 = vrot.slane %v25315_v40, %v24906_v29  ;;  %v12602_v17 = vrot.slane %v25315_v40, %v24909_v61  ;;  %v12947_v33 = vld [vmem:[%s25953_s18 + $0x540] sm:$0xff] }
0x11c1   : > { %14376 = vmatpush1.bf16.msra.mxu1 %v16456_v44  ;;  %14458 = vmatpush1.bf16.msra.mxu0 %v16458_v53 }
0x11c2   : > { %14377 = vmatprep.subr.bf16.mxu1 %v16465_v63  ;;  %14459 = vmatprep.subr.bf16.mxu0 %v16467_v14 }
0x11c5   : > { %14378 = vmatpush1.bf16.msra.mxu1 %v16464_v32  ;;  %14460 = vmatpush1.bf16.msra.mxu0 %v16466_v30 }
0x11c6   : > { %14379 = vmatprep.subr.bf16.mxu1 %v16473_v3  ;;  %14461 = vmatprep.subr.bf16.mxu0 %v16475_v55 }
0x11c9   : > { %14380 = vmatpush1.bf16.msra.mxu1 %v16472_v35  ;;  %14462 = vmatpush1.bf16.msra.mxu0 %v16474_v21  ;;  %v12920_v35 = vld [vmem:[%s25953_s18 + $0x468] sm:$0xff] }
0x11ca   : > { %14381 = vmatprep.subr.bf16.mxu1 %v16481_v28  ;;  %14463 = vmatprep.subr.bf16.mxu0 %v16483_v8  ;;  %v12923_v8 = vld [vmem:[%s25953_s18 + $0x480] sm:$0xff]  ;;  %v16523_v27 = vcombine.high %v12916_v24, %v12920_v35 }
0x11cd   : > { %14382 = vmatpush1.bf16.msra.mxu1 %v16480_v38  ;;  %14464 = vmatpush1.bf16.msra.mxu0 %v16482_v41  ;;  %v12928_v38 = vld [vmem:[%s25953_s18 + $0x4a8] sm:$0xff] }
0x11ce   : > { %14383 = vmatprep.subr.bf16.mxu1 %v16489_v22  ;;  %14465 = vmatprep.subr.bf16.mxu0 %v16491_v36  ;;  %v16520_v22 = vcombine.low %v12915_v26, %v12919_v62  ;;  %v16522_v36 = vcombine.low %v12916_v24, %v12920_v35  ;;  %v16530_v5 = vcombine.low %v12924_v31, %v12928_v38  ;;  %v12975_v62 = vld [vmem:[%s25953_s18 + $0x620] sm:$0xff]  ;;  %v12972_v24 = vld [vmem:[%s25953_s18 + $0x608] sm:$0xff] }
0x11cf   : > { %v12976_v35 = vld [vmem:[%s25953_s18 + $0x628] sm:$0xff] }
0x11d1   : > { %14384 = vmatpush1.bf16.msra.mxu1 %v16488_v49  ;;  %14466 = vmatpush1.bf16.msra.mxu0 %v16490_v0  ;;  %v16529_v49 = vcombine.high %v12923_v8, %v12927_v37  ;;  %v16531_v0 = vcombine.high %v12924_v31, %v12928_v38  ;;  %v12979_v31 = vld [vmem:[%s25953_s18 + $0x640] sm:$0xff] }
0x11d2   : > { %14385 = vmatprep.subr.bf16.mxu1 %v16497_v60  ;;  %14467 = vmatprep.subr.bf16.mxu0 %v16499_v58  ;;  %v16528_v60 = vcombine.low %v12923_v8, %v12927_v37  ;;  %v12943_v58 = vld [vmem:[%s25953_s18 + $0x520] sm:$0xff]  ;;  %v16579_v37 = vcombine.high %v12972_v24, %v12976_v35 }
0x11d3   : > { %v12983_v38 = vld [vmem:[%s25953_s18 + $0x660] sm:$0xff] }
0x11d4   : > { %v16585_v39 = vcombine.high %v12979_v31, %v12983_v38 }
0x11d5   : > { %14386 = vmatpush1.bf16.msra.mxu1 %v16496_v45  ;;  %14468 = vmatpush1.bf16.msra.mxu0 %v16498_v7  ;;  %v12936_v45 = vld [vmem:[%s25953_s18 + $0x4e8] sm:$0xff]  ;;  %v12939_v7 = vld [vmem:[%s25953_s18 + $0x500] sm:$0xff] }
0x11d6   : > { %14387 = vmatprep.subr.bf16.mxu1 %v16505_v13  ;;  %14469 = vmatprep.subr.bf16.mxu0 %v16507_v11  ;;  %v16539_v16 = vcombine.high %v12932_v1, %v12936_v45  ;;  %v12940_v13 = vld [vmem:[%s25953_s18 + $0x508] sm:$0xff]  ;;  %v16538_v11 = vcombine.low %v12932_v1, %v12936_v45  ;;  %v16545_v50 = vcombine.high %v12939_v7, %v12943_v58  ;;  %v12987_v1 = vld [vmem:[%s25953_s18 + $0x680] sm:$0xff] }
0x11d7   : > { %v16547_v47 = vcombine.high %v12940_v13, %v12944_v25  ;;  %v12991_v45 = vld [vmem:[%s25953_s18 + $0x6a0] sm:$0xff] }
0x11d9   : > { %14388 = vmatpush1.bf16.msra.mxu1 %v16504_v51  ;;  %14470 = vmatpush1.bf16.msra.mxu0 %v16506_v42  ;;  %v12951_v51 = vld [vmem:[%s25953_s18 + $0x560] sm:$0xff]  ;;  %v16544_v42 = vcombine.low %v12939_v7, %v12943_v58  ;;  %v16593_v7 = vcombine.high %v12987_v1, %v12991_v45 }
0x11da   : > { %14398 = vmatprep.subr.bf16.mxu1 %v16513_v6  ;;  %14480 = vmatprep.subr.bf16.mxu0 %v16515_v9  ;;  %v16546_v6 = vcombine.low %v12940_v13, %v12944_v25  ;;  %v12995_v13 = vld [vmem:[%s25953_s18 + $0x6c0] sm:$0xff] }
0x11db   : > { %v12999_v25 = vld [vmem:[%s25953_s18 + $0x6e0] sm:$0xff] }
0x126f   : > { %v12682_v20 = vpop.f32.mrb[108].mxu1  ;;  %v25323_v44 = vpop.f32.mrb[156].mxu0 }
0x1270   : > { %v18968_v53 = vadd.f32 %v12682_v20, %v12590_v10  ;;  %v12684_v63 = vpop.f32.mrb[109].mxu1  ;;  %v12766_v14 = vpop.f32.mrb[157].mxu0  ;;  %v12955_v10 = vld [vmem:[%s25953_s18 + $0x580] sm:$0xff]  ;;  %v12960_v20 = vld [vmem:[%s25953_s18 + $0x5a8] sm:$0xff] }
0x1271   : > { %v18969_v46 = vadd.f32 %v12684_v63, %v12594_v48  ;;  %v18971_v18 = vadd.f32 %v12766_v14, %v12602_v17  ;;  %v12686_v23 = vpop.f32.mrb[110].mxu1  ;;  %v12768_v19 = vpop.f32.mrb[158].mxu0  ;;  %v12959_v48 = vld [vmem:[%s25953_s18 + $0x5a0] sm:$0xff]  ;;  %v12956_v17 = vld [vmem:[%s25953_s18 + $0x588] sm:$0xff] }
0x1272   : > { %v12771_v32 = vmax.f32 %v18968_v53, 0.0  ;;  %v12687_v30 = vpop.f32.mrb[111].mxu1  ;;  %v12769_v3 = vpop.f32.mrb[159].mxu0  ;;  %v16552_v53 = vcombine.low %v12947_v33, %v12951_v51  ;;  %v16561_v14 = vcombine.high %v12955_v10, %v12959_v48  ;;  %v12967_v23 = vld [vmem:[%s25953_s18 + $0x5e0] sm:$0xff]  ;;  %v12964_v19 = vld [vmem:[%s25953_s18 + $0x5c8] sm:$0xff] }
0x1273   : > { %v12772_v55 = vmax.f32 %v18969_v46, 0.0  ;;  %v12774_v54 = vmax.f32 %v18971_v18, 0.0  ;;  %v16563_v46 = vcombine.high %v12956_v17, %v12960_v20  ;;  %v12963_v18 = vld [vmem:[%s25953_s18 + $0x5c0] sm:$0xff]  ;;  %v16560_v30 = vcombine.low %v12955_v10, %v12959_v48 }
0x1274   : > { %v25339_v28 = vpack.c.bf16 %v12771_v32, %v12771_v32  ;;  %v12968_v32 = vld [vmem:[%s25953_s18 + $0x5e8] sm:$0xff]  ;;  %v16562_v3 = vcombine.low %v12956_v17, %v12960_v20  ;;  %v16568_v8 = vcombine.low %v12963_v18, %v12967_v23  ;;  %v13011_v17 = vld [vmem:[%s25953_s18 + $0x740] sm:$0xff] }
0x1275   : > { %v25337_v21 = vpack.c.bf16 %v12772_v55, %v12772_v55  ;;  %v25355_v41 = vpack.c.bf16 %v12774_v54, %v12774_v54  ;;  %v16569_v55 = vcombine.high %v12963_v18, %v12967_v23  ;;  %v16571_v26 = vcombine.high %v12964_v19, %v12968_v32  ;;  %v12971_v54 = vld [vmem:[%s25953_s18 + $0x600] sm:$0xff] }
0x1276   : > { %v13015_v20 = vld [vmem:[%s25953_s18 + $0x760] sm:$0xff] }
0x1277   : > { %14389 = vmatprep.mubr.bf16.mxu1 %v25337_v21  ;;  %14471 = vmatprep.mubr.bf16.mxu0 %v25337_v21  ;;  %v16617_v18 = vcombine.high %v13011_v17, %v13015_v20 }
0x1278   : > { %14390 = vmatmul.mubr.bf16.vlgmr.msra.gmra.mrb[112].mxu1 %v25339_v28  ;;  %14472 = vmatmul.mubr.bf16.vlgmr.msra.gmra.mrb[160].mxu0 %v25339_v28 }
0x1279   : > { %14399 = vmatpush1.bf16.msra.mxu1 %v16512_v59  ;;  %14481 = vmatpush1.bf16.msra.mxu0 %v16514_v57  ;;  %v12948_v59 = vld [vmem:[%s25953_s18 + $0x548] sm:$0xff]  ;;  %v16553_v57 = vcombine.high %v12947_v33, %v12951_v51  ;;  %v16601_v33 = vcombine.high %v12995_v13, %v12999_v25 }
0x127a   : > { %14430 = vmatprep.mubr.bf16.mxu1 %v25355_v41  ;;  %14512 = vmatprep.mubr.bf16.mxu0 %v25355_v41  ;;  %v16555_v9 = vcombine.high %v12948_v59, %v12952_v12  ;;  %v16554_v63 = vcombine.low %v12948_v59, %v12952_v12  ;;  %v13003_v59 = vld [vmem:[%s25953_s18 + $0x700] sm:$0xff] }
0x127b   : > { %14400 = vmatprep.subr.bf16.mxu1 %v16521_v4  ;;  %14482 = vmatprep.subr.bf16.mxu0 %v16523_v27  ;;  %v16570_v4 = vcombine.low %v12964_v19, %v12968_v32  ;;  %v16577_v27 = vcombine.high %v12971_v54, %v12975_v62  ;;  %v13007_v12 = vld [vmem:[%s25953_s18 + $0x720] sm:$0xff] }
0x127c   : > { %v16609_v10 = vcombine.high %v13003_v59, %v13007_v12  ;;  %v13019_v19 = vld [vmem:[%s25953_s18 + $0x780] sm:$0xff] }
0x127d   : > { %14401 = vmatpush1.bf16.msra.mxu1 %v16520_v22  ;;  %14483 = vmatpush1.bf16.msra.mxu0 %v16522_v36  ;;  %v12980_v22 = vld [vmem:[%s25953_s18 + $0x648] sm:$0xff]  ;;  %v13023_v32 = vld [vmem:[%s25953_s18 + $0x7a0] sm:$0xff] }
0x127e   : > { %14402 = vmatprep.subr.bf16.mxu1 %v16529_v49  ;;  %14484 = vmatprep.subr.bf16.mxu0 %v16531_v0  ;;  %v12984_v36 = vld [vmem:[%s25953_s18 + $0x668] sm:$0xff]  ;;  %v16576_v49 = vcombine.low %v12971_v54, %v12975_v62  ;;  %v16578_v0 = vcombine.low %v12972_v24, %v12976_v35  ;;  %v12598_v54 = vrot.slane %v25315_v40, %v25070_v56  ;;  %v13027_v35 = vld [vmem:[%s25953_s18 + $0x7c0] sm:$0xff] }
0x127f   : > { %v16587_v15 = vcombine.high %v12980_v22, %v12984_v36  ;;  %v16625_v62 = vcombine.high %v13019_v19, %v13023_v32  ;;  %v13032_v40 = vld [vmem:[%s25953_s18 + $0x7e8] sm:$0xff] }
0x1281   : > { %14403 = vmatpush1.bf16.msra.mxu1 %v16528_v60  ;;  %14485 = vmatpush1.bf16.msra.mxu0 %v16530_v5  ;;  %v12988_v60 = vld [vmem:[%s25953_s18 + $0x688] sm:$0xff] }
0x1282   : > { %14404 = vmatprep.subr.bf16.mxu1 %v16537_v52  ;;  %14486 = vmatprep.subr.bf16.mxu0 %v16539_v16  ;;  %v12992_v5 = vld [vmem:[%s25953_s18 + $0x6a8] sm:$0xff]  ;;  %v16584_v52 = vcombine.low %v12979_v31, %v12983_v38  ;;  %v16586_v16 = vcombine.low %v12980_v22, %v12984_v36  ;;  %v18970_v31 = vadd.f32 %v25323_v44, %v12598_v54  ;;  %v12781_v36 = vld [vmem:[%s25953_s18 + $0x10] sm:$0xff]  ;;  %v12786_v44 = vld [vmem:[%s25953_s18 + $0x38] sm:$0xff] }
0x1283   : > { %v16595_v58 = vcombine.high %v12988_v60, %v12992_v5  ;;  %v12826_v54 = vld [vmem:[%s25953_s18 + $0x178] sm:$0xff] }
0x1285   : > { %14405 = vmatpush1.bf16.msra.mxu1 %v16536_v43  ;;  %14487 = vmatpush1.bf16.msra.mxu0 %v16538_v11  ;;  %v12996_v43 = vld [vmem:[%s25953_s18 + $0x6c8] sm:$0xff] }
0x1286   : > { %14406 = vmatprep.subr.bf16.mxu1 %v16545_v50  ;;  %14488 = vmatprep.subr.bf16.mxu0 %v16547_v47  ;;  %v13000_v11 = vld [vmem:[%s25953_s18 + $0x6e8] sm:$0xff]  ;;  %v16592_v50 = vcombine.low %v12987_v1, %v12991_v45  ;;  %v16594_v47 = vcombine.low %v12988_v60, %v12992_v5  ;;  %v12773_v1 = vmax.f32 %v18970_v31, 0.0  ;;  %v12789_v5 = vld [vmem:[%s25953_s18 + $0x50] sm:$0xff] }
0x1287   : > { %v16603_v51 = vcombine.high %v12996_v43, %v13000_v11 }
0x1289   : > { %14407 = vmatpush1.bf16.msra.mxu1 %v16544_v42  ;;  %14489 = vmatpush1.bf16.msra.mxu0 %v16546_v6  ;;  %v13004_v42 = vld [vmem:[%s25953_s18 + $0x708] sm:$0xff] }
0x128a   : > { %14408 = vmatprep.subr.bf16.mxu1 %v16553_v57  ;;  %14490 = vmatprep.subr.bf16.mxu0 %v16555_v9  ;;  %v13008_v6 = vld [vmem:[%s25953_s18 + $0x728] sm:$0xff]  ;;  %v16600_v57 = vcombine.low %v12995_v13, %v12999_v25  ;;  %v16602_v9 = vcombine.low %v12996_v43, %v13000_v11  ;;  %v25544_v13 = vpack.c.bf16 %v12773_v1, %v12773_v1 }
0x128b   : > { %v16611_v48 = vcombine.high %v13004_v42, %v13008_v6 }
0x128d   : > { %14409 = vmatpush1.bf16.msra.mxu1 %v16552_v53  ;;  %14491 = vmatpush1.bf16.msra.mxu0 %v16554_v63  ;;  %v13012_v53 = vld [vmem:[%s25953_s18 + $0x748] sm:$0xff] }
0x128e   : > { %14410 = vmatprep.subr.bf16.mxu1 %v16561_v14  ;;  %14492 = vmatprep.subr.bf16.mxu0 %v16563_v46  ;;  %v13016_v63 = vld [vmem:[%s25953_s18 + $0x768] sm:$0xff]  ;;  %v16608_v14 = vcombine.low %v13003_v59, %v13007_v12  ;;  %v16610_v46 = vcombine.low %v13004_v42, %v13008_v6 }
0x128f   : > { %v16619_v23 = vcombine.high %v13012_v53, %v13016_v63 }
0x1291   : > { %14411 = vmatpush1.bf16.msra.mxu1 %v16560_v30  ;;  %14493 = vmatpush1.bf16.msra.mxu0 %v16562_v3  ;;  %v13020_v30 = vld [vmem:[%s25953_s18 + $0x788] sm:$0xff] }
0x1292   : > { %14412 = vmatprep.subr.bf16.mxu1 %v16569_v55  ;;  %14494 = vmatprep.subr.bf16.mxu0 %v16571_v26  ;;  %v13024_v3 = vld [vmem:[%s25953_s18 + $0x7a8] sm:$0xff]  ;;  %v16616_v55 = vcombine.low %v13011_v17, %v13015_v20  ;;  %v16618_v26 = vcombine.low %v13012_v53, %v13016_v63  ;;  %v12813_v63 = vld [vmem:[%s25953_s18 + $0x110] sm:$0xff] }
0x1293   : > { %v16627_v24 = vcombine.high %v13020_v30, %v13024_v3 }
0x1295   : > { %14413 = vmatpush1.bf16.msra.mxu1 %v16568_v8  ;;  %14495 = vmatpush1.bf16.msra.mxu0 %v16570_v4  ;;  %v13031_v8 = vld [vmem:[%s25953_s18 + $0x7e0] sm:$0xff]  ;;  %v13028_v4 = vld [vmem:[%s25953_s18 + $0x7c8] sm:$0xff] }
0x1296   : > { %14414 = vmatprep.subr.bf16.mxu1 %v16577_v27  ;;  %14496 = vmatprep.subr.bf16.mxu0 %v16579_v37  ;;  %v16624_v27 = vcombine.low %v13019_v19, %v13023_v32  ;;  %v16626_v37 = vcombine.low %v13020_v30, %v13024_v3  ;;  %v16633_v38 = vcombine.high %v13027_v35, %v13031_v8  ;;  %v12821_v3 = vld [vmem:[%s25953_s18 + $0x150] sm:$0xff] }
0x1297   : > { %v16635_v22 = vcombine.high %v13028_v4, %v13032_v40 }
0x1299   : > { %14415 = vmatpush1.bf16.msra.mxu1 %v16576_v49  ;;  %14497 = vmatpush1.bf16.msra.mxu0 %v16578_v0  ;;  %v12785_v49 = vld [vmem:[%s25953_s18 + $0x30] sm:$0xff]  ;;  %v12782_v0 = vld [vmem:[%s25953_s18 + $0x18] sm:$0xff] }
0x129a   : > { %14416 = vmatprep.subr.bf16.mxu1 %v16585_v39  ;;  %14498 = vmatprep.subr.bf16.mxu0 %v16587_v15  ;;  %v16632_v39 = vcombine.low %v13027_v35, %v13031_v8  ;;  %v16634_v15 = vcombine.low %v13028_v4, %v13032_v40  ;;  %v16389_v45 = vcombine.high %v12781_v36, %v12785_v49  ;;  %v12829_v4 = vld [vmem:[%s25953_s18 + $0x190] sm:$0xff] }
0x129b   : > { %v16391_v60 = vcombine.high %v12782_v0, %v12786_v44  ;;  %v16390_v25 = vcombine.low %v12782_v0, %v12786_v44  ;;  %v12833_v40 = vld [vmem:[%s25953_s18 + $0x1b0] sm:$0xff]  ;;  %v12838_v44 = vld [vmem:[%s25953_s18 + $0x1d8] sm:$0xff] }
0x129c   : > { %v12841_v0 = vld [vmem:[%s25953_s18 + $0x1f0] sm:$0xff] }
0x129d   : > { %14417 = vmatpush1.bf16.msra.mxu1 %v16584_v52  ;;  %14499 = vmatpush1.bf16.msra.mxu0 %v16586_v16  ;;  %v12793_v52 = vld [vmem:[%s25953_s18 + $0x70] sm:$0xff]  ;;  %v12790_v16 = vld [vmem:[%s25953_s18 + $0x58] sm:$0xff] }
0x129e   : > { %14418 = vmatprep.subr.bf16.mxu1 %v16593_v7  ;;  %14500 = vmatprep.subr.bf16.mxu0 %v16595_v58  ;;  %v12794_v7 = vld [vmem:[%s25953_s18 + $0x78] sm:$0xff]  ;;  %v16388_v58 = vcombine.low %v12781_v36, %v12785_v49  ;;  %v16397_v43 = vcombine.high %v12789_v5, %v12793_v52  ;;  %v16396_v59 = vcombine.low %v12789_v5, %v12793_v52  ;;  %v12837_v49 = vld [vmem:[%s25953_s18 + $0x1d0] sm:$0xff] }
0x129f   : > { %v16399_v11 = vcombine.high %v12790_v16, %v12794_v7  ;;  %v16398_v12 = vcombine.low %v12790_v16, %v12794_v7  ;;  %v12845_v5 = vld [vmem:[%s25953_s18 + $0x210] sm:$0xff]  ;;  %v12846_v16 = vld [vmem:[%s25953_s18 + $0x218] sm:$0xff] }
0x12a0   : > { %v12849_v52 = vld [vmem:[%s25953_s18 + $0x230] sm:$0xff]  ;;  %v12850_v7 = vld [vmem:[%s25953_s18 + $0x238] sm:$0xff] }
0x12a1   : > { %14419 = vmatpush1.bf16.msra.mxu1 %v16592_v50  ;;  %14501 = vmatpush1.bf16.msra.mxu0 %v16594_v47  ;;  %v12797_v50 = vld [vmem:[%s25953_s18 + $0x90] sm:$0xff] }
0x12a2   : > { %14420 = vmatprep.subr.bf16.mxu1 %v16601_v33  ;;  %14502 = vmatprep.subr.bf16.mxu0 %v16603_v51  ;;  %v12801_v47 = vld [vmem:[%s25953_s18 + $0xb0] sm:$0xff]  ;;  %v12798_v33 = vld [vmem:[%s25953_s18 + $0x98] sm:$0xff] }
0x12a3   : > { %v12802_v51 = vld [vmem:[%s25953_s18 + $0xb8] sm:$0xff]  ;;  %v16405_v42 = vcombine.high %v12797_v50, %v12801_v47 }
0x12a4   : > { %v16407_v6 = vcombine.high %v12798_v33, %v12802_v51  ;;  %v16406_v17 = vcombine.low %v12798_v33, %v12802_v51  ;;  %v12854_v33 = vld [vmem:[%s25953_s18 + $0x258] sm:$0xff] }
0x12a5   : > { %14421 = vmatpush1.bf16.msra.mxu1 %v16600_v57  ;;  %14503 = vmatpush1.bf16.msra.mxu0 %v16602_v9  ;;  %v12805_v57 = vld [vmem:[%s25953_s18 + $0xd0] sm:$0xff]  ;;  %v12858_v51 = vld [vmem:[%s25953_s18 + $0x278] sm:$0xff] }
0x12a6   : > { %14422 = vmatprep.subr.bf16.mxu1 %v16609_v10  ;;  %14504 = vmatprep.subr.bf16.mxu0 %v16611_v48  ;;  %v12809_v9 = vld [vmem:[%s25953_s18 + $0xf0] sm:$0xff]  ;;  %v12806_v10 = vld [vmem:[%s25953_s18 + $0xd8] sm:$0xff]  ;;  %v16404_v48 = vcombine.low %v12797_v50, %v12801_v47 }
0x12a7   : > { %v16413_v20 = vcombine.high %v12805_v57, %v12809_v9  ;;  %v12853_v50 = vld [vmem:[%s25953_s18 + $0x250] sm:$0xff] }
0x12a8   : > { %v12857_v47 = vld [vmem:[%s25953_s18 + $0x270] sm:$0xff] }
0x12a9   : > { %14423 = vmatpush1.bf16.msra.mxu1 %v16608_v14  ;;  %14505 = vmatpush1.bf16.msra.mxu0 %v16610_v46  ;;  %v12817_v14 = vld [vmem:[%s25953_s18 + $0x130] sm:$0xff]  ;;  %v12814_v46 = vld [vmem:[%s25953_s18 + $0x118] sm:$0xff] }
0x12aa   : > { %14424 = vmatprep.subr.bf16.mxu1 %v16617_v18  ;;  %14506 = vmatprep.subr.bf16.mxu0 %v16619_v23  ;;  %v12818_v18 = vld [vmem:[%s25953_s18 + $0x138] sm:$0xff]  ;;  %v16412_v23 = vcombine.low %v12805_v57, %v12809_v9  ;;  %v16421_v32 = vcombine.high %v12813_v63, %v12817_v14  ;;  %v12861_v57 = vld [vmem:[%s25953_s18 + $0x290] sm:$0xff] }
0x12ab   : > { %v16423_v30 = vcombine.high %v12814_v46, %v12818_v18  ;;  %v12865_v9 = vld [vmem:[%s25953_s18 + $0x2b0] sm:$0xff] }
0x12ad   : > { %14425 = vmatpush1.bf16.msra.mxu1 %v16616_v55  ;;  %14507 = vmatpush1.bf16.msra.mxu0 %v16618_v26  ;;  %v12825_v55 = vld [vmem:[%s25953_s18 + $0x170] sm:$0xff]  ;;  %v12822_v26 = vld [vmem:[%s25953_s18 + $0x158] sm:$0xff] }
0x12ae   : > { %14426 = vmatprep.subr.bf16.mxu1 %v16625_v62  ;;  %14508 = vmatprep.subr.bf16.mxu0 %v16627_v24  ;;  %v16420_v62 = vcombine.low %v12813_v63, %v12817_v14  ;;  %v16422_v24 = vcombine.low %v12814_v46, %v12818_v18  ;;  %v16429_v35 = vcombine.high %v12821_v3, %v12825_v55  ;;  %v12869_v63 = vld [vmem:[%s25953_s18 + $0x2d0] sm:$0xff]  ;;  %v12870_v46 = vld [vmem:[%s25953_s18 + $0x2d8] sm:$0xff] }
0x12af   : > { %v16431_v8 = vcombine.high %v12822_v26, %v12826_v54  ;;  %v16428_v31 = vcombine.low %v12821_v3, %v12825_v55  ;;  %v12873_v14 = vld [vmem:[%s25953_s18 + $0x2f0] sm:$0xff]  ;;  %v12874_v18 = vld [vmem:[%s25953_s18 + $0x2f8] sm:$0xff] }
0x12b0   : > { %v12877_v3 = vld [vmem:[%s25953_s18 + $0x310] sm:$0xff] }
0x12b1   : > { %14427 = vmatpush1.bf16.msra.mxu1 %v16624_v27  ;;  %14509 = vmatpush1.bf16.msra.mxu0 %v16626_v37  ;;  %v12830_v27 = vld [vmem:[%s25953_s18 + $0x198] sm:$0xff]  ;;  %v12881_v55 = vld [vmem:[%s25953_s18 + $0x330] sm:$0xff] }
0x12b2   : > { %14428 = vmatprep.subr.bf16.mxu1 %v16633_v38  ;;  %14510 = vmatprep.subr.bf16.mxu0 %v16635_v22  ;;  %v12834_v37 = vld [vmem:[%s25953_s18 + $0x1b8] sm:$0xff]  ;;  %v16430_v38 = vcombine.low %v12822_v26, %v12826_v54  ;;  %v16437_v22 = vcombine.high %v12829_v4, %v12833_v40 }
0x12b3   : > { %v16439_v36 = vcombine.high %v12830_v27, %v12834_v37  ;;  %v16438_v1 = vcombine.low %v12830_v27, %v12834_v37  ;;  %v12878_v26 = vld [vmem:[%s25953_s18 + $0x318] sm:$0xff] }
0x12b4   : > { %v12882_v54 = vld [vmem:[%s25953_s18 + $0x338] sm:$0xff] }
0x12b5   : > { %14429 = vmatpush1.bf16.msra.mxu1 %v16632_v39  ;;  %14511 = vmatpush1.bf16.msra.mxu0 %v16634_v15  ;;  %v12842_v39 = vld [vmem:[%s25953_s18 + $0x1f8] sm:$0xff]  ;;  %v16436_v15 = vcombine.low %v12829_v4, %v12833_v40  ;;  %v12885_v4 = vld [vmem:[%s25953_s18 + $0x350] sm:$0xff] }
0x12b6   : > { %14521 = vmatprep.subr.bf16.mxu1 %v16389_v45  ;;  %14603 = vmatprep.subr.bf16.mxu0 %v16391_v60  ;;  %v16445_v45 = vcombine.high %v12837_v49, %v12841_v0  ;;  %v16447_v60 = vcombine.high %v12838_v44, %v12842_v39  ;;  %v12889_v40 = vld [vmem:[%s25953_s18 + $0x370] sm:$0xff]  ;;  %v12886_v27 = vld [vmem:[%s25953_s18 + $0x358] sm:$0xff] }
0x12b7   : > { %v12890_v37 = vld [vmem:[%s25953_s18 + $0x378] sm:$0xff] }
0x12b8   : > { %14431 = vmatmul.mubr.bf16.vlgmr.msra.gmra.mrb[112].mxu1 %v25544_v13  ;;  %14513 = vmatmul.mubr.bf16.vlgmr.msra.gmra.mrb[160].mxu0 %v25544_v13 }
0x12b9   : > { %14522 = vmatpush1.bf16.msra.mxu1 %v16388_v58  ;;  %14553 = vmatprep.mubr.bf16.mxu1 %v25337_v21  ;;  %v16444_v58 = vcombine.low %v12837_v49, %v12841_v0  ;;  %v12893_v49 = vld [vmem:[%s25953_s18 + $0x390] sm:$0xff] }
0x12ba   : > { %14604 = vmatpush1.bf16.msra.mxu0 %v16390_v25  ;;  %14635 = vmatprep.mubr.bf16.mxu0 %v25337_v21  ;;  %v12810_v21 = vld [vmem:[%s25953_s18 + $0xf8] sm:$0xff]  ;;  %v16446_v25 = vcombine.low %v12838_v44, %v12842_v39  ;;  %v12897_v0 = vld [vmem:[%s25953_s18 + $0x3b0] sm:$0xff] }
0x12bb   : > { %14523 = vmatprep.subr.bf16.mxu1 %v16397_v43  ;;  %14605 = vmatprep.subr.bf16.mxu0 %v16399_v11  ;;  %v16415_v53 = vcombine.high %v12806_v10, %v12810_v21  ;;  %v16414_v19 = vcombine.low %v12806_v10, %v12810_v21  ;;  %v16453_v43 = vcombine.high %v12845_v5, %v12849_v52  ;;  %v12862_v10 = vld [vmem:[%s25953_s18 + $0x298] sm:$0xff] }
0x12bc   : > { %v16455_v11 = vcombine.high %v12846_v16, %v12850_v7  ;;  %v12866_v21 = vld [vmem:[%s25953_s18 + $0x2b8] sm:$0xff] }
0x12bd   : > { %14524 = vmatpush1.bf16.msra.mxu1 %v16396_v59  ;;  %v16452_v59 = vcombine.low %v12845_v5, %v12849_v52  ;;  %v12894_v44 = vld [vmem:[%s25953_s18 + $0x398] sm:$0xff]  ;;  %v12901_v5 = vld [vmem:[%s25953_s18 + $0x3d0] sm:$0xff] }
0x12be   : > { %14606 = vmatpush1.bf16.msra.mxu0 %v16398_v12  ;;  %14525 = vmatprep.subr.bf16.mxu1 %v16405_v42  ;;  %v16454_v12 = vcombine.low %v12846_v16, %v12850_v7  ;;  %v16461_v42 = vcombine.high %v12853_v50, %v12857_v47  ;;  %v12898_v39 = vld [vmem:[%s25953_s18 + $0x3b8] sm:$0xff]  ;;  %v12905_v52 = vld [vmem:[%s25953_s18 + $0x3f0] sm:$0xff] }
0x12bf   : > { %14607 = vmatprep.subr.bf16.mxu0 %v16407_v6  ;;  %v16463_v6 = vcombine.high %v12854_v33, %v12858_v51  ;;  %v12902_v16 = vld [vmem:[%s25953_s18 + $0x3d8] sm:$0xff] }
0x12c0   : > { %v12906_v7 = vld [vmem:[%s25953_s18 + $0x3f8] sm:$0xff] }
0x12c1   : > { %14526 = vmatpush1.bf16.msra.mxu1 %v16404_v48  ;;  %v16460_v48 = vcombine.low %v12853_v50, %v12857_v47  ;;  %v12909_v50 = vld [vmem:[%s25953_s18 + $0x410] sm:$0xff] }
0x12c2   : > { %14608 = vmatpush1.bf16.msra.mxu0 %v16406_v17  ;;  %14527 = vmatprep.subr.bf16.mxu1 %v16413_v20  ;;  %v16462_v17 = vcombine.low %v12854_v33, %v12858_v51  ;;  %v16469_v20 = vcombine.high %v12861_v57, %v12865_v9  ;;  %v12913_v47 = vld [vmem:[%s25953_s18 + $0x430] sm:$0xff]  ;;  %v12910_v33 = vld [vmem:[%s25953_s18 + $0x418] sm:$0xff] }
0x12c3   : > { %14609 = vmatprep.subr.bf16.mxu0 %v16415_v53  ;;  %v16471_v53 = vcombine.high %v12862_v10, %v12866_v21  ;;  %v12914_v51 = vld [vmem:[%s25953_s18 + $0x438] sm:$0xff] }
0x12c5   : > { %14528 = vmatpush1.bf16.msra.mxu1 %v16412_v23  ;;  %v16468_v23 = vcombine.low %v12861_v57, %v12865_v9  ;;  %v12917_v57 = vld [vmem:[%s25953_s18 + $0x450] sm:$0xff] }
0x12c6   : > { %14610 = vmatpush1.bf16.msra.mxu0 %v16414_v19  ;;  %14529 = vmatprep.subr.bf16.mxu1 %v16421_v32  ;;  %v16470_v19 = vcombine.low %v12862_v10, %v12866_v21  ;;  %v16477_v32 = vcombine.high %v12869_v63, %v12873_v14  ;;  %v12921_v9 = vld [vmem:[%s25953_s18 + $0x470] sm:$0xff]  ;;  %v16516_v10 = vcombine.low %v12909_v50, %v12913_v47  ;;  %v12918_v21 = vld [vmem:[%s25953_s18 + $0x458] sm:$0xff] }
0x12c7   : > { %14611 = vmatprep.subr.bf16.mxu0 %v16423_v30  ;;  %v16479_v30 = vcombine.high %v12870_v46, %v12874_v18 }
0x12c9   : > { %14530 = vmatpush1.bf16.msra.mxu1 %v16420_v62  ;;  %v16476_v62 = vcombine.low %v12869_v63, %v12873_v14  ;;  %v12929_v63 = vld [vmem:[%s25953_s18 + $0x4b0] sm:$0xff] }
0x12ca   : > { %14612 = vmatpush1.bf16.msra.mxu0 %v16422_v24  ;;  %14531 = vmatprep.subr.bf16.mxu1 %v16429_v35  ;;  %v16478_v24 = vcombine.low %v12870_v46, %v12874_v18  ;;  %v16485_v35 = vcombine.high %v12877_v3, %v12881_v55  ;;  %v12926_v46 = vld [vmem:[%s25953_s18 + $0x498] sm:$0xff] }
0x12cb   : > { %14613 = vmatprep.subr.bf16.mxu0 %v16431_v8  ;;  %v16487_v8 = vcombine.high %v12878_v26, %v12882_v54  ;;  %v12930_v18 = vld [vmem:[%s25953_s18 + $0x4b8] sm:$0xff] }
0x12cd   : > { %14532 = vmatpush1.bf16.msra.mxu1 %v16428_v31  ;;  %v16484_v31 = vcombine.low %v12877_v3, %v12881_v55  ;;  %v12933_v3 = vld [vmem:[%s25953_s18 + $0x4d0] sm:$0xff] }
0x12ce   : > { %14614 = vmatpush1.bf16.msra.mxu0 %v16430_v38  ;;  %14533 = vmatprep.subr.bf16.mxu1 %v16437_v22  ;;  %v16486_v38 = vcombine.low %v12878_v26, %v12882_v54  ;;  %v16493_v22 = vcombine.high %v12885_v4, %v12889_v40  ;;  %v12937_v55 = vld [vmem:[%s25953_s18 + $0x4f0] sm:$0xff]  ;;  %v12938_v26 = vld [vmem:[%s25953_s18 + $0x4f8] sm:$0xff]  ;;  %v16534_v54 = vcombine.low %v12926_v46, %v12930_v18 }
0x12cf   : > { %14615 = vmatprep.subr.bf16.mxu0 %v16439_v36  ;;  %v16495_v36 = vcombine.high %v12886_v27, %v12890_v37 }
0x12d1   : > { %14534 = vmatpush1.bf16.msra.mxu1 %v16436_v15  ;;  %v16492_v15 = vcombine.low %v12885_v4, %v12889_v40  ;;  %v12942_v4 = vld [vmem:[%s25953_s18 + $0x518] sm:$0xff] }
0x12d2   : > { %14616 = vmatpush1.bf16.msra.mxu0 %v16438_v1  ;;  %14535 = vmatprep.subr.bf16.mxu1 %v16445_v45  ;;  %v16494_v1 = vcombine.low %v12886_v27, %v12890_v37  ;;  %v16501_v45 = vcombine.high %v12893_v49, %v12897_v0  ;;  %v12946_v40 = vld [vmem:[%s25953_s18 + $0x538] sm:$0xff]  ;;  %v16540_v27 = vcombine.low %v12933_v3, %v12937_v55 }
0x12d3   : > { %14617 = vmatprep.subr.bf16.mxu0 %v16447_v60  ;;  %v16503_v60 = vcombine.high %v12894_v44, %v12898_v39 }
0x12d5   : > { %14536 = vmatpush1.bf16.msra.mxu1 %v16444_v58  ;;  %v16500_v58 = vcombine.low %v12893_v49, %v12897_v0  ;;  %v12950_v49 = vld [vmem:[%s25953_s18 + $0x558] sm:$0xff] }
0x12d6   : > { %14618 = vmatpush1.bf16.msra.mxu0 %v16446_v25  ;;  %14537 = vmatprep.subr.bf16.mxu1 %v16453_v43  ;;  %v16502_v25 = vcombine.low %v12894_v44, %v12898_v39  ;;  %v16509_v43 = vcombine.high %v12901_v5, %v12905_v52  ;;  %v12954_v0 = vld [vmem:[%s25953_s18 + $0x578] sm:$0xff]  ;;  %v16550_v39 = vcombine.low %v12942_v4, %v12946_v40 }
0x12d7   : > { %14619 = vmatprep.subr.bf16.mxu0 %v16455_v11  ;;  %v16511_v11 = vcombine.high %v12902_v16, %v12906_v7 }
0x12d9   : > { %14538 = vmatpush1.bf16.msra.mxu1 %v16452_v59  ;;  %v16508_v59 = vcombine.low %v12901_v5, %v12905_v52  ;;  %v12958_v5 = vld [vmem:[%s25953_s18 + $0x598] sm:$0xff] }
0x12da   : > { %14620 = vmatpush1.bf16.msra.mxu0 %v16454_v12  ;;  %14539 = vmatprep.subr.bf16.mxu1 %v16461_v42  ;;  %v16510_v12 = vcombine.low %v12902_v16, %v12906_v7  ;;  %v16517_v42 = vcombine.high %v12909_v50, %v12913_v47  ;;  %v12962_v52 = vld [vmem:[%s25953_s18 + $0x5b8] sm:$0xff]  ;;  %v16558_v7 = vcombine.low %v12950_v49, %v12954_v0 }
0x12db   : > { %14621 = vmatprep.subr.bf16.mxu0 %v16463_v6  ;;  %v16519_v6 = vcombine.high %v12910_v33, %v12914_v51  ;;  %v12966_v50 = vld [vmem:[%s25953_s18 + $0x5d8] sm:$0xff] }
0x12dc   : > { %v12970_v47 = vld [vmem:[%s25953_s18 + $0x5f8] sm:$0xff] }
0x12dd   : > { %14540 = vmatpush1.bf16.msra.mxu1 %v16460_v48  ;;  %v12922_v48 = vld [vmem:[%s25953_s18 + $0x478] sm:$0xff] }
0x12de   : > { %14622 = vmatpush1.bf16.msra.mxu0 %v16462_v17  ;;  %14541 = vmatprep.subr.bf16.mxu1 %v16469_v20  ;;  %v16518_v17 = vcombine.low %v12910_v33, %v12914_v51  ;;  %v16525_v20 = vcombine.high %v12917_v57, %v12921_v9  ;;  %v16527_v14 = vcombine.high %v12918_v21, %v12922_v48 }
0x12df   : > { %14623 = vmatprep.subr.bf16.mxu0 %v16471_v53  ;;  %v12925_v53 = vld [vmem:[%s25953_s18 + $0x490] sm:$0xff]  ;;  %v16566_v51 = vcombine.low %v12958_v5, %v12962_v52 }
0x12e1   : > { %14542 = vmatpush1.bf16.msra.mxu1 %v16468_v23  ;;  %v16524_v23 = vcombine.low %v12917_v57, %v12921_v9  ;;  %v12974_v57 = vld [vmem:[%s25953_s18 + $0x618] sm:$0xff] }
0x12e2   : > { %14624 = vmatpush1.bf16.msra.mxu0 %v16470_v19  ;;  %14543 = vmatprep.subr.bf16.mxu1 %v16477_v32  ;;  %v16526_v19 = vcombine.low %v12918_v21, %v12922_v48  ;;  %v16533_v32 = vcombine.high %v12925_v53, %v12929_v63  ;;  %v12978_v9 = vld [vmem:[%s25953_s18 + $0x638] sm:$0xff]  ;;  %v16574_v21 = vcombine.low %v12966_v50, %v12970_v47 }
0x12e3   : > { %14625 = vmatprep.subr.bf16.mxu0 %v16479_v30  ;;  %v16535_v30 = vcombine.high %v12926_v46, %v12930_v18  ;;  %v16582_v18 = vcombine.low %v12974_v57, %v12978_v9 }
0x12e5   : > { %14544 = vmatpush1.bf16.msra.mxu1 %v16476_v62  ;;  %v16541_v62 = vcombine.high %v12933_v3, %v12937_v55  ;;  %v12990_v3 = vld [vmem:[%s25953_s18 + $0x698] sm:$0xff] }
0x12e6   : > { %14626 = vmatpush1.bf16.msra.mxu0 %v16478_v24  ;;  %14545 = vmatprep.subr.bf16.mxu1 %v16485_v35  ;;  %v12941_v35 = vld [vmem:[%s25953_s18 + $0x510] sm:$0xff]  ;;  %v12994_v55 = vld [vmem:[%s25953_s18 + $0x6b8] sm:$0xff] }
0x12e7   : > { %14627 = vmatprep.subr.bf16.mxu0 %v16487_v8  ;;  %v12945_v8 = vld [vmem:[%s25953_s18 + $0x530] sm:$0xff] }
0x12e8   : > { %v16548_v44 = vcombine.low %v12941_v35, %v12945_v8 }
0x12e9   : > { %14546 = vmatpush1.bf16.msra.mxu1 %v16484_v31  ;;  %v16549_v31 = vcombine.high %v12941_v35, %v12945_v8  ;;  %v12998_v35 = vld [vmem:[%s25953_s18 + $0x6d8] sm:$0xff] }
0x12ea   : > { %14628 = vmatpush1.bf16.msra.mxu0 %v16486_v38  ;;  %14547 = vmatprep.subr.bf16.mxu1 %v16493_v22  ;;  %v16551_v38 = vcombine.high %v12942_v4, %v12946_v40  ;;  %v12949_v22 = vld [vmem:[%s25953_s18 + $0x550] sm:$0xff]  ;;  %v13002_v8 = vld [vmem:[%s25953_s18 + $0x6f8] sm:$0xff]  ;;  %v16598_v40 = vcombine.low %v12990_v3, %v12994_v55 }
0x12eb   : > { %14629 = vmatprep.subr.bf16.mxu0 %v16495_v36  ;;  %v12953_v36 = vld [vmem:[%s25953_s18 + $0x570] sm:$0xff] }
0x12ec   : > { %v16556_v16 = vcombine.low %v12949_v22, %v12953_v36 }
0x12ed   : > { %14548 = vmatpush1.bf16.msra.mxu1 %v16492_v15  ;;  %v16557_v15 = vcombine.high %v12949_v22, %v12953_v36  ;;  %v13006_v22 = vld [vmem:[%s25953_s18 + $0x718] sm:$0xff] }
0x12ee   : > { %14630 = vmatpush1.bf16.msra.mxu0 %v16494_v1  ;;  %14549 = vmatprep.subr.bf16.mxu1 %v16501_v45  ;;  %v16559_v1 = vcombine.high %v12950_v49, %v12954_v0  ;;  %v12957_v45 = vld [vmem:[%s25953_s18 + $0x590] sm:$0xff]  ;;  %v13010_v36 = vld [vmem:[%s25953_s18 + $0x738] sm:$0xff]  ;;  %v16606_v0 = vcombine.low %v12998_v35, %v13002_v8 }
0x12ef   : > { %14631 = vmatprep.subr.bf16.mxu0 %v16503_v60  ;;  %v12961_v60 = vld [vmem:[%s25953_s18 + $0x5b0] sm:$0xff] }
0x12f0   : > { %v16564_v33 = vcombine.low %v12957_v45, %v12961_v60 }
0x12f1   : > { %14550 = vmatpush1.bf16.msra.mxu1 %v16500_v58  ;;  %v16565_v58 = vcombine.high %v12957_v45, %v12961_v60  ;;  %v13014_v45 = vld [vmem:[%s25953_s18 + $0x758] sm:$0xff] }
0x12f2   : > { %14632 = vmatpush1.bf16.msra.mxu0 %v16502_v25  ;;  %14551 = vmatprep.subr.bf16.mxu1 %v16509_v43  ;;  %v16567_v25 = vcombine.high %v12958_v5, %v12962_v52  ;;  %v12965_v43 = vld [vmem:[%s25953_s18 + $0x5d0] sm:$0xff]  ;;  %v13018_v60 = vld [vmem:[%s25953_s18 + $0x778] sm:$0xff]  ;;  %v16614_v52 = vcombine.low %v13006_v22, %v13010_v36 }
0x12f3   : > { %14633 = vmatprep.subr.bf16.mxu0 %v16511_v11  ;;  %v12969_v11 = vld [vmem:[%s25953_s18 + $0x5f0] sm:$0xff] }
0x12f5   : > { %14552 = vmatpush1.bf16.msra.mxu1 %v16508_v59  ;;  %v16573_v59 = vcombine.high %v12965_v43, %v12969_v11 }
0x12f6   : > { %14634 = vmatpush1.bf16.msra.mxu0 %v16510_v12  ;;  %14562 = vmatprep.subr.bf16.mxu1 %v16517_v42  ;;  %v16575_v12 = vcombine.high %v12966_v50, %v12970_v47  ;;  %v12973_v42 = vld [vmem:[%s25953_s18 + $0x610] sm:$0xff]  ;;  %v16622_v47 = vcombine.low %v13014_v45, %v13018_v60 }
0x12f7   : > { %14644 = vmatprep.subr.bf16.mxu0 %v16519_v6  ;;  %v12977_v6 = vld [vmem:[%s25953_s18 + $0x630] sm:$0xff] }
0x12f8   : > { %14554 = vmatmul.mubr.bf16.vlgmr.msra.gmra.mrb[116].mxu1 %v25339_v28  ;;  %v16581_v48 = vcombine.high %v12973_v42, %v12977_v6  ;;  %v16580_v46 = vcombine.low %v12973_v42, %v12977_v6  ;;  %v13030_v42 = vld [vmem:[%s25953_s18 + $0x7d8] sm:$0xff] }
0x12f9   : > { %14636 = vmatmul.mubr.bf16.vlgmr.msra.gmra.mrb[164].mxu0 %v25339_v28  ;;  %14563 = vmatpush1.bf16.msra.mxu1 %v16516_v10  ;;  %v12934_v28 = vld [vmem:[%s25953_s18 + $0x4d8] sm:$0xff]  ;;  %v16572_v10 = vcombine.low %v12965_v43, %v12969_v11 }
0x12fa   : > { %14594 = vmatprep.mubr.bf16.mxu1 %v25355_v41  ;;  %14645 = vmatpush1.bf16.msra.mxu0 %v16518_v17  ;;  %v16543_v24 = vcombine.high %v12934_v28, %v12938_v26  ;;  %v16542_v37 = vcombine.low %v12934_v28, %v12938_v26  ;;  %v16583_v17 = vcombine.high %v12974_v57, %v12978_v9  ;;  %v13022_v43 = vld [vmem:[%s25953_s18 + $0x798] sm:$0xff] }
0x12fb   : > { %14676 = vmatprep.mubr.bf16.mxu0 %v25355_v41  ;;  %14564 = vmatprep.subr.bf16.mxu1 %v16525_v20  ;;  %v16532_v41 = vcombine.low %v12925_v53, %v12929_v63  ;;  %v12981_v20 = vld [vmem:[%s25953_s18 + $0x650] sm:$0xff]  ;;  %v12982_v63 = vld [vmem:[%s25953_s18 + $0x658] sm:$0xff] }
0x12fc   : > { %14646 = vmatprep.subr.bf16.mxu0 %v16527_v14  ;;  %v12985_v53 = vld [vmem:[%s25953_s18 + $0x670] sm:$0xff]  ;;  %v12986_v14 = vld [vmem:[%s25953_s18 + $0x678] sm:$0xff] }
0x12fd   : > { %14565 = vmatpush1.bf16.msra.mxu1 %v16524_v23  ;;  %v16589_v23 = vcombine.high %v12981_v20, %v12985_v53  ;;  %v16588_v28 = vcombine.low %v12981_v20, %v12985_v53  ;;  %v16590_v26 = vcombine.low %v12982_v63, %v12986_v14  ;;  %v13026_v11 = vld [vmem:[%s25953_s18 + $0x7b8] sm:$0xff]  ;;  %v13035_v20 = vld [vmem:[%s26125_s4] sm:$0xff]  ;;  %v20475_v53 = vmov 1966171168  }
0x12fe   : > { %14647 = vmatpush1.bf16.msra.mxu0 %v16526_v19  ;;  %14566 = vmatprep.subr.bf16.mxu1 %v16533_v32  ;;  %v16591_v19 = vcombine.high %v12982_v63, %v12986_v14  ;;  %v12989_v32 = vld [vmem:[%s25953_s18 + $0x690] sm:$0xff]  ;;  %v13034_v6 = vld [vmem:[%s25953_s18 + $0x7f8] sm:$0xff]  ;;  %v16630_v9 = vcombine.low %v13022_v43, %v13026_v11  ;;  %v14698_v63 = vunpack.c.l.s4 %v20475_v53  ;;  %v14320_v14 = vrot.slane %v13035_v20, %v24898_v34 }
0x12ff   : > { %14648 = vmatprep.subr.bf16.mxu0 %v16535_v30  ;;  %v12993_v30 = vld [vmem:[%s25953_s18 + $0x6b0] sm:$0xff] }
0x1300   : > { %v16596_v4 = vcombine.low %v12989_v32, %v12993_v30 }
0x1301   : > { %14567 = vmatpush1.bf16.msra.mxu1 %v16532_v41  ;;  %v16597_v41 = vcombine.high %v12989_v32, %v12993_v30 }
0x1302   : > { %14649 = vmatpush1.bf16.msra.mxu0 %v16534_v54  ;;  %14568 = vmatprep.subr.bf16.mxu1 %v16541_v62  ;;  %v16599_v54 = vcombine.high %v12990_v3, %v12994_v55  ;;  %v12997_v62 = vld [vmem:[%s25953_s18 + $0x6d0] sm:$0xff] }
0x1303   : > { %14650 = vmatprep.subr.bf16.mxu0 %v16543_v24  ;;  %v13001_v24 = vld [vmem:[%s25953_s18 + $0x6f0] sm:$0xff] }
0x1304   : > { %v16604_v49 = vcombine.low %v12997_v62, %v13001_v24 }
0x1305   : > { %14569 = vmatpush1.bf16.msra.mxu1 %v16540_v27  ;;  %v16605_v27 = vcombine.high %v12997_v62, %v13001_v24 }
0x1306   : > { %14651 = vmatpush1.bf16.msra.mxu0 %v16542_v37  ;;  %14570 = vmatprep.subr.bf16.mxu1 %v16549_v31  ;;  %v16607_v37 = vcombine.high %v12998_v35, %v13002_v8  ;;  %v13005_v31 = vld [vmem:[%s25953_s18 + $0x710] sm:$0xff] }
0x1307   : > { %14652 = vmatprep.subr.bf16.mxu0 %v16551_v38  ;;  %v13009_v38 = vld [vmem:[%s25953_s18 + $0x730] sm:$0xff] }
0x1308   : > { %v16612_v5 = vcombine.low %v13005_v31, %v13009_v38 }
0x1309   : > { %14571 = vmatpush1.bf16.msra.mxu1 %v16548_v44  ;;  %v16613_v44 = vcombine.high %v13005_v31, %v13009_v38  ;;  %v14347_v31 = vsub.s32 7, %v24895_v2 }
0x130a   : > { %14653 = vmatpush1.bf16.msra.mxu0 %v16550_v39  ;;  %14572 = vmatprep.subr.bf16.mxu1 %v16557_v15  ;;  %v16615_v39 = vcombine.high %v13006_v22, %v13010_v36  ;;  %v13013_v15 = vld [vmem:[%s25953_s18 + $0x750] sm:$0xff] }
0x130b   : > { %14654 = vmatprep.subr.bf16.mxu0 %v16559_v1  ;;  %v13017_v1 = vld [vmem:[%s25953_s18 + $0x770] sm:$0xff] }
0x130c   : > { %v16620_v50 = vcombine.low %v13013_v15, %v13017_v1 }
0x130d   : > { %14573 = vmatpush1.bf16.msra.mxu1 %v16556_v16  ;;  %v16621_v16 = vcombine.high %v13013_v15, %v13017_v1 }
0x130e   : > { %14655 = vmatpush1.bf16.msra.mxu0 %v16558_v7  ;;  %14574 = vmatprep.subr.bf16.mxu1 %v16565_v58  ;;  %v16623_v7 = vcombine.high %v13014_v45, %v13018_v60  ;;  %v13021_v58 = vld [vmem:[%s25953_s18 + $0x790] sm:$0xff] }
0x130f   : > { %14656 = vmatprep.subr.bf16.mxu0 %v16567_v25  ;;  %v13025_v25 = vld [vmem:[%s25953_s18 + $0x7b0] sm:$0xff] }
0x1310   : > { %v16628_v57 = vcombine.low %v13021_v58, %v13025_v25 }
0x1311   : > { %14575 = vmatpush1.bf16.msra.mxu1 %v16564_v33  ;;  %v16629_v33 = vcombine.high %v13021_v58, %v13025_v25 }
0x1312   : > { %14657 = vmatpush1.bf16.msra.mxu0 %v16566_v51  ;;  %14576 = vmatprep.subr.bf16.mxu1 %v16573_v59  ;;  %v16631_v51 = vcombine.high %v13022_v43, %v13026_v11  ;;  %v13029_v59 = vld [vmem:[%s25953_s18 + $0x7d0] sm:$0xff] }
0x1313   : > { %14658 = vmatprep.subr.bf16.mxu0 %v16575_v12  ;;  %v13033_v12 = vld [vmem:[%s25953_s18 + $0x7f0] sm:$0xff] }
0x1315   : > { %14577 = vmatpush1.bf16.msra.mxu1 %v16572_v10  ;;  %v16637_v10 = vcombine.high %v13029_v59, %v13033_v12 }
0x1316   : > { %14659 = vmatpush1.bf16.msra.mxu0 %v16574_v21  ;;  %14578 = vmatprep.subr.bf16.mxu1 %v16581_v48  ;;  %v16639_v21 = vcombine.high %v13030_v42, %v13034_v6  ;;  %v16636_v48 = vcombine.low %v13029_v59, %v13033_v12 }
0x1317   : > { %14660 = vmatprep.subr.bf16.mxu0 %v16583_v17  ;;  %v16638_v17 = vcombine.low %v13030_v42, %v13034_v6 }
0x1319   : > { %14579 = vmatpush1.bf16.msra.mxu1 %v16580_v46  ;;  %v14328_v46 = vrot.slane %v13035_v20, %v25070_v56 }
0x131a   : > { %14661 = vmatpush1.bf16.msra.mxu0 %v16582_v18  ;;  %14580 = vmatprep.subr.bf16.mxu1 %v16589_v23  ;;  %v14324_v18 = vrot.slane %v13035_v20, %v24906_v29  ;;  %v14699_v23 = vunpack.c.0.s8 %v14698_v63 }
0x131b   : > { %14662 = vmatprep.subr.bf16.mxu0 %v16591_v19  ;;  %v14332_v19 = vrot.slane %v13035_v20, %v24909_v61  ;;  %v14335_v61 = vsub.s32 4, %v24895_v2 }
0x131d   : > { %14581 = vmatpush1.bf16.msra.mxu1 %v16588_v28  ;;  %v14336_v38 = vrot.slane %v13035_v20, %v14335_v61 }
0x131e   : > { %14663 = vmatpush1.bf16.msra.mxu0 %v16590_v26  ;;  %14582 = vmatprep.subr.bf16.mxu1 %v16597_v41  ;;  %v14702_v41 = vsub.s32 %v14699_v23, %v24895_v2 }
0x131f   : > { %14664 = vmatprep.subr.bf16.mxu0 %v16599_v54 }
0x1321   : > { %14583 = vmatpush1.bf16.msra.mxu1 %v16596_v4 }
0x1322   : > { %14665 = vmatpush1.bf16.msra.mxu0 %v16598_v40  ;;  %14584 = vmatprep.subr.bf16.mxu1 %v16605_v27  ;;  %v14343_v27 = vsub.s32 6, %v24895_v2 }
0x1323   : > { %14666 = vmatprep.subr.bf16.mxu0 %v16607_v37  ;;  %v14339_v37 = vsub.s32 5, %v24895_v2 }
0x1324   : > { %v14344_v22 = vrot.slane %v13035_v20, %v14343_v27 }
0x1325   : > { %14585 = vmatpush1.bf16.msra.mxu1 %v16604_v49  ;;  %v14340_v36 = vrot.slane %v13035_v20, %v14339_v37  ;;  %v14348_v49 = vrot.slane %v13035_v20, %v14347_v31 }
0x1326   : > { %14667 = vmatpush1.bf16.msra.mxu0 %v16606_v0  ;;  %14586 = vmatprep.subr.bf16.mxu1 %v16613_v44 }
0x1327   : > { %14668 = vmatprep.subr.bf16.mxu0 %v16615_v39 }
0x1329   : > { %14587 = vmatpush1.bf16.msra.mxu1 %v16612_v5 }
0x132a   : > { %14669 = vmatpush1.bf16.msra.mxu0 %v16614_v52  ;;  %14588 = vmatprep.subr.bf16.mxu1 %v16621_v16 }
0x132b   : > { %14670 = vmatprep.subr.bf16.mxu0 %v16623_v7 }
0x132d   : > { %14589 = vmatpush1.bf16.msra.mxu1 %v16620_v50 }
0x132e   : > { %14671 = vmatpush1.bf16.msra.mxu0 %v16622_v47  ;;  %14590 = vmatprep.subr.bf16.mxu1 %v16629_v33 }
0x132f   : > { %14672 = vmatprep.subr.bf16.mxu0 %v16631_v51 }
0x1331   : > { %14591 = vmatpush1.bf16.msra.mxu1 %v16628_v57 }
0x1332   : > { %14673 = vmatpush1.bf16.msra.mxu0 %v16630_v9  ;;  %14592 = vmatprep.subr.bf16.mxu1 %v16637_v10 }
0x1333   : > { %14674 = vmatprep.subr.bf16.mxu0 %v16639_v21 }
0x1335   : > { %14593 = vmatpush1.bf16.msra.mxu1 %v16636_v48 }
0x1336   : > { %14675 = vmatpush1.bf16.msra.mxu0 %v16638_v17 }
0x1338   : > { %14595 = vmatmul.mubr.bf16.vlgmr.msra.gmra.mrb[116].mxu1 %v25544_v13 }
0x1339   : > { %14677 = vmatmul.mubr.bf16.vlgmr.msra.gmra.mrb[164].mxu0 %v25544_v13 }
0x138b   : > { %v14432_v32 = vpop.f32.mrb[112].mxu1  ;;  %v14514_v30 = vpop.f32.mrb[160].mxu0 }
0x138c   : > { %v18972_v3 = vadd.f32 %v14432_v32, %v14320_v14  ;;  %v18974_v55 = vadd.f32 %v14514_v30, %v14328_v46  ;;  %v14434_v13 = vpop.f32.mrb[113].mxu1  ;;  %v14516_v28 = vpop.f32.mrb[161].mxu0 }
0x138d   : > { %v18973_v26 = vadd.f32 %v14434_v13, %v14324_v18  ;;  %v18975_v54 = vadd.f32 %v14516_v28, %v14332_v19  ;;  %v14436_v62 = vpop.f32.mrb[114].mxu1  ;;  %v14518_v24 = vpop.f32.mrb[162].mxu0 }
0x138e   : > { %v14437_v34 = vpop.f32.mrb[115].mxu1  ;;  %v14519_v35 = vpop.f32.mrb[163].mxu0 }
0x138f   : > { %v14693_v56 = vcombine.low %v18972_v3, %v18973_v26  ;;  %v14694_v8 = vcombine.low %v18974_v55, %v18975_v54 }
0x1391   : > { %v14703_v29 = vrot.slane %v14693_v56, %v14702_v41  ;;  %v14710_v4 = vrot.slane %v14694_v8, %v14702_v41 }
0x1393   : > { %v14725_v40 = vcombine.low %v14703_v29, %v14710_v4 }
0x1395   : > { %v14733_v47 = vrot.slane %v14725_v40, %v14702_v41 }
0x140b   : > { %v14596_v0 = vpop.f32.mrb[116].mxu1 }
0x140c   : > { %v18976_v44 = vadd.f32 %v14596_v0, %v14336_v38  ;;  %v14678_v39 = vpop.f32.mrb[164].mxu0  ;;  %v14598_v15 = vpop.f32.mrb[117].mxu1 }
0x140d   : > { %v18978_v1 = vadd.f32 %v14678_v39, %v14344_v22  ;;  %v18977_v45 = vadd.f32 %v14598_v15, %v14340_v36  ;;  %v14680_v60 = vpop.f32.mrb[165].mxu0  ;;  %v14600_v5 = vpop.f32.mrb[118].mxu1 }
0x140e   : > { %v18979_v52 = vadd.f32 %v14680_v60, %v14348_v49  ;;  %v14682_v16 = vpop.f32.mrb[166].mxu0  ;;  %v14601_v7 = vpop.f32.mrb[119].mxu1 }
0x140f   : > { %v14695_v58 = vcombine.low %v18976_v44, %v18977_v45  ;;  %v14683_v25 = vpop.f32.mrb[167].mxu0 }
0x1410   : > { %v14696_v43 = vcombine.low %v18978_v1, %v18979_v52 }
0x1411   : > { %v14717_v2 = vrot.slane %v14695_v58, %v14702_v41 }
0x1412   : > { %v14724_v11 = vrot.slane %v14696_v43, %v14702_v41 }
0x1414   : > { %v14726_v50 = vcombine.low %v14717_v2, %v14724_v11 }
0x1416   : > { %v14740_v33 = vrot.slane %v14726_v50, %v14702_v41 }
0x1418   : > { %v14741_v51 = vcombine.low %v14733_v47, %v14740_v33 }
0x141a   : > { %14743 = vst [vmem:[%s719_s23] sm:$0xff] %v14741_v51 }
0x141b PF: > { %s26127_s3 = sld [smem:[#allocation17_spill]] }
0x1421   : > { %s34_s1 = sadd.s32 1, %s26127_s3  }
0x1422   : > { %p31_p9 = scmp.ge.s32.totalorder %s34_s1, 4  }
0x1424   :  { %33 = sbr.rel (!%p31_p9) target bundleno = 13 (0xd), region = 210 }
0x142b   :  { %14763 = vsyncpa [#allocation3], 1 }
0x142c   :  { %14765 = vsyncpa [#allocation3 + $0x1], 1 }
0x142d   :  { %14766 = vsyncpa [#allocation5], 1 }
0x142e   :  { %14767 = vsyncpa [#allocation8], 1 }
0x142f   :  { %14768 = vsyncpa [#allocation11], 1 }

</bundles_post_ra>
